<compile_context>
chip_gen: v5e
topology: v5e:2x2
jax: 0.10.0
libtpu: 0.0.40
codegen_flags: <defaults>
</compile_context>

<pallas_src>
import jax
import jax.numpy as jnp
from jax.experimental import pallas as pl
from jax.experimental.pallas import tpu as pltpu


# ---------------------------------------------------------------------------
# Kernel 1: fused conv1 -> 2x2 maxpool -> conv2 -> 2x2 maxpool -> features
# ---------------------------------------------------------------------------
def _conv_stack_kernel(xq_ref, m1_ref, c1_ref, m2_ref, c2_ref, feat_ref, p1_ref):
    # xq_ref : (4, bb*20, 135) bf16  input rows split by (row mod 4); images stacked along rows
    # m1_ref : (6, 135, 256)  bf16   banded conv1 weights; cols = wi*128 + wp*6 + co
    # c1_ref : (1, 128)       f32    conv1 bias tiled over (wp, co), zero padded to 128 lanes
    # m2_ref : (6, 128, 256)  bf16   banded conv2 weights (input rows zero-padded 120 -> 128)
    # c2_ref : (1, 128)       f32    conv2 bias tiled over (wp2, co2), zero padded
    # feat_ref:(bb, 16, 128)  bf16   pooled conv2 output; rows = h, lanes = w*16 + c (+zero pad)
    # p1_ref : (2, bb*20, 128) f32   scratch: pooled conv1, split by (pooled-row mod 2)
    bb = feat_ref.shape[0]
    R = bb * 20
    L1 = (R - 1, R - 2)                    # accumulated rows for conv1, parity e = 0 / 1
    L2 = R - 4                             # accumulated rows for conv2

    # ---- conv1 + 2x2 max-pool (kh innermost -> single live f32 accumulator) --------------
    for e in range(2):
        res = None
        for hi in range(2):
            acc = None
            for kh in range(6):
                s = 2 * e + hi + kh                              # input row = 4*jj + s
                lhs = xq_ref[s % 4, s // 4: s // 4 + L1[e], :]
                t = jnp.dot(lhs, m1_ref[kh], preferred_element_type=jnp.float32)
                acc = t if acc is None else acc + t
            w = jnp.maximum(acc[:, 0:128], acc[:, 128:256])      # W-pool (lane halves)
            res = w if res is None else jnp.maximum(res, w)      # H-pool (hi partner)
        p1_ref[e, 0:L1[e], :] = res + c1_ref[...]                # bias commutes with max

    # ---- conv2 + 2x2 max-pool (dedup the 7 distinct pooled-conv1 slices) -----------------
    p1s = [p1_ref[s % 2, s // 2: s // 2 + L2, :].astype(jnp.bfloat16) for s in range(7)]
    res = None
    for hi in range(2):
        acc = None
        for kh in range(6):
            t = jnp.dot(p1s[hi + kh], m2_ref[kh], preferred_element_type=jnp.float32)
            acc = t if acc is None else acc + t
        w = jnp.maximum(acc[:, 0:128], acc[:, 128:256])
        res = w if res is None else jnp.maximum(res, w)
    out = res + c2_ref[...]                                      # (L2, 128), lane-dense

    for i in range(bb):                                          # per-image 16 feature rows
        feat_ref[i, :, :] = out[i * 20: i * 20 + 16, :].astype(feat_ref.dtype)


def _conv_stack(xq, pp, bb):
    nblk = xq.shape[0]
    return pl.pallas_call(
        _conv_stack_kernel,
        out_shape=jax.ShapeDtypeStruct((nblk * bb, 16, 128), jnp.bfloat16),
        grid=(nblk,),
        in_specs=[
            pl.BlockSpec((None, 4, bb * 20, 135), lambda n: (n, 0, 0, 0)),
            pl.BlockSpec((6, 135, 256), lambda n: (0, 0, 0)),
            pl.BlockSpec((1, 128), lambda n: (0, 0)),
            pl.BlockSpec((6, 128, 256), lambda n: (0, 0, 0)),
            pl.BlockSpec((1, 128), lambda n: (0, 0)),
        ],
        out_specs=pl.BlockSpec((bb, 16, 128), lambda n: (n, 0, 0)),
        scratch_shapes=[pltpu.VMEM((2, bb * 20, 128), jnp.float32)],
        compiler_params=pltpu.CompilerParams(dimension_semantics=("parallel",)),
    )(xq, pp["m1"], pp["c1"], pp["m2"], pp["c2"])


# ---------------------------------------------------------------------------
# Kernel 2: both Q-heads in a single body (N-concatenated / block-diag weights)
# ---------------------------------------------------------------------------
def _dual_head_kernel(f_ref, a_ref, w1f_ref, w1a_ref, b1_ref, w2_ref, b2_ref,
                      w3_ref, b3_ref, w4_ref, b4_ref, o_ref):
    z = jnp.dot(f_ref[...], w1f_ref[...], preferred_element_type=jnp.float32)      # (B, 512)
    z = z + jnp.dot(a_ref[...], w1a_ref[...], preferred_element_type=jnp.float32)  # action part
    z = jnp.maximum(z + b1_ref[...], 0.0)
    z = jnp.dot(z.astype(jnp.bfloat16), w2_ref[...],
                preferred_element_type=jnp.float32) + b2_ref[...]                   # (B, 256)
    z = jnp.maximum(z, 0.0)
    z = jnp.dot(z.astype(jnp.bfloat16), w3_ref[...],
                preferred_element_type=jnp.float32) + b3_ref[...]                   # (B, 128)
    z = jnp.maximum(z, 0.0)
    o_ref[...] = jnp.dot(z.astype(jnp.bfloat16), w4_ref[...],
                         preferred_element_type=jnp.float32) + b4_ref[...]          # (B, 2*na)


def _dual_head(feats, a, pp):
    B, d = feats.shape
    n_out = pp["w4"].shape[-1]
    # Split the batch into two "parallel" steps only when the sub-blocks stay tile-aligned.
    nsteps = 2 if (B >= 32 and B % 32 == 0) else 1
    bt = B // nsteps

    def full(arr):
        return pl.BlockSpec(arr.shape, lambda i, _nd=arr.ndim: (0,) * _nd)

    return pl.pallas_call(
        _dual_head_kernel,
        out_shape=jax.ShapeDtypeStruct((B, n_out), jnp.float32),
        grid=(nsteps,),
        in_specs=[
            pl.BlockSpec((bt, d), lambda i: (i, 0)),
            pl.BlockSpec((bt, a.shape[1]), lambda i: (i, 0)),
            full(pp["w1f"]), full(pp["w1a"]), full(pp["b1"]),
            full(pp["w2"]), full(pp["b2"]),
            full(pp["w3"]), full(pp["b3"]),
            full(pp["w4"]), full(pp["b4"]),
        ],
        out_specs=pl.BlockSpec((bt, n_out), lambda i: (i, 0)),
        compiler_params=pltpu.CompilerParams(dimension_semantics=("parallel",)),
    )(feats, a, pp["w1f"], pp["w1a"], pp["b1"], pp["w2"], pp["b2"],
      pp["w3"], pp["b3"], pp["w4"], pp["b4"])


# ---------------------------------------------------------------------------
# Forward pass (wrapper is one fused transpose/reshape/cast + a free reshape)
# ---------------------------------------------------------------------------
def _images_per_step(batch, cap=4):
    best = 1
    for bb in range(1, cap + 1):
        if batch % bb == 0 and batch // bb >= 2:
            best = bb
    return best


def critic_forward(pp, x, a):
    if x.ndim == 3:
        x = x[None]
    B, C, H, W = x.shape
    assert (C, H, W) == (3, 80, 45), "Critic expects (3, 80, 45) images"
    bb = _images_per_step(B)
    nblk = B // bb
    # NCHW -> NHWC-flat rows, fold (image, row mod 4) parity planes, cast to bf16.
    xf = jnp.transpose(x, (0, 2, 3, 1)).reshape(B, H, W * C)
    xq = (xf.reshape(nblk, bb, 20, 4, W * C)
            .transpose(0, 3, 1, 2, 4)
            .reshape(nblk, 4, bb * 20, W * C)
            .astype(jnp.bfloat16))
    feats = _conv_stack(xq, pp, bb)                       # (B, 16, 128) bf16, lane-dense
    q = _dual_head(feats.reshape(B, 16 * 128), a, pp)     # (B, 2*na)
    na = q.shape[1] // 2
    return q[:, :na], q[:, na:]


# ---------------------------------------------------------------------------
# Parameter construction / one-time preparation
# ---------------------------------------------------------------------------
def _build_banded(w_hwio, w_in, wp_out):
    """Fold im2col + W-pool column layout into a dense GEMM weight matrix.

    Returns M of shape (KH, CI*w_in, 256) such that, for an NHWC input row flattened
    channel-fastest, (row @ M[kh]) summed over kh gives the conv output at that row with
    columns laid out as  col = wi*128 + wp*CO + co  (wi in {0,1} is the W-pool partner).
    """
    KH, KW, CI, CO = w_hwio.shape
    F = CI * w_in
    assert wp_out * CO <= 128
    kh = jnp.arange(KH).reshape(KH, 1, 1, 1, 1, 1)
    kw = jnp.arange(KW).reshape(1, KW, 1, 1, 1, 1)
    ci = jnp.arange(CI).reshape(1, 1, CI, 1, 1, 1)
    wp = jnp.arange(wp_out).reshape(1, 1, 1, wp_out, 1, 1)
    wi = jnp.arange(2).reshape(1, 1, 1, 1, 2, 1)
    co = jnp.arange(CO).reshape(1, 1, 1, 1, 1, CO)
    f = CI * (2 * wp + wi + kw) + ci           # input feature index (< F)
    col = wi * 128 + wp * CO + co              # output column index (< 256)
    shape = (KH, KW, CI, wp_out, 2, CO)
    vals = jnp.broadcast_to(w_hwio[:, :, :, None, None, :], shape)
    m = jnp.zeros((KH, F, 256), jnp.float32)
    return m.at[jnp.broadcast_to(kh, shape),
                jnp.broadcast_to(f, shape),
                jnp.broadcast_to(col, shape)].set(vals)


def init_params(key, nb_actions, init_w=0.3):
    """Raw, torch-layout-equivalent parameters (conv weights HWIO, fc weights (in, out))."""
    keys = iter(jax.random.split(key, 24))

    def kaiming(k, fan_in, shape):
        bound = jnp.sqrt(2.0) * jnp.sqrt(3.0 / fan_in)          # leaky_relu a=0 gain
        return jax.random.uniform(k, shape, jnp.float32, -bound, bound)

    def uniform(k, shape, b):
        return jax.random.uniform(k, shape, jnp.float32, -b, b)

    d_in = 16 * 16 * 7 + nb_actions
    p = {
        "conv1_w": kaiming(next(keys), 6 * 6 * 3, (6, 6, 3, 6)),
        "conv1_b": uniform(next(keys), (6,), 1.0 / jnp.sqrt(6 * 6 * 3)),
        "conv2_w": kaiming(next(keys), 6 * 6 * 6, (6, 6, 6, 16)),
        "conv2_b": uniform(next(keys), (16,), 1.0 / jnp.sqrt(6 * 6 * 6)),
    }

    def head():
        w1 = kaiming(next(keys), d_in, (d_in, 256)); b1 = uniform(next(keys), (256,), 1.0 / jnp.sqrt(d_in))
        w2 = kaiming(next(keys), 256, (256, 128));   b2 = uniform(next(keys), (128,), 1.0 / jnp.sqrt(256))
        w3 = kaiming(next(keys), 128, (128, 64));    b3 = uniform(next(keys), (64,), 1.0 / jnp.sqrt(128))
        w4 = uniform(next(keys), (64, nb_actions), init_w)
        b4 = uniform(next(keys), (nb_actions,), 1.0 / jnp.sqrt(64))
        return (w1, b1, w2, b2, w3, b3, w4, b4)

    p["head1"] = head()
    p["head2"] = head()
    return p


def prepare_params(p):
    """One-time weight prep: banded conv matrices, bias rows, merged-head fc weights."""
    m1 = _build_banded(p["conv1_w"], 45, 20).astype(jnp.bfloat16)             # (6, 135, 256)
    m2 = jnp.pad(_build_banded(p["conv2_w"], 20, 7),
                 ((0, 0), (0, 8), (0, 0))).astype(jnp.bfloat16)               # (6, 128, 256)
    c1 = jnp.pad(jnp.tile(p["conv1_b"], 20), (0, 8))[None, :]                 # (1, 128)
    c2 = jnp.pad(jnp.tile(p["conv2_b"], 7), (0, 16))[None, :]                 # (1, 128)

    def split_w1(w1):
        # torch flatten order is (c, h, w); the kernel emits rows = h, lanes = w*16 + c with
        # 16 zero pad lanes per h -> permute + pad fc1 rows once (exact, no numerical change).
        img = w1[:1792].reshape(16, 16, 7, 256)                 # (c, h, w, n)
        img = jnp.transpose(img, (1, 2, 0, 3)).reshape(16, 112, 256)
        img = jnp.pad(img, ((0, 0), (0, 16), (0, 0))).reshape(2048, 256)
        return img, w1[1792:]                                   # (2048, 256), (na, 256)

    def blkdiag(a_mat, b_mat):
        ka, na_ = a_mat.shape
        kb, nb_ = b_mat.shape
        top = jnp.concatenate([a_mat, jnp.zeros((ka, nb_), a_mat.dtype)], axis=1)
        bot = jnp.concatenate([jnp.zeros((kb, na_), b_mat.dtype), b_mat], axis=1)
        return jnp.concatenate([top, bot], axis=0)

    w1_1, b1_1, w2_1, b2_1, w3_1, b3_1, w4_1, b4_1 = p["head1"]
    w1_2, b1_2, w2_2, b2_2, w3_2, b3_2, w4_2, b4_2 = p["head2"]
    img1, act1 = split_w1(w1_1)
    img2, act2 = split_w1(w1_2)
    catn = lambda u, v: jnp.concatenate([u, v], axis=1)
    catb = lambda u, v: jnp.concatenate([u, v], axis=0)[None, :]
    return {
        "m1": m1, "c1": c1, "m2": m2, "c2": c2,
        "w1f": catn(img1, img2).astype(jnp.bfloat16),           # (2048, 512)
        "w1a": catn(act1, act2),                                # (na, 512)  f32 (tiny)
        "b1": catb(b1_1, b1_2),                                 # (1, 512)
        "w2": blkdiag(w2_1, w2_2).astype(jnp.bfloat16),         # (512, 256)
        "b2": catb(b2_1, b2_2),                                 # (1, 256)
        "w3": blkdiag(w3_1, w3_2).astype(jnp.bfloat16),         # (256, 128)
        "b3": catb(b3_1, b3_2),                                 # (1, 128)
        "w4": blkdiag(w4_1, w4_2).astype(jnp.bfloat16),         # (128, 2*na)
        "b4": catb(b4_1, b4_2),                                 # (1, 2*na)
    }


# ---------------------------------------------------------------------------
# Plain-JAX f32 reference of the torch module (for a numerical sanity check)
# ---------------------------------------------------------------------------
def _reference_forward(raw, x, a):
    if x.ndim == 3:
        x = x[None]

    def conv(y, w, b):
        out = jax.lax.conv_general_dilated(y, w, (1, 1), "VALID",
                                           dimension_numbers=("NCHW", "HWIO", "NCHW"))
        return out + b[None, :, None, None]

    def pool(y):
        _, _, H, W = y.shape
        y = y[:, :, : (H // 2) * 2, : (W // 2) * 2]
        return jnp.maximum(jnp.maximum(y[:, :, 0::2, 0::2], y[:, :, 0::2, 1::2]),
                           jnp.maximum(y[:, :, 1::2, 0::2], y[:, :, 1::2, 1::2]))

    y = pool(conv(x, raw["conv1_w"], raw["conv1_b"]))
    y = pool(conv(y, raw["conv2_w"], raw["conv2_b"]))
    xa = jnp.concatenate([y.reshape(y.shape[0], -1), a], axis=1)

    def head(h):
        w1, b1, w2, b2, w3, b3, w4, b4 = h
        z = jnp.maximum(xa @ w1 + b1, 0.0)
        z = jnp.maximum(z @ w2 + b2, 0.0)
        z = jnp.maximum(z @ w3 + b3, 0.0)
        return z @ w4 + b4

    return head(raw["head1"]), head(raw["head2"])


# ---------------------------------------------------------------------------
# Main
# ---------------------------------------------------------------------------
if __name__ == "__main__":
    key = jax.random.PRNGKey(0)
    kp, kx, ka = jax.random.split(key, 3)

    nb_actions = 2
    batch = 2
    # (80, 45): conv6 -> (75, 40), pool -> (37, 20), conv6 -> (32, 15), pool -> (16, 7),
    # i.e. exactly the 16*16*7 features the module's fc layers expect.
    x = jax.random.normal(kx, (batch, 3, 80, 45), jnp.float32)
    a = jax.random.normal(ka, (batch, nb_actions), jnp.float32)

    raw = init_params(kp, nb_actions)
    pp = prepare_params(raw)

    fwd = jax.jit(critic_forward)
    q1, q2 = fwd(pp, x, a)
    jax.block_until_ready((q1, q2))

    assert q1.shape == (batch, nb_actions) and q2.shape == (batch, nb_actions)
    assert q1.dtype == jnp.float32 and q2.dtype == jnp.float32

    # Sanity check vs. f32 reference (kernels run matmuls in bf16 -> loose tolerance).
    r1, r2 = _reference_forward(raw, x, a)
    diff = float(jnp.max(jnp.abs(jnp.stack([q1, q2]) - jnp.stack([r1, r2]))))
    scale = float(jnp.max(jnp.abs(jnp.stack([r1, r2]))))
    assert diff <= 0.2 * (1.0 + scale), (diff, scale)

    print("KERNEL_OK")
</pallas_src>

<mosaic_0001>
module attributes {stable_mosaic.version = 11 : i64} {
  func.func @_conv_stack_kernel(%arg0: i32, %arg1: memref<1x4x20x135xbf16, #tpu.memory_space<vmem>>, %arg2: memref<6x135x256xbf16, #tpu.memory_space<vmem>>, %arg3: memref<1x128xf32, #tpu.memory_space<vmem>>, %arg4: memref<6x128x256xbf16, #tpu.memory_space<vmem>>, %arg5: memref<1x128xf32, #tpu.memory_space<vmem>>, %arg6: memref<1x16x128xbf16, #tpu.memory_space<vmem>>, %arg7: memref<2x20x128xf32, #tpu.memory_space<vmem>>) attributes {dimension_semantics = [#tpu.dimension_semantics<parallel>], iteration_bounds = array<i64: 2>, scalar_prefetch = 0 : i64, scratch_operands = 1 : i64, tpu.core_type = #tpu.core_type<tc>, window_params = [{transform_indices = @transform_0, window_bounds = array<i64: 1, 4, 20, 135>}, {pipeline_mode = #tpu.pipeline_mode<synchronous>, transform_indices = @transform_1, window_bounds = array<i64: 6, 135, 256>}, {pipeline_mode = #tpu.pipeline_mode<synchronous>, transform_indices = @transform_2, window_bounds = array<i64: 1, 128>}, {pipeline_mode = #tpu.pipeline_mode<synchronous>, transform_indices = @transform_3, window_bounds = array<i64: 6, 128, 256>}, {pipeline_mode = #tpu.pipeline_mode<synchronous>, transform_indices = @transform_4, window_bounds = array<i64: 1, 128>}, {transform_indices = @transform_5, window_bounds = array<i64: 1, 16, 128>}]} {
    %c0 = arith.constant 0 : index
    %c0_0 = arith.constant 0 : index
    %c0_1 = arith.constant 0 : index
    %c0_2 = arith.constant 0 : index
    %0 = vector.load %arg1[%c0, %c0_0, %c0_1, %c0_2] : memref<1x4x20x135xbf16, #tpu.memory_space<vmem>>, vector<1x1x19x135xbf16>
    %1 = vector.shape_cast %0 : vector<1x1x19x135xbf16> to vector<19x135xbf16>
    %c0_3 = arith.constant 0 : index
    %c0_4 = arith.constant 0 : index
    %c0_5 = arith.constant 0 : index
    %2 = vector.load %arg2[%c0_3, %c0_4, %c0_5] : memref<6x135x256xbf16, #tpu.memory_space<vmem>>, vector<1x135x256xbf16>
    %3 = vector.shape_cast %2 : vector<1x135x256xbf16> to vector<135x256xbf16>
    %cst = arith.constant dense<0.000000e+00> : vector<19x256xf32>
    %4 = tpu.matmul %1, %3, %cst {dimension_numbers = #tpu.dot_dimension_numbers<[1], [0], [0], [1], [0, 0, 1, 1], [], []>} : vector<19x135xbf16>, vector<135x256xbf16>, vector<19x256xf32> -> vector<19x256xf32>
    %c0_6 = arith.constant 0 : index
    %c1 = arith.constant 1 : index
    %c0_7 = arith.constant 0 : index
    %c0_8 = arith.constant 0 : index
    %5 = vector.load %arg1[%c0_6, %c1, %c0_7, %c0_8] : memref<1x4x20x135xbf16, #tpu.memory_space<vmem>>, vector<1x1x19x135xbf16>
    %6 = vector.shape_cast %5 : vector<1x1x19x135xbf16> to vector<19x135xbf16>
    %c1_9 = arith.constant 1 : index
    %c0_10 = arith.constant 0 : index
    %c0_11 = arith.constant 0 : index
    %7 = vector.load %arg2[%c1_9, %c0_10, %c0_11] : memref<6x135x256xbf16, #tpu.memory_space<vmem>>, vector<1x135x256xbf16>
    %8 = vector.shape_cast %7 : vector<1x135x256xbf16> to vector<135x256xbf16>
    %cst_12 = arith.constant dense<0.000000e+00> : vector<19x256xf32>
    %9 = tpu.matmul %6, %8, %cst_12 {dimension_numbers = #tpu.dot_dimension_numbers<[1], [0], [0], [1], [0, 0, 1, 1], [], []>} : vector<19x135xbf16>, vector<135x256xbf16>, vector<19x256xf32> -> vector<19x256xf32>
    %10 = arith.addf %4, %9 : vector<19x256xf32>
    %c0_13 = arith.constant 0 : index
    %c2 = arith.constant 2 : index
    %c0_14 = arith.constant 0 : index
    %c0_15 = arith.constant 0 : index
    %11 = vector.load %arg1[%c0_13, %c2, %c0_14, %c0_15] : memref<1x4x20x135xbf16, #tpu.memory_space<vmem>>, vector<1x1x19x135xbf16>
    %12 = vector.shape_cast %11 : vector<1x1x19x135xbf16> to vector<19x135xbf16>
    %c2_16 = arith.constant 2 : index
    %c0_17 = arith.constant 0 : index
    %c0_18 = arith.constant 0 : index
    %13 = vector.load %arg2[%c2_16, %c0_17, %c0_18] : memref<6x135x256xbf16, #tpu.memory_space<vmem>>, vector<1x135x256xbf16>
    %14 = vector.shape_cast %13 : vector<1x135x256xbf16> to vector<135x256xbf16>
    %cst_19 = arith.constant dense<0.000000e+00> : vector<19x256xf32>
    %15 = tpu.matmul %12, %14, %cst_19 {dimension_numbers = #tpu.dot_dimension_numbers<[1], [0], [0], [1], [0, 0, 1, 1], [], []>} : vector<19x135xbf16>, vector<135x256xbf16>, vector<19x256xf32> -> vector<19x256xf32>
    %16 = arith.addf %10, %15 : vector<19x256xf32>
    %c0_20 = arith.constant 0 : index
    %c3 = arith.constant 3 : index
    %c0_21 = arith.constant 0 : index
    %c0_22 = arith.constant 0 : index
    %17 = vector.load %arg1[%c0_20, %c3, %c0_21, %c0_22] : memref<1x4x20x135xbf16, #tpu.memory_space<vmem>>, vector<1x1x19x135xbf16>
    %18 = vector.shape_cast %17 : vector<1x1x19x135xbf16> to vector<19x135xbf16>
    %c3_23 = arith.constant 3 : index
    %c0_24 = arith.constant 0 : index
    %c0_25 = arith.constant 0 : index
    %19 = vector.load %arg2[%c3_23, %c0_24, %c0_25] : memref<6x135x256xbf16, #tpu.memory_space<vmem>>, vector<1x135x256xbf16>
    %20 = vector.shape_cast %19 : vector<1x135x256xbf16> to vector<135x256xbf16>
    %cst_26 = arith.constant dense<0.000000e+00> : vector<19x256xf32>
    %21 = tpu.matmul %18, %20, %cst_26 {dimension_numbers = #tpu.dot_dimension_numbers<[1], [0], [0], [1], [0, 0, 1, 1], [], []>} : vector<19x135xbf16>, vector<135x256xbf16>, vector<19x256xf32> -> vector<19x256xf32>
    %22 = arith.addf %16, %21 : vector<19x256xf32>
    %c0_27 = arith.constant 0 : index
    %c0_28 = arith.constant 0 : index
    %c1_29 = arith.constant 1 : index
    %c0_30 = arith.constant 0 : index
    %23 = vector.load %arg1[%c0_27, %c0_28, %c1_29, %c0_30] : memref<1x4x20x135xbf16, #tpu.memory_space<vmem>>, vector<1x1x19x135xbf16>
    %24 = vector.shape_cast %23 : vector<1x1x19x135xbf16> to vector<19x135xbf16>
    %c4 = arith.constant 4 : index
    %c0_31 = arith.constant 0 : index
    %c0_32 = arith.constant 0 : index
    %25 = vector.load %arg2[%c4, %c0_31, %c0_32] : memref<6x135x256xbf16, #tpu.memory_space<vmem>>, vector<1x135x256xbf16>
    %26 = vector.shape_cast %25 : vector<1x135x256xbf16> to vector<135x256xbf16>
    %cst_33 = arith.constant dense<0.000000e+00> : vector<19x256xf32>
    %27 = tpu.matmul %24, %26, %cst_33 {dimension_numbers = #tpu.dot_dimension_numbers<[1], [0], [0], [1], [0, 0, 1, 1], [], []>} : vector<19x135xbf16>, vector<135x256xbf16>, vector<19x256xf32> -> vector<19x256xf32>
    %28 = arith.addf %22, %27 : vector<19x256xf32>
    %c0_34 = arith.constant 0 : index
    %c1_35 = arith.constant 1 : index
    %c1_36 = arith.constant 1 : index
    %c0_37 = arith.constant 0 : index
    %29 = vector.load %arg1[%c0_34, %c1_35, %c1_36, %c0_37] : memref<1x4x20x135xbf16, #tpu.memory_space<vmem>>, vector<1x1x19x135xbf16>
    %30 = vector.shape_cast %29 : vector<1x1x19x135xbf16> to vector<19x135xbf16>
    %c5 = arith.constant 5 : index
    %c0_38 = arith.constant 0 : index
    %c0_39 = arith.constant 0 : index
    %31 = vector.load %arg2[%c5, %c0_38, %c0_39] : memref<6x135x256xbf16, #tpu.memory_space<vmem>>, vector<1x135x256xbf16>
    %32 = vector.shape_cast %31 : vector<1x135x256xbf16> to vector<135x256xbf16>
    %cst_40 = arith.constant dense<0.000000e+00> : vector<19x256xf32>
    %33 = tpu.matmul %30, %32, %cst_40 {dimension_numbers = #tpu.dot_dimension_numbers<[1], [0], [0], [1], [0, 0, 1, 1], [], []>} : vector<19x135xbf16>, vector<135x256xbf16>, vector<19x256xf32> -> vector<19x256xf32>
    %34 = arith.addf %28, %33 : vector<19x256xf32>
    %35 = vector.extract_strided_slice %34 {offsets = [0, 0], sizes = [19, 128], strides = [1, 1]} : vector<19x256xf32> to vector<19x128xf32>
    %36 = vector.extract_strided_slice %34 {offsets = [0, 128], sizes = [19, 128], strides = [1, 1]} : vector<19x256xf32> to vector<19x128xf32>
    %37 = arith.maximumf %35, %36 : vector<19x128xf32>
    %c0_41 = arith.constant 0 : index
    %c1_42 = arith.constant 1 : index
    %c0_43 = arith.constant 0 : index
    %c0_44 = arith.constant 0 : index
    %38 = vector.load %arg1[%c0_41, %c1_42, %c0_43, %c0_44] : memref<1x4x20x135xbf16, #tpu.memory_space<vmem>>, vector<1x1x19x135xbf16>
    %39 = vector.shape_cast %38 : vector<1x1x19x135xbf16> to vector<19x135xbf16>
    %c0_45 = arith.constant 0 : index
    %c0_46 = arith.constant 0 : index
    %c0_47 = arith.constant 0 : index
    %40 = vector.load %arg2[%c0_45, %c0_46, %c0_47] : memref<6x135x256xbf16, #tpu.memory_space<vmem>>, vector<1x135x256xbf16>
    %41 = vector.shape_cast %40 : vector<1x135x256xbf16> to vector<135x256xbf16>
    %cst_48 = arith.constant dense<0.000000e+00> : vector<19x256xf32>
    %42 = tpu.matmul %39, %41, %cst_48 {dimension_numbers = #tpu.dot_dimension_numbers<[1], [0], [0], [1], [0, 0, 1, 1], [], []>} : vector<19x135xbf16>, vector<135x256xbf16>, vector<19x256xf32> -> vector<19x256xf32>
    %c0_49 = arith.constant 0 : index
    %c2_50 = arith.constant 2 : index
    %c0_51 = arith.constant 0 : index
    %c0_52 = arith.constant 0 : index
    %43 = vector.load %arg1[%c0_49, %c2_50, %c0_51, %c0_52] : memref<1x4x20x135xbf16, #tpu.memory_space<vmem>>, vector<1x1x19x135xbf16>
    %44 = vector.shape_cast %43 : vector<1x1x19x135xbf16> to vector<19x135xbf16>
    %c1_53 = arith.constant 1 : index
    %c0_54 = arith.constant 0 : index
    %c0_55 = arith.constant 0 : index
    %45 = vector.load %arg2[%c1_53, %c0_54, %c0_55] : memref<6x135x256xbf16, #tpu.memory_space<vmem>>, vector<1x135x256xbf16>
    %46 = vector.shape_cast %45 : vector<1x135x256xbf16> to vector<135x256xbf16>
    %cst_56 = arith.constant dense<0.000000e+00> : vector<19x256xf32>
    %47 = tpu.matmul %44, %46, %cst_56 {dimension_numbers = #tpu.dot_dimension_numbers<[1], [0], [0], [1], [0, 0, 1, 1], [], []>} : vector<19x135xbf16>, vector<135x256xbf16>, vector<19x256xf32> -> vector<19x256xf32>
    %48 = arith.addf %42, %47 : vector<19x256xf32>
    %c0_57 = arith.constant 0 : index
    %c3_58 = arith.constant 3 : index
    %c0_59 = arith.constant 0 : index
    %c0_60 = arith.constant 0 : index
    %49 = vector.load %arg1[%c0_57, %c3_58, %c0_59, %c0_60] : memref<1x4x20x135xbf16, #tpu.memory_space<vmem>>, vector<1x1x19x135xbf16>
    %50 = vector.shape_cast %49 : vector<1x1x19x135xbf16> to vector<19x135xbf16>
    %c2_61 = arith.constant 2 : index
    %c0_62 = arith.constant 0 : index
    %c0_63 = arith.constant 0 : index
    %51 = vector.load %arg2[%c2_61, %c0_62, %c0_63] : memref<6x135x256xbf16, #tpu.memory_space<vmem>>, vector<1x135x256xbf16>
    %52 = vector.shape_cast %51 : vector<1x135x256xbf16> to vector<135x256xbf16>
    %cst_64 = arith.constant dense<0.000000e+00> : vector<19x256xf32>
    %53 = tpu.matmul %50, %52, %cst_64 {dimension_numbers = #tpu.dot_dimension_numbers<[1], [0], [0], [1], [0, 0, 1, 1], [], []>} : vector<19x135xbf16>, vector<135x256xbf16>, vector<19x256xf32> -> vector<19x256xf32>
    %54 = arith.addf %48, %53 : vector<19x256xf32>
    %c0_65 = arith.constant 0 : index
    %c0_66 = arith.constant 0 : index
    %c1_67 = arith.constant 1 : index
    %c0_68 = arith.constant 0 : index
    %55 = vector.load %arg1[%c0_65, %c0_66, %c1_67, %c0_68] : memref<1x4x20x135xbf16, #tpu.memory_space<vmem>>, vector<1x1x19x135xbf16>
    %56 = vector.shape_cast %55 : vector<1x1x19x135xbf16> to vector<19x135xbf16>
    %c3_69 = arith.constant 3 : index
    %c0_70 = arith.constant 0 : index
    %c0_71 = arith.constant 0 : index
    %57 = vector.load %arg2[%c3_69, %c0_70, %c0_71] : memref<6x135x256xbf16, #tpu.memory_space<vmem>>, vector<1x135x256xbf16>
    %58 = vector.shape_cast %57 : vector<1x135x256xbf16> to vector<135x256xbf16>
    %cst_72 = arith.constant dense<0.000000e+00> : vector<19x256xf32>
    %59 = tpu.matmul %56, %58, %cst_72 {dimension_numbers = #tpu.dot_dimension_numbers<[1], [0], [0], [1], [0, 0, 1, 1], [], []>} : vector<19x135xbf16>, vector<135x256xbf16>, vector<19x256xf32> -> vector<19x256xf32>
    %60 = arith.addf %54, %59 : vector<19x256xf32>
    %c0_73 = arith.constant 0 : index
    %c1_74 = arith.constant 1 : index
    %c1_75 = arith.constant 1 : index
    %c0_76 = arith.constant 0 : index
    %61 = vector.load %arg1[%c0_73, %c1_74, %c1_75, %c0_76] : memref<1x4x20x135xbf16, #tpu.memory_space<vmem>>, vector<1x1x19x135xbf16>
    %62 = vector.shape_cast %61 : vector<1x1x19x135xbf16> to vector<19x135xbf16>
    %c4_77 = arith.constant 4 : index
    %c0_78 = arith.constant 0 : index
    %c0_79 = arith.constant 0 : index
    %63 = vector.load %arg2[%c4_77, %c0_78, %c0_79] : memref<6x135x256xbf16, #tpu.memory_space<vmem>>, vector<1x135x256xbf16>
    %64 = vector.shape_cast %63 : vector<1x135x256xbf16> to vector<135x256xbf16>
    %cst_80 = arith.constant dense<0.000000e+00> : vector<19x256xf32>
    %65 = tpu.matmul %62, %64, %cst_80 {dimension_numbers = #tpu.dot_dimension_numbers<[1], [0], [0], [1], [0, 0, 1, 1], [], []>} : vector<19x135xbf16>, vector<135x256xbf16>, vector<19x256xf32> -> vector<19x256xf32>
    %66 = arith.addf %60, %65 : vector<19x256xf32>
    %c0_81 = arith.constant 0 : index
    %c2_82 = arith.constant 2 : index
    %c1_83 = arith.constant 1 : index
    %c0_84 = arith.constant 0 : index
    %67 = vector.load %arg1[%c0_81, %c2_82, %c1_83, %c0_84] : memref<1x4x20x135xbf16, #tpu.memory_space<vmem>>, vector<1x1x19x135xbf16>
    %68 = vector.shape_cast %67 : vector<1x1x19x135xbf16> to vector<19x135xbf16>
    %c5_85 = arith.constant 5 : index
    %c0_86 = arith.constant 0 : index
    %c0_87 = arith.constant 0 : index
    %69 = vector.load %arg2[%c5_85, %c0_86, %c0_87] : memref<6x135x256xbf16, #tpu.memory_space<vmem>>, vector<1x135x256xbf16>
    %70 = vector.shape_cast %69 : vector<1x135x256xbf16> to vector<135x256xbf16>
    %cst_88 = arith.constant dense<0.000000e+00> : vector<19x256xf32>
    %71 = tpu.matmul %68, %70, %cst_88 {dimension_numbers = #tpu.dot_dimension_numbers<[1], [0], [0], [1], [0, 0, 1, 1], [], []>} : vector<19x135xbf16>, vector<135x256xbf16>, vector<19x256xf32> -> vector<19x256xf32>
    %72 = arith.addf %66, %71 : vector<19x256xf32>
    %73 = vector.extract_strided_slice %72 {offsets = [0, 0], sizes = [19, 128], strides = [1, 1]} : vector<19x256xf32> to vector<19x128xf32>
    %74 = vector.extract_strided_slice %72 {offsets = [0, 128], sizes = [19, 128], strides = [1, 1]} : vector<19x256xf32> to vector<19x128xf32>
    %75 = arith.maximumf %73, %74 : vector<19x128xf32>
    %76 = arith.maximumf %37, %75 : vector<19x128xf32>
    %c0_89 = arith.constant 0 : index
    %c0_90 = arith.constant 0 : index
    %77 = vector.load %arg3[%c0_89, %c0_90] : memref<1x128xf32, #tpu.memory_space<vmem>>, vector<1x128xf32>
    %78 = vector.broadcast %77 : vector<1x128xf32> to vector<19x128xf32>
    %79 = arith.addf %76, %78 : vector<19x128xf32>
    %c0_91 = arith.constant 0 : index
    %c0_92 = arith.constant 0 : index
    %c0_93 = arith.constant 0 : index
    %80 = vector.load %arg7[%c0_91, %c0_92, %c0_93] : memref<2x20x128xf32, #tpu.memory_space<vmem>>, vector<1x19x128xf32>
    %81 = vector.shape_cast %80 : vector<1x19x128xf32> to vector<19x128xf32>
    %82 = vector.shape_cast %79 : vector<19x128xf32> to vector<1x19x128xf32>
    tpu.vector_store %arg7[%c0_91, %c0_92, %c0_93], %82 {strides = array<i32>} : memref<2x20x128xf32, #tpu.memory_space<vmem>>, vector<1x19x128xf32>,
    %c0_94 = arith.constant 0 : index
    %c2_95 = arith.constant 2 : index
    %c0_96 = arith.constant 0 : index
    %c0_97 = arith.constant 0 : index
    %83 = vector.load %arg1[%c0_94, %c2_95, %c0_96, %c0_97] : memref<1x4x20x135xbf16, #tpu.memory_space<vmem>>, vector<1x1x18x135xbf16>
    %84 = vector.shape_cast %83 : vector<1x1x18x135xbf16> to vector<18x135xbf16>
    %c0_98 = arith.constant 0 : index
    %c0_99 = arith.constant 0 : index
    %c0_100 = arith.constant 0 : index
    %85 = vector.load %arg2[%c0_98, %c0_99, %c0_100] : memref<6x135x256xbf16, #tpu.memory_space<vmem>>, vector<1x135x256xbf16>
    %86 = vector.shape_cast %85 : vector<1x135x256xbf16> to vector<135x256xbf16>
    %cst_101 = arith.constant dense<0.000000e+00> : vector<18x256xf32>
    %87 = tpu.matmul %84, %86, %cst_101 {dimension_numbers = #tpu.dot_dimension_numbers<[1], [0], [0], [1], [0, 0, 1, 1], [], []>} : vector<18x135xbf16>, vector<135x256xbf16>, vector<18x256xf32> -> vector<18x256xf32>
    %c0_102 = arith.constant 0 : index
    %c3_103 = arith.constant 3 : index
    %c0_104 = arith.constant 0 : index
    %c0_105 = arith.constant 0 : index
    %88 = vector.load %arg1[%c0_102, %c3_103, %c0_104, %c0_105] : memref<1x4x20x135xbf16, #tpu.memory_space<vmem>>, vector<1x1x18x135xbf16>
    %89 = vector.shape_cast %88 : vector<1x1x18x135xbf16> to vector<18x135xbf16>
    %c1_106 = arith.constant 1 : index
    %c0_107 = arith.constant 0 : index
    %c0_108 = arith.constant 0 : index
    %90 = vector.load %arg2[%c1_106, %c0_107, %c0_108] : memref<6x135x256xbf16, #tpu.memory_space<vmem>>, vector<1x135x256xbf16>
    %91 = vector.shape_cast %90 : vector<1x135x256xbf16> to vector<135x256xbf16>
    %cst_109 = arith.constant dense<0.000000e+00> : vector<18x256xf32>
    %92 = tpu.matmul %89, %91, %cst_109 {dimension_numbers = #tpu.dot_dimension_numbers<[1], [0], [0], [1], [0, 0, 1, 1], [], []>} : vector<18x135xbf16>, vector<135x256xbf16>, vector<18x256xf32> -> vector<18x256xf32>
    %93 = arith.addf %87, %92 : vector<18x256xf32>
    %c0_110 = arith.constant 0 : index
    %c0_111 = arith.constant 0 : index
    %c1_112 = arith.constant 1 : index
    %c0_113 = arith.constant 0 : index
    %94 = vector.load %arg1[%c0_110, %c0_111, %c1_112, %c0_113] : memref<1x4x20x135xbf16, #tpu.memory_space<vmem>>, vector<1x1x18x135xbf16>
    %95 = vector.shape_cast %94 : vector<1x1x18x135xbf16> to vector<18x135xbf16>
    %c2_114 = arith.constant 2 : index
    %c0_115 = arith.constant 0 : index
    %c0_116 = arith.constant 0 : index
    %96 = vector.load %arg2[%c2_114, %c0_115, %c0_116] : memref<6x135x256xbf16, #tpu.memory_space<vmem>>, vector<1x135x256xbf16>
    %97 = vector.shape_cast %96 : vector<1x135x256xbf16> to vector<135x256xbf16>
    %cst_117 = arith.constant dense<0.000000e+00> : vector<18x256xf32>
    %98 = tpu.matmul %95, %97, %cst_117 {dimension_numbers = #tpu.dot_dimension_numbers<[1], [0], [0], [1], [0, 0, 1, 1], [], []>} : vector<18x135xbf16>, vector<135x256xbf16>, vector<18x256xf32> -> vector<18x256xf32>
    %99 = arith.addf %93, %98 : vector<18x256xf32>
    %c0_118 = arith.constant 0 : index
    %c1_119 = arith.constant 1 : index
    %c1_120 = arith.constant 1 : index
    %c0_121 = arith.constant 0 : index
    %100 = vector.load %arg1[%c0_118, %c1_119, %c1_120, %c0_121] : memref<1x4x20x135xbf16, #tpu.memory_space<vmem>>, vector<1x1x18x135xbf16>
    %101 = vector.shape_cast %100 : vector<1x1x18x135xbf16> to vector<18x135xbf16>
    %c3_122 = arith.constant 3 : index
    %c0_123 = arith.constant 0 : index
    %c0_124 = arith.constant 0 : index
    %102 = vector.load %arg2[%c3_122, %c0_123, %c0_124] : memref<6x135x256xbf16, #tpu.memory_space<vmem>>, vector<1x135x256xbf16>
    %103 = vector.shape_cast %102 : vector<1x135x256xbf16> to vector<135x256xbf16>
    %cst_125 = arith.constant dense<0.000000e+00> : vector<18x256xf32>
    %104 = tpu.matmul %101, %103, %cst_125 {dimension_numbers = #tpu.dot_dimension_numbers<[1], [0], [0], [1], [0, 0, 1, 1], [], []>} : vector<18x135xbf16>, vector<135x256xbf16>, vector<18x256xf32> -> vector<18x256xf32>
    %105 = arith.addf %99, %104 : vector<18x256xf32>
    %c0_126 = arith.constant 0 : index
    %c2_127 = arith.constant 2 : index
    %c1_128 = arith.constant 1 : index
    %c0_129 = arith.constant 0 : index
    %106 = vector.load %arg1[%c0_126, %c2_127, %c1_128, %c0_129] : memref<1x4x20x135xbf16, #tpu.memory_space<vmem>>, vector<1x1x18x135xbf16>
    %107 = vector.shape_cast %106 : vector<1x1x18x135xbf16> to vector<18x135xbf16>
    %c4_130 = arith.constant 4 : index
    %c0_131 = arith.constant 0 : index
    %c0_132 = arith.constant 0 : index
    %108 = vector.load %arg2[%c4_130, %c0_131, %c0_132] : memref<6x135x256xbf16, #tpu.memory_space<vmem>>, vector<1x135x256xbf16>
    %109 = vector.shape_cast %108 : vector<1x135x256xbf16> to vector<135x256xbf16>
    %cst_133 = arith.constant dense<0.000000e+00> : vector<18x256xf32>
    %110 = tpu.matmul %107, %109, %cst_133 {dimension_numbers = #tpu.dot_dimension_numbers<[1], [0], [0], [1], [0, 0, 1, 1], [], []>} : vector<18x135xbf16>, vector<135x256xbf16>, vector<18x256xf32> -> vector<18x256xf32>
    %111 = arith.addf %105, %110 : vector<18x256xf32>
    %c0_134 = arith.constant 0 : index
    %c3_135 = arith.constant 3 : index
    %c1_136 = arith.constant 1 : index
    %c0_137 = arith.constant 0 : index
    %112 = vector.load %arg1[%c0_134, %c3_135, %c1_136, %c0_137] : memref<1x4x20x135xbf16, #tpu.memory_space<vmem>>, vector<1x1x18x135xbf16>
    %113 = vector.shape_cast %112 : vector<1x1x18x135xbf16> to vector<18x135xbf16>
    %c5_138 = arith.constant 5 : index
    %c0_139 = arith.constant 0 : index
    %c0_140 = arith.constant 0 : index
    %114 = vector.load %arg2[%c5_138, %c0_139, %c0_140] : memref<6x135x256xbf16, #tpu.memory_space<vmem>>, vector<1x135x256xbf16>
    %115 = vector.shape_cast %114 : vector<1x135x256xbf16> to vector<135x256xbf16>
    %cst_141 = arith.constant dense<0.000000e+00> : vector<18x256xf32>
    %116 = tpu.matmul %113, %115, %cst_141 {dimension_numbers = #tpu.dot_dimension_numbers<[1], [0], [0], [1], [0, 0, 1, 1], [], []>} : vector<18x135xbf16>, vector<135x256xbf16>, vector<18x256xf32> -> vector<18x256xf32>
    %117 = arith.addf %111, %116 : vector<18x256xf32>
    %118 = vector.extract_strided_slice %117 {offsets = [0, 0], sizes = [18, 128], strides = [1, 1]} : vector<18x256xf32> to vector<18x128xf32>
    %119 = vector.extract_strided_slice %117 {offsets = [0, 128], sizes = [18, 128], strides = [1, 1]} : vector<18x256xf32> to vector<18x128xf32>
    %120 = arith.maximumf %118, %119 : vector<18x128xf32>
    %c0_142 = arith.constant 0 : index
    %c3_143 = arith.constant 3 : index
    %c0_144 = arith.constant 0 : index
    %c0_145 = arith.constant 0 : index
    %121 = vector.load %arg1[%c0_142, %c3_143, %c0_144, %c0_145] : memref<1x4x20x135xbf16, #tpu.memory_space<vmem>>, vector<1x1x18x135xbf16>
    %122 = vector.shape_cast %121 : vector<1x1x18x135xbf16> to vector<18x135xbf16>
    %c0_146 = arith.constant 0 : index
    %c0_147 = arith.constant 0 : index
    %c0_148 = arith.constant 0 : index
    %123 = vector.load %arg2[%c0_146, %c0_147, %c0_148] : memref<6x135x256xbf16, #tpu.memory_space<vmem>>, vector<1x135x256xbf16>
    %124 = vector.shape_cast %123 : vector<1x135x256xbf16> to vector<135x256xbf16>
    %cst_149 = arith.constant dense<0.000000e+00> : vector<18x256xf32>
    %125 = tpu.matmul %122, %124, %cst_149 {dimension_numbers = #tpu.dot_dimension_numbers<[1], [0], [0], [1], [0, 0, 1, 1], [], []>} : vector<18x135xbf16>, vector<135x256xbf16>, vector<18x256xf32> -> vector<18x256xf32>
    %c0_150 = arith.constant 0 : index
    %c0_151 = arith.constant 0 : index
    %c1_152 = arith.constant 1 : index
    %c0_153 = arith.constant 0 : index
    %126 = vector.load %arg1[%c0_150, %c0_151, %c1_152, %c0_153] : memref<1x4x20x135xbf16, #tpu.memory_space<vmem>>, vector<1x1x18x135xbf16>
    %127 = vector.shape_cast %126 : vector<1x1x18x135xbf16> to vector<18x135xbf16>
    %c1_154 = arith.constant 1 : index
    %c0_155 = arith.constant 0 : index
    %c0_156 = arith.constant 0 : index
    %128 = vector.load %arg2[%c1_154, %c0_155, %c0_156] : memref<6x135x256xbf16, #tpu.memory_space<vmem>>, vector<1x135x256xbf16>
    %129 = vector.shape_cast %128 : vector<1x135x256xbf16> to vector<135x256xbf16>
    %cst_157 = arith.constant dense<0.000000e+00> : vector<18x256xf32>
    %130 = tpu.matmul %127, %129, %cst_157 {dimension_numbers = #tpu.dot_dimension_numbers<[1], [0], [0], [1], [0, 0, 1, 1], [], []>} : vector<18x135xbf16>, vector<135x256xbf16>, vector<18x256xf32> -> vector<18x256xf32>
    %131 = arith.addf %125, %130 : vector<18x256xf32>
    %c0_158 = arith.constant 0 : index
    %c1_159 = arith.constant 1 : index
    %c1_160 = arith.constant 1 : index
    %c0_161 = arith.constant 0 : index
    %132 = vector.load %arg1[%c0_158, %c1_159, %c1_160, %c0_161] : memref<1x4x20x135xbf16, #tpu.memory_space<vmem>>, vector<1x1x18x135xbf16>
    %133 = vector.shape_cast %132 : vector<1x1x18x135xbf16> to vector<18x135xbf16>
    %c2_162 = arith.constant 2 : index
    %c0_163 = arith.constant 0 : index
    %c0_164 = arith.constant 0 : index
    %134 = vector.load %arg2[%c2_162, %c0_163, %c0_164] : memref<6x135x256xbf16, #tpu.memory_space<vmem>>, vector<1x135x256xbf16>
    %135 = vector.shape_cast %134 : vector<1x135x256xbf16> to vector<135x256xbf16>
    %cst_165 = arith.constant dense<0.000000e+00> : vector<18x256xf32>
    %136 = tpu.matmul %133, %135, %cst_165 {dimension_numbers = #tpu.dot_dimension_numbers<[1], [0], [0], [1], [0, 0, 1, 1], [], []>} : vector<18x135xbf16>, vector<135x256xbf16>, vector<18x256xf32> -> vector<18x256xf32>
    %137 = arith.addf %131, %136 : vector<18x256xf32>
    %c0_166 = arith.constant 0 : index
    %c2_167 = arith.constant 2 : index
    %c1_168 = arith.constant 1 : index
    %c0_169 = arith.constant 0 : index
    %138 = vector.load %arg1[%c0_166, %c2_167, %c1_168, %c0_169] : memref<1x4x20x135xbf16, #tpu.memory_space<vmem>>, vector<1x1x18x135xbf16>
    %139 = vector.shape_cast %138 : vector<1x1x18x135xbf16> to vector<18x135xbf16>
    %c3_170 = arith.constant 3 : index
    %c0_171 = arith.constant 0 : index
    %c0_172 = arith.constant 0 : index
    %140 = vector.load %arg2[%c3_170, %c0_171, %c0_172] : memref<6x135x256xbf16, #tpu.memory_space<vmem>>, vector<1x135x256xbf16>
    %141 = vector.shape_cast %140 : vector<1x135x256xbf16> to vector<135x256xbf16>
    %cst_173 = arith.constant dense<0.000000e+00> : vector<18x256xf32>
    %142 = tpu.matmul %139, %141, %cst_173 {dimension_numbers = #tpu.dot_dimension_numbers<[1], [0], [0], [1], [0, 0, 1, 1], [], []>} : vector<18x135xbf16>, vector<135x256xbf16>, vector<18x256xf32> -> vector<18x256xf32>
    %143 = arith.addf %137, %142 : vector<18x256xf32>
    %c0_174 = arith.constant 0 : index
    %c3_175 = arith.constant 3 : index
    %c1_176 = arith.constant 1 : index
    %c0_177 = arith.constant 0 : index
    %144 = vector.load %arg1[%c0_174, %c3_175, %c1_176, %c0_177] : memref<1x4x20x135xbf16, #tpu.memory_space<vmem>>, vector<1x1x18x135xbf16>
    %145 = vector.shape_cast %144 : vector<1x1x18x135xbf16> to vector<18x135xbf16>
    %c4_178 = arith.constant 4 : index
    %c0_179 = arith.constant 0 : index
    %c0_180 = arith.constant 0 : index
    %146 = vector.load %arg2[%c4_178, %c0_179, %c0_180] : memref<6x135x256xbf16, #tpu.memory_space<vmem>>, vector<1x135x256xbf16>
    %147 = vector.shape_cast %146 : vector<1x135x256xbf16> to vector<135x256xbf16>
    %cst_181 = arith.constant dense<0.000000e+00> : vector<18x256xf32>
    %148 = tpu.matmul %145, %147, %cst_181 {dimension_numbers = #tpu.dot_dimension_numbers<[1], [0], [0], [1], [0, 0, 1, 1], [], []>} : vector<18x135xbf16>, vector<135x256xbf16>, vector<18x256xf32> -> vector<18x256xf32>
    %149 = arith.addf %143, %148 : vector<18x256xf32>
    %c0_182 = arith.constant 0 : index
    %c0_183 = arith.constant 0 : index
    %c2_184 = arith.constant 2 : index
    %c0_185 = arith.constant 0 : index
    %150 = vector.load %arg1[%c0_182, %c0_183, %c2_184, %c0_185] : memref<1x4x20x135xbf16, #tpu.memory_space<vmem>>, vector<1x1x18x135xbf16>
    %151 = vector.shape_cast %150 : vector<1x1x18x135xbf16> to vector<18x135xbf16>
    %c5_186 = arith.constant 5 : index
    %c0_187 = arith.constant 0 : index
    %c0_188 = arith.constant 0 : index
    %152 = vector.load %arg2[%c5_186, %c0_187, %c0_188] : memref<6x135x256xbf16, #tpu.memory_space<vmem>>, vector<1x135x256xbf16>
    %153 = vector.shape_cast %152 : vector<1x135x256xbf16> to vector<135x256xbf16>
    %cst_189 = arith.constant dense<0.000000e+00> : vector<18x256xf32>
    %154 = tpu.matmul %151, %153, %cst_189 {dimension_numbers = #tpu.dot_dimension_numbers<[1], [0], [0], [1], [0, 0, 1, 1], [], []>} : vector<18x135xbf16>, vector<135x256xbf16>, vector<18x256xf32> -> vector<18x256xf32>
    %155 = arith.addf %149, %154 : vector<18x256xf32>
    %156 = vector.extract_strided_slice %155 {offsets = [0, 0], sizes = [18, 128], strides = [1, 1]} : vector<18x256xf32> to vector<18x128xf32>
    %157 = vector.extract_strided_slice %155 {offsets = [0, 128], sizes = [18, 128], strides = [1, 1]} : vector<18x256xf32> to vector<18x128xf32>
    %158 = arith.maximumf %156, %157 : vector<18x128xf32>
    %159 = arith.maximumf %120, %158 : vector<18x128xf32>
    %c0_190 = arith.constant 0 : index
    %c0_191 = arith.constant 0 : index
    %160 = vector.load %arg3[%c0_190, %c0_191] : memref<1x128xf32, #tpu.memory_space<vmem>>, vector<1x128xf32>
    %161 = vector.broadcast %160 : vector<1x128xf32> to vector<18x128xf32>
    %162 = arith.addf %159, %161 : vector<18x128xf32>
    %c1_192 = arith.constant 1 : index
    %c0_193 = arith.constant 0 : index
    %c0_194 = arith.constant 0 : index
    %163 = vector.load %arg7[%c1_192, %c0_193, %c0_194] : memref<2x20x128xf32, #tpu.memory_space<vmem>>, vector<1x18x128xf32>
    %164 = vector.shape_cast %163 : vector<1x18x128xf32> to vector<18x128xf32>
    %165 = vector.shape_cast %162 : vector<18x128xf32> to vector<1x18x128xf32>
    tpu.vector_store %arg7[%c1_192, %c0_193, %c0_194], %165 {strides = array<i32>} : memref<2x20x128xf32, #tpu.memory_space<vmem>>, vector<1x18x128xf32>,
    %c0_195 = arith.constant 0 : index
    %c0_196 = arith.constant 0 : index
    %c0_197 = arith.constant 0 : index
    %166 = vector.load %arg7[%c0_195, %c0_196, %c0_197] : memref<2x20x128xf32, #tpu.memory_space<vmem>>, vector<1x16x128xf32>
    %167 = vector.shape_cast %166 : vector<1x16x128xf32> to vector<16x128xf32>
    %168 = arith.truncf %167 : vector<16x128xf32> to vector<16x128xbf16>
    %c1_198 = arith.constant 1 : index
    %c0_199 = arith.constant 0 : index
    %c0_200 = arith.constant 0 : index
    %169 = vector.load %arg7[%c1_198, %c0_199, %c0_200] : memref<2x20x128xf32, #tpu.memory_space<vmem>>, vector<1x16x128xf32>
    %170 = vector.shape_cast %169 : vector<1x16x128xf32> to vector<16x128xf32>
    %171 = arith.truncf %170 : vector<16x128xf32> to vector<16x128xbf16>
    %c0_201 = arith.constant 0 : index
    %c1_202 = arith.constant 1 : index
    %c0_203 = arith.constant 0 : index
    %172 = vector.load %arg7[%c0_201, %c1_202, %c0_203] : memref<2x20x128xf32, #tpu.memory_space<vmem>>, vector<1x16x128xf32>
    %173 = vector.shape_cast %172 : vector<1x16x128xf32> to vector<16x128xf32>
    %174 = arith.truncf %173 : vector<16x128xf32> to vector<16x128xbf16>
    %c1_204 = arith.constant 1 : index
    %c1_205 = arith.constant 1 : index
    %c0_206 = arith.constant 0 : index
    %175 = vector.load %arg7[%c1_204, %c1_205, %c0_206] : memref<2x20x128xf32, #tpu.memory_space<vmem>>, vector<1x16x128xf32>
    %176 = vector.shape_cast %175 : vector<1x16x128xf32> to vector<16x128xf32>
    %177 = arith.truncf %176 : vector<16x128xf32> to vector<16x128xbf16>
    %c0_207 = arith.constant 0 : index
    %c2_208 = arith.constant 2 : index
    %c0_209 = arith.constant 0 : index
    %178 = vector.load %arg7[%c0_207, %c2_208, %c0_209] : memref<2x20x128xf32, #tpu.memory_space<vmem>>, vector<1x16x128xf32>
    %179 = vector.shape_cast %178 : vector<1x16x128xf32> to vector<16x128xf32>
    %180 = arith.truncf %179 : vector<16x128xf32> to vector<16x128xbf16>
    %c1_210 = arith.constant 1 : index
    %c2_211 = arith.constant 2 : index
    %c0_212 = arith.constant 0 : index
    %181 = vector.load %arg7[%c1_210, %c2_211, %c0_212] : memref<2x20x128xf32, #tpu.memory_space<vmem>>, vector<1x16x128xf32>
    %182 = vector.shape_cast %181 : vector<1x16x128xf32> to vector<16x128xf32>
    %183 = arith.truncf %182 : vector<16x128xf32> to vector<16x128xbf16>
    %c0_213 = arith.constant 0 : index
    %c3_214 = arith.constant 3 : index
    %c0_215 = arith.constant 0 : index
    %184 = vector.load %arg7[%c0_213, %c3_214, %c0_215] : memref<2x20x128xf32, #tpu.memory_space<vmem>>, vector<1x16x128xf32>
    %185 = vector.shape_cast %184 : vector<1x16x128xf32> to vector<16x128xf32>
    %186 = arith.truncf %185 : vector<16x128xf32> to vector<16x128xbf16>
    %c0_216 = arith.constant 0 : index
    %c0_217 = arith.constant 0 : index
    %c0_218 = arith.constant 0 : index
    %187 = vector.load %arg4[%c0_216, %c0_217, %c0_218] : memref<6x128x256xbf16, #tpu.memory_space<vmem>>, vector<1x128x256xbf16>
    %188 = vector.shape_cast %187 : vector<1x128x256xbf16> to vector<128x256xbf16>
    %cst_219 = arith.constant dense<0.000000e+00> : vector<16x256xf32>
    %189 = tpu.matmul %168, %188, %cst_219 {dimension_numbers = #tpu.dot_dimension_numbers<[1], [0], [0], [1], [0, 0, 1, 1], [], []>} : vector<16x128xbf16>, vector<128x256xbf16>, vector<16x256xf32> -> vector<16x256xf32>
    %c1_220 = arith.constant 1 : index
    %c0_221 = arith.constant 0 : index
    %c0_222 = arith.constant 0 : index
    %190 = vector.load %arg4[%c1_220, %c0_221, %c0_222] : memref<6x128x256xbf16, #tpu.memory_space<vmem>>, vector<1x128x256xbf16>
    %191 = vector.shape_cast %190 : vector<1x128x256xbf16> to vector<128x256xbf16>
    %cst_223 = arith.constant dense<0.000000e+00> : vector<16x256xf32>
    %192 = tpu.matmul %171, %191, %cst_223 {dimension_numbers = #tpu.dot_dimension_numbers<[1], [0], [0], [1], [0, 0, 1, 1], [], []>} : vector<16x128xbf16>, vector<128x256xbf16>, vector<16x256xf32> -> vector<16x256xf32>
    %193 = arith.addf %189, %192 : vector<16x256xf32>
    %c2_224 = arith.constant 2 : index
    %c0_225 = arith.constant 0 : index
    %c0_226 = arith.constant 0 : index
    %194 = vector.load %arg4[%c2_224, %c0_225, %c0_226] : memref<6x128x256xbf16, #tpu.memory_space<vmem>>, vector<1x128x256xbf16>
    %195 = vector.shape_cast %194 : vector<1x128x256xbf16> to vector<128x256xbf16>
    %cst_227 = arith.constant dense<0.000000e+00> : vector<16x256xf32>
    %196 = tpu.matmul %174, %195, %cst_227 {dimension_numbers = #tpu.dot_dimension_numbers<[1], [0], [0], [1], [0, 0, 1, 1], [], []>} : vector<16x128xbf16>, vector<128x256xbf16>, vector<16x256xf32> -> vector<16x256xf32>
    %197 = arith.addf %193, %196 : vector<16x256xf32>
    %c3_228 = arith.constant 3 : index
    %c0_229 = arith.constant 0 : index
    %c0_230 = arith.constant 0 : index
    %198 = vector.load %arg4[%c3_228, %c0_229, %c0_230] : memref<6x128x256xbf16, #tpu.memory_space<vmem>>, vector<1x128x256xbf16>
    %199 = vector.shape_cast %198 : vector<1x128x256xbf16> to vector<128x256xbf16>
    %cst_231 = arith.constant dense<0.000000e+00> : vector<16x256xf32>
    %200 = tpu.matmul %177, %199, %cst_231 {dimension_numbers = #tpu.dot_dimension_numbers<[1], [0], [0], [1], [0, 0, 1, 1], [], []>} : vector<16x128xbf16>, vector<128x256xbf16>, vector<16x256xf32> -> vector<16x256xf32>
    %201 = arith.addf %197, %200 : vector<16x256xf32>
    %c4_232 = arith.constant 4 : index
    %c0_233 = arith.constant 0 : index
    %c0_234 = arith.constant 0 : index
    %202 = vector.load %arg4[%c4_232, %c0_233, %c0_234] : memref<6x128x256xbf16, #tpu.memory_space<vmem>>, vector<1x128x256xbf16>
    %203 = vector.shape_cast %202 : vector<1x128x256xbf16> to vector<128x256xbf16>
    %cst_235 = arith.constant dense<0.000000e+00> : vector<16x256xf32>
    %204 = tpu.matmul %180, %203, %cst_235 {dimension_numbers = #tpu.dot_dimension_numbers<[1], [0], [0], [1], [0, 0, 1, 1], [], []>} : vector<16x128xbf16>, vector<128x256xbf16>, vector<16x256xf32> -> vector<16x256xf32>
    %205 = arith.addf %201, %204 : vector<16x256xf32>
    %c5_236 = arith.constant 5 : index
    %c0_237 = arith.constant 0 : index
    %c0_238 = arith.constant 0 : index
    %206 = vector.load %arg4[%c5_236, %c0_237, %c0_238] : memref<6x128x256xbf16, #tpu.memory_space<vmem>>, vector<1x128x256xbf16>
    %207 = vector.shape_cast %206 : vector<1x128x256xbf16> to vector<128x256xbf16>
    %cst_239 = arith.constant dense<0.000000e+00> : vector<16x256xf32>
    %208 = tpu.matmul %183, %207, %cst_239 {dimension_numbers = #tpu.dot_dimension_numbers<[1], [0], [0], [1], [0, 0, 1, 1], [], []>} : vector<16x128xbf16>, vector<128x256xbf16>, vector<16x256xf32> -> vector<16x256xf32>
    %209 = arith.addf %205, %208 : vector<16x256xf32>
    %210 = vector.extract_strided_slice %209 {offsets = [0, 0], sizes = [16, 128], strides = [1, 1]} : vector<16x256xf32> to vector<16x128xf32>
    %211 = vector.extract_strided_slice %209 {offsets = [0, 128], sizes = [16, 128], strides = [1, 1]} : vector<16x256xf32> to vector<16x128xf32>
    %212 = arith.maximumf %210, %211 : vector<16x128xf32>
    %c0_240 = arith.constant 0 : index
    %c0_241 = arith.constant 0 : index
    %c0_242 = arith.constant 0 : index
    %213 = vector.load %arg4[%c0_240, %c0_241, %c0_242] : memref<6x128x256xbf16, #tpu.memory_space<vmem>>, vector<1x128x256xbf16>
    %214 = vector.shape_cast %213 : vector<1x128x256xbf16> to vector<128x256xbf16>
    %cst_243 = arith.constant dense<0.000000e+00> : vector<16x256xf32>
    %215 = tpu.matmul %171, %214, %cst_243 {dimension_numbers = #tpu.dot_dimension_numbers<[1], [0], [0], [1], [0, 0, 1, 1], [], []>} : vector<16x128xbf16>, vector<128x256xbf16>, vector<16x256xf32> -> vector<16x256xf32>
    %c1_244 = arith.constant 1 : index
    %c0_245 = arith.constant 0 : index
    %c0_246 = arith.constant 0 : index
    %216 = vector.load %arg4[%c1_244, %c0_245, %c0_246] : memref<6x128x256xbf16, #tpu.memory_space<vmem>>, vector<1x128x256xbf16>
    %217 = vector.shape_cast %216 : vector<1x128x256xbf16> to vector<128x256xbf16>
    %cst_247 = arith.constant dense<0.000000e+00> : vector<16x256xf32>
    %218 = tpu.matmul %174, %217, %cst_247 {dimension_numbers = #tpu.dot_dimension_numbers<[1], [0], [0], [1], [0, 0, 1, 1], [], []>} : vector<16x128xbf16>, vector<128x256xbf16>, vector<16x256xf32> -> vector<16x256xf32>
    %219 = arith.addf %215, %218 : vector<16x256xf32>
    %c2_248 = arith.constant 2 : index
    %c0_249 = arith.constant 0 : index
    %c0_250 = arith.constant 0 : index
    %220 = vector.load %arg4[%c2_248, %c0_249, %c0_250] : memref<6x128x256xbf16, #tpu.memory_space<vmem>>, vector<1x128x256xbf16>
    %221 = vector.shape_cast %220 : vector<1x128x256xbf16> to vector<128x256xbf16>
    %cst_251 = arith.constant dense<0.000000e+00> : vector<16x256xf32>
    %222 = tpu.matmul %177, %221, %cst_251 {dimension_numbers = #tpu.dot_dimension_numbers<[1], [0], [0], [1], [0, 0, 1, 1], [], []>} : vector<16x128xbf16>, vector<128x256xbf16>, vector<16x256xf32> -> vector<16x256xf32>
    %223 = arith.addf %219, %222 : vector<16x256xf32>
    %c3_252 = arith.constant 3 : index
    %c0_253 = arith.constant 0 : index
    %c0_254 = arith.constant 0 : index
    %224 = vector.load %arg4[%c3_252, %c0_253, %c0_254] : memref<6x128x256xbf16, #tpu.memory_space<vmem>>, vector<1x128x256xbf16>
    %225 = vector.shape_cast %224 : vector<1x128x256xbf16> to vector<128x256xbf16>
    %cst_255 = arith.constant dense<0.000000e+00> : vector<16x256xf32>
    %226 = tpu.matmul %180, %225, %cst_255 {dimension_numbers = #tpu.dot_dimension_numbers<[1], [0], [0], [1], [0, 0, 1, 1], [], []>} : vector<16x128xbf16>, vector<128x256xbf16>, vector<16x256xf32> -> vector<16x256xf32>
    %227 = arith.addf %223, %226 : vector<16x256xf32>
    %c4_256 = arith.constant 4 : index
    %c0_257 = arith.constant 0 : index
    %c0_258 = arith.constant 0 : index
    %228 = vector.load %arg4[%c4_256, %c0_257, %c0_258] : memref<6x128x256xbf16, #tpu.memory_space<vmem>>, vector<1x128x256xbf16>
    %229 = vector.shape_cast %228 : vector<1x128x256xbf16> to vector<128x256xbf16>
    %cst_259 = arith.constant dense<0.000000e+00> : vector<16x256xf32>
    %230 = tpu.matmul %183, %229, %cst_259 {dimension_numbers = #tpu.dot_dimension_numbers<[1], [0], [0], [1], [0, 0, 1, 1], [], []>} : vector<16x128xbf16>, vector<128x256xbf16>, vector<16x256xf32> -> vector<16x256xf32>
    %231 = arith.addf %227, %230 : vector<16x256xf32>
    %c5_260 = arith.constant 5 : index
    %c0_261 = arith.constant 0 : index
    %c0_262 = arith.constant 0 : index
    %232 = vector.load %arg4[%c5_260, %c0_261, %c0_262] : memref<6x128x256xbf16, #tpu.memory_space<vmem>>, vector<1x128x256xbf16>
    %233 = vector.shape_cast %232 : vector<1x128x256xbf16> to vector<128x256xbf16>
    %cst_263 = arith.constant dense<0.000000e+00> : vector<16x256xf32>
    %234 = tpu.matmul %186, %233, %cst_263 {dimension_numbers = #tpu.dot_dimension_numbers<[1], [0], [0], [1], [0, 0, 1, 1], [], []>} : vector<16x128xbf16>, vector<128x256xbf16>, vector<16x256xf32> -> vector<16x256xf32>
    %235 = arith.addf %231, %234 : vector<16x256xf32>
    %236 = vector.extract_strided_slice %235 {offsets = [0, 0], sizes = [16, 128], strides = [1, 1]} : vector<16x256xf32> to vector<16x128xf32>
    %237 = vector.extract_strided_slice %235 {offsets = [0, 128], sizes = [16, 128], strides = [1, 1]} : vector<16x256xf32> to vector<16x128xf32>
    %238 = arith.maximumf %236, %237 : vector<16x128xf32>
    %239 = arith.maximumf %212, %238 : vector<16x128xf32>
    %c0_264 = arith.constant 0 : index
    %c0_265 = arith.constant 0 : index
    %240 = vector.load %arg5[%c0_264, %c0_265] : memref<1x128xf32, #tpu.memory_space<vmem>>, vector<1x128xf32>
    %241 = vector.broadcast %240 : vector<1x128xf32> to vector<16x128xf32>
    %242 = arith.addf %239, %241 : vector<16x128xf32>
    %243 = arith.truncf %242 : vector<16x128xf32> to vector<16x128xbf16>
    %c0_266 = arith.constant 0 : index
    %c0_267 = arith.constant 0 : index
    %c0_268 = arith.constant 0 : index
    %244 = vector.load %arg6[%c0_266, %c0_267, %c0_268] : memref<1x16x128xbf16, #tpu.memory_space<vmem>>, vector<1x16x128xbf16>
    %245 = vector.shape_cast %244 : vector<1x16x128xbf16> to vector<16x128xbf16>
    %246 = vector.shape_cast %243 : vector<16x128xbf16> to vector<1x16x128xbf16>
    tpu.vector_store %arg6[%c0_266, %c0_267, %c0_268], %246 {strides = array<i32>} : memref<1x16x128xbf16, #tpu.memory_space<vmem>>, vector<1x16x128xbf16>,
    return
  }
  func.func @transform_0(%arg0: i32) -> (i32, i32, i32, i32) {
    %c0_i32 = arith.constant 0 : i32
    %c0_i32_0 = arith.constant 0 : i32
    %c0_i32_1 = arith.constant 0 : i32
    %c0_i32_2 = arith.constant 0 : i32
    return %arg0, %c0_i32, %c0_i32_0, %c0_i32_1 : i32, i32, i32, i32
  }
  func.func @transform_1(%arg0: i32) -> (i32, i32, i32) {
    %c0_i32 = arith.constant 0 : i32
    %c0_i32_0 = arith.constant 0 : i32
    %c0_i32_1 = arith.constant 0 : i32
    %c0_i32_2 = arith.constant 0 : i32
    return %c0_i32, %c0_i32_0, %c0_i32_1 : i32, i32, i32
  }
  func.func @transform_2(%arg0: i32) -> (i32, i32) {
    %c0_i32 = arith.constant 0 : i32
    %c0_i32_0 = arith.constant 0 : i32
    %c0_i32_1 = arith.constant 0 : i32
    return %c0_i32, %c0_i32_0 : i32, i32
  }
  func.func @transform_3(%arg0: i32) -> (i32, i32, i32) {
    %c0_i32 = arith.constant 0 : i32
    %c0_i32_0 = arith.constant 0 : i32
    %c0_i32_1 = arith.constant 0 : i32
    %c0_i32_2 = arith.constant 0 : i32
    return %c0_i32, %c0_i32_0, %c0_i32_1 : i32, i32, i32
  }
  func.func @transform_4(%arg0: i32) -> (i32, i32) {
    %c0_i32 = arith.constant 0 : i32
    %c0_i32_0 = arith.constant 0 : i32
    %c0_i32_1 = arith.constant 0 : i32
    return %c0_i32, %c0_i32_0 : i32, i32
  }
  func.func @transform_5(%arg0: i32) -> (i32, i32, i32) {
    %c0_i32 = arith.constant 0 : i32
    %c0_i32_0 = arith.constant 0 : i32
    %c0_i32_1 = arith.constant 0 : i32
    return %arg0, %c0_i32, %c0_i32_0 : i32, i32, i32
  }
}

module attributes {stable_mosaic.version = 11 : i64} {
  func.func @_dual_head_kernel(%arg0: i32, %arg1: memref<2x2048xbf16, #tpu.memory_space<vmem>>, %arg2: memref<2x2xf32, #tpu.memory_space<vmem>>, %arg3: memref<2048x512xbf16, #tpu.memory_space<vmem>>, %arg4: memref<2x512xf32, #tpu.memory_space<vmem>>, %arg5: memref<1x512xf32, #tpu.memory_space<vmem>>, %arg6: memref<512x256xbf16, #tpu.memory_space<vmem>>, %arg7: memref<1x256xf32, #tpu.memory_space<vmem>>, %arg8: memref<256x128xbf16, #tpu.memory_space<vmem>>, %arg9: memref<1x128xf32, #tpu.memory_space<vmem>>, %arg10: memref<128x4xbf16, #tpu.memory_space<vmem>>, %arg11: memref<1x4xf32, #tpu.memory_space<vmem>>, %arg12: memref<2x4xf32, #tpu.memory_space<vmem>>) attributes {dimension_semantics = [#tpu.dimension_semantics<parallel>], iteration_bounds = array<i64: 1>, scalar_prefetch = 0 : i64, scratch_operands = 0 : i64, tpu.core_type = #tpu.core_type<tc>, window_params = [{transform_indices = @transform_0, window_bounds = array<i64: 2, 2048>}, {transform_indices = @transform_1, window_bounds = array<i64: 2, 2>}, {pipeline_mode = #tpu.pipeline_mode<synchronous>, transform_indices = @transform_2, window_bounds = array<i64: 2048, 512>}, {pipeline_mode = #tpu.pipeline_mode<synchronous>, transform_indices = @transform_3, window_bounds = array<i64: 2, 512>}, {pipeline_mode = #tpu.pipeline_mode<synchronous>, transform_indices = @transform_4, window_bounds = array<i64: 1, 512>}, {pipeline_mode = #tpu.pipeline_mode<synchronous>, transform_indices = @transform_5, window_bounds = array<i64: 512, 256>}, {pipeline_mode = #tpu.pipeline_mode<synchronous>, transform_indices = @transform_6, window_bounds = array<i64: 1, 256>}, {pipeline_mode = #tpu.pipeline_mode<synchronous>, transform_indices = @transform_7, window_bounds = array<i64: 256, 128>}, {pipeline_mode = #tpu.pipeline_mode<synchronous>, transform_indices = @transform_8, window_bounds = array<i64: 1, 128>}, {pipeline_mode = #tpu.pipeline_mode<synchronous>, transform_indices = @transform_9, window_bounds = array<i64: 128, 4>}, {pipeline_mode = #tpu.pipeline_mode<synchronous>, transform_indices = @transform_10, window_bounds = array<i64: 1, 4>}, {transform_indices = @transform_11, window_bounds = array<i64: 2, 4>}]} {
    %c0 = arith.constant 0 : index
    %c0_0 = arith.constant 0 : index
    %0 = vector.load %arg1[%c0, %c0_0] : memref<2x2048xbf16, #tpu.memory_space<vmem>>, vector<2x2048xbf16>
    %c0_1 = arith.constant 0 : index
    %c0_2 = arith.constant 0 : index
    %1 = vector.load %arg3[%c0_1, %c0_2] : memref<2048x512xbf16, #tpu.memory_space<vmem>>, vector<2048x512xbf16>
    %cst = arith.constant dense<0.000000e+00> : vector<2x512xf32>
    %2 = tpu.matmul %0, %1, %cst {dimension_numbers = #tpu.dot_dimension_numbers<[1], [0], [0], [1], [0, 0, 1, 1], [], []>} : vector<2x2048xbf16>, vector<2048x512xbf16>, vector<2x512xf32> -> vector<2x512xf32>
    %c0_3 = arith.constant 0 : index
    %c0_4 = arith.constant 0 : index
    %3 = vector.load %arg2[%c0_3, %c0_4] : memref<2x2xf32, #tpu.memory_space<vmem>>, vector<2x2xf32>
    %c0_5 = arith.constant 0 : index
    %c0_6 = arith.constant 0 : index
    %4 = vector.load %arg4[%c0_5, %c0_6] : memref<2x512xf32, #tpu.memory_space<vmem>>, vector<2x512xf32>
    %cst_7 = arith.constant dense<0.000000e+00> : vector<2x512xf32>
    %5 = tpu.matmul %3, %4, %cst_7 {dimension_numbers = #tpu.dot_dimension_numbers<[1], [0], [0], [1], [0, 0, 1, 1], [], []>} : vector<2x2xf32>, vector<2x512xf32>, vector<2x512xf32> -> vector<2x512xf32>
    %6 = arith.addf %2, %5 : vector<2x512xf32>
    %c0_8 = arith.constant 0 : index
    %c0_9 = arith.constant 0 : index
    %7 = vector.load %arg5[%c0_8, %c0_9] : memref<1x512xf32, #tpu.memory_space<vmem>>, vector<1x512xf32>
    %8 = vector.broadcast %7 : vector<1x512xf32> to vector<2x512xf32>
    %9 = arith.addf %6, %8 : vector<2x512xf32>
    %cst_10 = arith.constant 0.000000e+00 : f32
    %10 = vector.broadcast %cst_10 : f32 to vector<2x512xf32>
    %11 = arith.maximumf %9, %10 : vector<2x512xf32>
    %12 = arith.truncf %11 : vector<2x512xf32> to vector<2x512xbf16>
    %c0_11 = arith.constant 0 : index
    %c0_12 = arith.constant 0 : index
    %13 = vector.load %arg6[%c0_11, %c0_12] : memref<512x256xbf16, #tpu.memory_space<vmem>>, vector<512x256xbf16>
    %cst_13 = arith.constant dense<0.000000e+00> : vector<2x256xf32>
    %14 = tpu.matmul %12, %13, %cst_13 {dimension_numbers = #tpu.dot_dimension_numbers<[1], [0], [0], [1], [0, 0, 1, 1], [], []>} : vector<2x512xbf16>, vector<512x256xbf16>, vector<2x256xf32> -> vector<2x256xf32>
    %c0_14 = arith.constant 0 : index
    %c0_15 = arith.constant 0 : index
    %15 = vector.load %arg7[%c0_14, %c0_15] : memref<1x256xf32, #tpu.memory_space<vmem>>, vector<1x256xf32>
    %16 = vector.broadcast %15 : vector<1x256xf32> to vector<2x256xf32>
    %17 = arith.addf %14, %16 : vector<2x256xf32>
    %cst_16 = arith.constant 0.000000e+00 : f32
    %18 = vector.broadcast %cst_16 : f32 to vector<2x256xf32>
    %19 = arith.maximumf %17, %18 : vector<2x256xf32>
    %20 = arith.truncf %19 : vector<2x256xf32> to vector<2x256xbf16>
    %c0_17 = arith.constant 0 : index
    %c0_18 = arith.constant 0 : index
    %21 = vector.load %arg8[%c0_17, %c0_18] : memref<256x128xbf16, #tpu.memory_space<vmem>>, vector<256x128xbf16>
    %cst_19 = arith.constant dense<0.000000e+00> : vector<2x128xf32>
    %22 = tpu.matmul %20, %21, %cst_19 {dimension_numbers = #tpu.dot_dimension_numbers<[1], [0], [0], [1], [0, 0, 1, 1], [], []>} : vector<2x256xbf16>, vector<256x128xbf16>, vector<2x128xf32> -> vector<2x128xf32>
    %c0_20 = arith.constant 0 : index
    %c0_21 = arith.constant 0 : index
    %23 = vector.load %arg9[%c0_20, %c0_21] : memref<1x128xf32, #tpu.memory_space<vmem>>, vector<1x128xf32>
    %24 = vector.broadcast %23 : vector<1x128xf32> to vector<2x128xf32>
    %25 = arith.addf %22, %24 : vector<2x128xf32>
    %cst_22 = arith.constant 0.000000e+00 : f32
    %26 = vector.broadcast %cst_22 : f32 to vector<2x128xf32>
    %27 = arith.maximumf %25, %26 : vector<2x128xf32>
    %28 = arith.truncf %27 : vector<2x128xf32> to vector<2x128xbf16>
    %c0_23 = arith.constant 0 : index
    %c0_24 = arith.constant 0 : index
    %29 = vector.load %arg10[%c0_23, %c0_24] : memref<128x4xbf16, #tpu.memory_space<vmem>>, vector<128x4xbf16>
    %cst_25 = arith.constant dense<0.000000e+00> : vector<2x4xf32>
    %30 = tpu.matmul %28, %29, %cst_25 {dimension_numbers = #tpu.dot_dimension_numbers<[1], [0], [0], [1], [0, 0, 1, 1], [], []>} : vector<2x128xbf16>, vector<128x4xbf16>, vector<2x4xf32> -> vector<2x4xf32>
    %c0_26 = arith.constant 0 : index
    %c0_27 = arith.constant 0 : index
    %31 = vector.load %arg11[%c0_26, %c0_27] : memref<1x4xf32, #tpu.memory_space<vmem>>, vector<1x4xf32>
    %32 = vector.broadcast %31 : vector<1x4xf32> to vector<2x4xf32>
    %33 = arith.addf %30, %32 : vector<2x4xf32>
    %c0_28 = arith.constant 0 : index
    %c0_29 = arith.constant 0 : index
    %34 = vector.load %arg12[%c0_28, %c0_29] : memref<2x4xf32, #tpu.memory_space<vmem>>, vector<2x4xf32>
    tpu.vector_store %arg12[%c0_28, %c0_29], %33 {strides = array<i32>} : memref<2x4xf32, #tpu.memory_space<vmem>>, vector<2x4xf32>,
    return
  }
  func.func @transform_0(%arg0: i32) -> (i32, i32) {
    %c0_i32 = arith.constant 0 : i32
    %c0_i32_0 = arith.constant 0 : i32
    return %arg0, %c0_i32 : i32, i32
  }
  func.func @transform_1(%arg0: i32) -> (i32, i32) {
    %c0_i32 = arith.constant 0 : i32
    %c0_i32_0 = arith.constant 0 : i32
    return %arg0, %c0_i32 : i32, i32
  }
  func.func @transform_2(%arg0: i32) -> (i32, i32) {
    %c0_i32 = arith.constant 0 : i32
    %c0_i32_0 = arith.constant 0 : i32
    %c0_i32_1 = arith.constant 0 : i32
    return %c0_i32, %c0_i32_0 : i32, i32
  }
  func.func @transform_3(%arg0: i32) -> (i32, i32) {
    %c0_i32 = arith.constant 0 : i32
    %c0_i32_0 = arith.constant 0 : i32
    %c0_i32_1 = arith.constant 0 : i32
    return %c0_i32, %c0_i32_0 : i32, i32
  }
  func.func @transform_4(%arg0: i32) -> (i32, i32) {
    %c0_i32 = arith.constant 0 : i32
    %c0_i32_0 = arith.constant 0 : i32
    %c0_i32_1 = arith.constant 0 : i32
    return %c0_i32, %c0_i32_0 : i32, i32
  }
  func.func @transform_5(%arg0: i32) -> (i32, i32) {
    %c0_i32 = arith.constant 0 : i32
    %c0_i32_0 = arith.constant 0 : i32
    %c0_i32_1 = arith.constant 0 : i32
    return %c0_i32, %c0_i32_0 : i32, i32
  }
  func.func @transform_6(%arg0: i32) -> (i32, i32) {
    %c0_i32 = arith.constant 0 : i32
    %c0_i32_0 = arith.constant 0 : i32
    %c0_i32_1 = arith.constant 0 : i32
    return %c0_i32, %c0_i32_0 : i32, i32
  }
  func.func @transform_7(%arg0: i32) -> (i32, i32) {
    %c0_i32 = arith.constant 0 : i32
    %c0_i32_0 = arith.constant 0 : i32
    %c0_i32_1 = arith.constant 0 : i32
    return %c0_i32, %c0_i32_0 : i32, i32
  }
  func.func @transform_8(%arg0: i32) -> (i32, i32) {
    %c0_i32 = arith.constant 0 : i32
    %c0_i32_0 = arith.constant 0 : i32
    %c0_i32_1 = arith.constant 0 : i32
    return %c0_i32, %c0_i32_0 : i32, i32
  }
  func.func @transform_9(%arg0: i32) -> (i32, i32) {
    %c0_i32 = arith.constant 0 : i32
    %c0_i32_0 = arith.constant 0 : i32
    %c0_i32_1 = arith.constant 0 : i32
    return %c0_i32, %c0_i32_0 : i32, i32
  }
  func.func @transform_10(%arg0: i32) -> (i32, i32) {
    %c0_i32 = arith.constant 0 : i32
    %c0_i32_0 = arith.constant 0 : i32
    %c0_i32_1 = arith.constant 0 : i32
    return %c0_i32, %c0_i32_0 : i32, i32
  }
  func.func @transform_11(%arg0: i32) -> (i32, i32) {
    %c0_i32 = arith.constant 0 : i32
    %c0_i32_0 = arith.constant 0 : i32
    return %arg0, %c0_i32 : i32, i32
  }
}

</mosaic_0001>

<bundles_post_ra>
// kernel: critic_forward.2
= control target key start
LH: loop header
LB: loop body
LE: loop exit
PB: predicated region body
PF: predicated region fallthrough
CT: control target
= control target key end

     0   :  { %s6851_s18 = smov 0   ;;  %s10897_s0 = inlined_call_operand.vmem [shape: bf16[2,4,20,135], index: 0, kind: input, shape index: {}]   ;;  %s10898_s1 = inlined_call_operand.vmem [shape: bf16[6,135,256], index: 1, kind: input, shape index: {}]   ;;  %s10899_s2 = inlined_call_operand.vmem [shape: f32[1,128], index: 2, kind: input, shape index: {}]   ;;  %s10900_s3 = inlined_call_operand.vmem [shape: bf16[6,128,256], index: 3, kind: input, shape index: {}]   ;;  %s10901_s4 = inlined_call_operand.vmem [shape: f32[1,128], index: 4, kind: input, shape index: {}]   ;;  %s10902_s5 = inlined_call_operand.vmem [shape: bf16[2,16,128], index: 5, kind: output, shape index: {}]  }
   0x1 LB: > { %s4907_s19 = sadd.s32 4294967295, %s6818_s18   ;;  %p4911_p0 = scmp.ge.s32.totalorder %s6818_s18, 1  ;;  %s6818_s18 = sphi %s6851_s18, %s15_s18  }
   0x2   : > { %p187_p1 = scmp.lt.s32.totalorder %s6818_s18, 3 }
   0x4   : > { %p188_p2 = pnand %p4911_p0, %p187_p1 }
   0x6   : > { %191 = sbr.rel (%p188_p2) target bundleno = 1248 (0x4e0), region = 40 }
   0xb   : > { %v5001_v0 = vld [vmem:[%s10898_s1 + $0xf8] sm:$0xf]  ;;  %v6527_v1 = vld [vmem:[%s10898_s1 + $0xfc] sm:$0xf0]  ;;  %v6526_v2 = vld [vmem:[%s10898_s1 + $0xfc] sm:$0xf] }
   0xc   : > { %v6868_v3 = vor.u32 %v6527_v1, %v5001_v0  ;;  %v5003_v4 = vld [vmem:[%s10898_s1 + $0x100] sm:$0xf0]  ;;  %v4993_v5 = vld [vmem:[%s10898_s1 + $0xe8] sm:$0xf]  ;;  %v6525_v6 = vld [vmem:[%s10898_s1 + $0xec] sm:$0xf0] }
   0xd   : > { %v6879_v7 = vor.u32 %v6526_v2, %v5003_v4  ;;  %v4934_v8 = vld [vmem:[%s10898_s1 + $0x108] sm:$0xff]  ;;  %vm375_vm0 = vcmask 1042432   ;;  %vm376_vm1 = vcmask 1043456   ;;  %p215_p3 = scmp.lt.s32.totalorder %s4907_s19, 1  ;;  %v6888_v10 = vor.u32 %v6525_v6, %v4993_v5  ;;  %v4995_v12 = vld [vmem:[%s10898_s1 + $0xf0] sm:$0xf0] }
   0xe   : > { %v6524_v9 = vld [vmem:[%s10898_s1 + $0xec] sm:$0xf]  ;;  %385 = vmatpush.bf16.msra.mxu0 %v6868_v3  ;;  %v332_v11 = vunpack.c.l.b16 %v4934_v8  ;;  %v333_v13 = vunpack.c.h.b16 %v4934_v8  ;;  %v6820_v14 = vmov 65535   ;;  %v4985_v17 = vld [vmem:[%s10898_s1 + $0xd8] sm:$0xf]  ;;  %v6916_v24 = vld [vmem:[%s10898_s1 + $0x80] sm:$0xff] }
   0xf   : > { %421 = vmatpush.bf16.msra.mxu2 %v6879_v7  ;;  %v377_v15 = vsel %vm375_vm0, 4294967295, %v6820_v14  ;;  %v6894_v16 = vor.u32 %v6524_v9, %v4995_v12  ;;  %s11626_s19 = smov (!%p215_p3, %s4907_s19), 1  ;;  %v6523_v18 = vld [vmem:[%s10898_s1 + $0xdc] sm:$0xf0]  ;;  %v6522_v22 = vld [vmem:[%s10898_s1 + $0xdc] sm:$0xf]  ;;  %v521_v27 = vunpack.c.l.b16 %v6916_v24 }
  0x10   : > { %v350_v19 = vpack.c.b16 %v332_v11, %v332_v11  ;;  %v6905_v20 = vsel %vm376_vm1, %v377_v15, 0  ;;  %v351_v21 = vpack.c.b16 %v333_v13, %v333_v13  ;;  %v5077_v23 = vld [vmem:[%s10898_s1 + $0x70] sm:$0xf]  ;;  %s6799_s25 = smul.u32 96, %s11626_s19  ;;  %v4987_v25 = vld [vmem:[%s10898_s1 + $0xe0] sm:$0xf0]  ;;  %v6933_v30 = vor.u32 %v6523_v18, %v4985_v17 }
  0x11   : > { %v6509_v26 = vld [vmem:[%s10898_s1 + $0x74] sm:$0xf0]  ;;  %v4977_v32 = vld [vmem:[%s10898_s1 + $0xc8] sm:$0xf]  ;;  %v6521_v33 = vld [vmem:[%s10898_s1 + $0xcc] sm:$0xf0]  ;;  %v539_v36 = vpack.c.b16 %v521_v27, %v521_v27  ;;  %v6959_v39 = vor.u32 %v6522_v22, %v4987_v25 }
  0x12   : > { %386 = vmatpush.bf16.msra.mxu0 %v6888_v10  ;;  %v6928_v28 = vand.u32 %v6905_v20, %v350_v19  ;;  %v6931_v29 = vand.u32 %v6905_v20, %v351_v21  ;;  %v6935_v31 = vor.u32 %v6509_v26, %v5077_v23  ;;  %s6944_s9 = scalar_lea.vmem %s10897_s0, %s6799_s25  ;;  %v5069_v34 = vld [vmem:[%s10898_s1 + $0x60] sm:$0xf]  ;;  %v6507_v35 = vld [vmem:[%s10898_s1 + $0x64] sm:$0xf0]  ;;  %vm368_vm2 = vcmask 56320   ;;  %s6491_s21 = sshll.u32 %s11626_s19, 3 }
  0x13   : > { %422 = vmatpush.bf16.msra.mxu2 %v6894_v16  ;;  %v6510_v37 = vld [vmem:[%s6944_s9 + $0x1c] sm:$0xf]  ;;  %v4939_v38 = vld [vmem:[%s6944_s9 + $0x20] sm:$0xf0]  ;;  %v6520_v41 = vld [vmem:[%s10898_s1 + $0xcc] sm:$0xf]  ;;  %v6970_v43 = vor.u32 %v6507_v35, %v5069_v34  ;;  %v6973_v44 = vand.u32 %v539_v36, %v6905_v20  ;;  %v6976_v45 = vor.u32 %v6521_v33, %v4977_v32 }
  0x14   : > { %410 = vmatpush.bf16.msra.mxu1 %v6928_v28  ;;  %446 = vmatpush.bf16.msra.mxu3 %v6931_v29  ;;  %v6961_v40 = vor.u32 %v6510_v37, %v4939_v38  ;;  %v4979_v42 = vld [vmem:[%s10898_s1 + $0xd0] sm:$0xf0]  ;;  %v5061_v46 = vld [vmem:[%s10898_s1 + $0x50] sm:$0xf]  ;;  %v6505_v47 = vld [vmem:[%s10898_s1 + $0x54] sm:$0xf0]  ;;  %v522_v37 = vunpack.c.h.b16 %v6916_v24 }
  0x15   : > { %v4969_v48 = vld [vmem:[%s10898_s1 + $0xb8] sm:$0xf]  ;;  %v6519_v49 = vld [vmem:[%s10898_s1 + $0xbc] sm:$0xf0]  ;;  %v6995_v50 = vor.u32 %v6520_v41, %v4979_v42  ;;  %v6518_v51 = vld [vmem:[%s10898_s1 + $0xbc] sm:$0xf]  ;;  %v7005_v53 = vor.u32 %v6505_v47, %v5061_v46 }
  0x16   : > { %387 = vmatpush.bf16.msra.mxu0 %v6933_v30  ;;  %v4971_v52 = vld [vmem:[%s10898_s1 + $0xc0] sm:$0xf0]  ;;  %v7008_v54 = vor.u32 %v6519_v49, %v4969_v48  ;;  %v5053_v55 = vld [vmem:[%s10898_s1 + $0x40] sm:$0xf]  ;;  %v6503_v56 = vld [vmem:[%s10898_s1 + $0x44] sm:$0xf0]  ;;  %v540_v46 = vpack.c.b16 %v522_v37, %v522_v37 }
  0x17   : > { %5007 = vmatmul.msk.bf16.vlgmr.msra.gmra.mxu1 %vm368_vm2, %v6961_v40  ;;  %5009 = vmatmul.msk.bf16.vlgmr.msra.gmra.mxu3 %vm368_vm2, %v6961_v40  ;;  %v4961_v57 = vld [vmem:[%s10898_s1 + $0xa8] sm:$0xf]  ;;  %v6517_v58 = vld [vmem:[%s10898_s1 + $0xac] sm:$0xf0]  ;;  %v7023_v59 = vor.u32 %v6518_v51, %v4971_v52  ;;  %v6516_v61 = vld [vmem:[%s10898_s1 + $0xac] sm:$0xf]  ;;  %v7035_v63 = vor.u32 %v6503_v56, %v5053_v55 }
  0x18   : > { %569 = vmatpush.bf16.msrb.mxu1 %v6935_v31  ;;  %423 = vmatpush.bf16.msra.mxu2 %v6959_v39  ;;  %v7026_v60 = vld [vmem:[%s6944_s9 + $0x28] sm:$0x33]  ;;  %v4963_v62 = vld [vmem:[%s10898_s1 + $0xb0] sm:$0xf0]  ;;  %v7038_v0 = vor.u32 %v6517_v58, %v4961_v57  ;;  %v5045_v1 = vld [vmem:[%s10898_s1 + $0x30] sm:$0xf]  ;;  %v7140_v52 = vand.u32 %v540_v46, %v6905_v20 }
  0x19   : > { %594 = vmatpush.bf16.msrb.mxu3 %v6973_v44  ;;  %v6501_v2 = vld [vmem:[%s10898_s1 + $0x34] sm:$0xf0]  ;;  %v276_v4 = vunpack.c.h.b16 %v7026_v60  ;;  %v6515_v6 = vld [vmem:[%s10898_s1 + $0x9c] sm:$0xf0]  ;;  %v7054_v8 = vor.u32 %v6516_v61, %v4963_v62  ;;  %v6514_v9 = vld [vmem:[%s10898_s1 + $0x9c] sm:$0xf] }
  0x1a   : > { %388 = vmatpush.bf16.msra.mxu0 %v6976_v45  ;;  %v4953_v5 = vld [vmem:[%s10898_s1 + $0x98] sm:$0xf]  ;;  %v4955_v11 = vld [vmem:[%s10898_s1 + $0xa0] sm:$0xf0]  ;;  %v7063_v12 = vor.u32 %v6501_v2, %v5045_v1  ;;  %v5037_v14 = vld [vmem:[%s10898_s1 + $0x20] sm:$0xf] }
  0x1b   : > { %v7066_v13 = vor.u32 %v6515_v6, %v4953_v5  ;;  %v6499_v15 = vld [vmem:[%s10898_s1 + $0x24] sm:$0xf0]  ;;  %v7074_v17 = vpack.c.b16 %v276_v4, %v276_v4  ;;  %v6513_v19 = vld [vmem:[%s10898_s1 + $0x8c] sm:$0xf0]  ;;  %v7083_v21 = vor.u32 %v6514_v9, %v4955_v11  ;;  %v6508_v22 = vld [vmem:[%s10898_s1 + $0x74] sm:$0xf] }
  0x1c   : > { %570 = vmatpush.bf16.msrb.mxu1 %v6970_v43  ;;  %424 = vmatpush.bf16.msra.mxu2 %v6995_v50  ;;  %v4945_v18 = vld [vmem:[%s10898_s1 + $0x88] sm:$0xf]  ;;  %v5079_v23 = vld [vmem:[%s10898_s1 + $0x78] sm:$0xf0]  ;;  %v6512_v25 = vld [vmem:[%s10898_s1 + $0x8c] sm:$0xf]  ;;  %v7098_v27 = vor.u32 %v6499_v15, %v5037_v14 }
  0x1d   : > { %v4947_v26 = vld [vmem:[%s10898_s1 + $0x90] sm:$0xf0]  ;;  %v4937_v32 = vld [vmem:[%s6944_s9 + $0x18] sm:$0xf]  ;;  %v7102_v33 = vor.u32 %v6513_v19, %v4945_v18  ;;  %v6511_v34 = vld [vmem:[%s6944_s9 + $0x1c] sm:$0xf0]  ;;  %v7116_v38 = vor.u32 %v6508_v22, %v5079_v23 }
  0x1e   : > { %389 = vmatpush.bf16.msra.mxu0 %v7008_v54  ;;  %v5029_v35 = vld [vmem:[%s10898_s1 + $0x10] sm:$0xf]  ;;  %v6497_v36 = vld [vmem:[%s10898_s1 + $0x14] sm:$0xf0]  ;;  %v7119_v41 = vor.u32 %v6512_v25, %v4947_v26  ;;  %v6506_v42 = vld [vmem:[%s10898_s1 + $0x64] sm:$0xf]  ;;  %v7128_v47 = vor.u32 %v6511_v34, %v4937_v32 }
  0x1f   : > { %v5071_v24 = vld [vmem:[%s10898_s1 + $0x68] sm:$0xf0]  ;;  %v7130_v48 = vor.u32 %v6497_v36, %v5029_v35  ;;  %v5021_v49 = vld [vmem:[%s10898_s1] sm:$0xf]  ;;  %v6495_v51 = vld [vmem:[%s10898_s1 + $0x4] sm:$0xf0] }
  0x20   : > { %571 = vmatpush.bf16.msrb.mxu1 %v7005_v53  ;;  %425 = vmatpush.bf16.msra.mxu2 %v7023_v59  ;;  %v7143_v55 = vor.u32 %v6506_v42, %v5071_v24  ;;  %v5173_v56 = vld [vmem:[%s10898_s1 + $0x180] sm:$0xf]  ;;  %v6545_v57 = vld [vmem:[%s10898_s1 + $0x184] sm:$0xf0]  ;;  %v6504_v58 = vld [vmem:[%s10898_s1 + $0x54] sm:$0xf]  ;;  %v7160_v62 = vor.u32 %v6495_v51, %v5021_v49  ;;  %v275_v42 = vunpack.c.l.b16 %v7026_v60 }
  0x21   : > { %v5063_v61 = vld [vmem:[%s10898_s1 + $0x58] sm:$0xf0]  ;;  %v7162_v1 = vor.u32 %v6545_v57, %v5173_v56  ;;  %v7168_v2 = vld [vmem:[%s10898_s1 + $0x190] sm:$0xff]  ;;  %v5013_v4 = vld [vmem:[%s6944_s9] sm:$0xf]  ;;  %vm3756_vm4 = vcmask 1046528  }
  0x22   : > { %390 = vmatpush.bf16.msra.mxu0 %v7038_v0  ;;  %11147 = vst [vmem:[#allocation3_spill] sm:$0xff] %v7143_v55  ;;  %v7173_v5 = vor.u32 %v6504_v58, %v5063_v61  ;;  %v5165_v6 = vld [vmem:[%s10898_s1 + $0x170] sm:$0xf]  ;;  %v6543_v9 = vld [vmem:[%s10898_s1 + $0x174] sm:$0xf0]  ;;  %v727_v11 = vunpack.c.l.b16 %v7168_v2  ;;  %v7234_v57 = vpack.c.b16 %v275_v42, %v275_v42 }
  0x23   : > { %11148 = vst [vmem:[#allocation4_spill] sm:$0xff] %v7160_v62  ;;  %v6493_v14 = vld [vmem:[%s6944_s9 + $0x4] sm:$0xf0]  ;;  %v6492_v15 = vld [vmem:[%s6944_s9 + $0x4] sm:$0xf]  ;;  %v7193_v25 = vor.u32 %v6543_v9, %v5165_v6 }
  0x24   : > { %572 = vmatpush.bf16.msrb.mxu1 %v7035_v63  ;;  %426 = vmatpush.bf16.msra.mxu2 %v7054_v8  ;;  %11149 = vst [vmem:[#allocation5_spill] sm:$0xff] %v7162_v1  ;;  %v5015_v18 = vld [vmem:[%s6944_s9 + $0x8] sm:$0xf0]  ;;  %v6502_v19 = vld [vmem:[%s10898_s1 + $0x44] sm:$0xf]  ;;  %v745_v23 = vpack.c.b16 %v727_v11, %v727_v11  ;;  %v7195_v26 = vor.u32 %v6493_v14, %v5013_v4 }
  0x25   : > { %11150 = vst [vmem:[#allocation6_spill] sm:$0xff] %v7173_v5  ;;  %v5055_v22 = vld [vmem:[%s10898_s1 + $0x48] sm:$0xf0]  ;;  %v7197_v32 = vor.u32 %v6492_v15, %v5015_v18  ;;  %v5157_v34 = vld [vmem:[%s10898_s1 + $0x160] sm:$0xf] }
  0x26   : > { %391 = vmatpush.bf16.msra.mxu0 %v7066_v13  ;;  %11151 = vst [vmem:[#allocation7_spill] sm:$0xff] %v7193_v25  ;;  %v6541_v35 = vld [vmem:[%s10898_s1 + $0x164] sm:$0xf0]  ;;  %v7207_v36 = vand.u32 %v745_v23, %v6905_v20  ;;  %v7209_v37 = vor.u32 %v6502_v19, %v5055_v22  ;;  %v6500_v24 = vld [vmem:[%s10898_s1 + $0x34] sm:$0xf] }
  0x27   : > { %5008 = vmatmul.msk.bf16.gmra.mxu1 %vm368_vm2, %v7074_v17  ;;  %5010 = vmatmul.msk.bf16.gmra.mxu3 %vm368_vm2, %v7074_v17  ;;  %v5047_v46 = vld [vmem:[%s10898_s1 + $0x38] sm:$0xf0]  ;;  %v7220_v49 = vor.u32 %v6541_v35, %v5157_v34  ;;  %v5149_v60 = vld [vmem:[%s10898_s1 + $0x150] sm:$0xf]  ;;  %v6539_v51 = vld [vmem:[%s10898_s1 + $0x154] sm:$0xf0] }
  0x28   : > { %573 = vmatpush.bf16.msrb.mxu1 %v7063_v12  ;;  %427 = vmatpush.bf16.msra.mxu2 %v7083_v21  ;;  %11152 = vst [vmem:[#allocation8_spill] sm:$0xff] %v7209_v37  ;;  %v7232_v56 = vor.u32 %v6500_v24, %v5047_v46  ;;  %v6498_v58 = vld [vmem:[%s10898_s1 + $0x24] sm:$0xf]  ;;  %v5039_v61 = vld [vmem:[%s10898_s1 + $0x28] sm:$0xf0]  ;;  %v7243_v4 = vor.u32 %v6539_v51, %v5149_v60 }
  0x29   : > { %800 = vmatpush.bf16.msra.mxu3 %v7207_v36  ;;  %11153 = vst [vmem:[#allocation9_spill] sm:$0xff] %v7220_v49  ;;  %v5141_v6 = vld [vmem:[%s10898_s1 + $0x140] sm:$0xf]  ;;  %v6537_v9 = vld [vmem:[%s10898_s1 + $0x144] sm:$0xf0]  ;;  %v7252_v11 = vor.u32 %v6498_v58, %v5039_v61 }
  0x2a   : > { %392 = vmatpush.bf16.msra.mxu0 %v7102_v33  ;;  %11154 = vst [vmem:[#allocation10_spill] sm:$0xff] %v7232_v56  ;;  %v228_v14 = vld [vmem:[%s6944_s9 + $0x10] sm:$0x33]  ;;  %v5031_v18 = vld [vmem:[%s10898_s1 + $0x18] sm:$0xf0]  ;;  %v7263_v19 = vor.u32 %v6537_v9, %v5141_v6 }
  0x2b   : > { %11155 = vst [vmem:[#allocation11_spill] sm:$0xff] %v7243_v4  ;;  %v6496_v15 = vld [vmem:[%s10898_s1 + $0x14] sm:$0xf]  ;;  %v464_v22 = vunpack.c.l.b16 %v228_v14  ;;  %v465_v23 = vunpack.c.h.b16 %v228_v14  ;;  %v5133_v34 = vld [vmem:[%s10898_s1 + $0x130] sm:$0xf] }
  0x2c   : > { %574 = vmatpush.bf16.msrb.mxu1 %v7098_v27  ;;  %428 = vmatpush.bf16.msra.mxu2 %v7119_v41  ;;  %11156 = vst [vmem:[#allocation12_spill] sm:$0xff] %v7252_v11  ;;  %v6535_v35 = vld [vmem:[%s10898_s1 + $0x134] sm:$0xf0]  ;;  %v7273_v42 = vor.u32 %v6496_v15, %v5031_v18  ;;  %v6494_v24 = vld [vmem:[%s10898_s1 + $0x4] sm:$0xf] }
  0x2d   : > { %393 = vmatmul.bf16.vlgmr.msra.gmra.mxu0 %v7128_v47  ;;  %11157 = vst [vmem:[#allocation13_spill] sm:$0xff] %v7263_v19  ;;  %v5023_v46 = vld [vmem:[%s10898_s1 + $0x8] sm:$0xf0]  ;;  %v7282_v60 = vor.u32 %v6535_v35, %v5133_v34  ;;  %v6544_v51 = vld [vmem:[%s10898_s1 + $0x184] sm:$0xf]  ;;  %v7290_v61 = vpack.c.b16 %v464_v22, %v464_v22  ;;  %v7292_v6 = vpack.c.b16 %v465_v23, %v465_v23  ;;  %v728_v34 = vunpack.c.h.b16 %v7168_v2 }
  0x2e   : > { %605 = vmatpush.bf16.msrb.mxu0 %v7116_v38  ;;  %11158 = vst [vmem:[#allocation14_spill] sm:$0xff] %v7273_v42  ;;  %v5175_v58 = vld [vmem:[%s10898_s1 + $0x188] sm:$0xf0]  ;;  %v5125_v9 = vld [vmem:[%s10898_s1 + $0x120] sm:$0xf]  ;;  %v7301_v15 = vor.u32 %v6494_v24, %v5023_v46 }
  0x2f   : > { %429 = vmatmul.bf16.vlgmr.msra.gmra.mxu2 %v7128_v47  ;;  %11159 = vst [vmem:[#allocation15_spill] sm:$0xff] %v7282_v60  ;;  %v6533_v14 = vld [vmem:[%s10898_s1 + $0x124] sm:$0xf0]  ;;  %v7303_v18 = vor.u32 %v6544_v51, %v5175_v58  ;;  %v5117_v23 = vld [vmem:[%s10898_s1 + $0x110] sm:$0xf]  ;;  %v746_v58 = vpack.c.b16 %v728_v34, %v728_v34 }
  0x30   : > { %575 = vmatpush.bf16.msrb.mxu1 %v7130_v48  ;;  %630 = vmatpush.bf16.msrb.mxu2 %v7140_v52  ;;  %11160 = vst [vmem:[#allocation16_spill] sm:$0xff] %v7301_v15  ;;  %v7306_v22 = vor.u32 %v6533_v14, %v5125_v9  ;;  %v6531_v35 = vld [vmem:[%s10898_s1 + $0x114] sm:$0xf0]  ;;  %v6542_v24 = vld [vmem:[%s10898_s1 + $0x174] sm:$0xf] }
  0x31   : > { %11161 = vst [vmem:[#allocation17_spill] sm:$0xff] %v7303_v18  ;;  %v5167_v46 = vld [vmem:[%s10898_s1 + $0x178] sm:$0xf0]  ;;  %v5269_v2 = vld [vmem:[%s10898_s1 + $0x208] sm:$0xf]  ;;  %v7333_v9 = vor.u32 %v6531_v35, %v5117_v23 }
  0x32   : > { %606 = vmatpush.bf16.msrb.mxu0 %v7143_v55  ;;  %11162 = vst [vmem:[#allocation18_spill] sm:$0xff] %v7306_v22  ;;  %v6563_v51 = vld [vmem:[%s10898_s1 + $0x20c] sm:$0xf0]  ;;  %v7335_v14 = vor.u32 %v6542_v24, %v5167_v46  ;;  %v5159_v34 = vld [vmem:[%s10898_s1 + $0x168] sm:$0xf0]  ;;  %v7363_v46 = vld [vmem:[%s10898_s1 + $0x218] sm:$0xff] }
  0x33   : > { %11163 = vst [vmem:[#allocation19_spill] sm:$0xff] %v7333_v9  ;;  %v5261_v23 = vld [vmem:[%s10898_s1 + $0x1f8] sm:$0xf]  ;;  %v6561_v35 = vld [vmem:[%s10898_s1 + $0x1fc] sm:$0xf0] }
  0x34   : > { %576 = vmatpush.bf16.msrb.mxu1 %v7160_v62  ;;  %11164 = vst [vmem:[#allocation20_spill] sm:$0xff] %v7335_v14  ;;  %v6573_v55 = vld [vmem:[%s10898_s1 + $0x264] sm:$0xf0]  ;;  %vm1083_vm3 = vsmask.f32 7424 }
  0x36   : > { %607 = vmatpush.bf16.msrb.mxu0 %v7173_v5 }
  0x37   : > { %577 = vmatmul.bf16.vlgmr.msrb.gmra.mxu1 %v7195_v26  ;;  %5083 = vmatmul.msk.bf16.vlgmr.msrb.gmra.mxu3 %vm368_vm2, %v7197_v32 }
  0x38   : > { %775 = vmatpush.bf16.msra.mxu1 %v7162_v1  ;;  %v1085_v1 = vshrl.u32 %v7195_v26, 16 }
  0x3a   : > { %608 = vmatpush.bf16.msrb.mxu0 %v7209_v37  ;;  %v1087_v37 = vshll.u32 %v7195_v26, 16 }
  0x3c   : > { %776 = vmatpush.bf16.msra.mxu1 %v7193_v25  ;;  %v1089_v62 = vrot.slane %v1087_v37, 1  ;;  %v5231_v37 = vld [vmem:[%s10898_s1 + $0x1c0] sm:$0xf0] }
  0x3d   : > { %398 = vmatmul.bf16.gmra.mxu0 %v7234_v57 }
  0x3e   : > { %609 = vmatpush.bf16.msrb.mxu0 %v7232_v56  ;;  %v5143_v56 = vld [vmem:[%s10898_s1 + $0x148] sm:$0xf0] }
  0x3f   : > { %434 = vmatmul.bf16.gmra.mxu2 %v7234_v57 }
  0x40   : > { %777 = vmatpush.bf16.msra.mxu1 %v7220_v49  ;;  %v1098_v49 = vshll.u32 %v7197_v32, 16 }
  0x42   : > { %610 = vmatpush.bf16.msrb.mxu0 %v7252_v11 }
  0x44   : > { %778 = vmatpush.bf16.msra.mxu1 %v7243_v4  ;;  %v5213_v4 = vld [vmem:[%s10898_s1 + $0x198] sm:$0xf] }
  0x46   : > { %611 = vmatpush.bf16.msrb.mxu0 %v7273_v42  ;;  %v6540_v42 = vld [vmem:[%s10898_s1 + $0x164] sm:$0xf] }
  0x47   : > { %582 = vmatmul.bf16.gmra.mxu1 %v7290_v61  ;;  %5084 = vmatmul.msk.bf16.gmra.mxu3 %vm368_vm2, %v7292_v6  ;;  %v7358_v24 = vor.u32 %v6540_v42, %v5159_v34  ;;  %v5151_v42 = vld [vmem:[%s10898_s1 + $0x158] sm:$0xf0]  ;;  %v939_v34 = vunpack.c.l.b16 %v7363_v46 }
  0x48   : > { %779 = vmatpush.bf16.msra.mxu1 %v7263_v19 }
  0x49   : > { %11167 = vst [vmem:[#allocation23_spill] sm:$0xff] %v7358_v24  ;;  %v957_v11 = vpack.c.b16 %v939_v34, %v939_v34 }
  0x4a   : > { %612 = vmatpush.bf16.msrb.mxu0 %v7301_v15  ;;  %v7338_v15 = vand.u32 %v746_v58, %v6905_v20  ;;  %v7375_v58 = vor.u32 %v6561_v35, %v5261_v23 }
  0x4b   : > { %v7402_v34 = vand.u32 %v957_v11, %v6905_v20  ;;  %v6534_v11 = vld [vmem:[%s10898_s1 + $0x134] sm:$0xf] }
  0x4c   : > { %780 = vmatpush.bf16.msra.mxu1 %v7282_v60  ;;  %11165 = vst [vmem:[#allocation21_spill] sm:$0xff] %v7338_v15  ;;  %v7346_v60 = vor.u32 %v6563_v51, %v5269_v2  ;;  %836 = vmatpush.bf16.msra.mxu2 %v7338_v15  ;;  %v5109_v2 = vld [vmem:[%s6944_s9 + $0x30] sm:$0xf]  ;;  %v6538_v51 = vld [vmem:[%s10898_s1 + $0x154] sm:$0xf] }
  0x4d   : > { %613 = vmatmul.bf16.vlgmr.msrb.gmra.mxu0 %v7195_v26  ;;  %11168 = vst [vmem:[#allocation24_spill] sm:$0xff] %v7375_v58  ;;  %v7388_v19 = vor.u32 %v6538_v51, %v5151_v42  ;;  %v6536_v15 = vld [vmem:[%s10898_s1 + $0x144] sm:$0xf]  ;;  %1012 = vmatpush.bf16.msrb.mxu3 %v7402_v34  ;;  %v5127_v42 = vld [vmem:[%s10898_s1 + $0x128] sm:$0xf0] }
  0x4e   : > { %811 = vmatpush.bf16.msra.mxu0 %v7303_v18  ;;  %11166 = vst [vmem:[#allocation22_spill] sm:$0xff] %v7346_v60  ;;  %v5111_v18 = vld [vmem:[%s6944_s9 + $0x38] sm:$0xf0]  ;;  %v6532_v51 = vld [vmem:[%s10898_s1 + $0x124] sm:$0xf] }
  0x4f   : > { %5085 = vmatmul.msk.bf16.vlgmr.msrb.gmra.mxu2 %vm368_vm2, %v7197_v32  ;;  %11169 = vst [vmem:[#allocation25_spill] sm:$0xff] %v7388_v19  ;;  %v6552_v26 = vld [vmem:[%s10898_s1 + $0x1bc] sm:$0xf] }
  0x50   : > { %781 = vmatpush.bf16.msra.mxu1 %v7306_v22  ;;  %v5253_v22 = vld [vmem:[%s10898_s1 + $0x1e8] sm:$0xf]  ;;  %11170 = vst [vmem:[#allocation26_spill] sm:$0xff] %v7402_v34 }
  0x52   : > { %812 = vmatpush.bf16.msra.mxu0 %v7335_v14  ;;  %v6529_v14 = vld [vmem:[%s6944_s9 + $0x34] sm:$0xf0] }
  0x53   : > { %v7390_v23 = vor.u32 %v6529_v14, %v5109_v2  ;;  %v7414_v14 = vor.u32 %v6536_v15, %v5143_v56  ;;  %v5237_v56 = vld [vmem:[%s10898_s1 + $0x1c8] sm:$0xf]  ;;  %v6555_v15 = vld [vmem:[%s10898_s1 + $0x1cc] sm:$0xf0] }
  0x54   : > { %782 = vmatpush.bf16.msra.mxu1 %v7333_v9  ;;  %v6528_v9 = vld [vmem:[%s6944_s9 + $0x34] sm:$0xf] }
  0x55   : > { %v7392_v35 = vor.u32 %v6528_v9, %v5111_v18  ;;  %v5245_v18 = vld [vmem:[%s10898_s1 + $0x1d8] sm:$0xf]  ;;  %v6557_v9 = vld [vmem:[%s10898_s1 + $0x1dc] sm:$0xf0]  ;;  %11172 = vst [vmem:[#allocation28_spill] sm:$0xff] %v7414_v14 }
  0x56   : > { %813 = vmatpush.bf16.msra.mxu0 %v7358_v24 }
  0x57   : > { %783 = vmatmul.bf16.vlgmr.msra.gmra.mxu1 %v7390_v23  ;;  %5179 = vmatmul.msk.bf16.vlgmr.msra.gmra.mxu3 %vm368_vm2, %v7392_v35 }
  0x58   : > { %987 = vmatpush.bf16.msrb.mxu1 %v7346_v60  ;;  %v6559_v60 = vld [vmem:[%s10898_s1 + $0x1ec] sm:$0xf0] }
  0x59   : > { %v7404_v24 = vor.u32 %v6559_v60, %v5253_v22  ;;  %v5135_v60 = vld [vmem:[%s10898_s1 + $0x138] sm:$0xf0]  ;;  %v7426_v22 = vor.u32 %v6557_v9, %v5245_v18  ;;  %v5089_v18 = vld [vmem:[%s6944_s9 + $0x40] sm:$0x33]  ;;  %v7445_v9 = vor.u32 %v6555_v15, %v5237_v56  ;;  %v6530_v15 = vld [vmem:[%s10898_s1 + $0x114] sm:$0xf] }
  0x5a   : > { %814 = vmatpush.bf16.msra.mxu0 %v7388_v19  ;;  %v7435_v2 = vor.u32 %v6534_v11, %v5135_v60  ;;  %v5229_v11 = vld [vmem:[%s10898_s1 + $0x1b8] sm:$0xf]  ;;  %v6553_v60 = vld [vmem:[%s10898_s1 + $0x1bc] sm:$0xf0]  ;;  %v671_v56 = vunpack.c.h.b16 %v5089_v18  ;;  %v5119_v19 = vld [vmem:[%s10898_s1 + $0x118] sm:$0xf0] }
  0x5b   : > { %11171 = vst [vmem:[#allocation27_spill] sm:$0xff] %v7404_v24 }
  0x5c   : > { %988 = vmatpush.bf16.msrb.mxu1 %v7375_v58  ;;  %11173 = vst [vmem:[#allocation29_spill] sm:$0xff] %v7426_v22 }
  0x5d   : > { %11174 = vst [vmem:[#allocation30_spill] sm:$0xff] %v7435_v2  ;;  %618 = vmatmul.bf16.gmra.mxu0 %v7290_v61 }
  0x5e   : > { %815 = vmatpush.bf16.msra.mxu0 %v7414_v14  ;;  %11175 = vst [vmem:[#allocation31_spill] sm:$0xff] %v7445_v9  ;;  %v7455_v14 = vor.u32 %v6532_v51, %v5127_v42  ;;  %v5221_v51 = vld [vmem:[%s10898_s1 + $0x1a8] sm:$0xf]  ;;  %v6551_v42 = vld [vmem:[%s10898_s1 + $0x1ac] sm:$0xf0] }
  0x5f   : > { %5086 = vmatmul.msk.bf16.gmra.mxu2 %vm368_vm2, %v7292_v6  ;;  %v7488_v58 = vor.u32 %v6551_v42, %v5221_v51 }
  0x60   : > { %989 = vmatpush.bf16.msrb.mxu1 %v7404_v24  ;;  %11176 = vst [vmem:[#allocation32_spill] sm:$0xff] %v7455_v14  ;;  %v7466_v24 = vor.u32 %v6553_v60, %v5229_v11  ;;  %v7481_v11 = vor.u32 %v6530_v15, %v5119_v19  ;;  %v6560_v19 = vld [vmem:[%s10898_s1 + $0x1fc] sm:$0xf]  ;;  %v940_v15 = vunpack.c.h.b16 %v7363_v46  ;;  %v6558_v46 = vld [vmem:[%s10898_s1 + $0x1ec] sm:$0xf] }
  0x61   : > { %11179 = vst [vmem:[#allocation35_spill] sm:$0xff] %v7488_v58 }
  0x62   : > { %816 = vmatpush.bf16.msra.mxu0 %v7435_v2  ;;  %11177 = vst [vmem:[#allocation33_spill] sm:$0xff] %v7466_v24  ;;  %v5271_v2 = vld [vmem:[%s10898_s1 + $0x210] sm:$0xf0] }
  0x63   : > { %11178 = vst [vmem:[#allocation34_spill] sm:$0xff] %v7481_v11 }
  0x64   : > { %990 = vmatpush.bf16.msrb.mxu1 %v7426_v22  ;;  %v670_v22 = vunpack.c.l.b16 %v5089_v18  ;;  %v6562_v18 = vld [vmem:[%s10898_s1 + $0x20c] sm:$0xf] }
  0x65   : > { %v7490_v34 = vor.u32 %v6562_v18, %v5271_v2  ;;  %v5354_v2 = vld [vmem:[%s10898_s1 + $0x290] sm:$0xf]  ;;  %v958_v18 = vpack.c.b16 %v940_v15, %v940_v15  ;;  %v5247_v15 = vld [vmem:[%s10898_s1 + $0x1e0] sm:$0xf0] }
  0x66   : > { %817 = vmatpush.bf16.msra.mxu0 %v7455_v14  ;;  %v7483_v60 = vpack.c.b16 %v670_v22, %v670_v22  ;;  %v6549_v14 = vld [vmem:[%s10898_s1 + $0x19c] sm:$0xf0]  ;;  %v5263_v22 = vld [vmem:[%s10898_s1 + $0x200] sm:$0xf0] }
  0x67   : > { %11180 = vst [vmem:[#allocation36_spill] sm:$0xff] %v7490_v34  ;;  %v7517_v51 = vor.u32 %v6549_v14, %v5213_v4  ;;  %v7519_v42 = vor.u32 %v6560_v19, %v5263_v22  ;;  %v6577_v4 = vld [vmem:[%s10898_s1 + $0x284] sm:$0xf0]  ;;  %v7536_v14 = vand.u32 %v958_v18, %v6905_v20 }
  0x68   : > { %991 = vmatpush.bf16.msrb.mxu1 %v7445_v9  ;;  %v7485_v9 = vpack.c.b16 %v671_v56, %v671_v56  ;;  %v6579_v56 = vld [vmem:[%s10898_s1 + $0x294] sm:$0xf0]  ;;  %v5205_v19 = vld [vmem:[%s6944_s9 + $0x48] sm:$0xf] }
  0x69   : > { %788 = vmatmul.bf16.gmra.mxu1 %v7483_v60  ;;  %11181 = vst [vmem:[#allocation37_spill] sm:$0xff] %v7517_v51  ;;  %1048 = vmatpush.bf16.msrb.mxu2 %v7536_v14 }
  0x6a   : > { %818 = vmatpush.bf16.msra.mxu0 %v7481_v11  ;;  %5180 = vmatmul.msk.bf16.gmra.mxu3 %vm368_vm2, %v7485_v9  ;;  %11182 = vst [vmem:[#allocation38_spill] sm:$0xff] %v7519_v42  ;;  %v5255_v11 = vld [vmem:[%s10898_s1 + $0x1f0] sm:$0xf0] }
  0x6b   : > { %11184 = vst [vmem:[#allocation40_spill] sm:$0xff] %v7536_v14  ;;  %v7541_v22 = vor.u32 %v6558_v46, %v5255_v11  ;;  %v5338_v11 = vld [vmem:[%s10898_s1 + $0x270] sm:$0xf]  ;;  %v6575_v46 = vld [vmem:[%s10898_s1 + $0x274] sm:$0xf0] }
  0x6c   : > { %992 = vmatpush.bf16.msrb.mxu1 %v7466_v24  ;;  %v7527_v24 = vor.u32 %v6579_v56, %v5354_v2  ;;  %v6547_v2 = vld [vmem:[%s6944_s9 + $0x4c] sm:$0xf0]  ;;  %v6556_v56 = vld [vmem:[%s10898_s1 + $0x1dc] sm:$0xf]  ;;  %v5239_v14 = vld [vmem:[%s10898_s1 + $0x1d0] sm:$0xf0]  ;;  %v7585_v25 = vor.u32 %v6575_v46, %v5338_v11 }
  0x6d   : > { %11185 = vst [vmem:[#allocation41_spill] sm:$0xff] %v7541_v22  ;;  %819 = vmatmul.bf16.vlgmr.msra.gmra.mxu0 %v7390_v23  ;;  %v7582_v5 = vor.u32 %v6547_v2, %v5205_v19  ;;  %v1092_v19 = vshll.u32 %v7290_v61, 16  ;;  %v1096_v46 = vshrl.u32 %v7197_v32, 16 }
  0x6e   : > { %1023 = vmatpush.bf16.msrb.mxu0 %v7490_v34  ;;  %11183 = vst [vmem:[#allocation39_spill] sm:$0xff] %v7527_v24  ;;  %v6554_v34 = vld [vmem:[%s10898_s1 + $0x1cc] sm:$0xf] }
  0x6f   : > { %5181 = vmatmul.msk.bf16.vlgmr.msra.gmra.mxu2 %vm368_vm2, %v7392_v35  ;;  %11188 = vst [vmem:[#allocation44_spill] sm:$0xff] %v7585_v25  ;;  %v7597_v2 = vor.u32 %v6554_v34, %v5239_v14 }
  0x70   : > { %993 = vmatpush.bf16.msrb.mxu1 %v7488_v58  ;;  %v5346_v58 = vld [vmem:[%s10898_s1 + $0x280] sm:$0xf] }
  0x71   : > { %v7552_v18 = vor.u32 %v6577_v4, %v5346_v58  ;;  %v6546_v58 = vld [vmem:[%s6944_s9 + $0x4c] sm:$0xf]  ;;  %v5207_v4 = vld [vmem:[%s6944_s9 + $0x50] sm:$0xf0]  ;;  %11190 = vst [vmem:[#allocation46_spill] sm:$0xff] %v7597_v2 }
  0x72   : > { %1024 = vmatpush.bf16.msrb.mxu0 %v7519_v42  ;;  %v7564_v42 = vld [vmem:[%s10898_s1 + $0x2a0] sm:$0xff] }
  0x73   : > { %11186 = vst [vmem:[#allocation42_spill] sm:$0xff] %v7552_v18 }
  0x74   : > { %994 = vmatpush.bf16.msrb.mxu1 %v7517_v51  ;;  %v7572_v51 = vor.u32 %v6556_v56, %v5247_v15  ;;  %v5330_v56 = vld [vmem:[%s10898_s1 + $0x260] sm:$0xf] }
  0x75   : > { %v7614_v32 = vor.u32 %v6573_v55, %v5330_v56  ;;  %v7633_v55 = vor.u32 %v6552_v26, %v5231_v37  ;;  %v6550_v56 = vld [vmem:[%s10898_s1 + $0x1ac] sm:$0xf]  ;;  %v6548_v37 = vld [vmem:[%s10898_s1 + $0x19c] sm:$0xf] }
  0x76   : > { %1025 = vmatpush.bf16.msrb.mxu0 %v7541_v22  ;;  %11187 = vst [vmem:[#allocation43_spill] sm:$0xff] %v7572_v51  ;;  %v7590_v22 = vor.u32 %v6546_v58, %v5207_v4  ;;  %v7604_v58 = vrot.slane %v1092_v19, 1  ;;  %v1102_v4 = vshll.u32 %v7292_v6, 16 }
  0x77   : > { %11192 = vst [vmem:[#allocation48_spill] sm:$0xff] %v7614_v32 }
  0x78   : > { %1211 = vmatpush.bf16.msra.mxu1 %v7527_v24  ;;  %v1163_v24 = vunpack.c.l.b16 %v7564_v42  ;;  %11189 = vst [vmem:[#allocation45_spill] sm:$0xff] %v7590_v22  ;;  %v7627_v14 = vrot.slane %v1102_v4, 1  ;;  %v5185_v4 = vld [vmem:[%s6944_s9 + $0x58] sm:$0x33] }
  0x79   : > { %995 = vmatmul.bf16.vlgmr.msrb.gmra.mxu1 %v7582_v5  ;;  %11193 = vst [vmem:[#allocation49_spill] sm:$0xff] %v7633_v55 }
  0x7a   : > { %v1181_v15 = vpack.c.b16 %v1163_v24, %v1163_v24  ;;  %1026 = vmatpush.bf16.msrb.mxu0 %v7572_v51  ;;  %v1090_v24 = vor.u32 %v1089_v62, %v1085_v1  ;;  %v5322_v62 = vld [vmem:[%s10898_s1 + $0x250] sm:$0xf]  ;;  %v6571_v1 = vld [vmem:[%s10898_s1 + $0x254] sm:$0xf0]  ;;  %5275 = vmatmul.msk.bf16.vlgmr.msrb.gmra.mxu3 %vm368_vm2, %v7590_v22  ;;  %v5298_v51 = vld [vmem:[%s10898_s1 + $0x220] sm:$0xf] }
  0x7b   : > { %v7646_v19 = vor.u32 %v6571_v1, %v5322_v62  ;;  %v5306_v1 = vld [vmem:[%s10898_s1 + $0x230] sm:$0xf] }
  0x7c   : > { %1212 = vmatpush.bf16.msra.mxu1 %v7552_v18  ;;  %v7600_v11 = vand.u32 %v1181_v15, %v6905_v20  ;;  %v1100_v18 = vrot.slane %v1098_v49, 1  ;;  %v7625_v34 = vsel %vm1083_vm3, %v1090_v24, %v7604_v58  ;;  %v5223_v15 = vld [vmem:[%s10898_s1 + $0x1b0] sm:$0xf0]  ;;  %v6569_v24 = vld [vmem:[%s10898_s1 + $0x244] sm:$0xf0] }
  0x7d   : > { %11194 = vst [vmem:[#allocation50_spill] sm:$0xff] %v7646_v19  ;;  %v7656_v26 = vor.u32 %v6550_v56, %v5223_v15  ;;  %824 = vmatmul.bf16.gmra.mxu0 %v7483_v60  ;;  %v6567_v56 = vld [vmem:[%s10898_s1 + $0x234] sm:$0xf0]  ;;  %v6578_v15 = vld [vmem:[%s10898_s1 + $0x294] sm:$0xf] }
  0x7e   : > { %11191 = vst [vmem:[#allocation47_spill] sm:$0xff] %v7600_v11  ;;  %1236 = vmatpush.bf16.msra.mxu3 %v7600_v11  ;;  %v1101_v49 = vor.u32 %v1100_v18, %v1096_v46  ;;  %1027 = vmatpush.bf16.msrb.mxu0 %v7597_v2  ;;  %v5314_v46 = vld [vmem:[%s10898_s1 + $0x240] sm:$0xf]  ;;  %v7686_v2 = vor.u32 %v6567_v56, %v5306_v1  ;;  %v5439_v1 = vld [vmem:[%s10898_s1 + $0x318] sm:$0xf] }
  0x7f   : > { %11195 = vst [vmem:[#allocation51_spill] sm:$0xff] %v7656_v26  ;;  %v7666_v62 = vor.u32 %v6569_v24, %v5314_v46  ;;  %5182 = vmatmul.msk.bf16.gmra.mxu2 %vm368_vm2, %v7485_v9  ;;  %v882_v46 = vunpack.c.l.b16 %v5185_v4  ;;  %v883_v24 = vunpack.c.h.b16 %v5185_v4  ;;  %v6576_v4 = vld [vmem:[%s10898_s1 + $0x284] sm:$0xf]  ;;  %v6595_v56 = vld [vmem:[%s10898_s1 + $0x31c] sm:$0xf0] }
  0x80   : > { %1213 = vmatpush.bf16.msra.mxu1 %v7585_v25  ;;  %v7637_v18 = vsel %vm1083_vm3, %v1101_v49, %v7627_v14  ;;  %v5215_v49 = vld [vmem:[%s10898_s1 + $0x1a0] sm:$0xf0]  ;;  %11198 = vst [vmem:[#allocation54_spill] sm:$0xff] %v7686_v2  ;;  %v6565_v25 = vld [vmem:[%s10898_s1 + $0x224] sm:$0xf0] }
  0x81   : > { %11196 = vst [vmem:[#allocation52_spill] sm:$0xff] %v7666_v62 }
  0x82   : > { %1028 = vmatpush.bf16.msrb.mxu0 %v7633_v55  ;;  %v5356_v55 = vld [vmem:[%s10898_s1 + $0x298] sm:$0xf0] }
  0x84   : > { %1214 = vmatpush.bf16.msra.mxu1 %v7614_v32  ;;  %v7688_v32 = vor.u32 %v6578_v15, %v5356_v55  ;;  %v7704_v55 = vpack.c.b16 %v883_v24, %v883_v24  ;;  %v7715_v15 = vor.u32 %v6565_v25, %v5298_v51  ;;  %v6574_v24 = vld [vmem:[%s10898_s1 + $0x274] sm:$0xf]  ;;  %v5340_v25 = vld [vmem:[%s10898_s1 + $0x278] sm:$0xf0]  ;;  %v5431_v51 = vld [vmem:[%s10898_s1 + $0x308] sm:$0xf] }
  0x86   : > { %1029 = vmatpush.bf16.msrb.mxu0 %v7656_v26  ;;  %11199 = vst [vmem:[#allocation55_spill] sm:$0xff] %v7688_v32  ;;  %v7722_v26 = vor.u32 %v6595_v56, %v5439_v1  ;;  %v6572_v1 = vld [vmem:[%s10898_s1 + $0x264] sm:$0xf] }
  0x87   : > { %11201 = vst [vmem:[#allocation57_spill] sm:$0xff] %v7704_v55 }
  0x88   : > { %1215 = vmatpush.bf16.msra.mxu1 %v7646_v19  ;;  %v7683_v19 = vor.u32 %v6548_v37, %v5215_v49  ;;  %v5348_v37 = vld [vmem:[%s10898_s1 + $0x288] sm:$0xf0]  ;;  %v7702_v49 = vpack.c.b16 %v882_v46, %v882_v46  ;;  %11202 = vst [vmem:[#allocation58_spill] sm:$0xff] %v7715_v15 }
  0x89   : > { %v7717_v46 = vor.u32 %v6576_v4, %v5348_v37  ;;  %11204 = vst [vmem:[#allocation60_spill] sm:$0xff] %v7722_v26  ;;  %v6593_v4 = vld [vmem:[%s10898_s1 + $0x30c] sm:$0xf0] }
  0x8a   : > { %11197 = vst [vmem:[#allocation53_spill] sm:$0xff] %v7683_v19  ;;  %1030 = vmatpush.bf16.msrb.mxu0 %v7683_v19  ;;  %1000 = vmatmul.bf16.gmra.mxu1 %v7702_v49  ;;  %v7745_v56 = vor.u32 %v6593_v4, %v5431_v51  ;;  %v6570_v4 = vld [vmem:[%s10898_s1 + $0x254] sm:$0xf]  ;;  %v5316_v19 = vld [vmem:[%s10898_s1 + $0x248] sm:$0xf0] }
  0x8b   : > { %11200 = vst [vmem:[#allocation56_spill] sm:$0xff] %v7702_v49  ;;  %5276 = vmatmul.msk.bf16.gmra.mxu3 %vm368_vm2, %v7704_v55 }
  0x8c   : > { %1216 = vmatpush.bf16.msra.mxu1 %v7666_v62  ;;  %11203 = vst [vmem:[#allocation59_spill] sm:$0xff] %v7717_v46  ;;  %v1164_v62 = vunpack.c.h.b16 %v7564_v42  ;;  %v7739_v42 = vor.u32 %v6574_v24, %v5340_v25  ;;  %v5423_v24 = vld [vmem:[%s10898_s1 + $0x2f8] sm:$0xf]  ;;  %v6591_v25 = vld [vmem:[%s10898_s1 + $0x2fc] sm:$0xf0] }
  0x8d   : > { %11206 = vst [vmem:[#allocation62_spill] sm:$0xff] %v7745_v56  ;;  %1031 = vmatmul.bf16.vlgmr.msrb.gmra.mxu0 %v7582_v5 }
  0x8e   : > { %1247 = vmatpush.bf16.msra.mxu0 %v7688_v32  ;;  %v1182_v37 = vpack.c.b16 %v1164_v62, %v1164_v62  ;;  %11205 = vst [vmem:[#allocation61_spill] sm:$0xff] %v7739_v42  ;;  %v5332_v62 = vld [vmem:[%s10898_s1 + $0x268] sm:$0xf0] }
  0x8f   : > { %v7762_v51 = vor.u32 %v6572_v1, %v5332_v62  ;;  %5277 = vmatmul.msk.bf16.vlgmr.msrb.gmra.mxu2 %vm368_vm2, %v7590_v22  ;;  %v5324_v1 = vld [vmem:[%s10898_s1 + $0x258] sm:$0xf0]  ;;  %v5415_v62 = vld [vmem:[%s10898_s1 + $0x2e8] sm:$0xf] }
  0x90   : > { %1217 = vmatpush.bf16.msra.mxu1 %v7686_v2  ;;  %v7748_v32 = vand.u32 %v1182_v37, %v6905_v20  ;;  %v7768_v37 = vor.u32 %v6591_v25, %v5423_v24  ;;  %v6589_v24 = vld [vmem:[%s10898_s1 + $0x2ec] sm:$0xf0]  ;;  %v1106_v2 = vshrl.u32 %v7290_v61, 16  ;;  %v5433_v61 = vld [vmem:[%s10898_s1 + $0x310] sm:$0xf0] }
  0x91   : > { %11208 = vst [vmem:[#allocation64_spill] sm:$0xff] %v7762_v51 }
  0x92   : > { %1248 = vmatpush.bf16.msra.mxu0 %v7717_v46  ;;  %11207 = vst [vmem:[#allocation63_spill] sm:$0xff] %v7748_v32  ;;  %1272 = vmatpush.bf16.msra.mxu2 %v7748_v32  ;;  %v7773_v46 = vld [vmem:[%s10898_s1 + $0x328] sm:$0xff]  ;;  %v1109_v32 = vshrl.u32 %v7292_v6, 16 }
  0x93   : > { %11209 = vst [vmem:[#allocation65_spill] sm:$0xff] %v7768_v37  ;;  %v1386_v25 = vunpack.c.l.b16 %v7773_v46 }
  0x94   : > { %1218 = vmatpush.bf16.msra.mxu1 %v7715_v15  ;;  %v7794_v15 = vor.u32 %v6589_v24, %v5415_v62  ;;  %v6566_v24 = vld [vmem:[%s10898_s1 + $0x234] sm:$0xf] }
  0x96   : > { %1249 = vmatpush.bf16.msra.mxu0 %v7739_v42  ;;  %v1404_v42 = vpack.c.b16 %v1386_v25, %v1386_v25  ;;  %11211 = vst [vmem:[#allocation67_spill] sm:$0xff] %v7794_v15  ;;  %v5407_v25 = vld [vmem:[%s10898_s1 + $0x2d8] sm:$0xf] }
  0x98   : > { %1434 = vmatpush.bf16.msrb.mxu1 %v7722_v26  ;;  %v6568_v26 = vld [vmem:[%s10898_s1 + $0x244] sm:$0xf] }
  0x99   : > { %v7812_v62 = vor.u32 %v6568_v26, %v5316_v19  ;;  %v5399_v19 = vld [vmem:[%s10898_s1 + $0x2c8] sm:$0xf]  ;;  %v6585_v26 = vld [vmem:[%s10898_s1 + $0x2cc] sm:$0xf0] }
  0x9a   : > { %1250 = vmatpush.bf16.msra.mxu0 %v7762_v51  ;;  %v7808_v51 = vpop.f32.mrf.mxu1  ;;  %1219 = vmatmul.bf16.vlgmr.msra.gmra.mxu1 %v7625_v34 }
  0x9b   : > { %11213 = vst [vmem:[#allocation69_spill] sm:$0xff] %v7812_v62  ;;  %5360 = vmatmul.msk.bf16.vlgmr.msra.gmra.mxu3 %vm368_vm2, %v7637_v18 }
  0x9c   : > { %1435 = vmatpush.bf16.msrb.mxu1 %v7745_v56  ;;  %v7788_v56 = vor.u32 %v6570_v4, %v5324_v1  ;;  %v6587_v4 = vld [vmem:[%s10898_s1 + $0x2dc] sm:$0xf0]  ;;  %v7806_v1 = vand.u32 %v1404_v42, %v6905_v20  ;;  %v5308_v42 = vld [vmem:[%s10898_s1 + $0x238] sm:$0xf0] }
  0x9d   : > { %1036 = vmatmul.bf16.gmra.mxu0 %v7702_v49  ;;  %v5383_v49 = vld [vmem:[%s10898_s1 + $0x2a8] sm:$0xf] }
  0x9e   : > { %11210 = vst [vmem:[#allocation66_spill] sm:$0xff] %v7788_v56  ;;  %1459 = vmatpush.bf16.msrb.mxu3 %v7806_v1  ;;  %1251 = vmatpush.bf16.msra.mxu0 %v7788_v56  ;;  %v6564_v56 = vld [vmem:[%s10898_s1 + $0x224] sm:$0xf] }
  0x9f   : > { %11212 = vst [vmem:[#allocation68_spill] sm:$0xff] %v7806_v1  ;;  %v5300_v1 = vld [vmem:[%s10898_s1 + $0x228] sm:$0xf0]  ;;  %5278 = vmatmul.msk.bf16.gmra.mxu2 %vm368_vm2, %v7704_v55  ;;  %v1325_v55 = vshll.u32 %v7074_v17, 16 }
  0xa0   : > { %1436 = vmatpush.bf16.msrb.mxu1 %v7768_v37  ;;  %v7818_v37 = vor.u32 %v6587_v4, %v5407_v25  ;;  %v7833_v25 = vpop.f32.mrf.mxu3  ;;  %v7836_v4 = vor.u32 %v6566_v24, %v5308_v42  ;;  %v6583_v24 = vld [vmem:[%s10898_s1 + $0x2bc] sm:$0xf0] }
  0xa2   : > { %11214 = vst [vmem:[#allocation70_spill] sm:$0xff] %v7818_v37  ;;  %1540 = vmatpush.bf16.msra.mxu3 %v6928_v28  ;;  %1252 = vmatpush.bf16.msra.mxu0 %v7812_v62  ;;  %v5391_v28 = vld [vmem:[%s10898_s1 + $0x2b8] sm:$0xf]  ;;  %v7853_v42 = vpop.f32.mrf.mxu1  ;;  %v6594_v62 = vld [vmem:[%s10898_s1 + $0x31c] sm:$0xf] }
  0xa3   : > { %11215 = vst [vmem:[#allocation71_spill] sm:$0xff] %v7836_v4 }
  0xa4   : > { %1437 = vmatpush.bf16.msrb.mxu1 %v7794_v15  ;;  %v7842_v15 = vor.u32 %v6585_v26, %v5399_v19  ;;  %v5441_v19 = vld [vmem:[%s10898_s1 + $0x320] sm:$0xf0]  ;;  %v7863_v26 = vor.u32 %v6564_v56, %v5300_v1  ;;  %v6581_v56 = vld [vmem:[%s10898_s1 + $0x2ac] sm:$0xf0]  ;;  %v6592_v1 = vld [vmem:[%s10898_s1 + $0x30c] sm:$0xf] }
  0xa5   : > { %v7872_v11 = vor.u32 %v6594_v62, %v5441_v19  ;;  %v7890_v6 = vor.u32 %v6581_v56, %v5383_v49  ;;  %v7893_v62 = vor.u32 %v1106_v2, %v7604_v58  ;;  %v5425_v49 = vld [vmem:[%s10898_s1 + $0x300] sm:$0xf0]  ;;  %v1387_v2 = vunpack.c.h.b16 %v7773_v46  ;;  %v6588_v46 = vld [vmem:[%s10898_s1 + $0x2ec] sm:$0xf] }
  0xa6   : > { %11216 = vst [vmem:[#allocation72_spill] sm:$0xff] %v7842_v15  ;;  %1253 = vmatpush.bf16.msra.mxu0 %v7836_v4  ;;  %v7901_v4 = vor.u32 %v6592_v1, %v5433_v61  ;;  %v1310_v58 = vshll.u32 %v7128_v47, 16  ;;  %v5417_v1 = vld [vmem:[%s10898_s1 + $0x2f0] sm:$0xf0] }
  0xa7   : > { %11217 = vst [vmem:[#allocation73_spill] sm:$0xff] %v7863_v26  ;;  %v1405_v56 = vpack.c.b16 %v1387_v2, %v1387_v2  ;;  %v1315_v2 = vshll.u32 %v7234_v57, 16  ;;  %v7937_v22 = vor.u32 %v6588_v46, %v5417_v1  ;;  %v6584_v46 = vld [vmem:[%s10898_s1 + $0x2cc] sm:$0xf]  ;;  %v5401_v1 = vld [vmem:[%s10898_s1 + $0x2d0] sm:$0xf0] }
  0xa8   : > { %1438 = vmatpush.bf16.msrb.mxu1 %v7818_v37  ;;  %v7866_v37 = vor.u32 %v6583_v24, %v5391_v28  ;;  %11219 = vst [vmem:[#allocation75_spill] sm:$0xff] %v7872_v11  ;;  %v7886_v28 = vpop.f32.mrf.mxu3  ;;  %v7896_v24 = vor.u32 %v1109_v32, %v7627_v14  ;;  %v1321_v32 = vshll.u32 %v6961_v40, 16 }
  0xa9   : > { %11220 = vst [vmem:[#allocation76_spill] sm:$0xff] %v7890_v6 }
  0xaa   : > { %11218 = vst [vmem:[#allocation74_spill] sm:$0xff] %v7866_v37  ;;  %1254 = vmatpush.bf16.msra.mxu0 %v7863_v26  ;;  %v7899_v19 = vpop.f32.mrf.mxu1  ;;  %v6590_v26 = vld [vmem:[%s10898_s1 + $0x2fc] sm:$0xf]  ;;  %1224 = vmatmul.bf16.gmra.mxu1 %v7893_v62 }
  0xab   : > { %11221 = vst [vmem:[#allocation77_spill] sm:$0xff] %v7901_v4  ;;  %5361 = vmatmul.msk.bf16.gmra.mxu3 %vm368_vm2, %v7896_v24  ;;  %v7917_v14 = vor.u32 %v6590_v26, %v5425_v49  ;;  %v1308_v49 = vshrl.u32 %v7128_v47, 16 }
  0xac   : > { %1439 = vmatpush.bf16.msrb.mxu1 %v7842_v15  ;;  %v1323_v15 = vrot.slane %v1321_v32, 1 }
  0xad   : > { %1255 = vmatmul.bf16.vlgmr.msra.gmra.mxu0 %v7625_v34 }
  0xae   : > { %1470 = vmatpush.bf16.msrb.mxu0 %v7872_v11  ;;  %v394_v11 = vpop.f32.mrf.mxu0 }
  0xaf   : > { %v413_v26 = vadd.f32 %v7808_v51, %v394_v11  ;;  %v6586_v11 = vld [vmem:[%s10898_s1 + $0x2dc] sm:$0xf]  ;;  %v5409_v51 = vld [vmem:[%s10898_s1 + $0x2e0] sm:$0xf0]  ;;  %5362 = vmatmul.msk.bf16.vlgmr.msra.gmra.mxu2 %vm368_vm2, %v7637_v18 }
  0xb0   : > { %1440 = vmatpush.bf16.msrb.mxu1 %v7866_v37  ;;  %v7926_v61 = vpop.f32.mrf.mxu3  ;;  %v1319_v37 = vshrl.u32 %v6961_v40, 16 }
  0xb2   : > { %1471 = vmatpush.bf16.msrb.mxu0 %v7901_v4  ;;  %v7929_v4 = vand.u32 %v1405_v56, %v6905_v20  ;;  %v1324_v32 = vor.u32 %v1323_v15, %v1319_v37  ;;  %v1327_v56 = vrot.slane %v1325_v55, 1 }
  0xb4   : > { %1441 = vmatpush.bf16.msrb.mxu1 %v7890_v6  ;;  %v419_v6 = vpop.f32.mrf.mxu1  ;;  %1495 = vmatpush.bf16.msrb.mxu2 %v7929_v4 }
  0xb6   : > { %1472 = vmatpush.bf16.msrb.mxu0 %v7917_v14  ;;  %v396_v15 = vpop.f32.mrf.mxu0 }
  0xb8   : > { %1515 = vmatpush.bf16.msra.mxu1 %v6868_v3  ;;  %v1312_v3 = vrot.slane %v1310_v58, 1  ;;  %v1317_v58 = vrot.slane %v1315_v2, 1  ;;  %1576 = vmatpush.bf16.msra.mxu2 %v6931_v29 }
  0xba   : > { %v1313_v6 = vor.u32 %v1312_v3, %v1308_v49  ;;  %1473 = vmatpush.bf16.msrb.mxu0 %v7937_v22  ;;  %v430_v49 = vpop.f32.mrf.mxu2  ;;  %v455_v3 = vpop.f32.mrf.mxu3 }
  0xbb   : > { %v449_v55 = vadd.f32 %v7833_v25, %v430_v49  ;;  %v6582_v25 = vld [vmem:[%s10898_s1 + $0x2bc] sm:$0xf] }
  0xbc   : > { %1516 = vmatpush.bf16.msra.mxu1 %v6888_v10  ;;  %v7951_v10 = vor.u32 %v6586_v11, %v5409_v51  ;;  %v7963_v37 = vsel %vm1083_vm3, %v1313_v6, %v1317_v58  ;;  %v578_v2 = vpop.f32.mrf.mxu1  ;;  %v7967_v11 = vsel %vm1083_vm3, %v1324_v32, %v1327_v56  ;;  %v7970_v51 = vor.u32 %v6584_v46, %v5401_v1  ;;  %v5393_v6 = vld [vmem:[%s10898_s1 + $0x2c0] sm:$0xf0] }
  0xbd   : > { %v579_v29 = vadd.f32 %v578_v2, %v413_v26  ;;  %1442 = vmatmul.bf16.vlgmr.msrb.gmra.mxu1 %v7963_v37  ;;  %5445 = vmatmul.msk.bf16.vlgmr.msrb.gmra.mxu3 %vm368_vm2, %v7967_v11  ;;  %v5385_v26 = vld [vmem:[%s10898_s1 + $0x2b0] sm:$0xf0] }
  0xbe   : > { %1474 = vmatpush.bf16.msrb.mxu0 %v7951_v10  ;;  %1612 = vmatpush.bf16.msrb.mxu3 %v6973_v44  ;;  %v399_v3 = vpop.f32.mrf.mxu0  ;;  %v1329_v44 = vshrl.u32 %v7234_v57, 16 }
  0xbf   : > { %1260 = vmatmul.bf16.gmra.mxu0 %v7893_v62  ;;  %5363 = vmatmul.msk.bf16.gmra.mxu2 %vm368_vm2, %v7896_v24 }
  0xc0   : > { %1517 = vmatpush.bf16.msra.mxu1 %v6933_v30  ;;  %v415_v30 = vadd.f32 %v7853_v42, %v396_v15  ;;  %v7983_v42 = vor.u32 %v6582_v25, %v5393_v6  ;;  %v418_v15 = vadd.f32 %v7899_v19, %v399_v3 }
  0xc2   : > { %1475 = vmatpush.bf16.msrb.mxu0 %v7970_v51  ;;  %v432_v32 = vpop.f32.mrf.mxu2  ;;  %v596_v46 = vpop.f32.mrf.mxu3 }
  0xc3   : > { %v451_v1 = vadd.f32 %v7886_v28, %v432_v32  ;;  %v7994_v49 = vadd.f32 %v596_v46, %v579_v29  ;;  %v1332_v28 = vshrl.u32 %v7074_v17, 16 }
  0xc4   : > { %1518 = vmatpush.bf16.msra.mxu1 %v6976_v45  ;;  %v6580_v45 = vld [vmem:[%s10898_s1 + $0x2ac] sm:$0xf] }
  0xc5   : > { %v7998_v2 = vor.u32 %v6580_v45, %v5385_v26  ;;  %v8010_v45 = vor.u32 %v1329_v44, %v1317_v58  ;;  %v8012_v26 = vor.u32 %v1332_v28, %v1327_v56  ;;  %v11224_v44 = vld [vmem:[#allocation3_spill] sm:$0xff] }
  0xc6   : > { %1476 = vmatpush.bf16.msrb.mxu0 %v7983_v42  ;;  %v401_v6 = vpop.f32.mrf.mxu0 }
  0xc8   : > { %1519 = vmatpush.bf16.msra.mxu1 %v7008_v54  ;;  %v580_v54 = vpop.f32.mrf.mxu1 }
  0xc9   : > { %v581_v25 = vadd.f32 %v580_v54, %v415_v30 }
  0xca   : > { %1477 = vmatpush.bf16.msrb.mxu0 %v7998_v2  ;;  %v435_v19 = vpop.f32.mrf.mxu2  ;;  %v598_v29 = vpop.f32.mrf.mxu3 }
  0xcb   : > { %v599_v30 = vadd.f32 %v598_v29, %v581_v25 }
  0xcc   : > { %1520 = vmatpush.bf16.msra.mxu1 %v7038_v0  ;;  %v454_v0 = vadd.f32 %v7926_v61, %v435_v19  ;;  %v11225_v19 = vld [vmem:[#allocation7_spill] sm:$0xff] }
  0xcd   : > { %1447 = vmatmul.bf16.gmra.mxu1 %v8010_v45  ;;  %5446 = vmatmul.msk.bf16.gmra.mxu3 %vm368_vm2, %v8012_v26 }
  0xce   : > { %1551 = vmatpush.bf16.msra.mxu0 %v6879_v7  ;;  %v614_v58 = vpop.f32.mrf.mxu0 }
  0xcf   : > { %1478 = vmatmul.bf16.vlgmr.msrb.gmra.mxu0 %v7963_v37  ;;  %5447 = vmatmul.msk.bf16.vlgmr.msrb.gmra.mxu2 %vm368_vm2, %v7967_v11 }
  0xd0   : > { %1521 = vmatpush.bf16.msra.mxu1 %v7066_v13  ;;  %v583_v32 = vpop.f32.mrf.mxu1  ;;  %1648 = vmatpush.bf16.msrb.mxu2 %v7140_v52 }
  0xd1   : > { %v584_v46 = vadd.f32 %v583_v32, %v418_v15  ;;  %v11223_v15 = vld [vmem:[#allocation5_spill] sm:$0xff] }
  0xd2   : > { %1552 = vmatpush.bf16.msra.mxu0 %v6894_v16  ;;  %v437_v7 = vpop.f32.mrf.mxu2  ;;  %v601_v13 = vpop.f32.mrf.mxu3 }
  0xd3   : > { %v602_v61 = vadd.f32 %v601_v13, %v584_v46  ;;  %v11228_v7 = vld [vmem:[#allocation8_spill] sm:$0xff] }
  0xd4   : > { %1522 = vmatpush.bf16.msra.mxu1 %v7102_v33  ;;  %v615_v33 = vadd.f32 %v614_v58, %v449_v55  ;;  %v11230_v58 = vld [vmem:[#allocation10_spill] sm:$0xff] }
  0xd6   : > { %1553 = vmatpush.bf16.msra.mxu0 %v6959_v39 }
  0xd8   : > { %1587 = vmatpush.bf16.msrb.mxu1 %v6935_v31  ;;  %v585_v56 = vpop.f32.mrf.mxu1 }
  0xd9   : > { %v11231_v56 = vld [vmem:[#allocation21_spill] sm:$0xff] }
  0xda   : > { %1554 = vmatpush.bf16.msra.mxu0 %v6995_v50  ;;  %v603_v16 = vpop.f32.mrf.mxu3  ;;  %v632_v31 = vpop.f32.mrf.mxu2 }
  0xdb   : > { %v633_v39 = vadd.f32 %v632_v31, %v615_v33  ;;  %v11232_v31 = vld [vmem:[#allocation13_spill] sm:$0xff] }
  0xdc   : > { %1588 = vmatpush.bf16.msrb.mxu1 %v6970_v43  ;;  %v616_v43 = vpop.f32.mrf.mxu0 }
  0xdd   : > { %v617_v55 = vadd.f32 %v616_v43, %v451_v1  ;;  %1523 = vmatmul.bf16.vlgmr.msra.gmra.mxu1 %v7390_v23  ;;  %5449 = vmatmul.msk.bf16.vlgmr.msra.gmra.mxu3 %vm368_vm2, %v7392_v35 }
  0xde   : > { %1555 = vmatpush.bf16.msra.mxu0 %v7023_v59  ;;  %1684 = vmatpush.bf16.msra.mxu3 %v7207_v36 }
  0xdf   : > { %1483 = vmatmul.bf16.gmra.mxu0 %v8010_v45  ;;  %5448 = vmatmul.msk.bf16.gmra.mxu2 %vm368_vm2, %v8012_v26 }
  0xe0   : > { %1589 = vmatpush.bf16.msrb.mxu1 %v7005_v53  ;;  %v784_v3 = vpop.f32.mrf.mxu1 }
  0xe2   : > { %1556 = vmatpush.bf16.msra.mxu0 %v7054_v8  ;;  %v634_v50 = vpop.f32.mrf.mxu2  ;;  %v802_v53 = vpop.f32.mrf.mxu3 }
  0xe3   : > { %v635_v59 = vadd.f32 %v634_v50, %v617_v55  ;;  %v11233_v50 = vld [vmem:[#allocation12_spill] sm:$0xff] }
  0xe4   : > { %1590 = vmatpush.bf16.msrb.mxu1 %v7035_v63  ;;  %v803_v63 = vadd.f32 %v802_v53, %v784_v3  ;;  %v619_v52 = vpop.f32.mrf.mxu0  ;;  %v11234_v53 = vld [vmem:[#allocation15_spill] sm:$0xff] }
  0xe5   : > { %v620_v1 = vadd.f32 %v619_v52, %v454_v0  ;;  %v11227_v0 = vld [vmem:[#allocation9_spill] sm:$0xff]  ;;  %v11236_v52 = vld [vmem:[#allocation26_spill] sm:$0xff] }
  0xe6   : > { %1557 = vmatpush.bf16.msra.mxu0 %v7083_v21  ;;  %v847_v8 = vadd.f32 %v803_v63, %v7994_v49  ;;  %v11235_v63 = vld [vmem:[#allocation14_spill] sm:$0xff] }
  0xe8   : > { %1591 = vmatpush.bf16.msrb.mxu1 %v7063_v12  ;;  %v786_v12 = vpop.f32.mrf.mxu1 }
  0xea   : > { %1558 = vmatpush.bf16.msra.mxu0 %v7119_v41  ;;  %v637_v21 = vpop.f32.mrf.mxu2  ;;  %v804_v36 = vpop.f32.mrf.mxu3 }
  0xeb   : > { %v638_v54 = vadd.f32 %v637_v21, %v620_v1  ;;  %v805_v25 = vadd.f32 %v804_v36, %v786_v12 }
  0xec   : > { %1592 = vmatpush.bf16.msrb.mxu1 %v7098_v27  ;;  %v11222_v27 = vld [vmem:[#allocation4_spill] sm:$0xff]  ;;  %v621_v49 = vpop.f32.mrf.mxu0 }
  0xed   : > { %1528 = vmatmul.bf16.gmra.mxu1 %v7483_v60  ;;  %5450 = vmatmul.msk.bf16.gmra.mxu3 %vm368_vm2, %v7485_v9 }
  0xee   : > { %1623 = vmatpush.bf16.msrb.mxu0 %v7116_v38  ;;  %v11226_v38 = vld [vmem:[#allocation6_spill] sm:$0xff] }
  0xef   : > { %1559 = vmatmul.bf16.vlgmr.msra.gmra.mxu0 %v7390_v23  ;;  %5451 = vmatmul.msk.bf16.vlgmr.msra.gmra.mxu2 %vm368_vm2, %v7392_v35 }
  0xf0   : > { %1593 = vmatpush.bf16.msrb.mxu1 %v7130_v48  ;;  %v789_v28 = vpop.f32.mrf.mxu1  ;;  %v849_v48 = vadd.f32 %v805_v25, %v599_v30  ;;  %v11229_v30 = vld [vmem:[#allocation11_spill] sm:$0xff]  ;;  %1720 = vmatpush.bf16.msra.mxu2 %v11231_v56 }
  0xf1   : > { %v11245_v56 = vld [vmem:[#allocation27_spill] sm:$0xff] }
  0xf2   : > { %1624 = vmatpush.bf16.msrb.mxu0 %v11224_v44  ;;  %v639_v41 = vpop.f32.mrf.mxu2  ;;  %v807_v29 = vpop.f32.mrf.mxu3 }
  0xf3   : > { %v808_v6 = vadd.f32 %v807_v29, %v789_v28  ;;  %v11239_v28 = vld [vmem:[#allocation17_spill] sm:$0xff] }
  0xf4   : > { %1594 = vmatpush.bf16.msrb.mxu1 %v11222_v27  ;;  %v820_v32 = vpop.f32.mrf.mxu0  ;;  %v11237_v27 = vld [vmem:[#allocation18_spill] sm:$0xff] }
  0xf5   : > { %v851_v13 = vadd.f32 %v808_v6, %v602_v61 }
  0xf6   : > { %1625 = vmatpush.bf16.msrb.mxu0 %v11226_v38  ;;  %v11241_v38 = vld [vmem:[#allocation22_spill] sm:$0xff] }
  0xf8   : > { %1659 = vmatpush.bf16.msra.mxu1 %v11223_v15  ;;  %v791_v46 = vpop.f32.mrf.mxu1 }
  0xfa   : > { %1626 = vmatpush.bf16.msrb.mxu0 %v11228_v7  ;;  %v809_v33 = vpop.f32.mrf.mxu3  ;;  %v838_v16 = vpop.f32.mrf.mxu2 }
  0xfb   : > { %v839_v43 = vadd.f32 %v838_v16, %v820_v32 }
  0xfc   : > { %1660 = vmatpush.bf16.msra.mxu1 %v11225_v19  ;;  %v822_v55 = vpop.f32.mrf.mxu0  ;;  %v11240_v19 = vld [vmem:[#allocation19_spill] sm:$0xff] }
  0xfd   : > { %v848_v61 = vadd.f32 %v839_v43, %v633_v39  ;;  %1595 = vmatmul.bf16.vlgmr.msrb.gmra.mxu1 %v7128_v47  ;;  %5453 = vmatmul.msk.bf16.vlgmr.msrb.gmra.mxu3 %vm368_vm2, %v6961_v40  ;;  %v11238_v39 = vld [vmem:[#allocation16_spill] sm:$0xff] }
  0xfe   : > { %1627 = vmatpush.bf16.msrb.mxu0 %v11230_v58  ;;  %1762 = vmatpush.bf16.msrb.mxu3 %v11236_v52  ;;  %v11244_v58 = vld [vmem:[#allocation23_spill] sm:$0xff] }
  0xff   : > { %1564 = vmatmul.bf16.gmra.mxu0 %v7483_v60  ;;  %5452 = vmatmul.msk.bf16.gmra.mxu2 %vm368_vm2, %v7485_v9 }
 0x100   : > { %1661 = vmatpush.bf16.msra.mxu1 %v11227_v0  ;;  %v996_v3 = vpop.f32.mrf.mxu1  ;;  %v11242_v0 = vld [vmem:[#allocation20_spill] sm:$0xff] }
 0x102   : > { %1628 = vmatpush.bf16.msrb.mxu0 %v11233_v50  ;;  %v840_v1 = vpop.f32.mrf.mxu2  ;;  %v1014_v12 = vpop.f32.mrf.mxu3  ;;  %v11247_v50 = vld [vmem:[#allocation29_spill] sm:$0xff] }
 0x103   : > { %v841_v21 = vadd.f32 %v840_v1, %v822_v55  ;;  %v1015_v36 = vadd.f32 %v1014_v12, %v996_v3  ;;  %v11251_v12 = vld [vmem:[#allocation30_spill] sm:$0xff] }
 0x104   : > { %1662 = vmatpush.bf16.msra.mxu1 %v11229_v30  ;;  %v825_v15 = vpop.f32.mrf.mxu0 }
 0x105   : > { %v850_v49 = vadd.f32 %v841_v21, %v635_v59  ;;  %v1059_v44 = vadd.f32 %v1015_v36, %v847_v8  ;;  %v11243_v59 = vld [vmem:[#allocation24_spill] sm:$0xff] }
 0x106   : > { %1629 = vmatpush.bf16.msrb.mxu0 %v11235_v63  ;;  %v11250_v63 = vld [vmem:[#allocation40_spill] sm:$0xff] }
 0x108   : > { %1663 = vmatpush.bf16.msra.mxu1 %v11232_v31  ;;  %v998_v25 = vpop.f32.mrf.mxu1  ;;  %v11246_v31 = vld [vmem:[#allocation25_spill] sm:$0xff] }
 0x10a   : > { %1630 = vmatpush.bf16.msrb.mxu0 %v11238_v39  ;;  %v843_v41 = vpop.f32.mrf.mxu2  ;;  %v1016_v29 = vpop.f32.mrf.mxu3  ;;  %v11256_v39 = vld [vmem:[#allocation47_spill] sm:$0xff] }
 0x10b   : > { %v844_v6 = vadd.f32 %v843_v41, %v825_v15  ;;  %v1017_v32 = vadd.f32 %v1016_v29, %v998_v25  ;;  %v11252_v15 = vld [vmem:[#allocation33_spill] sm:$0xff] }
 0x10c   : > { %1664 = vmatpush.bf16.msra.mxu1 %v11234_v53  ;;  %v827_v46 = vpop.f32.mrf.mxu0  ;;  %v11249_v53 = vld [vmem:[#allocation31_spill] sm:$0xff]  ;;  %v11254_v25 = vld [vmem:[#allocation45_spill] sm:$0xff] }
 0x10d   : > { %v852_v7 = vadd.f32 %v844_v6, %v638_v54  ;;  %v1061_v30 = vadd.f32 %v1017_v32, %v849_v48  ;;  %1600 = vmatmul.bf16.gmra.mxu1 %v7234_v57  ;;  %5454 = vmatmul.msk.bf16.gmra.mxu3 %vm368_vm2, %v7074_v17  ;;  %v11248_v48 = vld [vmem:[#allocation28_spill] sm:$0xff]  ;;  %v11259_v32 = vld [vmem:[#allocation37_spill] sm:$0xff] }
 0x10e   : > { %1695 = vmatpush.bf16.msra.mxu0 %v11239_v28  ;;  %v11258_v6 = vld [vmem:[#allocation36_spill] sm:$0xff] }
 0x10f   : > { %1631 = vmatmul.bf16.vlgmr.msrb.gmra.mxu0 %v7128_v47  ;;  %5455 = vmatmul.msk.bf16.vlgmr.msrb.gmra.mxu2 %vm368_vm2, %v6961_v40  ;;  %v11253_v47 = vld [vmem:[#allocation32_spill] sm:$0xff]  ;;  %v11255_v40 = vld [vmem:[#allocation35_spill] sm:$0xff] }
 0x110   : > { %1665 = vmatpush.bf16.msra.mxu1 %v11237_v27  ;;  %v1001_v8 = vpop.f32.mrf.mxu1  ;;  %1798 = vmatpush.bf16.msrb.mxu2 %v11250_v63  ;;  %v11268_v63 = vld [vmem:[#allocation48_spill] sm:$0xff] }
 0x112   : > { %1696 = vmatpush.bf16.msra.mxu0 %v11242_v0  ;;  %v845_v33 = vpop.f32.mrf.mxu2  ;;  %v1019_v16 = vpop.f32.mrf.mxu3 }
 0x113   : > { %v1020_v43 = vadd.f32 %v1019_v16, %v1001_v8  ;;  %v11260_v8 = vld [vmem:[#allocation39_spill] sm:$0xff] }
 0x114   : > { %1666 = vmatpush.bf16.msra.mxu1 %v11240_v19  ;;  %v1032_v55 = vpop.f32.mrf.mxu0 }
 0x115   : > { %v1063_v54 = vadd.f32 %v1020_v43, %v851_v13 }
 0x116   : > { %1697 = vmatpush.bf16.msra.mxu0 %v11244_v58  ;;  %v11261_v58 = vld [vmem:[#allocation38_spill] sm:$0xff] }
 0x118   : > { %1737 = vmatpush.bf16.msrb.mxu1 %v11241_v38  ;;  %v1003_v3 = vpop.f32.mrf.mxu1  ;;  %v11257_v38 = vld [vmem:[#allocation34_spill] sm:$0xff] }
 0x119   : > { %v11263_v3 = vld [vmem:[#allocation41_spill] sm:$0xff] }
 0x11a   : > { %1698 = vmatpush.bf16.msra.mxu0 %v11246_v31  ;;  %v1021_v52 = vpop.f32.mrf.mxu3  ;;  %v1050_v1 = vpop.f32.mrf.mxu2 }
 0x11b   : > { %v1051_v27 = vadd.f32 %v1050_v1, %v1032_v55 }
 0x11c   : > { %1738 = vmatpush.bf16.msrb.mxu1 %v11243_v59  ;;  %v1034_v21 = vpop.f32.mrf.mxu0 }
 0x11d   : > { %v1060_v13 = vadd.f32 %v1051_v27, %v848_v61  ;;  %1667 = vmatmul.bf16.vlgmr.msra.gmra.mxu1 %v7582_v5  ;;  %5457 = vmatmul.msk.bf16.vlgmr.msra.gmra.mxu3 %vm368_vm2, %v11254_v25 }
 0x11e   : > { %1699 = vmatpush.bf16.msra.mxu0 %v11248_v48  ;;  %1840 = vmatpush.bf16.msra.mxu3 %v11256_v39  ;;  %v11265_v48 = vld [vmem:[#allocation56_spill] sm:$0xff] }
 0x11f   : > { %1636 = vmatmul.bf16.gmra.mxu0 %v7234_v57  ;;  %5456 = vmatmul.msk.bf16.gmra.mxu2 %vm368_vm2, %v7074_v17  ;;  %v11264_v57 = vld [vmem:[#allocation44_spill] sm:$0xff]  ;;  %v11267_v17 = vld [vmem:[#allocation43_spill] sm:$0xff] }
 0x120   : > { %1739 = vmatpush.bf16.msrb.mxu1 %v11245_v56  ;;  %v1220_v36 = vpop.f32.mrf.mxu1  ;;  %v11262_v56 = vld [vmem:[#allocation42_spill] sm:$0xff] }
 0x122   : > { %1700 = vmatpush.bf16.msra.mxu0 %v11251_v12  ;;  %v1052_v28 = vpop.f32.mrf.mxu2  ;;  %v1238_v19 = vpop.f32.mrf.mxu3 }
 0x123   : > { %v1053_v41 = vadd.f32 %v1052_v28, %v1034_v21  ;;  %v1239_v29 = vadd.f32 %v1238_v19, %v1220_v36  ;;  %v11269_v36 = vld [vmem:[#allocation46_spill] sm:$0xff] }
 0x124   : > { %1740 = vmatpush.bf16.msrb.mxu1 %v11247_v50  ;;  %v1037_v0 = vpop.f32.mrf.mxu0 }
 0x125   : > { %v1062_v46 = vadd.f32 %v1053_v41, %v850_v49  ;;  %v1283_v59 = vadd.f32 %v1239_v29, %v1059_v44  ;;  %v11274_v29 = vld [vmem:[#allocation51_spill] sm:$0xff] }
 0x126   : > { %1701 = vmatpush.bf16.msra.mxu0 %v11253_v47  ;;  %v11272_v47 = vld [vmem:[#allocation63_spill] sm:$0xff] }
 0x128   : > { %1741 = vmatpush.bf16.msrb.mxu1 %v11249_v53  ;;  %v1222_v61 = vpop.f32.mrf.mxu1  ;;  %v11266_v53 = vld [vmem:[#allocation57_spill] sm:$0xff] }
 0x12a   : > { %1702 = vmatpush.bf16.msra.mxu0 %v11257_v38  ;;  %v1055_v33 = vpop.f32.mrf.mxu2  ;;  %v1240_v16 = vpop.f32.mrf.mxu3 }
 0x12b   : > { %v1056_v31 = vadd.f32 %v1055_v33, %v1037_v0  ;;  %v1241_v43 = vadd.f32 %v1240_v16, %v1222_v61  ;;  %v11277_v0 = vld [vmem:[#allocation68_spill] sm:$0xff]  ;;  %v11279_v61 = vld [vmem:[#allocation58_spill] sm:$0xff] }
 0x12c   : > { %1742 = vmatpush.bf16.msrb.mxu1 %v11252_v15  ;;  %v1039_v55 = vpop.f32.mrf.mxu0  ;;  %v11271_v15 = vld [vmem:[#allocation49_spill] sm:$0xff] }
 0x12d   : > { %v1064_v44 = vadd.f32 %v1056_v31, %v852_v7  ;;  %v1285_v50 = vadd.f32 %v1241_v43, %v1061_v30  ;;  %1672 = vmatmul.bf16.gmra.mxu1 %v11265_v48  ;;  %5458 = vmatmul.msk.bf16.gmra.mxu3 %vm368_vm2, %v11266_v53  ;;  %v11270_v30 = vld [vmem:[#allocation50_spill] sm:$0xff]  ;;  %v11281_v55 = vld [vmem:[#allocation59_spill] sm:$0xff] }
 0x12e   : > { %1773 = vmatpush.bf16.msrb.mxu0 %v11258_v6  ;;  %v11278_v6 = vld [vmem:[#allocation55_spill] sm:$0xff] }
 0x12f   : > { %1703 = vmatmul.bf16.vlgmr.msra.gmra.mxu0 %v7582_v5  ;;  %5459 = vmatmul.msk.bf16.vlgmr.msra.gmra.mxu2 %vm368_vm2, %v11254_v25  ;;  %v11275_v5 = vld [vmem:[#allocation54_spill] sm:$0xff]  ;;  %v11276_v25 = vld [vmem:[#allocation53_spill] sm:$0xff] }
 0x130   : > { %1743 = vmatpush.bf16.msrb.mxu1 %v11255_v40  ;;  %v1225_v49 = vpop.f32.mrf.mxu1  ;;  %1876 = vmatpush.bf16.msra.mxu2 %v11272_v47  ;;  %v11273_v40 = vld [vmem:[#allocation52_spill] sm:$0xff] }
 0x132   : > { %1774 = vmatpush.bf16.msrb.mxu0 %v11261_v58  ;;  %v1057_v52 = vpop.f32.mrf.mxu2  ;;  %v1243_v1 = vpop.f32.mrf.mxu3  ;;  %v11280_v58 = vld [vmem:[#allocation60_spill] sm:$0xff] }
 0x133   : > { %v1244_v12 = vadd.f32 %v1243_v1, %v1225_v49 }
 0x134   : > { %1744 = vmatpush.bf16.msrb.mxu1 %v11259_v32  ;;  %v1256_v27 = vpop.f32.mrf.mxu0 }
 0x135   : > { %v1287_v7 = vadd.f32 %v1244_v12, %v1063_v54 }
 0x136   : > { %1775 = vmatpush.bf16.msrb.mxu0 %v11263_v3  ;;  %v11282_v3 = vld [vmem:[#allocation62_spill] sm:$0xff] }
 0x138   : > { %1815 = vmatpush.bf16.msra.mxu1 %v11260_v8  ;;  %v1227_v21 = vpop.f32.mrf.mxu1 }
 0x139   : > { %v11286_v21 = vld [vmem:[#allocation67_spill] sm:$0xff] }
 0x13a   : > { %1776 = vmatpush.bf16.msrb.mxu0 %v11267_v17  ;;  %v1245_v39 = vpop.f32.mrf.mxu3  ;;  %v1274_v28 = vpop.f32.mrf.mxu2  ;;  %v11283_v17 = vld [vmem:[#allocation61_spill] sm:$0xff] }
 0x13b   : > { %v1275_v19 = vadd.f32 %v1274_v28, %v1256_v27  ;;  %v11285_v27 = vld [vmem:[#allocation64_spill] sm:$0xff]  ;;  %v11289_v39 = vld [vmem:[#allocation69_spill] sm:$0xff] }
 0x13c   : > { %1816 = vmatpush.bf16.msra.mxu1 %v11262_v56  ;;  %v1258_v38 = vpop.f32.mrf.mxu0  ;;  %v11290_v28 = vld [vmem:[#allocation72_spill] sm:$0xff] }
 0x13d   : > { %v1284_v54 = vadd.f32 %v1275_v19, %v1060_v13  ;;  %1745 = vmatmul.bf16.vlgmr.msrb.gmra.mxu1 %v7625_v34  ;;  %5461 = vmatmul.msk.bf16.vlgmr.msrb.gmra.mxu3 %vm368_vm2, %v7637_v18 }
 0x13e   : > { %1777 = vmatpush.bf16.msrb.mxu0 %v11269_v36  ;;  %1954 = vmatpush.bf16.msrb.mxu3 %v11277_v0 }
 0x13f   : > { %1708 = vmatmul.bf16.gmra.mxu0 %v11265_v48  ;;  %5460 = vmatmul.msk.bf16.gmra.mxu2 %vm368_vm2, %v11266_v53 }
 0x140   : > { %1817 = vmatpush.bf16.msra.mxu1 %v11264_v57  ;;  %v1443_v41 = vpop.f32.mrf.mxu1 }
 0x142   : > { %1778 = vmatpush.bf16.msrb.mxu0 %v11271_v15  ;;  %v1276_v32 = vpop.f32.mrf.mxu2  ;;  %v1461_v8 = vpop.f32.mrf.mxu3  ;;  %v11288_v15 = vld [vmem:[#allocation70_spill] sm:$0xff] }
 0x143   : > { %v1277_v13 = vadd.f32 %v1276_v32, %v1258_v38  ;;  %v1462_v56 = vadd.f32 %v1461_v8, %v1443_v41  ;;  %v11291_v41 = vld [vmem:[#allocation71_spill] sm:$0xff]  ;;  %v5554_v8 = vld [vmem:[%s10898_s1 + $0xe8] sm:$0xf] }
 0x144   : > { %1818 = vmatpush.bf16.msra.mxu1 %v11268_v63  ;;  %v1261_v33 = vpop.f32.mrf.mxu0  ;;  %v11284_v63 = vld [vmem:[#allocation65_spill] sm:$0xff] }
 0x145   : > { %v1286_v31 = vadd.f32 %v1277_v13, %v1062_v46  ;;  %v8134_v43 = vadd.f32 %v1462_v56, %v1283_v59 }
 0x146   : > { %1779 = vmatpush.bf16.msrb.mxu0 %v11274_v29  ;;  %v11292_v29 = vld [vmem:[#allocation74_spill] sm:$0xff] }
 0x148   : > { %1819 = vmatpush.bf16.msra.mxu1 %v11270_v30  ;;  %v1445_v16 = vpop.f32.mrf.mxu1  ;;  %v11287_v30 = vld [vmem:[#allocation66_spill] sm:$0xff] }
 0x14a   : > { %1780 = vmatpush.bf16.msrb.mxu0 %v11276_v25  ;;  %v1279_v49 = vpop.f32.mrf.mxu2  ;;  %v1463_v57 = vpop.f32.mrf.mxu3 }
 0x14b   : > { %v1280_v52 = vadd.f32 %v1279_v49, %v1261_v33  ;;  %v1464_v1 = vadd.f32 %v1463_v57, %v1445_v16  ;;  %v11296_v57 = vld [vmem:[#allocation77_spill] sm:$0xff] }
 0x14c   : > { %1820 = vmatpush.bf16.msra.mxu1 %v11273_v40  ;;  %v1263_v46 = vpop.f32.mrf.mxu0 }
 0x14d   : > { %v8143_v12 = vadd.f32 %v1280_v52, %v1064_v44  ;;  %v8145_v48 = vadd.f32 %v1464_v1, %v1285_v50  ;;  %1750 = vmatmul.bf16.gmra.mxu1 %v7893_v62  ;;  %5462 = vmatmul.msk.bf16.gmra.mxu3 %vm368_vm2, %v7896_v24  ;;  %v6627_v52 = vld [vmem:[%s10898_s1 + $0xdc] sm:$0xf0] }
 0x14e   : > { %1851 = vmatpush.bf16.msra.mxu0 %v11278_v6  ;;  %v11294_v6 = vld [vmem:[#allocation76_spill] sm:$0xff] }
 0x14f   : > { %1781 = vmatmul.bf16.vlgmr.msrb.gmra.mxu0 %v7625_v34  ;;  %5463 = vmatmul.msk.bf16.vlgmr.msrb.gmra.mxu2 %vm368_vm2, %v7637_v18  ;;  %v5562_v34 = vld [vmem:[%s10898_s1 + $0xf8] sm:$0xf]  ;;  %v6631_v18 = vld [vmem:[%s10898_s1 + $0xfc] sm:$0xf0] }
 0x150   : > { %1821 = vmatpush.bf16.msra.mxu1 %v11275_v5  ;;  %v1448_v59 = vpop.f32.mrf.mxu1  ;;  %1990 = vmatpush.bf16.msrb.mxu2 %v7929_v4  ;;  %v11293_v4 = vld [vmem:[#allocation73_spill] sm:$0xff] }
 0x152   : > { %1852 = vmatpush.bf16.msra.mxu0 %v11281_v55  ;;  %v1281_v53 = vpop.f32.mrf.mxu2  ;;  %v1466_v36 = vpop.f32.mrf.mxu3 }
 0x153   : > { %v1467_v47 = vadd.f32 %v1466_v36, %v1448_v59 }
 0x154   : > { %1822 = vmatpush.bf16.msra.mxu1 %v11279_v61  ;;  %v1479_v44 = vpop.f32.mrf.mxu0  ;;  %v8174_v61 = vor.u32 %v6631_v18, %v5562_v34  ;;  %v1901_v34 = vshll.u32 %v7483_v60, 16  ;;  %v1905_v18 = vshrl.u32 %v7392_v35, 16 }
 0x155   : > { %v8154_v50 = vadd.f32 %v1467_v47, %v1287_v7  ;;  %v6623_v47 = vld [vmem:[%s10898_s1 + $0xbc] sm:$0xf0] }
 0x156   : > { %1853 = vmatpush.bf16.msra.mxu0 %v11283_v17 }
 0x158   : > { %1929 = vmatpush.bf16.msrb.mxu1 %v11280_v58  ;;  %v1450_v40 = vpop.f32.mrf.mxu1  ;;  %v6629_v58 = vld [vmem:[%s10898_s1 + $0xec] sm:$0xf0] }
 0x159   : > { %v8189_v33 = vor.u32 %v6629_v58, %v5554_v8 }
 0x15a   : > { %1854 = vmatpush.bf16.msra.mxu0 %v11285_v27  ;;  %v1468_v19 = vpop.f32.mrf.mxu3  ;;  %v1497_v38 = vpop.f32.mrf.mxu2 }
 0x15b   : > { %v1498_v5 = vadd.f32 %v1497_v38, %v1479_v44 }
 0x15c   : > { %1930 = vmatpush.bf16.msrb.mxu1 %v11282_v3  ;;  %v1481_v7 = vpop.f32.mrf.mxu0 }
 0x15d   : > { %v8164_v0 = vadd.f32 %v1498_v5, %v1284_v54  ;;  %1823 = vmatmul.bf16.vlgmr.msra.gmra.mxu1 %v7963_v37  ;;  %5465 = vmatmul.msk.bf16.vlgmr.msra.gmra.mxu3 %vm368_vm2, %v7967_v11  ;;  %v11295_v54 = vld [vmem:[#allocation75_spill] sm:$0xff] }
 0x15e   : > { %1855 = vmatpush.bf16.msra.mxu0 %v11287_v30 }
 0x15f   : > { %1786 = vmatmul.bf16.gmra.mxu0 %v7893_v62  ;;  %5464 = vmatmul.msk.bf16.gmra.mxu2 %vm368_vm2, %v7896_v24  ;;  %v5538_v62 = vld [vmem:[%s10898_s1 + $0xc8] sm:$0xf] }
 0x160   : > { %1931 = vmatpush.bf16.msrb.mxu1 %v11284_v63  ;;  %v1524_v25 = vpop.f32.mrf.mxu1  ;;  %v5546_v63 = vld [vmem:[%s10898_s1 + $0xd8] sm:$0xf] }
 0x161   : > { %v8204_v1 = vor.u32 %v6627_v52, %v5546_v63 }
 0x162   : > { %1856 = vmatpush.bf16.msra.mxu0 %v11289_v39  ;;  %v1499_v13 = vpop.f32.mrf.mxu2  ;;  %v1542_v56 = vpop.f32.mrf.mxu3  ;;  %v5522_v39 = vld [vmem:[%s10898_s1 + $0xa8] sm:$0xf] }
 0x163   : > { %v1500_v16 = vadd.f32 %v1499_v13, %v1481_v7  ;;  %v8191_v55 = vadd.f32 %v1542_v56, %v1524_v25  ;;  %v1894_v7 = vshrl.u32 %v7390_v23, 16  ;;  %v8283_v56 = vrot.slane %v1901_v34, 1 }
 0x164   : > { %1932 = vmatpush.bf16.msrb.mxu1 %v11286_v21  ;;  %v1484_v3 = vpop.f32.mrf.mxu0 }
 0x165   : > { %v8195_v17 = vadd.f32 %v1500_v16, %v1286_v31  ;;  %v6625_v31 = vld [vmem:[%s10898_s1 + $0xcc] sm:$0xf0] }
 0x166   : > { %1857 = vmatpush.bf16.msra.mxu0 %v11291_v41  ;;  %v8218_v21 = vor.u32 %v6625_v31, %v5538_v62 }
 0x168   : > { %1933 = vmatpush.bf16.msrb.mxu1 %v11288_v15  ;;  %v1526_v49 = vpop.f32.mrf.mxu1  ;;  %v5530_v15 = vld [vmem:[%s10898_s1 + $0xb8] sm:$0xf] }
 0x169   : > { %v8233_v44 = vor.u32 %v6623_v47, %v5530_v15 }
 0x16a   : > { %1858 = vmatpush.bf16.msra.mxu0 %v11293_v4  ;;  %v1502_v59 = vpop.f32.mrf.mxu2  ;;  %v1544_v27 = vpop.f32.mrf.mxu3 }
 0x16b   : > { %v1503_v53 = vadd.f32 %v1502_v59, %v1484_v3  ;;  %v8220_v36 = vadd.f32 %v1544_v27, %v1526_v49  ;;  %v5556_v59 = vld [vmem:[%s10898_s1 + $0xf0] sm:$0xf0] }
 0x16c   : > { %1934 = vmatpush.bf16.msrb.mxu1 %v11290_v28  ;;  %v1486_v24 = vpop.f32.mrf.mxu0  ;;  %v6621_v28 = vld [vmem:[%s10898_s1 + $0xac] sm:$0xf0] }
 0x16d   : > { %1828 = vmatmul.bf16.gmra.mxu1 %v8010_v45  ;;  %5466 = vmatmul.msk.bf16.gmra.mxu3 %vm368_vm2, %v8012_v26  ;;  %v8250_v41 = vor.u32 %v6621_v28, %v5522_v39  ;;  %v5638_v39 = vld [vmem:[%s10898_s1 + $0x70] sm:$0xf]  ;;  %v6613_v28 = vld [vmem:[%s10898_s1 + $0x74] sm:$0xf0] }
 0x16e   : > { %1965 = vmatpush.bf16.msrb.mxu0 %v11295_v54  ;;  %v5514_v54 = vld [vmem:[%s10898_s1 + $0x98] sm:$0xf] }
 0x16f   : > { %1859 = vmatmul.bf16.vlgmr.msra.gmra.mxu0 %v7963_v37  ;;  %v8278_v37 = vld [vmem:[%s10898_s1 + $0x108] sm:$0xff]  ;;  %5467 = vmatmul.msk.bf16.vlgmr.msra.gmra.mxu2 %vm368_vm2, %v7967_v11  ;;  %v6617_v11 = vld [vmem:[%s10898_s1 + $0x8c] sm:$0xf0] }
 0x170   : > { %1935 = vmatpush.bf16.msrb.mxu1 %v11292_v29  ;;  %v1529_v30 = vpop.f32.mrf.mxu1  ;;  %v2127_v58 = vunpack.c.l.b16 %v8278_v37 }
 0x172   : > { %1966 = vmatpush.bf16.msrb.mxu0 %v11296_v57  ;;  %v1504_v19 = vpop.f32.mrf.mxu2  ;;  %v1547_v38 = vpop.f32.mrf.mxu3  ;;  %v5506_v57 = vld [vmem:[%s10898_s1 + $0x88] sm:$0xf]  ;;  %v2145_v63 = vpack.c.b16 %v2127_v58, %v2127_v58  ;;  %v5622_v58 = vld [vmem:[%s10898_s1 + $0x50] sm:$0xf] }
 0x173   : > { %v8252_v29 = vadd.f32 %v1547_v38, %v1529_v30  ;;  %v8297_v31 = vor.u32 %v6617_v11, %v5506_v57  ;;  %v8340_v19 = vor.u32 %v6613_v28, %v5638_v39  ;;  %v5630_v38 = vld [vmem:[%s10898_s1 + $0x60] sm:$0xf]  ;;  %v6609_v57 = vld [vmem:[%s10898_s1 + $0x54] sm:$0xf0]  ;;  %v5524_v39 = vld [vmem:[%s10898_s1 + $0xb0] sm:$0xf0] }
 0x174   : > { %1936 = vmatpush.bf16.msrb.mxu1 %v11294_v6  ;;  %v1560_v5 = vpop.f32.mrf.mxu0  ;;  %v1911_v6 = vshll.u32 %v7485_v9, 16  ;;  %v8308_v24 = vand.u32 %v2145_v63, %v6905_v20  ;;  %v8386_v11 = vor.u32 %v6609_v57, %v5622_v58  ;;  %v5614_v63 = vld [vmem:[%s10898_s1 + $0x40] sm:$0xf] }
 0x175   : > { %11299 = vst [vmem:[#allocation3_spill] sm:$0xff] %v8297_v31 }
 0x176   : > { %1967 = vmatpush.bf16.msrb.mxu0 %v7917_v14  ;;  %v8225_v14 = vadd.f32 %v1503_v53, %v8143_v12  ;;  %v1907_v12 = vshll.u32 %v7392_v35, 16  ;;  %v6630_v35 = vld [vmem:[%s10898_s1 + $0xfc] sm:$0xf]  ;;  %v8285_v3 = vrot.slane %v1911_v6, 1  ;;  %2200 = vmatpush.bf16.msra.mxu3 %v8308_v24  ;;  %11301 = vst [vmem:[#allocation6_spill] sm:$0xff] %v8340_v19 }
 0x177   : > { %v6624_v6 = vld [vmem:[%s10898_s1 + $0xcc] sm:$0xf]  ;;  %11305 = vst [vmem:[#allocation10_spill] sm:$0xff] %v8386_v11 }
 0x178   : > { %2175 = vmatpush.bf16.msra.mxu1 %v8174_v61  ;;  %v1531_v25 = vpop.f32.mrf.mxu1  ;;  %v1909_v4 = vrot.slane %v1907_v12, 1 }
 0x179   : > { %v6611_v25 = vld [vmem:[%s10898_s1 + $0x64] sm:$0xf0] }
 0x17a   : > { %1968 = vmatpush.bf16.msrb.mxu0 %v7937_v22  ;;  %v1896_v22 = vshll.u32 %v7390_v23, 16  ;;  %v6619_v23 = vld [vmem:[%s10898_s1 + $0x9c] sm:$0xf0]  ;;  %v1910_v16 = vor.u32 %v1909_v4, %v1905_v18  ;;  %v1549_v52 = vpop.f32.mrf.mxu3  ;;  %v1578_v62 = vpop.f32.mrf.mxu2 }
 0x17b   : > { %v8267_v8 = vor.u32 %v6619_v23, %v5514_v54  ;;  %v8305_v27 = vadd.f32 %v1578_v62, %v1560_v5  ;;  %v5540_v54 = vld [vmem:[%s10898_s1 + $0xd0] sm:$0xf0]  ;;  %v8362_v23 = vor.u32 %v6611_v25, %v5630_v38  ;;  %v5516_v25 = vld [vmem:[%s10898_s1 + $0xa0] sm:$0xf0] }
 0x17c   : > { %2176 = vmatpush.bf16.msra.mxu1 %v8189_v33  ;;  %v1562_v53 = vpop.f32.mrf.mxu0  ;;  %v8316_v47 = vsel %vm1083_vm3, %v1910_v16, %v8285_v3  ;;  %v8372_v16 = vor.u32 %v6624_v6, %v5540_v54 }
 0x17d   : > { %11297 = vst [vmem:[#allocation4_spill] sm:$0xff] %v8267_v8  ;;  %5469 = vmatmul.msk.bf16.vlgmr.msrb.gmra.mxu3 %vm368_vm2, %v8316_v47 }
 0x17e   : > { %1969 = vmatpush.bf16.msrb.mxu0 %v7951_v10  ;;  %v1898_v10 = vrot.slane %v1896_v22, 1  ;;  %11303 = vst [vmem:[#allocation8_spill] sm:$0xff] %v8362_v23 }
 0x17f   : > { %1864 = vmatmul.bf16.gmra.mxu0 %v8010_v45  ;;  %11304 = vst [vmem:[#allocation11_spill] sm:$0xff] %v8372_v16  ;;  %5468 = vmatmul.msk.bf16.gmra.mxu2 %vm368_vm2, %v8012_v26  ;;  %v1918_v45 = vshrl.u32 %v7485_v9, 16 }
 0x180   : > { %2177 = vmatpush.bf16.msra.mxu1 %v8204_v1  ;;  %v1899_v13 = vor.u32 %v1898_v10, %v1894_v7  ;;  %v1596_v30 = vpop.f32.mrf.mxu1 }
 0x181   : > { %v1597_v22 = vadd.f32 %v1596_v30, %v8191_v55  ;;  %v5548_v55 = vld [vmem:[%s10898_s1 + $0xe0] sm:$0xf0] }
 0x182   : > { %1970 = vmatpush.bf16.msrb.mxu0 %v7970_v51  ;;  %v5564_v51 = vld [vmem:[%s10898_s1 + $0x100] sm:$0xf0]  ;;  %v8312_v15 = vsel %vm1083_vm3, %v1899_v13, %v8283_v56  ;;  %v1580_v5 = vpop.f32.mrf.mxu2  ;;  %v1614_v7 = vpop.f32.mrf.mxu3  ;;  %v1915_v13 = vshrl.u32 %v7483_v60, 16 }
 0x183   : > { %v8289_v49 = vor.u32 %v6630_v35, %v5564_v51  ;;  %1937 = vmatmul.bf16.vlgmr.msrb.gmra.mxu1 %v8312_v15  ;;  %v8352_v34 = vadd.f32 %v1580_v5, %v1562_v53  ;;  %v8354_v18 = vadd.f32 %v1614_v7, %v1597_v22  ;;  %v5532_v60 = vld [vmem:[%s10898_s1 + $0xc0] sm:$0xf0]  ;;  %v8406_v22 = vor.u32 %v1918_v45, %v8285_v3  ;;  %v5606_v3 = vld [vmem:[%s10898_s1 + $0x30] sm:$0xf]  ;;  %v6605_v5 = vld [vmem:[%s10898_s1 + $0x34] sm:$0xf0] }
 0x184   : > { %2178 = vmatpush.bf16.msra.mxu1 %v8218_v21  ;;  %v1565_v4 = vpop.f32.mrf.mxu0  ;;  %v8393_v9 = vor.u32 %v1915_v13, %v8283_v56  ;;  %v6620_v56 = vld [vmem:[%s10898_s1 + $0xac] sm:$0xf]  ;;  %v2128_v7 = vunpack.c.h.b16 %v8278_v37  ;;  %v5598_v37 = vld [vmem:[%s10898_s1 + $0x20] sm:$0xf]  ;;  %v6603_v13 = vld [vmem:[%s10898_s1 + $0x24] sm:$0xf0] }
 0x185   : > { %11298 = vst [vmem:[#allocation5_spill] sm:$0xff] %v8289_v49  ;;  %v8422_v38 = vor.u32 %v6620_v56, %v5524_v39  ;;  %v5640_v39 = vld [vmem:[%s10898_s1 + $0x78] sm:$0xf0] }
 0x186   : > { %1971 = vmatpush.bf16.msrb.mxu0 %v7983_v42  ;;  %v6628_v42 = vld [vmem:[%s10898_s1 + $0xec] sm:$0xf]  ;;  %v2146_v6 = vpack.c.b16 %v2128_v7, %v2128_v7  ;;  %v6615_v7 = vld [vmem:[%s6944_s9 + $0x4c] sm:$0xf0] }
 0x187   : > { %v8323_v12 = vor.u32 %v6628_v42, %v5556_v59  ;;  %v6607_v42 = vld [vmem:[%s10898_s1 + $0x44] sm:$0xf0]  ;;  %11308 = vst [vmem:[#allocation12_spill] sm:$0xff] %v8422_v38 }
 0x188   : > { %2179 = vmatpush.bf16.msra.mxu1 %v8233_v44  ;;  %v1598_v35 = vpop.f32.mrf.mxu1  ;;  %v8414_v28 = vor.u32 %v6607_v42, %v5614_v63  ;;  %v8447_v58 = vand.u32 %v2146_v6, %v6905_v20  ;;  %v8460_v63 = vor.u32 %v6603_v13, %v5598_v37  ;;  %v5590_v42 = vld [vmem:[%s10898_s1 + $0x10] sm:$0xf]  ;;  %v5582_v6 = vld [vmem:[%s10898_s1] sm:$0xf]  ;;  %v6599_v37 = vld [vmem:[%s10898_s1 + $0x4] sm:$0xf0] }
 0x189   : > { %11300 = vst [vmem:[#allocation7_spill] sm:$0xff] %v8323_v12  ;;  %v1599_v51 = vadd.f32 %v1598_v35, %v8220_v36  ;;  %v6622_v36 = vld [vmem:[%s10898_s1 + $0xbc] sm:$0xf] }
 0x18a   : > { %1972 = vmatpush.bf16.msrb.mxu0 %v7998_v2  ;;  %v6626_v2 = vld [vmem:[%s10898_s1 + $0xdc] sm:$0xf]  ;;  %v1583_v52 = vpop.f32.mrf.mxu2  ;;  %v1616_v26 = vpop.f32.mrf.mxu3  ;;  %v8396_v62 = vor.u32 %v6622_v36, %v5532_v60  ;;  %11307 = vst [vmem:[#allocation13_spill] sm:$0xff] %v8414_v28  ;;  %v6616_v36 = vld [vmem:[%s10898_s1 + $0x8c] sm:$0xf]  ;;  %2236 = vmatpush.bf16.msra.mxu2 %v8447_v58 }
 0x18b   : > { %v8347_v10 = vor.u32 %v6626_v2, %v5548_v55  ;;  %v8401_v59 = vadd.f32 %v1583_v52, %v1565_v4  ;;  %v8403_v53 = vadd.f32 %v1616_v26, %v1599_v51  ;;  %v8437_v4 = vor.u32 %v6605_v5, %v5606_v3  ;;  %11311 = vst [vmem:[#allocation26_spill] sm:$0xff] %v8447_v58  ;;  %v5508_v60 = vld [vmem:[%s10898_s1 + $0x90] sm:$0xf0] }
 0x18c   : > { %2180 = vmatpush.bf16.msra.mxu1 %v8250_v41  ;;  %11306 = vst [vmem:[#allocation21_spill] sm:$0xff] %v8396_v62  ;;  %v1567_v30 = vpop.f32.mrf.mxu0  ;;  %v8476_v56 = vor.u32 %v6616_v36, %v5508_v60  ;;  %v5632_v36 = vld [vmem:[%s10898_s1 + $0x68] sm:$0xf0] }
 0x18d   : > { %11302 = vst [vmem:[#allocation9_spill] sm:$0xff] %v8347_v10  ;;  %5470 = vmatmul.msk.bf16.gmra.mxu3 %vm368_vm2, %v8406_v22  ;;  %v6601_v30 = vld [vmem:[%s10898_s1 + $0x14] sm:$0xf0] }
 0x18e   : > { %2211 = vmatpush.bf16.msra.mxu0 %v8289_v49  ;;  %11309 = vst [vmem:[#allocation15_spill] sm:$0xff] %v8437_v4 }
 0x18f   : > { %11312 = vst [vmem:[#allocation18_spill] sm:$0xff] %v8460_v63  ;;  %1973 = vmatmul.bf16.vlgmr.msrb.gmra.mxu0 %v8312_v15  ;;  %v8478_v15 = vor.u32 %v6601_v30, %v5590_v42  ;;  %5471 = vmatmul.msk.bf16.vlgmr.msrb.gmra.mxu2 %vm368_vm2, %v8316_v47  ;;  %v6610_v47 = vld [vmem:[%s10898_s1 + $0x64] sm:$0xf] }
 0x190   : > { %2181 = vmatpush.bf16.msra.mxu1 %v8267_v8  ;;  %v1601_v2 = vpop.f32.mrf.mxu1  ;;  %11313 = vst [vmem:[#allocation16_spill] sm:$0xff] %v8476_v56 }
 0x191   : > { %v1602_v55 = vadd.f32 %v1601_v2, %v8252_v29  ;;  %v6618_v29 = vld [vmem:[%s10898_s1 + $0x9c] sm:$0xf]  ;;  %11314 = vst [vmem:[#allocation17_spill] sm:$0xff] %v8478_v15  ;;  %v8486_v2 = vld [vmem:[%s10898_s1 + $0x80] sm:$0xff] }
 0x192   : > { %2212 = vmatpush.bf16.msra.mxu0 %v8323_v12  ;;  %v1585_v54 = vpop.f32.mrf.mxu2  ;;  %v1619_v35 = vpop.f32.mrf.mxu3  ;;  %v8444_v51 = vor.u32 %v6618_v29, %v5516_v25  ;;  %v2311_v5 = vunpack.c.l.b16 %v8486_v2  ;;  %v6614_v29 = vld [vmem:[%s6944_s9 + $0x4c] sm:$0xf]  ;;  %v5500_v25 = vld [vmem:[%s6944_s9 + $0x50] sm:$0xf0] }
 0x193   : > { %1942 = vmatmul.bf16.gmra.mxu1 %v8393_v9  ;;  %v8452_v57 = vadd.f32 %v1619_v35, %v1602_v55  ;;  %v5498_v55 = vld [vmem:[%s6944_s9 + $0x48] sm:$0xf]  ;;  %v8517_v30 = vor.u32 %v6614_v29, %v5500_v25 }
 0x194   : > { %2182 = vmatpush.bf16.msra.mxu1 %v8297_v31  ;;  %11310 = vst [vmem:[#allocation14_spill] sm:$0xff] %v8444_v51  ;;  %v1632_v45 = vpop.f32.mrf.mxu0  ;;  %v2329_v54 = vpack.c.b16 %v2311_v5, %v2311_v5  ;;  %v8515_v42 = vor.u32 %v6615_v7, %v5498_v55  ;;  %v5624_v55 = vld [vmem:[%s10898_s1 + $0x58] sm:$0xf0]  ;;  %v5723_v7 = vld [vmem:[%s10898_s1 + $0x180] sm:$0xf] }
 0x195   : > { %v1633_v26 = vadd.f32 %v1632_v45, %v8305_v27  ;;  %v6612_v27 = vld [vmem:[%s10898_s1 + $0x74] sm:$0xf]  ;;  %v8508_v45 = vor.u32 %v6599_v37, %v5582_v6  ;;  %v8524_v6 = vor.u32 %v6610_v47, %v5632_v36  ;;  %v6606_v37 = vld [vmem:[%s10898_s1 + $0x44] sm:$0xf]  ;;  %v5715_v47 = vld [vmem:[%s10898_s1 + $0x170] sm:$0xf] }
 0x196   : > { %2213 = vmatpush.bf16.msra.mxu0 %v8347_v10  ;;  %v8491_v3 = vor.u32 %v6612_v27, %v5640_v39  ;;  %v8521_v27 = vand.u32 %v2329_v54, %v6905_v20  ;;  %v5616_v54 = vld [vmem:[%s10898_s1 + $0x48] sm:$0xf0]  ;;  %v6645_v36 = vld [vmem:[%s10898_s1 + $0x174] sm:$0xf0] }
 0x197   : > { %11316 = vst [vmem:[#allocation22_spill] sm:$0xff] %v8508_v45  ;;  %v8568_v32 = vor.u32 %v6606_v37, %v5616_v54 }
 0x198   : > { %2359 = vmatpush.bf16.msrb.mxu1 %v8340_v19  ;;  %v1603_v52 = vpop.f32.mrf.mxu1  ;;  %11315 = vst [vmem:[#allocation19_spill] sm:$0xff] %v8491_v3  ;;  %2384 = vmatpush.bf16.msrb.mxu3 %v8521_v27 }
 0x199   : > { %11317 = vst [vmem:[#allocation20_spill] sm:$0xff] %v8521_v27 }
 0x19a   : > { %2214 = vmatpush.bf16.msra.mxu0 %v8372_v16  ;;  %v1621_v35 = vpop.f32.mrf.mxu3  ;;  %v1650_v13 = vpop.f32.mrf.mxu2  ;;  %11318 = vst [vmem:[#allocation24_spill] sm:$0xff] %v8524_v6 }
 0x19b   : > { %v8513_v60 = vadd.f32 %v1650_v13, %v1633_v26  ;;  %v6608_v26 = vld [vmem:[%s10898_s1 + $0x54] sm:$0xf]  ;;  %11322 = vst [vmem:[#allocation29_spill] sm:$0xff] %v8568_v32 }
 0x19c   : > { %2360 = vmatpush.bf16.msrb.mxu1 %v8362_v23  ;;  %v1634_v52 = vpop.f32.mrf.mxu0  ;;  %v8546_v25 = vor.u32 %v6608_v26, %v5624_v55 }
 0x19d   : > { %v1635_v39 = vadd.f32 %v1634_v52, %v8352_v34  ;;  %v6647_v34 = vld [vmem:[%s10898_s1 + $0x184] sm:$0xf0]  ;;  %5568 = vmatmul.msk.bf16.vlgmr.msra.gmra.mxu3 %vm368_vm2, %v8517_v30 }
 0x19e   : > { %2215 = vmatpush.bf16.msra.mxu0 %v8396_v62  ;;  %v8543_v29 = vor.u32 %v6647_v34, %v5723_v7  ;;  %11320 = vst [vmem:[#allocation27_spill] sm:$0xff] %v8546_v25  ;;  %v5478_v7 = vld [vmem:[%s6944_s9 + $0x58] sm:$0x11]  ;;  %v8564_v34 = vor.u32 %v6645_v36, %v5715_v47 }
 0x19f   : > { %1978 = vmatmul.bf16.gmra.mxu0 %v8393_v9  ;;  %v2070_v37 = vunpack.c.l.b16 %v5478_v7  ;;  %5472 = vmatmul.msk.bf16.gmra.mxu2 %vm368_vm2, %v8406_v22  ;;  %v2071_v9 = vunpack.c.h.b16 %v5478_v7  ;;  %v5699_v22 = vld [vmem:[%s10898_s1 + $0x150] sm:$0xf]  ;;  %v6641_v7 = vld [vmem:[%s10898_s1 + $0x154] sm:$0xf0] }
 0x1a0   : > { %2361 = vmatpush.bf16.msrb.mxu1 %v8386_v11  ;;  %v1668_v5 = vpop.f32.mrf.mxu1  ;;  %11319 = vst [vmem:[#allocation23_spill] sm:$0xff] %v8543_v29 }
 0x1a1   : > { %11321 = vst [vmem:[#allocation25_spill] sm:$0xff] %v8564_v34 }
 0x1a2   : > { %2216 = vmatpush.bf16.msra.mxu0 %v8422_v38  ;;  %v1652_v35 = vpop.f32.mrf.mxu2  ;;  %v1686_v13 = vpop.f32.mrf.mxu3 }
 0x1a3   : > { %2183 = vmatmul.bf16.vlgmr.msra.gmra.mxu1 %v8515_v42  ;;  %v8561_v52 = vadd.f32 %v1652_v35, %v1635_v39  ;;  %v1687_v26 = vadd.f32 %v1686_v13, %v1668_v5  ;;  %v6604_v39 = vld [vmem:[%s10898_s1 + $0x34] sm:$0xf]  ;;  %v5707_v5 = vld [vmem:[%s10898_s1 + $0x160] sm:$0xf]  ;;  %v6602_v35 = vld [vmem:[%s10898_s1 + $0x24] sm:$0xf] }
 0x1a4   : > { %2362 = vmatpush.bf16.msrb.mxu1 %v8414_v28  ;;  %v1637_v55 = vpop.f32.mrf.mxu0  ;;  %v5600_v13 = vld [vmem:[%s10898_s1 + $0x28] sm:$0xf0] }
 0x1a5   : > { %v1638_v40 = vadd.f32 %v1637_v55, %v8401_v59  ;;  %v5608_v59 = vld [vmem:[%s10898_s1 + $0x38] sm:$0xf0]  ;;  %v8604_v55 = vpack.c.b16 %v2070_v37, %v2070_v37 }
 0x1a6   : > { %2217 = vmatpush.bf16.msra.mxu0 %v8444_v51  ;;  %v8592_v47 = vor.u32 %v6604_v39, %v5608_v59 }
 0x1a7   : > { %11325 = vst [vmem:[#allocation40_spill] sm:$0xff] %v8604_v55 }
 0x1a8   : > { %2363 = vmatpush.bf16.msrb.mxu1 %v8437_v4  ;;  %v1670_v46 = vpop.f32.mrf.mxu1  ;;  %11324 = vst [vmem:[#allocation31_spill] sm:$0xff] %v8592_v47 }
 0x1aa   : > { %2218 = vmatpush.bf16.msra.mxu0 %v8476_v56  ;;  %v1655_v36 = vpop.f32.mrf.mxu2 }
 0x1ab   : > { %v8609_v39 = vadd.f32 %v1655_v36, %v1638_v40  ;;  %v6600_v40 = vld [vmem:[%s10898_s1 + $0x14] sm:$0xf] }
 0x1ac   : > { %2364 = vmatpush.bf16.msrb.mxu1 %v8460_v63 }
 0x1ae   : > { %2395 = vmatpush.bf16.msrb.mxu0 %v8491_v3 }
 0x1af   : > { %2219 = vmatmul.bf16.vlgmr.msra.gmra.mxu0 %v8515_v42  ;;  %5570 = vmatmul.msk.bf16.vlgmr.msra.gmra.mxu2 %vm368_vm2, %v8517_v30 }
 0x1b0   : > { %2365 = vmatpush.bf16.msrb.mxu1 %v8478_v15 }
 0x1b2   : > { %2396 = vmatpush.bf16.msrb.mxu0 %v8524_v6 }
 0x1b3   : > { %2188 = vmatmul.bf16.gmra.mxu1 %v8604_v55 }
 0x1b4   : > { %2366 = vmatpush.bf16.msrb.mxu1 %v8508_v45 }
 0x1b6   : > { %2397 = vmatpush.bf16.msrb.mxu0 %v8546_v25 }
 0x1b8   : > { %2593 = vmatpush.bf16.msra.mxu1 %v8543_v29  ;;  %v8571_v29 = vadd.f32 %v1687_v26, %v8354_v18  ;;  %v6643_v18 = vld [vmem:[%s10898_s1 + $0x164] sm:$0xf0]  ;;  %v1688_v26 = vpop.f32.mrf.mxu3 }
 0x1b9   : > { %v8589_v54 = vor.u32 %v6643_v18, %v5707_v5  ;;  %v1689_v59 = vadd.f32 %v1688_v26, %v1670_v46  ;;  %v1639_v5 = vpop.f32.mrf.mxu0  ;;  %v8611_v18 = vpack.c.b16 %v2071_v9, %v2071_v9  ;;  %v5592_v46 = vld [vmem:[%s10898_s1 + $0x18] sm:$0xf0]  ;;  %v5691_v9 = vld [vmem:[%s10898_s1 + $0x140] sm:$0xf]  ;;  %v6598_v26 = vld [vmem:[%s10898_s1 + $0x4] sm:$0xf] }
 0x1ba   : > { %2398 = vmatpush.bf16.msrb.mxu0 %v8568_v32  ;;  %v8616_v32 = vor.u32 %v6602_v35, %v5600_v13  ;;  %v6639_v35 = vld [vmem:[%s10898_s1 + $0x144] sm:$0xf0] }
 0x1bb   : > { %11323 = vst [vmem:[#allocation28_spill] sm:$0xff] %v8589_v54  ;;  %v8619_v37 = vadd.f32 %v1689_v59, %v8403_v53  ;;  %v2312_v53 = vunpack.c.h.b16 %v8486_v2  ;;  %5569 = vmatmul.msk.bf16.gmra.mxu3 %vm368_vm2, %v8611_v18  ;;  %v8638_v13 = vor.u32 %v6639_v35, %v5691_v9  ;;  %v5584_v2 = vld [vmem:[%s10898_s1 + $0x8] sm:$0xf0]  ;;  %v1657_v59 = vpop.f32.mrf.mxu2 }
 0x1bc   : > { %2594 = vmatpush.bf16.msra.mxu1 %v8564_v34  ;;  %11326 = vst [vmem:[#allocation30_spill] sm:$0xff] %v8611_v18  ;;  %v1673_v34 = vpop.f32.mrf.mxu1  ;;  %v5574_v59 = vld [vmem:[%s6944_s9 + $0x30] sm:$0xf] }
 0x1bd   : > { %11328 = vst [vmem:[#allocation32_spill] sm:$0xff] %v8616_v32  ;;  %v2330_v36 = vpack.c.b16 %v2312_v53, %v2312_v53 }
 0x1be   : > { %2399 = vmatpush.bf16.msrb.mxu0 %v8592_v47  ;;  %11329 = vst [vmem:[#allocation45_spill] sm:$0xff] %v8638_v13 }
 0x1bf   : > { %2224 = vmatmul.bf16.gmra.mxu0 %v8604_v55  ;;  %5571 = vmatmul.msk.bf16.gmra.mxu2 %vm368_vm2, %v8611_v18 }
 0x1c0   : > { %2595 = vmatpush.bf16.msra.mxu1 %v8589_v54  ;;  %v8613_v54 = vor.u32 %v6641_v7, %v5699_v22  ;;  %v8641_v22 = vor.u32 %v6600_v40, %v5592_v46  ;;  %v5683_v7 = vld [vmem:[%s10898_s1 + $0x130] sm:$0xf]  ;;  %v1691_v5 = vpop.f32.mrf.mxu3  ;;  %v8654_v40 = vand.u32 %v2330_v36, %v6905_v20  ;;  %v6637_v46 = vld [vmem:[%s10898_s1 + $0x134] sm:$0xf0] }
 0x1c1   : > { %v1692_v9 = vadd.f32 %v1691_v5, %v1673_v34  ;;  %v1704_v35 = vpop.f32.mrf.mxu0  ;;  %v8659_v53 = vor.u32 %v6637_v46, %v5683_v7  ;;  %v5675_v34 = vld [vmem:[%s10898_s1 + $0x120] sm:$0xf]  ;;  %v8687_v7 = vld [vmem:[%s10898_s1 + $0x190] sm:$0xff]  ;;  %v6597_v5 = vld [vmem:[%s6944_s9 + $0x34] sm:$0xf0] }
 0x1c2   : > { %11327 = vst [vmem:[#allocation33_spill] sm:$0xff] %v8613_v54  ;;  %2400 = vmatpush.bf16.msrb.mxu0 %v8616_v32  ;;  %2420 = vmatpush.bf16.msrb.mxu2 %v8654_v40 }
 0x1c3   : > { %11330 = vst [vmem:[#allocation35_spill] sm:$0xff] %v8641_v22  ;;  %v8666_v36 = vadd.f32 %v1692_v9, %v8452_v57  ;;  %v5725_v57 = vld [vmem:[%s10898_s1 + $0x188] sm:$0xf0]  ;;  %v2545_v9 = vunpack.c.l.b16 %v8687_v7  ;;  %v1722_v47 = vpop.f32.mrf.mxu2 }
 0x1c4   : > { %2596 = vmatpush.bf16.msra.mxu1 %v8613_v54  ;;  %11331 = vst [vmem:[#allocation47_spill] sm:$0xff] %v8654_v40  ;;  %v8662_v54 = vor.u32 %v6598_v26, %v5584_v2  ;;  %v6646_v26 = vld [vmem:[%s10898_s1 + $0x184] sm:$0xf]  ;;  %v1723_v25 = vadd.f32 %v1722_v47, %v1704_v35 }
 0x1c5   : > { %11332 = vst [vmem:[#allocation34_spill] sm:$0xff] %v8659_v53  ;;  %v8693_v46 = vor.u32 %v6646_v26, %v5725_v57  ;;  %v2563_v26 = vpack.c.b16 %v2545_v9, %v2545_v9  ;;  %v6644_v57 = vld [vmem:[%s10898_s1 + $0x174] sm:$0xf]  ;;  %v6642_v47 = vld [vmem:[%s10898_s1 + $0x164] sm:$0xf] }
 0x1c6   : > { %2401 = vmatpush.bf16.msrb.mxu0 %v8641_v22  ;;  %11333 = vst [vmem:[#allocation36_spill] sm:$0xff] %v8662_v54  ;;  %v6633_v22 = vld [vmem:[%s10898_s1 + $0x114] sm:$0xf0] }
 0x1c7   : > { %11335 = vst [vmem:[#allocation39_spill] sm:$0xff] %v8693_v46  ;;  %v8720_v9 = vand.u32 %v2563_v26, %v6905_v20 }
 0x1c8   : > { %2597 = vmatpush.bf16.msra.mxu1 %v8638_v13  ;;  %v1675_v13 = vpop.f32.mrf.mxu1  ;;  %v1693_v32 = vpop.f32.mrf.mxu3 }
 0x1c9   : > { %v6635_v13 = vld [vmem:[%s10898_s1 + $0x124] sm:$0xf0]  ;;  %v1706_v45 = vpop.f32.mrf.mxu0  ;;  %11337 = vst [vmem:[#allocation42_spill] sm:$0xff] %v8720_v9  ;;  %v8725_v32 = vadd.f32 %v1723_v25, %v8513_v60  ;;  %2618 = vmatpush.bf16.msra.mxu3 %v8720_v9  ;;  %v6665_v25 = vld [vmem:[%s10898_s1 + $0x20c] sm:$0xf0] }
 0x1ca   : > { %v8679_v2 = vor.u32 %v6635_v13, %v5675_v34  ;;  %v6596_v34 = vld [vmem:[%s6944_s9 + $0x34] sm:$0xf]  ;;  %v5576_v13 = vld [vmem:[%s6944_s9 + $0x38] sm:$0xf0]  ;;  %2402 = vmatpush.bf16.msrb.mxu0 %v8662_v54  ;;  %v8710_v54 = vor.u32 %v6597_v5, %v5574_v59  ;;  %v5819_v60 = vld [vmem:[%s10898_s1 + $0x208] sm:$0xf] }
 0x1cb   : > { %v8717_v6 = vor.u32 %v6596_v34, %v5576_v13  ;;  %v6640_v59 = vld [vmem:[%s10898_s1 + $0x154] sm:$0xf]  ;;  %v5701_v5 = vld [vmem:[%s10898_s1 + $0x158] sm:$0xf0]  ;;  %v1724_v34 = vpop.f32.mrf.mxu2  ;;  %v8770_v9 = vld [vmem:[%s6944_s9 + $0x8] sm:$0xff] }
 0x1cc   : > { %2598 = vmatpush.bf16.msra.mxu1 %v8659_v53  ;;  %11334 = vst [vmem:[#allocation37_spill] sm:$0xff] %v8679_v2  ;;  %v5667_v53 = vld [vmem:[%s10898_s1 + $0x110] sm:$0xf]  ;;  %v8760_v26 = vor.u32 %v6640_v59, %v5701_v5  ;;  %v11347_v63 = vunpack.c.l.b16 %v8770_v9  ;;  %v11349_v28 = vunpack.c.h.b16 %v8770_v9 }
 0x1cd   : > { %2367 = vmatmul.bf16.vlgmr.msrb.gmra.mxu1 %v8710_v54  ;;  %5644 = vmatmul.msk.bf16.vlgmr.msrb.gmra.mxu3 %vm368_vm2, %v8717_v6  ;;  %11343 = vst [vmem:[#allocation48_spill] sm:$0xff] %v8770_v9 }
 0x1ce   : > { %2629 = vmatpush.bf16.msra.mxu0 %v8693_v46  ;;  %v5717_v46 = vld [vmem:[%s10898_s1 + $0x178] sm:$0xf0]  ;;  %11341 = vst [vmem:[#allocation57_spill] sm:$0xff] %v8760_v26 }
 0x1cf   : > { %v8722_v40 = vor.u32 %v6644_v57, %v5717_v46  ;;  %v5811_v46 = vld [vmem:[%s10898_s1 + $0x1f8] sm:$0xf]  ;;  %v6663_v57 = vld [vmem:[%s10898_s1 + $0x1fc] sm:$0xf0]  ;;  %2403 = vmatmul.bf16.vlgmr.msrb.gmra.mxu0 %v8710_v54  ;;  %5646 = vmatmul.msk.bf16.vlgmr.msrb.gmra.mxu2 %vm368_vm2, %v8717_v6 }
 0x1d0   : > { %2599 = vmatpush.bf16.msra.mxu1 %v8679_v2  ;;  %v8712_v2 = vor.u32 %v6633_v22, %v5667_v53  ;;  %v1746_v15 = vpop.f32.mrf.mxu1  ;;  %v5709_v22 = vld [vmem:[%s10898_s1 + $0x168] sm:$0xf0]  ;;  %v8747_v53 = vor.u32 %v6665_v25, %v5819_v60  ;;  %v1764_v13 = vpop.f32.mrf.mxu3  ;;  %v5475_v25 = vld [vmem:[%s6944_s9 + $0x40] sm:$0x11] }
 0x1d1   : > { %11338 = vst [vmem:[#allocation41_spill] sm:$0xff] %v8722_v40  ;;  %v8736_v35 = vor.u32 %v6642_v47, %v5709_v22  ;;  %v1725_v47 = vadd.f32 %v1724_v34, %v1706_v45  ;;  %v1765_v22 = vadd.f32 %v1764_v13, %v1746_v15  ;;  %v1709_v60 = vpop.f32.mrf.mxu0  ;;  %v6638_v15 = vld [vmem:[%s10898_s1 + $0x144] sm:$0xf]  ;;  %v5693_v45 = vld [vmem:[%s10898_s1 + $0x148] sm:$0xf0]  ;;  %v2254_v5 = vunpack.c.l.b16 %v5475_v25 }
 0x1d2   : > { %11336 = vst [vmem:[#allocation38_spill] sm:$0xff] %v8712_v2  ;;  %2630 = vmatpush.bf16.msra.mxu0 %v8722_v40  ;;  %v2431_v40 = vld [vmem:[%s6944_s9] sm:$0xff]  ;;  %v6661_v34 = vld [vmem:[%s10898_s1 + $0x1ec] sm:$0xf0] }
 0x1d3   : > { %11339 = vst [vmem:[#allocation44_spill] sm:$0xff] %v8736_v35  ;;  %v8773_v3 = vadd.f32 %v1725_v47, %v8561_v52  ;;  %v8776_v59 = vadd.f32 %v1765_v22, %v8571_v29  ;;  %v5803_v52 = vld [vmem:[%s10898_s1 + $0x1e8] sm:$0xf]  ;;  %v8790_v29 = vor.u32 %v6638_v15, %v5693_v45  ;;  %v2454_v13 = vunpack.c.l.b16 %v2431_v40  ;;  %v2433_v22 = vld [vmem:[%s6944_s9 + $0x10] sm:$0x33] }
 0x1d4   : > { %2600 = vmatpush.bf16.msra.mxu1 %v8712_v2  ;;  %11340 = vst [vmem:[#allocation56_spill] sm:$0xff] %v8747_v53  ;;  %v8798_v47 = vor.u32 %v6661_v34, %v5803_v52  ;;  %v2455_v55 = vunpack.c.h.b16 %v2431_v40  ;;  %v6636_v15 = vld [vmem:[%s10898_s1 + $0x134] sm:$0xf]  ;;  %v5685_v45 = vld [vmem:[%s10898_s1 + $0x138] sm:$0xf0]  ;;  %v1727_v52 = vpop.f32.mrf.mxu2  ;;  %v8812_v18 = vpack.c.b16 %v2254_v5, %v2254_v5  ;;  %v2458_v51 = vunpack.c.l.b16 %v2433_v22 }
 0x1d5   : > { %11344 = vst [vmem:[#allocation46_spill] sm:$0xff] %v8790_v29  ;;  %v2460_v56 = vpack.c.b16 %v11347_v63, %v2454_v13  ;;  %v6634_v63 = vld [vmem:[%s10898_s1 + $0x124] sm:$0xf] }
 0x1d6   : > { %2631 = vmatpush.bf16.msra.mxu0 %v8736_v35  ;;  %11345 = vst [vmem:[#allocation50_spill] sm:$0xff] %v8798_v47 }
 0x1d8   : > { %2833 = vmatpush.bf16.msrb.mxu1 %v8747_v53  ;;  %v8766_v53 = vor.u32 %v6663_v57, %v5811_v46  ;;  %v1748_v2 = vpop.f32.mrf.mxu1  ;;  %v2255_v46 = vunpack.c.h.b16 %v5475_v25  ;;  %v5795_v57 = vld [vmem:[%s10898_s1 + $0x1d8] sm:$0xf]  ;;  %v1766_v34 = vpop.f32.mrf.mxu3  ;;  %v8817_v25 = vor.u32 %v6636_v15, %v5685_v45 }
 0x1d9   : > { %v1711_v35 = vpop.f32.mrf.mxu0 }
 0x1da   : > { %11342 = vst [vmem:[#allocation43_spill] sm:$0xff] %v8766_v53  ;;  %2632 = vmatpush.bf16.msra.mxu0 %v8760_v26  ;;  %v8814_v40 = vpack.c.b16 %v2255_v46, %v2255_v46  ;;  %v1767_v26 = vadd.f32 %v1766_v34, %v1748_v2  ;;  %v2459_v46 = vunpack.c.h.b16 %v2433_v22  ;;  %v5677_v2 = vld [vmem:[%s10898_s1 + $0x128] sm:$0xf0]  ;;  %v2467_v35 = vshll.u32 %v2460_v56, 16  ;;  %v5779_v22 = vld [vmem:[%s10898_s1 + $0x1b8] sm:$0xf] }
 0x1db   : > { %11346 = vst [vmem:[#allocation49_spill] sm:$0xff] %v8817_v25 }
 0x1dc   : > { %2834 = vmatpush.bf16.msrb.mxu1 %v8766_v53  ;;  %v1728_v53 = vadd.f32 %v1727_v52, %v1709_v60  ;;  %v8832_v45 = vadd.f32 %v1767_v26, %v8619_v37  ;;  %v2546_v37 = vunpack.c.h.b16 %v8687_v7  ;;  %v8856_v26 = vpack.c.b16 %v2458_v51, %v2458_v51  ;;  %v6632_v7 = vld [vmem:[%s10898_s1 + $0x114] sm:$0xf]  ;;  %v1729_v51 = vpop.f32.mrf.mxu2 }
 0x1dd   : > { %2372 = vmatmul.bf16.gmra.mxu1 %v8812_v18  ;;  %5645 = vmatmul.msk.bf16.gmra.mxu3 %vm368_vm2, %v8814_v40  ;;  %v8858_v60 = vpack.c.b16 %v2459_v46, %v2459_v46 }
 0x1de   : > { %2633 = vmatpush.bf16.msra.mxu0 %v8790_v29  ;;  %v2461_v29 = vpack.c.b16 %v11349_v28, %v2455_v55  ;;  %v8829_v15 = vadd.f32 %v1728_v53, %v8609_v39  ;;  %v5787_v28 = vld [vmem:[%s10898_s1 + $0x1c8] sm:$0xf]  ;;  %v8845_v55 = vor.u32 %v6634_v63, %v5677_v2  ;;  %v6657_v39 = vld [vmem:[%s10898_s1 + $0x1cc] sm:$0xf0]  ;;  %11352 = vst [vmem:[#allocation54_spill] sm:$0xff] %v8856_v26  ;;  %v2472_v51 = vshll.u32 %v8856_v26, 16 }
 0x1df   : > { %v8854_v53 = vor.u32 %v6657_v39, %v5787_v28  ;;  %11353 = vst [vmem:[#allocation53_spill] sm:$0xff] %v8858_v60  ;;  %v6655_v63 = vld [vmem:[%s10898_s1 + $0x1bc] sm:$0xf0]  ;;  %v2465_v39 = vshrl.u32 %v2460_v56, 16  ;;  %v5771_v56 = vld [vmem:[%s10898_s1 + $0x1a8] sm:$0xf]  ;;  %2408 = vmatmul.bf16.gmra.mxu0 %v8812_v18  ;;  %5647 = vmatmul.msk.bf16.gmra.mxu2 %vm368_vm2, %v8814_v40 }
 0x1e0   : > { %2835 = vmatpush.bf16.msrb.mxu1 %v8798_v47  ;;  %v6659_v47 = vld [vmem:[%s10898_s1 + $0x1dc] sm:$0xf0]  ;;  %v1751_v5 = vpop.f32.mrf.mxu1  ;;  %11350 = vst [vmem:[#allocation52_spill] sm:$0xff] %v8845_v55  ;;  %v2479_v13 = vshll.u32 %v2461_v29, 16  ;;  %v1769_v52 = vpop.f32.mrf.mxu3  ;;  %v8879_v9 = vor.u32 %v6655_v63, %v5779_v22 }
 0x1e1   : > { %v8824_v4 = vor.u32 %v6659_v47, %v5795_v57  ;;  %11351 = vst [vmem:[#allocation51_spill] sm:$0xff] %v8854_v53  ;;  %v2564_v57 = vpack.c.b16 %v2546_v37, %v2546_v37  ;;  %v5669_v47 = vld [vmem:[%s10898_s1 + $0x118] sm:$0xf0]  ;;  %v1770_v2 = vadd.f32 %v1769_v52, %v1751_v5  ;;  %v1782_v28 = vpop.f32.mrf.mxu0  ;;  %v2469_v37 = vrot.slane %v2467_v35, 1  ;;  %v6664_v5 = vld [vmem:[%s10898_s1 + $0x20c] sm:$0xf] }
 0x1e2   : > { %2634 = vmatpush.bf16.msra.mxu0 %v8817_v25  ;;  %v8871_v34 = vor.u32 %v6632_v7, %v5669_v47  ;;  %11356 = vst [vmem:[#allocation58_spill] sm:$0xff] %v8879_v9  ;;  %v2484_v7 = vshll.u32 %v8858_v60, 16  ;;  %v5821_v35 = vld [vmem:[%s10898_s1 + $0x210] sm:$0xf0]  ;;  %v8914_v52 = vrot.slane %v2472_v51, 1 }
 0x1e3   : > { %11348 = vst [vmem:[#allocation63_spill] sm:$0xff] %v8824_v4  ;;  %v8874_v46 = vand.u32 %v2564_v57, %v6905_v20  ;;  %v8885_v57 = vadd.f32 %v1770_v2, %v8666_v36  ;;  %v2470_v22 = vor.u32 %v2469_v37, %v2465_v39  ;;  %v6662_v39 = vld [vmem:[%s10898_s1 + $0x1fc] sm:$0xf]  ;;  %v5813_v51 = vld [vmem:[%s10898_s1 + $0x200] sm:$0xf0] }
 0x1e4   : > { %2836 = vmatpush.bf16.msrb.mxu1 %v8824_v4  ;;  %11354 = vst [vmem:[#allocation68_spill] sm:$0xff] %v8871_v34  ;;  %v2477_v4 = vshrl.u32 %v2461_v29, 16  ;;  %v6653_v29 = vld [vmem:[%s10898_s1 + $0x1ac] sm:$0xf0]  ;;  %v8916_v2 = vrot.slane %v2484_v7, 1 }
 0x1e5   : > { %11355 = vst [vmem:[#allocation55_spill] sm:$0xff] %v8874_v46  ;;  %2654 = vmatpush.bf16.msra.mxu2 %v8874_v46  ;;  %v8899_v36 = vor.u32 %v6653_v29, %v5771_v56  ;;  %v5763_v56 = vld [vmem:[%s10898_s1 + $0x198] sm:$0xf]  ;;  %v6651_v29 = vld [vmem:[%s10898_s1 + $0x19c] sm:$0xf0] }
 0x1e6   : > { %2635 = vmatpush.bf16.msra.mxu0 %v8845_v55  ;;  %v2481_v55 = vrot.slane %v2479_v13, 1  ;;  %v8911_v13 = vor.u32 %v6664_v5, %v5821_v35  ;;  %v8929_v37 = vor.u32 %v6651_v29, %v5763_v56  ;;  %v6648_v25 = vld [vmem:[%s6944_s9 + $0x1c] sm:$0xf]  ;;  %v5881_v40 = vld [vmem:[%s10898_s1 + $0x260] sm:$0xf] }
 0x1e7   : > { %11357 = vst [vmem:[#allocation60_spill] sm:$0xff] %v8899_v36 }
 0x1e8   : > { %2837 = vmatpush.bf16.msrb.mxu1 %v8854_v53  ;;  %v1753_v53 = vpop.f32.mrf.mxu1  ;;  %11358 = vst [vmem:[#allocation59_spill] sm:$0xff] %v8911_v13  ;;  %v2482_v63 = vor.u32 %v2481_v55, %v2477_v4  ;;  %v1771_v4 = vpop.f32.mrf.mxu3 }
 0x1e9   : > { %v8907_v53 = vld [vmem:[%s10898_s1 + $0x218] sm:$0xff]  ;;  %v1800_v55 = vpop.f32.mrf.mxu2  ;;  %11359 = vst [vmem:[#allocation62_spill] sm:$0xff] %v8929_v37  ;;  %v1784_v35 = vpop.f32.mrf.mxu0 }
 0x1ea   : > { %2636 = vmatpush.bf16.msra.mxu0 %v8871_v34  ;;  %v2785_v47 = vunpack.c.l.b16 %v8907_v53  ;;  %v1801_v7 = vadd.f32 %v1800_v55, %v1782_v28  ;;  %v8947_v56 = vsel %vm1083_vm3, %v2482_v63, %v8916_v2  ;;  %v6660_v28 = vld [vmem:[%s10898_s1 + $0x1ec] sm:$0xf]  ;;  %v6681_v63 = vld [vmem:[%s10898_s1 + $0x294] sm:$0xf0]  ;;  %v6658_v4 = vld [vmem:[%s10898_s1 + $0x1dc] sm:$0xf] }
 0x1eb   : > { %11363 = vst [vmem:[#allocation67_spill] sm:$0xff] %v8947_v56  ;;  %v5797_v55 = vld [vmem:[%s10898_s1 + $0x1e0] sm:$0xf0] }
 0x1ec   : > { %2838 = vmatpush.bf16.msrb.mxu1 %v8879_v9  ;;  %v2803_v5 = vpack.c.b16 %v2785_v47, %v2785_v47  ;;  %v8943_v9 = vsel %vm1083_vm3, %v2470_v22, %v8914_v52  ;;  %v8950_v29 = vadd.f32 %v1801_v7, %v8725_v32  ;;  %v5805_v22 = vld [vmem:[%s10898_s1 + $0x1f0] sm:$0xf0]  ;;  %v5905_v32 = vld [vmem:[%s10898_s1 + $0x290] sm:$0xf] }
 0x1ed   : > { %11362 = vst [vmem:[#allocation64_spill] sm:$0xff] %v8943_v9  ;;  %2601 = vmatmul.bf16.vlgmr.msra.gmra.mxu1 %v8943_v9  ;;  %5729 = vmatmul.msk.bf16.vlgmr.msra.gmra.mxu3 %vm368_vm2, %v8947_v56 }
 0x1ee   : > { %2869 = vmatpush.bf16.msrb.mxu0 %v8911_v13  ;;  %v8937_v13 = vor.u32 %v6662_v39, %v5813_v51  ;;  %v8972_v39 = vor.u32 %v6681_v63, %v5905_v32  ;;  %v5897_v51 = vld [vmem:[%s10898_s1 + $0x280] sm:$0xf]  ;;  %v6679_v32 = vld [vmem:[%s10898_s1 + $0x284] sm:$0xf0] }
 0x1ef   : > { %2637 = vmatmul.bf16.vlgmr.msra.gmra.mxu0 %v8943_v9  ;;  %5731 = vmatmul.msk.bf16.vlgmr.msra.gmra.mxu2 %vm368_vm2, %v8947_v56  ;;  %v5829_v9 = vld [vmem:[%s6944_s9 + $0x40] sm:$0x33] }
 0x1f0   : > { %2839 = vmatpush.bf16.msrb.mxu1 %v8899_v36  ;;  %v8935_v36 = vand.u32 %v2803_v5, %v6905_v20  ;;  %11361 = vst [vmem:[#allocation65_spill] sm:$0xff] %v8937_v13  ;;  %v8939_v47 = vpop.f32.mrf.mxu1  ;;  %v8961_v5 = vor.u32 %v6660_v28, %v5805_v22  ;;  %v8984_v28 = vpop.f32.mrf.mxu3  ;;  %v8987_v22 = vor.u32 %v6658_v4, %v5797_v55  ;;  %v5789_v4 = vld [vmem:[%s10898_s1 + $0x1d0] sm:$0xf0]  ;;  %v5889_v55 = vld [vmem:[%s10898_s1 + $0x270] sm:$0xf]  ;;  %v2930_v31 = vunpack.c.l.b16 %v5829_v9 }
 0x1f1   : > { %11365 = vst [vmem:[#allocation70_spill] sm:$0xff] %v8972_v39  ;;  %v1802_v7 = vpop.f32.mrf.mxu2  ;;  %v2931_v12 = vunpack.c.h.b16 %v5829_v9  ;;  %v6689_v9 = vld [vmem:[%s10898_s1 + $0x2dc] sm:$0xf0] }
 0x1f2   : > { %11360 = vst [vmem:[#allocation61_spill] sm:$0xff] %v8935_v36  ;;  %2858 = vmatpush.bf16.msrb.mxu3 %v8935_v36  ;;  %2870 = vmatpush.bf16.msrb.mxu0 %v8937_v13  ;;  %v1803_v63 = vadd.f32 %v1802_v7, %v1784_v35  ;;  %v6656_v35 = vld [vmem:[%s10898_s1 + $0x1cc] sm:$0xf]  ;;  %v2491_v7 = vshrl.u32 %v8858_v60, 16 }
 0x1f3   : > { %11364 = vst [vmem:[#allocation66_spill] sm:$0xff] %v8961_v5  ;;  %v9012_v18 = vor.u32 %v6656_v35, %v5789_v4  ;;  %v6654_v35 = vld [vmem:[%s10898_s1 + $0x1bc] sm:$0xf]  ;;  %v5781_v4 = vld [vmem:[%s10898_s1 + $0x1c0] sm:$0xf0] }
 0x1f4   : > { %2840 = vmatpush.bf16.msrb.mxu1 %v8929_v37  ;;  %11366 = vst [vmem:[#allocation69_spill] sm:$0xff] %v8987_v22  ;;  %v8992_v37 = vor.u32 %v6679_v32, %v5897_v51  ;;  %v8997_v34 = vadd.f32 %v1803_v63, %v8773_v3  ;;  %v2488_v3 = vshrl.u32 %v8856_v26, 16  ;;  %v6677_v51 = vld [vmem:[%s10898_s1 + $0x274] sm:$0xf0]  ;;  %v6649_v63 = vld [vmem:[%s6944_s9 + $0x1c] sm:$0xf0]  ;;  %v9049_v38 = vor.u32 %v2491_v7, %v8916_v2 }
 0x1f5   : > { %11368 = vst [vmem:[#allocation71_spill] sm:$0xff] %v9012_v18  ;;  %v5755_v32 = vld [vmem:[%s6944_s9 + $0x18] sm:$0xf]  ;;  %v5757_v26 = vld [vmem:[%s6944_s9 + $0x20] sm:$0xf0] }
 0x1f6   : > { %2871 = vmatpush.bf16.msrb.mxu0 %v8961_v5  ;;  %11367 = vst [vmem:[#allocation72_spill] sm:$0xff] %v8992_v37  ;;  %v5735_v5 = vld [vmem:[%s6944_s9 + $0x28] sm:$0x33]  ;;  %v5756_v11 = vor.u32 %v6649_v63, %v5755_v32  ;;  %v5760_v16 = vor.u32 %v6648_v25, %v5757_v26  ;;  %v5873_v2 = vld [vmem:[%s10898_s1 + $0x250] sm:$0xf]  ;;  %v2786_v26 = vunpack.c.h.b16 %v8907_v53 }
 0x1f7   : > { %11372 = vst [vmem:[#allocation75_spill] sm:$0xff] %v9049_v38  ;;  %v6650_v53 = vld [vmem:[%s10898_s1 + $0x19c] sm:$0xf]  ;;  %v5765_v63 = vld [vmem:[%s10898_s1 + $0x1a0] sm:$0xf0] }
 0x1f8   : > { %3062 = vmatpush.bf16.msra.mxu1 %v8972_v39  ;;  %v1787_v39 = vpop.f32.mrf.mxu0  ;;  %v8994_v13 = vpop.f32.mrf.mxu1  ;;  %v2719_v7 = vshll.u32 %v5760_v16, 16  ;;  %v2804_v32 = vpack.c.b16 %v2786_v26, %v2786_v26 }
 0x1f9   : > { %v1805_v60 = vpop.f32.mrf.mxu2 }
 0x1fa   : > { %2872 = vmatpush.bf16.msrb.mxu0 %v8987_v22  ;;  %v6675_v22 = vld [vmem:[%s10898_s1 + $0x264] sm:$0xf0]  ;;  %v1806_v36 = vadd.f32 %v1805_v60, %v1787_v39  ;;  %v6652_v60 = vld [vmem:[%s10898_s1 + $0x1ac] sm:$0xf] }
 0x1fb   : > { %v9051_v62 = vor.u32 %v6675_v22, %v5881_v40 }
 0x1fc   : > { %3063 = vmatpush.bf16.msra.mxu1 %v8992_v37  ;;  %v9022_v37 = vor.u32 %v6677_v51, %v5889_v55  ;;  %v9037_v55 = vpop.f32.mrf.mxu3  ;;  %v9040_v51 = vor.u32 %v2488_v3, %v8914_v52  ;;  %v2698_v52 = vunpack.c.l.b16 %v5735_v5  ;;  %v2699_v3 = vunpack.c.h.b16 %v5735_v5 }
 0x1fd   : > { %11373 = vst [vmem:[#allocation77_spill] sm:$0xff] %v9051_v62  ;;  %5730 = vmatmul.msk.bf16.gmra.mxu3 %vm368_vm2, %v9049_v38 }
 0x1fe   : > { %11369 = vst [vmem:[#allocation74_spill] sm:$0xff] %v9022_v37  ;;  %2873 = vmatpush.bf16.msrb.mxu0 %v9012_v18  ;;  %2606 = vmatmul.bf16.gmra.mxu1 %v9040_v51  ;;  %v9080_v39 = vpack.c.b16 %v2698_v52, %v2698_v52  ;;  %v9082_v22 = vpack.c.b16 %v2699_v3, %v2699_v3 }
 0x1ff   : > { %11370 = vst [vmem:[#allocation73_spill] sm:$0xff] %v9040_v51  ;;  %v9097_v3 = vor.u32 %v6650_v53, %v5765_v63  ;;  %v9132_v63 = vld [vmem:[%s10898_s1 + $0x2a0] sm:$0xff]  ;;  %2642 = vmatmul.bf16.gmra.mxu0 %v9040_v51  ;;  %5732 = vmatmul.msk.bf16.gmra.mxu2 %vm368_vm2, %v9049_v38 }
 0x200   : > { %3064 = vmatpush.bf16.msra.mxu1 %v9022_v37  ;;  %v9043_v37 = vor.u32 %v6654_v35, %v5781_v4  ;;  %v1789_v46 = vpop.f32.mrf.mxu0  ;;  %v9053_v23 = vpop.f32.mrf.mxu1  ;;  %v9056_v35 = vadd.f32 %v1806_v36, %v8829_v15  ;;  %v6673_v15 = vld [vmem:[%s10898_s1 + $0x254] sm:$0xf0]  ;;  %v2707_v36 = vshll.u32 %v5756_v11, 16  ;;  %v5865_v4 = vld [vmem:[%s10898_s1 + $0x240] sm:$0xf]  ;;  %v2724_v53 = vshll.u32 %v9082_v22, 16 }
 0x201   : > { %v5773_v46 = vld [vmem:[%s10898_s1 + $0x1b0] sm:$0xf0]  ;;  %v9078_v5 = vor.u32 %v6673_v15, %v5873_v2  ;;  %v1807_v40 = vpop.f32.mrf.mxu2  ;;  %11376 = vst [vmem:[#allocation80_spill] sm:$0xff] %v9097_v3  ;;  %v2705_v15 = vshrl.u32 %v5756_v11, 16  ;;  %v5857_v11 = vld [vmem:[%s10898_s1 + $0x230] sm:$0xf] }
 0x202   : > { %11371 = vst [vmem:[#allocation76_spill] sm:$0xff] %v9043_v37  ;;  %2874 = vmatpush.bf16.msrb.mxu0 %v9043_v37  ;;  %v9069_v25 = vor.u32 %v6652_v60, %v5773_v46  ;;  %v9100_v60 = vand.u32 %v2804_v32, %v6905_v20  ;;  %v6671_v46 = vld [vmem:[%s10898_s1 + $0x244] sm:$0xf0]  ;;  %v2709_v26 = vrot.slane %v2707_v36, 1  ;;  %v2717_v37 = vshrl.u32 %v5760_v16, 16 }
 0x203   : > { %11375 = vst [vmem:[#allocation79_spill] sm:$0xff] %v9078_v5  ;;  %v6669_v36 = vld [vmem:[%s10898_s1 + $0x234] sm:$0xf0]  ;;  %v6680_v16 = vld [vmem:[%s10898_s1 + $0x294] sm:$0xf]  ;;  %v2731_v51 = vshrl.u32 %v9082_v22, 16 }
 0x204   : > { %3065 = vmatpush.bf16.msra.mxu1 %v9051_v62  ;;  %11374 = vst [vmem:[#allocation78_spill] sm:$0xff] %v9069_v25  ;;  %v9094_v52 = vpop.f32.mrf.mxu3  ;;  %v2712_v62 = vshll.u32 %v9080_v39, 16  ;;  %2894 = vmatpush.bf16.msrb.mxu2 %v9100_v60  ;;  %v5907_v32 = vld [vmem:[%s10898_s1 + $0x298] sm:$0xf0] }
 0x205   : > { %11377 = vst [vmem:[#allocation81_spill] sm:$0xff] %v9100_v60 }
 0x206   : > { %2875 = vmatpush.bf16.msrb.mxu0 %v9069_v25  ;;  %v2721_v25 = vrot.slane %v2719_v7, 1  ;;  %v9124_v7 = vor.u32 %v6669_v36, %v5857_v11  ;;  %v9141_v36 = vrot.slane %v2724_v53, 1 }
 0x208   : > { %3066 = vmatpush.bf16.msra.mxu1 %v9078_v5  ;;  %v9105_v2 = vpop.f32.mrf.mxu0  ;;  %v9107_v5 = vor.u32 %v6671_v46, %v5865_v4  ;;  %v1831_v40 = vpop.f32.mrf.mxu1  ;;  %11379 = vst [vmem:[#allocation83_spill] sm:$0xff] %v9124_v7  ;;  %v9136_v4 = vor.u32 %v6680_v16, %v5907_v32  ;;  %v3014_v46 = vunpack.c.l.b16 %v9132_v63  ;;  %v2722_v11 = vor.u32 %v2721_v25, %v2717_v37  ;;  %v6667_v16 = vld [vmem:[%s10898_s1 + $0x224] sm:$0xf0] }
 0x209   : > { %v2710_v40 = vor.u32 %v2709_v26, %v2705_v15  ;;  %v9154_v25 = vpop.f32.mrf.mxu2  ;;  %v5899_v26 = vld [vmem:[%s10898_s1 + $0x288] sm:$0xf0]  ;;  %v9274_v27 = vor.u32 %v2731_v51, %v9141_v36  ;;  %v5959_v51 = vld [vmem:[%s10898_s1 + $0x2d8] sm:$0xf] }
 0x20a   : > { %11378 = vst [vmem:[#allocation82_spill] sm:$0xff] %v9107_v5  ;;  %2876 = vmatpush.bf16.msrb.mxu0 %v9097_v3  ;;  %v5849_v3 = vld [vmem:[%s10898_s1 + $0x220] sm:$0xf]  ;;  %v3032_v32 = vpack.c.b16 %v3014_v46, %v3014_v46 }
 0x20b   : > { %11380 = vst [vmem:[#allocation84_spill] sm:$0xff] %v9136_v4  ;;  %v9156_v15 = vor.u32 %v6667_v16, %v5849_v3  ;;  %v9176_v3 = vsel %vm1083_vm3, %v2722_v11, %v9141_v36  ;;  %v6676_v16 = vld [vmem:[%s10898_s1 + $0x274] sm:$0xf]  ;;  %v5991_v11 = vld [vmem:[%s10898_s1 + $0x318] sm:$0xf]  ;;  %v9301_v36 = vor.u32 %v6689_v9, %v5959_v51 }
 0x20c   : > { %3067 = vmatpush.bf16.msra.mxu1 %v9107_v5  ;;  %v9139_v5 = vrot.slane %v2712_v62, 1  ;;  %v6678_v62 = vld [vmem:[%s10898_s1 + $0x284] sm:$0xf]  ;;  %v1849_v37 = vpop.f32.mrf.mxu3 }
 0x20d   : > { %11381 = vst [vmem:[#allocation85_spill] sm:$0xff] %v9156_v15  ;;  %5825 = vmatmul.msk.bf16.vlgmr.msrb.gmra.mxu3 %vm368_vm2, %v9176_v3 }
 0x20e   : > { %3098 = vmatpush.bf16.msra.mxu0 %v9136_v4  ;;  %v9166_v4 = vor.u32 %v6678_v62, %v5899_v26  ;;  %v9172_v37 = vsel %vm1083_vm3, %v2710_v40, %v9139_v5  ;;  %v6697_v62 = vld [vmem:[%s10898_s1 + $0x31c] sm:$0xf0]  ;;  %11393 = vst [vmem:[#allocation97_spill] sm:$0xff] %v9301_v36 }
 0x20f   : > { %2841 = vmatmul.bf16.vlgmr.msrb.gmra.mxu1 %v9172_v37  ;;  %v9198_v26 = vor.u32 %v6697_v62, %v5991_v11  ;;  %v5983_v11 = vld [vmem:[%s10898_s1 + $0x308] sm:$0xf]  ;;  %v6695_v62 = vld [vmem:[%s10898_s1 + $0x30c] sm:$0xf0]  ;;  %2877 = vmatmul.bf16.vlgmr.msrb.gmra.mxu0 %v9172_v37 }
 0x210   : > { %3068 = vmatpush.bf16.msra.mxu1 %v9124_v7  ;;  %v9161_v53 = vpop.f32.mrf.mxu0  ;;  %v9164_v7 = vand.u32 %v3032_v32, %v6905_v20  ;;  %11383 = vst [vmem:[#allocation87_spill] sm:$0xff] %v9166_v4  ;;  %v9168_v46 = vpop.f32.mrf.mxu1  ;;  %v5891_v32 = vld [vmem:[%s10898_s1 + $0x278] sm:$0xf0]  ;;  %5827 = vmatmul.msk.bf16.vlgmr.msrb.gmra.mxu2 %vm368_vm2, %v9176_v3 }
 0x211   : > { %v9187_v40 = vor.u32 %v6676_v16, %v5891_v32  ;;  %11385 = vst [vmem:[#allocation89_spill] sm:$0xff] %v9198_v26  ;;  %v6674_v16 = vld [vmem:[%s10898_s1 + $0x264] sm:$0xf]  ;;  %v5883_v32 = vld [vmem:[%s10898_s1 + $0x268] sm:$0xf0] }
 0x212   : > { %11382 = vst [vmem:[#allocation86_spill] sm:$0xff] %v9164_v7  ;;  %3087 = vmatpush.bf16.msra.mxu3 %v9164_v7  ;;  %3099 = vmatpush.bf16.msra.mxu0 %v9166_v4  ;;  %v9212_v18 = vor.u32 %v6674_v16, %v5883_v32  ;;  %v9222_v7 = vor.u32 %v6695_v62, %v5983_v11  ;;  %v6672_v16 = vld [vmem:[%s10898_s1 + $0x254] sm:$0xf]  ;;  %v5875_v32 = vld [vmem:[%s10898_s1 + $0x258] sm:$0xf0] }
 0x213   : > { %11384 = vst [vmem:[#allocation88_spill] sm:$0xff] %v9187_v40  ;;  %v9238_v11 = vor.u32 %v6672_v16, %v5875_v32  ;;  %v6693_v62 = vld [vmem:[%s10898_s1 + $0x2fc] sm:$0xf0]  ;;  %v6670_v16 = vld [vmem:[%s10898_s1 + $0x244] sm:$0xf] }
 0x214   : > { %3069 = vmatpush.bf16.msra.mxu1 %v9156_v15  ;;  %v9207_v15 = vpop.f32.mrf.mxu2  ;;  %v9209_v4 = vpop.f32.mrf.mxu3  ;;  %11386 = vst [vmem:[#allocation90_spill] sm:$0xff] %v9212_v18  ;;  %v5867_v32 = vld [vmem:[%s10898_s1 + $0x248] sm:$0xf0] }
 0x215   : > { %11387 = vst [vmem:[#allocation91_spill] sm:$0xff] %v9222_v7 }
 0x216   : > { %3100 = vmatpush.bf16.msra.mxu0 %v9187_v40  ;;  %v5975_v40 = vld [vmem:[%s10898_s1 + $0x2f8] sm:$0xf]  ;;  %11388 = vst [vmem:[#allocation92_spill] sm:$0xff] %v9238_v11 }
 0x217   : > { %v9247_v56 = vor.u32 %v6693_v62, %v5975_v40  ;;  %v9265_v40 = vor.u32 %v6670_v16, %v5867_v32  ;;  %v6691_v62 = vld [vmem:[%s10898_s1 + $0x2ec] sm:$0xf0]  ;;  %v6668_v16 = vld [vmem:[%s10898_s1 + $0x234] sm:$0xf]  ;;  %v9303_v32 = vpack.c.b16 %v2930_v31, %v2930_v31  ;;  %v5951_v31 = vld [vmem:[%s10898_s1 + $0x2c8] sm:$0xf] }
 0x218   : > { %3291 = vmatpush.bf16.msrb.mxu1 %v9198_v26  ;;  %v9220_v26 = vpop.f32.mrf.mxu0  ;;  %v9224_v60 = vpop.f32.mrf.mxu1 }
 0x219   : > { %11389 = vst [vmem:[#allocation93_spill] sm:$0xff] %v9247_v56  ;;  %v2942_v49 = vshll.u32 %v9303_v32, 16 }
 0x21a   : > { %3101 = vmatpush.bf16.msra.mxu0 %v9212_v18  ;;  %v5967_v18 = vld [vmem:[%s10898_s1 + $0x2e8] sm:$0xf]  ;;  %11390 = vst [vmem:[#allocation94_spill] sm:$0xff] %v9265_v40 }
 0x21b   : > { %v9276_v19 = vor.u32 %v6691_v62, %v5967_v18  ;;  %v9305_v62 = vpack.c.b16 %v2931_v12, %v2931_v12 }
 0x21c   : > { %3292 = vmatpush.bf16.msrb.mxu1 %v9222_v7  ;;  %v2728_v7 = vshrl.u32 %v9080_v39, 16  ;;  %v9260_v39 = vpop.f32.mrf.mxu2  ;;  %v9262_v22 = vpop.f32.mrf.mxu3 }
 0x21d   : > { %11391 = vst [vmem:[#allocation95_spill] sm:$0xff] %v9276_v19  ;;  %5826 = vmatmul.msk.bf16.gmra.mxu3 %vm368_vm2, %v9274_v27 }
 0x21e   : > { %3102 = vmatpush.bf16.msra.mxu0 %v9238_v11  ;;  %v9271_v38 = vor.u32 %v2728_v7, %v9139_v5  ;;  %v3015_v5 = vunpack.c.h.b16 %v9132_v63  ;;  %v2937_v7 = vshll.u32 %v8710_v54, 16  ;;  %v6666_v63 = vld [vmem:[%s10898_s1 + $0x224] sm:$0xf]  ;;  %v2935_v11 = vshrl.u32 %v8710_v54, 16  ;;  %v5943_v54 = vld [vmem:[%s10898_s1 + $0x2b8] sm:$0xf] }
 0x220   : > { %3293 = vmatpush.bf16.msrb.mxu1 %v9247_v56  ;;  %v1867_v56 = vpop.f32.mrf.mxu0  ;;  %v9278_v10 = vpop.f32.mrf.mxu1  ;;  %v2939_v58 = vrot.slane %v2937_v7, 1  ;;  %v6685_v7 = vld [vmem:[%s10898_s1 + $0x2bc] sm:$0xf0]  ;;  %2882 = vmatmul.bf16.gmra.mxu0 %v9271_v38 }
 0x221   : > { %v5859_v56 = vld [vmem:[%s10898_s1 + $0x238] sm:$0xf0]  ;;  %2846 = vmatmul.bf16.gmra.mxu1 %v9271_v38  ;;  %5828 = vmatmul.msk.bf16.gmra.mxu2 %vm368_vm2, %v9274_v27 }
 0x222   : > { %3103 = vmatpush.bf16.msra.mxu0 %v9265_v40  ;;  %v9291_v18 = vor.u32 %v6668_v16, %v5859_v56  ;;  %v2948_v16 = vshll.u32 %v8717_v6, 16  ;;  %v3033_v56 = vpack.c.b16 %v3015_v5, %v3015_v5 }
 0x224   : > { %3294 = vmatpush.bf16.msrb.mxu1 %v9276_v19  ;;  %11392 = vst [vmem:[#allocation96_spill] sm:$0xff] %v9291_v18  ;;  %v5851_v19 = vld [vmem:[%s10898_s1 + $0x228] sm:$0xf0]  ;;  %v1885_v51 = vpop.f32.mrf.mxu2  ;;  %v9318_v12 = vpop.f32.mrf.mxu3  ;;  %v9324_v5 = vand.u32 %v3033_v56, %v6905_v20  ;;  %v5993_v56 = vld [vmem:[%s10898_s1 + $0x320] sm:$0xf0] }
 0x225   : > { %v9321_v9 = vor.u32 %v6666_v63, %v5851_v19  ;;  %v2950_v19 = vrot.slane %v2948_v16, 1  ;;  %v2953_v63 = vshll.u32 %v9305_v62, 16  ;;  %v9350_v16 = vor.u32 %v6685_v7, %v5943_v54 }
 0x226   : > { %3104 = vmatpush.bf16.msra.mxu0 %v9291_v18  ;;  %11395 = vst [vmem:[#allocation99_spill] sm:$0xff] %v9324_v5  ;;  %v2946_v18 = vshrl.u32 %v8717_v6, 16  ;;  %3123 = vmatpush.bf16.msra.mxu2 %v9324_v5  ;;  %v6696_v6 = vld [vmem:[%s10898_s1 + $0x31c] sm:$0xf]  ;;  %v2940_v54 = vor.u32 %v2939_v58, %v2935_v11  ;;  %v9367_v7 = vrot.slane %v2942_v49, 1  ;;  %v1957_v5 = vadd.f32 %v9209_v4, %v9168_v46 }
 0x227   : > { %11394 = vst [vmem:[#allocation98_spill] sm:$0xff] %v9321_v9  ;;  %v6683_v58 = vld [vmem:[%s10898_s1 + $0x2ac] sm:$0xf0] }
 0x228   : > { %3295 = vmatpush.bf16.msrb.mxu1 %v9301_v36  ;;  %v6687_v36 = vld [vmem:[%s10898_s1 + $0x2cc] sm:$0xf0]  ;;  %v1974_v40 = vpop.f32.mrf.mxu0  ;;  %v1945_v51 = vpop.f32.mrf.mxu1  ;;  %11397 = vst [vmem:[#allocation101_spill] sm:$0xff] %v9350_v16 }
 0x229   : > { %v9330_v8 = vor.u32 %v6687_v36, %v5951_v31  ;;  %v1843_v36 = vadd.f32 %v8984_v28, %v8939_v47  ;;  %v9358_v31 = vld [vmem:[%s10898_s1 + $0x328] sm:$0xff]  ;;  %v1879_v51 = vadd.f32 %v9154_v25, %v9105_v2  ;;  %v9364_v47 = vor.u32 %v6696_v6, %v5993_v56 }
 0x22a   : > { %3105 = vmatpush.bf16.msra.mxu0 %v9321_v9  ;;  %v3243_v28 = vunpack.c.l.b16 %v9358_v31  ;;  %v9369_v9 = vrot.slane %v2953_v63, 1  ;;  %v5935_v2 = vld [vmem:[%s10898_s1 + $0x2a8] sm:$0xf]  ;;  %v6694_v25 = vld [vmem:[%s10898_s1 + $0x30c] sm:$0xf] }
 0x22b   : > { %11396 = vst [vmem:[#allocation100_spill] sm:$0xff] %v9330_v8  ;;  %v1887_v11 = vadd.f32 %v1843_v36, %v8776_v59  ;;  %v1888_v63 = vadd.f32 %v1879_v51, %v8950_v29  ;;  %v9398_v59 = vsel %vm1083_vm3, %v2940_v54, %v9367_v7  ;;  %v6692_v29 = vld [vmem:[%s10898_s1 + $0x2fc] sm:$0xf]  ;;  %v1845_v51 = vadd.f32 %v9037_v55, %v8994_v13 }
 0x22c   : > { %3296 = vmatpush.bf16.msrb.mxu1 %v9330_v8  ;;  %11398 = vst [vmem:[#allocation102_spill] sm:$0xff] %v9364_v47  ;;  %v2951_v8 = vor.u32 %v2950_v19, %v2946_v18  ;;  %v3261_v49 = vpack.c.b16 %v3243_v28, %v3243_v28  ;;  %v1963_v4 = vpop.f32.mrf.mxu3  ;;  %v1992_v46 = vpop.f32.mrf.mxu2  ;;  %v9385_v18 = vor.u32 %v6683_v58, %v5935_v2  ;;  %v5985_v19 = vld [vmem:[%s10898_s1 + $0x310] sm:$0xf0] }
 0x22d   : > { %v1993_v6 = vadd.f32 %v1992_v46, %v1974_v40  ;;  %v2001_v2 = vadd.f32 %v1957_v5, %v1887_v11  ;;  %v5977_v40 = vld [vmem:[%s10898_s1 + $0x300] sm:$0xf0]  ;;  %v1881_v5 = vadd.f32 %v9207_v15, %v9161_v53  ;;  %v1959_v13 = vadd.f32 %v9262_v22, %v9224_v60  ;;  %v6690_v53 = vld [vmem:[%s10898_s1 + $0x2ec] sm:$0xf] }
 0x22e   : > { %3327 = vmatpush.bf16.msrb.mxu0 %v9364_v47  ;;  %v9392_v28 = vand.u32 %v3261_v49, %v6905_v20  ;;  %v9402_v36 = vsel %vm1083_vm3, %v2951_v8, %v9369_v9  ;;  %v9415_v8 = vor.u32 %v6692_v29, %v5977_v40  ;;  %v9422_v49 = vld [vmem:[%s10899_s2] ss:$0 sm:$0xff]  ;;  %v11399_v55 = vmax.f32 %v8134_v43, %v8164_v0  ;;  %v5953_v40 = vld [vmem:[%s10898_s1 + $0x2d0] sm:$0xf0] }
 0x22f   : > { %v2002_v58 = vadd.f32 %v1993_v6, %v1888_v63  ;;  %5911 = vmatmul.msk.bf16.vlgmr.msra.gmra.mxu3 %vm368_vm2, %v9402_v36  ;;  %v1889_v11 = vadd.f32 %v1845_v51, %v8832_v45  ;;  %v1890_v60 = vadd.f32 %v1881_v5, %v8997_v34  ;;  %v6688_v6 = vld [vmem:[%s10898_s1 + $0x2dc] sm:$0xf]  ;;  %v5961_v34 = vld [vmem:[%s10898_s1 + $0x2e0] sm:$0xf0]  ;;  %v2960_v29 = vshrl.u32 %v9305_v62, 16 }
 0x230   : > { %3297 = vmatpush.bf16.msrb.mxu1 %v9350_v16  ;;  %v1976_v56 = vpop.f32.mrf.mxu0  ;;  %v9394_v16 = vor.u32 %v6694_v25, %v5985_v19  ;;  %v2184_v47 = vpop.f32.mrf.mxu1  ;;  %3316 = vmatpush.bf16.msrb.mxu3 %v9392_v28  ;;  %v5969_v25 = vld [vmem:[%s10898_s1 + $0x2f0] sm:$0xf0] }
 0x231   : > { %v2007_v54 = vmax.f32 %v2001_v2, %v2002_v58  ;;  %3070 = vmatmul.bf16.vlgmr.msra.gmra.mxu1 %v9398_v59  ;;  %v2003_v63 = vadd.f32 %v1959_v13, %v1889_v11  ;;  %v9462_v2 = vor.u32 %v6688_v6, %v5961_v34  ;;  %v5945_v11 = vld [vmem:[%s10898_s1 + $0x2c0] sm:$0xf0]  ;;  %3106 = vmatmul.bf16.vlgmr.msra.gmra.mxu0 %v9398_v59 }
 0x232   : > { %3328 = vmatpush.bf16.msrb.mxu0 %v9394_v16  ;;  %5913 = vmatmul.msk.bf16.vlgmr.msra.gmra.mxu2 %vm368_vm2, %v9402_v36 }
 0x233   : > { %v2010_v15 = vmax.f32 %v11399_v55, %v2007_v54  ;;  %v9492_v55 = vor.u32 %v2960_v29, %v9369_v9 }
 0x234   : > { %3298 = vmatpush.bf16.msrb.mxu1 %v9385_v18  ;;  %3397 = vmatpush.bf16.msra.mxu3 %v8308_v24  ;;  %v2202_v4 = vpop.f32.mrf.mxu3  ;;  %v9442_v24 = vor.u32 %v6690_v53, %v5969_v25  ;;  %v6684_v25 = vld [vmem:[%s10898_s1 + $0x2bc] sm:$0xf] }
 0x235   : > { %v2017_v43 = vadd.f32 %v9422_v49, %v2010_v15  ;;  %v9446_v22 = vadd.f32 %v2202_v4, %v2184_v47  ;;  %v1848_v47 = vadd.f32 %v9094_v52, %v9053_v23  ;;  %v1962_v23 = vadd.f32 %v9318_v12, %v9278_v10 }
 0x236   : > { %3329 = vmatpush.bf16.msrb.mxu0 %v9415_v8  ;;  %v11400_v52 = vmax.f32 %v8145_v48, %v8195_v17  ;;  %v9502_v9 = vor.u32 %v6684_v25, %v5945_v11  ;;  %v11407_v25 = vld [vmem:[#allocation9_spill] sm:$0xff]  ;;  %v11408_v11 = vld [vmem:[#allocation6_spill] sm:$0xff] }
 0x237   : > { %2020 = vst [vmem:[#allocation2] sm:$0xff] %v2017_v43  ;;  %v1891_v62 = vadd.f32 %v1848_v47, %v8885_v57 }
 0x238   : > { %3372 = vmatpush.bf16.msra.mxu1 %v8174_v61  ;;  %v1994_v61 = vpop.f32.mrf.mxu2  ;;  %v1979_v46 = vpop.f32.mrf.mxu0 }
 0x239   : > { %v1995_v0 = vadd.f32 %v1994_v61, %v1976_v56  ;;  %v2186_v19 = vpop.f32.mrf.mxu1  ;;  %v2957_v56 = vshrl.u32 %v9303_v32, 16  ;;  %v6686_v32 = vld [vmem:[%s10898_s1 + $0x2cc] sm:$0xf]  ;;  %v3244_v61 = vunpack.c.h.b16 %v9358_v31  ;;  %v11401_v31 = vmax.f32 %v8154_v50, %v8225_v14 }
 0x23a   : > { %3330 = vmatpush.bf16.msrb.mxu0 %v9442_v24  ;;  %v9486_v48 = vor.u32 %v6686_v32, %v5953_v40 }
 0x23b   : > { %v2004_v45 = vadd.f32 %v1995_v0, %v1890_v60  ;;  %v9483_v10 = vor.u32 %v2957_v56, %v9367_v7  ;;  %v2005_v7 = vadd.f32 %v1962_v23, %v1891_v62  ;;  %v3177_v0 = vshll.u32 %v8517_v30, 16 }
 0x23c   : > { %3373 = vmatpush.bf16.msra.mxu1 %v8189_v33  ;;  %v1884_v33 = vadd.f32 %v9260_v39, %v9220_v26  ;;  %v5915_v39 = vld [vmem:[%s6944_s9 + $0x58] sm:$0x33]  ;;  %v2204_v5 = vpop.f32.mrf.mxu3  ;;  %v3164_v56 = vshrl.u32 %v8515_v42, 16 }
 0x23d   : > { %v2008_v58 = vmax.f32 %v2003_v63, %v2004_v45  ;;  %v9489_v54 = vadd.f32 %v2204_v5, %v2186_v19  ;;  %v3160_v15 = vunpack.c.h.b16 %v5915_v39  ;;  %v6682_v63 = vld [vmem:[%s10898_s1 + $0x2ac] sm:$0xf]  ;;  %v5937_v45 = vld [vmem:[%s10898_s1 + $0x2b0] sm:$0xf0] }
 0x23e   : > { %3331 = vmatpush.bf16.msrb.mxu0 %v9462_v2  ;;  %v9525_v47 = vor.u32 %v6682_v63, %v5937_v45  ;;  %v11410_v63 = vld [vmem:[#allocation11_spill] sm:$0xff] }
 0x23f   : > { %v2011_v26 = vmax.f32 %v11400_v52, %v2008_v58  ;;  %5912 = vmatmul.msk.bf16.gmra.mxu3 %vm368_vm2, %v9492_v55  ;;  %v9511_v43 = vpack.c.b16 %v3160_v15, %v3160_v15  ;;  %v3175_v52 = vshrl.u32 %v8517_v30, 16 }
 0x240   : > { %3374 = vmatpush.bf16.msra.mxu1 %v8204_v1  ;;  %v1892_v1 = vadd.f32 %v1884_v33, %v9056_v35  ;;  %v1997_v51 = vpop.f32.mrf.mxu2  ;;  %v1981_v13 = vpop.f32.mrf.mxu0  ;;  %v3159_v35 = vunpack.c.l.b16 %v5915_v39 }
 0x241   : > { %v2018_v17 = vadd.f32 %v9422_v49, %v2011_v26  ;;  %v1998_v12 = vadd.f32 %v1997_v51, %v1979_v46  ;;  %v2189_v57 = vpop.f32.mrf.mxu1  ;;  %3075 = vmatmul.bf16.gmra.mxu1 %v9483_v10  ;;  %v3262_v46 = vpack.c.b16 %v3244_v61, %v3244_v61  ;;  %v3179_v26 = vrot.slane %v3177_v0, 1  ;;  %v11404_v51 = vld [vmem:[#allocation26_spill] sm:$0xff]  ;;  %v11405_v13 = vld [vmem:[#allocation7_spill] sm:$0xff]  ;;  %v11409_v61 = vld [vmem:[#allocation20_spill] sm:$0xff]  ;;  %3111 = vmatmul.bf16.gmra.mxu0 %v9483_v10 }
 0x242   : > { %3332 = vmatpush.bf16.msrb.mxu0 %v9486_v48  ;;  %v9509_v60 = vpack.c.b16 %v3159_v35, %v3159_v35  ;;  %v3182_v39 = vshll.u32 %v9511_v43, 16  ;;  %5914 = vmatmul.msk.bf16.gmra.mxu2 %vm368_vm2, %v9492_v55 }
 0x243   : > { %2021 = vst [vmem:[#allocation2 + $0x8] sm:$0xff] %v2018_v17  ;;  %v2006_v53 = vadd.f32 %v1998_v12, %v1892_v1  ;;  %v3180_v40 = vor.u32 %v3179_v26, %v3175_v52  ;;  %v11403_v1 = vld [vmem:[#allocation4_spill] sm:$0xff] }
 0x244   : > { %3375 = vmatpush.bf16.msra.mxu1 %v8218_v21  ;;  %v3166_v21 = vshll.u32 %v8515_v42, 16  ;;  %v2207_v34 = vpop.f32.mrf.mxu3  ;;  %v3171_v23 = vshll.u32 %v9509_v60, 16  ;;  %v3184_v62 = vrot.slane %v3182_v39, 1 }
 0x245   : > { %v2009_v4 = vmax.f32 %v2005_v7, %v2006_v53  ;;  %v2208_v14 = vadd.f32 %v2207_v34, %v2189_v57  ;;  %v11406_v7 = vld [vmem:[#allocation3_spill] sm:$0xff]  ;;  %v3189_v34 = vshrl.u32 %v9511_v43, 16  ;;  %v11416_v43 = vld [vmem:[#allocation14_spill] sm:$0xff] }
 0x246   : > { %3333 = vmatpush.bf16.msrb.mxu0 %v9502_v9  ;;  %v3168_v58 = vrot.slane %v3166_v21, 1  ;;  %v3173_v32 = vrot.slane %v3171_v23, 1  ;;  %v9549_v15 = vsel %vm1083_vm3, %v3180_v40, %v3184_v62  ;;  %v11417_v40 = vld [vmem:[#allocation15_spill] sm:$0xff] }
 0x247   : > { %v2012_v19 = vmax.f32 %v11401_v31, %v2009_v4 }
 0x248   : > { %3376 = vmatpush.bf16.msra.mxu1 %v8233_v44  ;;  %v1999_v6 = vpop.f32.mrf.mxu2  ;;  %v9528_v44 = vand.u32 %v3262_v46, %v6905_v20  ;;  %v2220_v33 = vpop.f32.mrf.mxu0  ;;  %v11402_v20 = vld [vmem:[#allocation5_spill] sm:$0xff] }
 0x249   : > { %v2019_v50 = vadd.f32 %v9422_v49, %v2012_v19  ;;  %v2191_v29 = vpop.f32.mrf.mxu1  ;;  %v3169_v49 = vor.u32 %v3168_v58, %v3164_v56  ;;  %v3186_v6 = vshrl.u32 %v9509_v60, 16 }
 0x24a   : > { %3352 = vmatpush.bf16.msrb.mxu2 %v9528_v44  ;;  %3334 = vmatpush.bf16.msrb.mxu0 %v9525_v47 }
 0x24b   : > { %2022 = vst [vmem:[#allocation2 + $0x10] sm:$0x7] %v2019_v50  ;;  %v9546_v35 = vsel %vm1083_vm3, %v3169_v49, %v3173_v32  ;;  %v11412_v50 = vld [vmem:[#allocation21_spill] sm:$0xff]  ;;  %v9569_v26 = vor.u32 %v3186_v6, %v3173_v32  ;;  %v11429_v6 = vld [vmem:[#allocation42_spill] sm:$0xff] }
 0x24c   : > { %3377 = vmatpush.bf16.msra.mxu1 %v8250_v41  ;;  %v2209_v5 = vpop.f32.mrf.mxu3  ;;  %v11415_v49 = vld [vmem:[#allocation13_spill] sm:$0xff] }
 0x24e   : > { %3408 = vmatpush.bf16.msra.mxu0 %v11402_v20  ;;  %3433 = vmatpush.bf16.msra.mxu2 %v11404_v51  ;;  %v11414_v20 = vld [vmem:[#allocation12_spill] sm:$0xff] }
 0x24f   : > { %5997 = vmatmul.msk.bf16.vlgmr.msrb.gmra.mxu3 %vm368_vm2, %v9549_v15 }
 0x250   : > { %3378 = vmatpush.bf16.msra.mxu1 %v11403_v1  ;;  %v2238_v41 = vpop.f32.mrf.mxu2  ;;  %v2222_v12 = vpop.f32.mrf.mxu0  ;;  %3469 = vmatpush.bf16.msrb.mxu3 %v11409_v61 }
 0x251   : > { %v2239_v17 = vadd.f32 %v2238_v41, %v2220_v33  ;;  %v2368_v57 = vpop.f32.mrf.mxu1  ;;  %3299 = vmatmul.bf16.vlgmr.msrb.gmra.mxu1 %v9546_v35  ;;  %v11413_v33 = vld [vmem:[#allocation10_spill] sm:$0xff]  ;;  %3335 = vmatmul.bf16.vlgmr.msrb.gmra.mxu0 %v9546_v35 }
 0x252   : > { %3409 = vmatpush.bf16.msra.mxu0 %v11405_v13  ;;  %v2369_v53 = vadd.f32 %v2368_v57, %v9446_v22  ;;  %v11411_v22 = vld [vmem:[#allocation8_spill] sm:$0xff]  ;;  %v11419_v13 = vld [vmem:[#allocation18_spill] sm:$0xff]  ;;  %5999 = vmatmul.msk.bf16.vlgmr.msrb.gmra.mxu2 %vm368_vm2, %v9549_v15  ;;  %v11421_v57 = vld [vmem:[#allocation17_spill] sm:$0xff] }
 0x254   : > { %3379 = vmatpush.bf16.msra.mxu1 %v11406_v7  ;;  %v2386_v21 = vpop.f32.mrf.mxu3  ;;  %v11422_v7 = vld [vmem:[#allocation47_spill] sm:$0xff] }
 0x255   : > { %v2387_v46 = vadd.f32 %v2386_v21, %v2369_v53  ;;  %3505 = vmatpush.bf16.msrb.mxu2 %v11422_v7  ;;  %v11439_v7 = vld [vmem:[#allocation45_spill] sm:$0xff] }
 0x256   : > { %3410 = vmatpush.bf16.msra.mxu0 %v11407_v25 }
 0x258   : > { %3444 = vmatpush.bf16.msrb.mxu1 %v11408_v11  ;;  %v2240_v4 = vpop.f32.mrf.mxu2  ;;  %v2225_v31 = vpop.f32.mrf.mxu0  ;;  %v11423_v11 = vld [vmem:[#allocation24_spill] sm:$0xff] }
 0x259   : > { %v2241_v0 = vadd.f32 %v2240_v4, %v2222_v12  ;;  %v2370_v19 = vpop.f32.mrf.mxu1  ;;  %v11418_v12 = vld [vmem:[#allocation16_spill] sm:$0xff] }
 0x25a   : > { %3411 = vmatpush.bf16.msra.mxu0 %v11410_v63  ;;  %v2371_v45 = vadd.f32 %v2370_v19, %v9489_v54  ;;  %v9571_v54 = vor.u32 %v3189_v34, %v3184_v62  ;;  %v11425_v19 = vld [vmem:[#allocation27_spill] sm:$0xff]  ;;  %v11426_v63 = vld [vmem:[#allocation64_spill] sm:$0xff] }
 0x25c   : > { %3445 = vmatpush.bf16.msrb.mxu1 %v11411_v22  ;;  %v2388_v58 = vpop.f32.mrf.mxu3  ;;  %v11427_v22 = vld [vmem:[#allocation67_spill] sm:$0xff] }
 0x25d   : > { %v2389_v23 = vadd.f32 %v2388_v58, %v2371_v45  ;;  %v11428_v45 = vld [vmem:[#allocation23_spill] sm:$0xff] }
 0x25e   : > { %3412 = vmatpush.bf16.msra.mxu0 %v11412_v50 }
 0x25f   : > { %5998 = vmatmul.msk.bf16.gmra.mxu3 %vm368_vm2, %v9571_v54 }
 0x260   : > { %3446 = vmatpush.bf16.msrb.mxu1 %v11413_v33  ;;  %v2243_v56 = vpop.f32.mrf.mxu2  ;;  %v2227_v52 = vpop.f32.mrf.mxu0  ;;  %v11430_v33 = vld [vmem:[#allocation29_spill] sm:$0xff] }
 0x261   : > { %v2244_v29 = vadd.f32 %v2243_v56, %v2225_v31  ;;  %v2373_v39 = vpop.f32.mrf.mxu1  ;;  %3304 = vmatmul.bf16.gmra.mxu1 %v9569_v26  ;;  %v11424_v31 = vld [vmem:[#allocation22_spill] sm:$0xff]  ;;  %3340 = vmatmul.bf16.gmra.mxu0 %v9569_v26 }
 0x262   : > { %3413 = vmatpush.bf16.msra.mxu0 %v11414_v20  ;;  %v2374_v60 = vadd.f32 %v2373_v39, %v2208_v14  ;;  %v11420_v14 = vld [vmem:[#allocation19_spill] sm:$0xff]  ;;  %v11431_v20 = vld [vmem:[#allocation25_spill] sm:$0xff]  ;;  %6000 = vmatmul.msk.bf16.gmra.mxu2 %vm368_vm2, %v9571_v54 }
 0x264   : > { %3447 = vmatpush.bf16.msrb.mxu1 %v11415_v49  ;;  %v2391_v32 = vpop.f32.mrf.mxu3 }
 0x265   : > { %v2392_v51 = vadd.f32 %v2391_v32, %v2374_v60  ;;  %v11432_v60 = vld [vmem:[#allocation31_spill] sm:$0xff]  ;;  %v11434_v32 = vld [vmem:[#allocation32_spill] sm:$0xff] }
 0x266   : > { %3414 = vmatpush.bf16.msra.mxu0 %v11416_v43  ;;  %v11433_v43 = vld [vmem:[#allocation28_spill] sm:$0xff] }
 0x268   : > { %3448 = vmatpush.bf16.msrb.mxu1 %v11417_v40  ;;  %v2245_v1 = vpop.f32.mrf.mxu2  ;;  %v2404_v62 = vpop.f32.mrf.mxu0 }
 0x269   : > { %v2375_v5 = vpop.f32.mrf.mxu1  ;;  %v2405_v41 = vadd.f32 %v2404_v62, %v2239_v17 }
 0x26a   : > { %3415 = vmatpush.bf16.msra.mxu0 %v11418_v12  ;;  %v11435_v12 = vld [vmem:[#allocation33_spill] sm:$0xff] }
 0x26c   : > { %3449 = vmatpush.bf16.msrb.mxu1 %v11419_v13  ;;  %v2393_v53 = vpop.f32.mrf.mxu3  ;;  %v11436_v13 = vld [vmem:[#allocation35_spill] sm:$0xff] }
 0x26e   : > { %3480 = vmatpush.bf16.msrb.mxu0 %v11420_v14  ;;  %v11437_v14 = vld [vmem:[#allocation73_spill] sm:$0xff] }
 0x26f   : > { %6001 = vmatmul.msk.bf16.vlgmr.msra.gmra.mxu3 %vm368_vm2, %v11427_v22 }
 0x270   : > { %3450 = vmatpush.bf16.msrb.mxu1 %v11421_v57  ;;  %v2422_v25 = vpop.f32.mrf.mxu2  ;;  %v2406_v61 = vpop.f32.mrf.mxu0  ;;  %3541 = vmatpush.bf16.msra.mxu3 %v11429_v6  ;;  %v11438_v57 = vld [vmem:[#allocation75_spill] sm:$0xff] }
 0x271   : > { %v2423_v17 = vadd.f32 %v2422_v25, %v2405_v41  ;;  %v2407_v4 = vadd.f32 %v2406_v61, %v2241_v0  ;;  %v2602_v21 = vpop.f32.mrf.mxu1  ;;  %3380 = vmatmul.bf16.vlgmr.msra.gmra.mxu1 %v11426_v63  ;;  %3416 = vmatmul.bf16.vlgmr.msra.gmra.mxu0 %v11426_v63  ;;  %v11444_v6 = vld [vmem:[#allocation55_spill] sm:$0xff]  ;;  %v11447_v63 = vld [vmem:[#allocation44_spill] sm:$0xff] }
 0x272   : > { %3481 = vmatpush.bf16.msrb.mxu0 %v11423_v11  ;;  %v11440_v11 = vld [vmem:[#allocation36_spill] sm:$0xff]  ;;  %6003 = vmatmul.msk.bf16.vlgmr.msra.gmra.mxu2 %vm368_vm2, %v11427_v22 }
 0x273   : > { %3577 = vmatpush.bf16.msra.mxu2 %v11444_v6  ;;  %v11448_v22 = vld [vmem:[#allocation56_spill] sm:$0xff]  ;;  %v11458_v6 = vld [vmem:[#allocation30_spill] sm:$0xff] }
 0x274   : > { %3451 = vmatpush.bf16.msrb.mxu1 %v11424_v31  ;;  %v2620_v50 = vpop.f32.mrf.mxu3  ;;  %v11441_v31 = vld [vmem:[#allocation34_spill] sm:$0xff] }
 0x275   : > { %v2621_v0 = vadd.f32 %v2620_v50, %v2602_v21 }
 0x276   : > { %3482 = vmatpush.bf16.msrb.mxu0 %v11425_v19 }
 0x277   : > { %v2665_v49 = vadd.f32 %v2621_v0, %v2387_v46 }
 0x278   : > { %3516 = vmatpush.bf16.msra.mxu1 %v11428_v45  ;;  %v2424_v34 = vpop.f32.mrf.mxu2  ;;  %v2409_v58 = vpop.f32.mrf.mxu0  ;;  %v11443_v45 = vld [vmem:[#allocation37_spill] sm:$0xff] }
 0x279   : > { %v2425_v56 = vadd.f32 %v2424_v34, %v2407_v4  ;;  %v2410_v52 = vadd.f32 %v2409_v58, %v2244_v29  ;;  %v2604_v39 = vpop.f32.mrf.mxu1 }
 0x27a   : > { %3483 = vmatpush.bf16.msrb.mxu0 %v11430_v33  ;;  %v11445_v33 = vld [vmem:[#allocation41_spill] sm:$0xff] }
 0x27c   : > { %3517 = vmatpush.bf16.msra.mxu1 %v11431_v20  ;;  %v2622_v1 = vpop.f32.mrf.mxu3  ;;  %v11449_v20 = vld [vmem:[#allocation61_spill] sm:$0xff] }
 0x27d   : > { %v2623_v5 = vadd.f32 %v2622_v1, %v2604_v39  ;;  %v11446_v39 = vld [vmem:[#allocation38_spill] sm:$0xff] }
 0x27e   : > { %3484 = vmatpush.bf16.msrb.mxu0 %v11432_v60 }
 0x27f   : > { %v2667_v46 = vadd.f32 %v2623_v5, %v2389_v23  ;;  %6002 = vmatmul.msk.bf16.gmra.mxu3 %vm368_vm2, %v11438_v57  ;;  %v11442_v23 = vld [vmem:[#allocation39_spill] sm:$0xff] }
 0x280   : > { %3518 = vmatpush.bf16.msra.mxu1 %v11433_v43  ;;  %v2427_v40 = vpop.f32.mrf.mxu2  ;;  %v2411_v29 = vpop.f32.mrf.mxu0 }
 0x281   : > { %v2428_v62 = vadd.f32 %v2427_v40, %v2410_v52  ;;  %v2607_v41 = vpop.f32.mrf.mxu1  ;;  %3385 = vmatmul.bf16.gmra.mxu1 %v11437_v14  ;;  %v11450_v40 = vld [vmem:[#allocation57_spill] sm:$0xff]  ;;  %3421 = vmatmul.bf16.gmra.mxu0 %v11437_v14  ;;  %v11456_v14 = vld [vmem:[#allocation52_spill] sm:$0xff] }
 0x282   : > { %3485 = vmatpush.bf16.msrb.mxu0 %v11434_v32  ;;  %6004 = vmatmul.msk.bf16.gmra.mxu2 %vm368_vm2, %v11438_v57  ;;  %v11459_v57 = vld [vmem:[#allocation51_spill] sm:$0xff] }
 0x284   : > { %3519 = vmatpush.bf16.msra.mxu1 %v11435_v12  ;;  %v2625_v25 = vpop.f32.mrf.mxu3 }
 0x285   : > { %v2626_v61 = vadd.f32 %v2625_v25, %v2607_v41 }
 0x286   : > { %3486 = vmatpush.bf16.msrb.mxu0 %v11436_v13  ;;  %v11452_v13 = vld [vmem:[#allocation46_spill] sm:$0xff] }
 0x287   : > { %v2669_v19 = vadd.f32 %v2626_v61, %v2392_v51 }
 0x288   : > { %3520 = vmatpush.bf16.msra.mxu1 %v11439_v7  ;;  %v2429_v53 = vpop.f32.mrf.mxu2  ;;  %v2638_v4 = vpop.f32.mrf.mxu0  ;;  %v11453_v7 = vld [vmem:[#allocation50_spill] sm:$0xff] }
 0x289   : > { %v2609_v21 = vpop.f32.mrf.mxu1 }
 0x28a   : > { %3487 = vmatpush.bf16.msrb.mxu0 %v11440_v11  ;;  %v11454_v11 = vld [vmem:[#allocation49_spill] sm:$0xff] }
 0x28c   : > { %3521 = vmatpush.bf16.msra.mxu1 %v11441_v31  ;;  %v2627_v34 = vpop.f32.mrf.mxu3 }
 0x28e   : > { %3552 = vmatpush.bf16.msra.mxu0 %v11442_v23  ;;  %v11455_v23 = vld [vmem:[#allocation63_spill] sm:$0xff] }
 0x28f   : > { %6005 = vmatmul.msk.bf16.vlgmr.msrb.gmra.mxu3 %vm368_vm2, %v8517_v30 }
 0x290   : > { %3522 = vmatpush.bf16.msra.mxu1 %v11443_v45  ;;  %v2656_v50 = vpop.f32.mrf.mxu2  ;;  %v2640_v58 = vpop.f32.mrf.mxu0  ;;  %3619 = vmatpush.bf16.msrb.mxu3 %v11449_v20  ;;  %v11457_v45 = vld [vmem:[#allocation40_spill] sm:$0xff] }
 0x291   : > { %v2657_v0 = vadd.f32 %v2656_v50, %v2638_v4  ;;  %v2842_v52 = vpop.f32.mrf.mxu1  ;;  %3452 = vmatmul.bf16.vlgmr.msrb.gmra.mxu1 %v8515_v42  ;;  %3488 = vmatmul.bf16.vlgmr.msrb.gmra.mxu0 %v8515_v42  ;;  %v11467_v42 = vld [vmem:[#allocation66_spill] sm:$0xff] }
 0x292   : > { %3553 = vmatpush.bf16.msra.mxu0 %v11445_v33  ;;  %v11460_v33 = vld [vmem:[#allocation68_spill] sm:$0xff]  ;;  %6007 = vmatmul.msk.bf16.vlgmr.msrb.gmra.mxu2 %vm368_vm2, %v8517_v30  ;;  %v11468_v30 = vld [vmem:[#allocation70_spill] sm:$0xff] }
 0x293   : > { %v2666_v51 = vadd.f32 %v2657_v0, %v2423_v17  ;;  %v11451_v17 = vld [vmem:[#allocation43_spill] sm:$0xff] }
 0x294   : > { %3523 = vmatpush.bf16.msra.mxu1 %v11446_v39  ;;  %v2860_v43 = vpop.f32.mrf.mxu3  ;;  %v11461_v39 = vld [vmem:[#allocation58_spill] sm:$0xff] }
 0x295   : > { %v2861_v32 = vadd.f32 %v2860_v43, %v2842_v52  ;;  %v11465_v43 = vld [vmem:[#allocation65_spill] sm:$0xff] }
 0x296   : > { %3554 = vmatpush.bf16.msra.mxu0 %v11447_v63  ;;  %v11463_v63 = vld [vmem:[#allocation60_spill] sm:$0xff] }
 0x297   : > { %v2905_v12 = vadd.f32 %v2861_v32, %v2665_v49 }
 0x298   : > { %3594 = vmatpush.bf16.msrb.mxu1 %v11448_v22  ;;  %v2658_v60 = vpop.f32.mrf.mxu2  ;;  %v2643_v5 = vpop.f32.mrf.mxu0  ;;  %v11464_v22 = vld [vmem:[#allocation81_spill] sm:$0xff] }
 0x299   : > { %v2659_v1 = vadd.f32 %v2658_v60, %v2640_v58  ;;  %v2844_v29 = vpop.f32.mrf.mxu1  ;;  %3655 = vmatpush.bf16.msrb.mxu2 %v11464_v22 }
 0x29a   : > { %3555 = vmatpush.bf16.msra.mxu0 %v11450_v40 }
 0x29b   : > { %v2668_v41 = vadd.f32 %v2659_v1, %v2425_v56 }
 0x29c   : > { %3595 = vmatpush.bf16.msrb.mxu1 %v11451_v17  ;;  %v2862_v25 = vpop.f32.mrf.mxu3 }
 0x29d   : > { %v2863_v4 = vadd.f32 %v2862_v25, %v2844_v29  ;;  %v11469_v29 = vld [vmem:[#allocation86_spill] sm:$0xff] }
 0x29e   : > { %3556 = vmatpush.bf16.msra.mxu0 %v11452_v13 }
 0x29f   : > { %v2907_v49 = vadd.f32 %v2863_v4, %v2667_v46  ;;  %6006 = vmatmul.msk.bf16.gmra.mxu3 %vm368_vm2, %v11458_v6  ;;  %v11462_v46 = vld [vmem:[#allocation59_spill] sm:$0xff] }
 0x2a0   : > { %3596 = vmatpush.bf16.msrb.mxu1 %v11453_v7  ;;  %v2661_v53 = vpop.f32.mrf.mxu2  ;;  %v2645_v21 = vpop.f32.mrf.mxu0  ;;  %v11470_v7 = vld [vmem:[#allocation69_spill] sm:$0xff] }
 0x2a1   : > { %v2662_v61 = vadd.f32 %v2661_v53, %v2643_v5  ;;  %v2847_v31 = vpop.f32.mrf.mxu1  ;;  %3457 = vmatmul.bf16.gmra.mxu1 %v11457_v45  ;;  %v11466_v5 = vld [vmem:[#allocation62_spill] sm:$0xff]  ;;  %3493 = vmatmul.bf16.gmra.mxu0 %v11457_v45 }
 0x2a2   : > { %3557 = vmatpush.bf16.msra.mxu0 %v11454_v11  ;;  %6008 = vmatmul.msk.bf16.gmra.mxu2 %vm368_vm2, %v11458_v6  ;;  %v11476_v45 = vld [vmem:[#allocation78_spill] sm:$0xff]  ;;  %v11477_v6 = vld [vmem:[#allocation79_spill] sm:$0xff] }
 0x2a3   : > { %v2670_v56 = vadd.f32 %v2662_v61, %v2428_v62 }
 0x2a4   : > { %3597 = vmatpush.bf16.msrb.mxu1 %v11455_v23  ;;  %v2865_v50 = vpop.f32.mrf.mxu3  ;;  %v11473_v23 = vld [vmem:[#allocation74_spill] sm:$0xff] }
 0x2a5   : > { %v2866_v0 = vadd.f32 %v2865_v50, %v2847_v31  ;;  %v11472_v31 = vld [vmem:[#allocation71_spill] sm:$0xff] }
 0x2a6   : > { %3558 = vmatpush.bf16.msra.mxu0 %v11456_v14 }
 0x2a7   : > { %v2909_v62 = vadd.f32 %v2866_v0, %v2669_v19 }
 0x2a8   : > { %3598 = vmatpush.bf16.msrb.mxu1 %v11459_v57  ;;  %v2663_v34 = vpop.f32.mrf.mxu2  ;;  %v2878_v58 = vpop.f32.mrf.mxu0 }
 0x2a9   : > { %v2849_v52 = vpop.f32.mrf.mxu1  ;;  %v11474_v34 = vld [vmem:[#allocation76_spill] sm:$0xff] }
 0x2aa   : > { %3559 = vmatpush.bf16.msra.mxu0 %v11460_v33  ;;  %v11475_v52 = vld [vmem:[#allocation77_spill] sm:$0xff] }
 0x2ac   : > { %3599 = vmatpush.bf16.msrb.mxu1 %v11461_v39  ;;  %v2867_v20 = vpop.f32.mrf.mxu3 }
 0x2ae   : > { %3630 = vmatpush.bf16.msrb.mxu0 %v11462_v46 }
 0x2af   : > { %6009 = vmatmul.msk.bf16.vlgmr.msra.gmra.mxu3 %vm368_vm2, %v9176_v3 }
 0x2b0   : > { %3600 = vmatpush.bf16.msrb.mxu1 %v11463_v63  ;;  %v2896_v60 = vpop.f32.mrf.mxu2  ;;  %v2880_v1 = vpop.f32.mrf.mxu0  ;;  %3697 = vmatpush.bf16.msra.mxu3 %v11469_v29  ;;  %v11478_v63 = vld [vmem:[#allocation80_spill] sm:$0xff] }
 0x2b1   : > { %v2897_v40 = vadd.f32 %v2896_v60, %v2878_v58  ;;  %v3071_v32 = vpop.f32.mrf.mxu1  ;;  %3524 = vmatmul.bf16.vlgmr.msra.gmra.mxu1 %v9172_v37  ;;  %3560 = vmatmul.bf16.vlgmr.msra.gmra.mxu0 %v9172_v37  ;;  %v11485_v37 = vld [vmem:[#allocation88_spill] sm:$0xff] }
 0x2b2   : > { %3631 = vmatpush.bf16.msrb.mxu0 %v11465_v43  ;;  %v11479_v43 = vld [vmem:[#allocation82_spill] sm:$0xff]  ;;  %6011 = vmatmul.msk.bf16.vlgmr.msra.gmra.mxu2 %vm368_vm2, %v9176_v3  ;;  %v11486_v3 = vld [vmem:[#allocation89_spill] sm:$0xff] }
 0x2b3   : > { %v2906_v19 = vadd.f32 %v2897_v40, %v2666_v51  ;;  %v11471_v51 = vld [vmem:[#allocation72_spill] sm:$0xff]  ;;  %v11481_v40 = vld [vmem:[#allocation83_spill] sm:$0xff] }
 0x2b4   : > { %3601 = vmatpush.bf16.msrb.mxu1 %v11466_v5  ;;  %v3089_v13 = vpop.f32.mrf.mxu3 }
 0x2b5   : > { %v3090_v25 = vadd.f32 %v3089_v13, %v3071_v32  ;;  %v11484_v13 = vld [vmem:[#allocation85_spill] sm:$0xff] }
 0x2b6   : > { %3632 = vmatpush.bf16.msrb.mxu0 %v11467_v42  ;;  %v11483_v42 = vld [vmem:[#allocation87_spill] sm:$0xff] }
 0x2b7   : > { %v3134_v21 = vadd.f32 %v3090_v25, %v2905_v12  ;;  %v11487_v25 = vld [vmem:[#allocation90_spill] sm:$0xff] }
 0x2b8   : > { %3672 = vmatpush.bf16.msra.mxu1 %v11468_v30  ;;  %v2898_v17 = vpop.f32.mrf.mxu2  ;;  %v2883_v11 = vpop.f32.mrf.mxu0 }
 0x2b9   : > { %v2899_v53 = vadd.f32 %v2898_v17, %v2880_v1  ;;  %v3073_v61 = vpop.f32.mrf.mxu1  ;;  %v11482_v1 = vld [vmem:[#allocation99_spill] sm:$0xff] }
 0x2ba   : > { %3633 = vmatpush.bf16.msrb.mxu0 %v11470_v7  ;;  %3733 = vmatpush.bf16.msra.mxu2 %v11482_v1 }
 0x2bb   : > { %v2908_v4 = vadd.f32 %v2899_v53, %v2668_v41 }
 0x2bc   : > { %3673 = vmatpush.bf16.msra.mxu1 %v11471_v51  ;;  %v3091_v57 = vpop.f32.mrf.mxu3 }
 0x2bd   : > { %v3092_v33 = vadd.f32 %v3091_v57, %v3073_v61  ;;  %v11489_v57 = vld [vmem:[#allocation92_spill] sm:$0xff] }
 0x2be   : > { %3634 = vmatpush.bf16.msrb.mxu0 %v11472_v31 }
 0x2bf   : > { %v3136_v12 = vadd.f32 %v3092_v33, %v2907_v49  ;;  %6010 = vmatmul.msk.bf16.gmra.mxu3 %vm368_vm2, %v9274_v27  ;;  %v11480_v49 = vld [vmem:[#allocation84_spill] sm:$0xff]  ;;  %v11491_v33 = vld [vmem:[#allocation94_spill] sm:$0xff] }
 0x2c0   : > { %3674 = vmatpush.bf16.msra.mxu1 %v11473_v23  ;;  %v2901_v14 = vpop.f32.mrf.mxu2  ;;  %v2885_v0 = vpop.f32.mrf.mxu0 }
 0x2c1   : > { %v2902_v50 = vadd.f32 %v2901_v14, %v2883_v11  ;;  %v3076_v58 = vpop.f32.mrf.mxu1  ;;  %3529 = vmatmul.bf16.gmra.mxu1 %v9271_v38  ;;  %3565 = vmatmul.bf16.gmra.mxu0 %v9271_v38  ;;  %v11493_v38 = vld [vmem:[#allocation96_spill] sm:$0xff] }
 0x2c2   : > { %3635 = vmatpush.bf16.msrb.mxu0 %v11474_v34  ;;  %6012 = vmatmul.msk.bf16.gmra.mxu2 %vm368_vm2, %v9274_v27  ;;  %v11494_v27 = vld [vmem:[#allocation97_spill] sm:$0xff] }
 0x2c3   : > { %v2910_v41 = vadd.f32 %v2902_v50, %v2670_v56 }
 0x2c4   : > { %3675 = vmatpush.bf16.msra.mxu1 %v11475_v52  ;;  %v3094_v46 = vpop.f32.mrf.mxu3 }
 0x2c5   : > { %v3095_v22 = vadd.f32 %v3094_v46, %v3076_v58 }
 0x2c6   : > { %3636 = vmatpush.bf16.msrb.mxu0 %v11476_v45 }
 0x2c7   : > { %v3138_v56 = vadd.f32 %v3095_v22, %v2909_v62 }
 0x2c8   : > { %3676 = vmatpush.bf16.msra.mxu1 %v11477_v6  ;;  %v2903_v39 = vpop.f32.mrf.mxu2  ;;  %v3107_v20 = vpop.f32.mrf.mxu0 }
 0x2c9   : > { %v3078_v60 = vpop.f32.mrf.mxu1 }
 0x2ca   : > { %3637 = vmatpush.bf16.msrb.mxu0 %v11478_v63  ;;  %v11495_v63 = vld [vmem:[#allocation98_spill] sm:$0xff] }
 0x2cc   : > { %3677 = vmatpush.bf16.msra.mxu1 %v11479_v43  ;;  %v3096_v32 = vpop.f32.mrf.mxu3  ;;  %v11496_v43 = vld [vmem:[#allocation100_spill] sm:$0xff] }
 0x2ce   : > { %3708 = vmatpush.bf16.msra.mxu0 %v11480_v49  ;;  %v11498_v49 = vld [vmem:[#allocation101_spill] sm:$0xff] }
 0x2cf   : > { %6013 = vmatmul.msk.bf16.vlgmr.msrb.gmra.mxu3 %vm368_vm2, %v9402_v36 }
 0x2d0   : > { %3678 = vmatpush.bf16.msra.mxu1 %v11481_v40  ;;  %v3125_v5 = vpop.f32.mrf.mxu2  ;;  %v3109_v29 = vpop.f32.mrf.mxu0  ;;  %3796 = vmatpush.bf16.msrb.mxu3 %v9392_v28  ;;  %v11490_v28 = vld [vmem:[#allocation93_spill] sm:$0xff] }
 0x2d1   : > { %v3126_v30 = vadd.f32 %v3125_v5, %v3107_v20  ;;  %v3300_v17 = vpop.f32.mrf.mxu1  ;;  %3602 = vmatmul.bf16.vlgmr.msrb.gmra.mxu1 %v9398_v59  ;;  %3638 = vmatmul.bf16.vlgmr.msrb.gmra.mxu0 %v9398_v59  ;;  %v6051_v59 = vld [vmem:[%s10900_s3 + $0x90] sm:$0xf] }
 0x2d2   : > { %3709 = vmatpush.bf16.msra.mxu0 %v11483_v42  ;;  %6015 = vmatmul.msk.bf16.vlgmr.msrb.gmra.mxu2 %vm368_vm2, %v9402_v36 }
 0x2d3   : > { %v3135_v62 = vadd.f32 %v3126_v30, %v2906_v19  ;;  %v11488_v19 = vld [vmem:[#allocation91_spill] sm:$0xff]  ;;  %3832 = vmatpush.bf16.msrb.mxu2 %v9528_v44 }
 0x2d4   : > { %3679 = vmatpush.bf16.msra.mxu1 %v11484_v13  ;;  %v3318_v53 = vpop.f32.mrf.mxu3 }
 0x2d5   : > { %v3319_v61 = vadd.f32 %v3318_v53, %v3300_v17 }
 0x2d6   : > { %3710 = vmatpush.bf16.msra.mxu0 %v11485_v37 }
 0x2d7   : > { %v9688_v14 = vadd.f32 %v3319_v61, %v3134_v21 }
 0x2d8   : > { %3771 = vmatpush.bf16.msrb.mxu1 %v11486_v3  ;;  %v3127_v7 = vpop.f32.mrf.mxu2  ;;  %v3112_v51 = vpop.f32.mrf.mxu0 }
 0x2d9   : > { %v3128_v11 = vadd.f32 %v3127_v7, %v3109_v29  ;;  %v3302_v31 = vpop.f32.mrf.mxu1  ;;  %v3750_v7 = vld [vmem:[%s6944_s9] sm:$0xee]  ;;  %s224_s9 = scalar_lea.vmem %s10902_s5, %s6491_s21 }
 0x2da   : > { %3711 = vmatpush.bf16.msra.mxu0 %v11487_v25 }
 0x2db   : > { %v3137_v23 = vadd.f32 %v3128_v11, %v2908_v4  ;;  %v11492_v4 = vld [vmem:[#allocation95_spill] sm:$0xff] }
 0x2dc   : > { %3772 = vmatpush.bf16.msrb.mxu1 %v11488_v19  ;;  %v3320_v50 = vpop.f32.mrf.mxu3 }
 0x2dd   : > { %v3321_v58 = vadd.f32 %v3320_v50, %v3302_v31 }
 0x2de   : > { %3712 = vmatpush.bf16.msra.mxu0 %v11489_v57 }
 0x2df   : > { %v9697_v6 = vadd.f32 %v3321_v58, %v3136_v12  ;;  %6014 = vmatmul.msk.bf16.gmra.mxu3 %vm368_vm2, %v9492_v55  ;;  %v11497_v12 = vld [vmem:[#allocation102_spill] sm:$0xff]  ;;  %v11502_v58 = vld [vmem:[#allocation53_spill] sm:$0xff] }
 0x2e0   : > { %3773 = vmatpush.bf16.msrb.mxu1 %v11490_v28  ;;  %v3130_v34 = vpop.f32.mrf.mxu2  ;;  %v3114_v52 = vpop.f32.mrf.mxu0  ;;  %v6163_v28 = vld [vmem:[%s10900_s3 + $0x70] sm:$0xf] }
 0x2e1   : > { %v3131_v0 = vadd.f32 %v3130_v34, %v3112_v51  ;;  %v3305_v45 = vpop.f32.mrf.mxu1  ;;  %3607 = vmatmul.bf16.gmra.mxu1 %v9483_v10  ;;  %3643 = vmatmul.bf16.gmra.mxu0 %v9483_v10  ;;  %v3753_v10 = vunpack.c.h.b16 %v3750_v7  ;;  %v11499_v51 = vld [vmem:[#allocation48_spill] sm:$0xff]  ;;  %v6712_v34 = vld [vmem:[%s10900_s3 + $0x74] sm:$0xf]  ;;  %v9774_v52 = vrot.slane %v11502_v58, 1 }
 0x2e2   : > { %3713 = vmatpush.bf16.msra.mxu0 %v11491_v33  ;;  %6016 = vmatmul.msk.bf16.gmra.mxu2 %vm368_vm2, %v9492_v55  ;;  %v3752_v55 = vunpack.c.l.b16 %v3750_v7  ;;  %v11500_v31 = vunpack.c.h.b16 %v11499_v51  ;;  %v6165_v33 = vld [vmem:[%s10900_s3 + $0x78] sm:$0xf0]  ;;  %v6141_v7 = vld [vmem:[%s10900_s3 + $0x48] sm:$0xf0] }
 0x2e3   : > { %v3139_v21 = vadd.f32 %v3131_v0, %v2910_v41  ;;  %v9771_v0 = vor.u32 %v6712_v34, %v6165_v33 }
 0x2e4   : > { %3774 = vmatpush.bf16.msrb.mxu1 %v11492_v4  ;;  %v3323_v46 = vpop.f32.mrf.mxu3  ;;  %v11503_v4 = vld [vmem:[#allocation54_spill] sm:$0xff] }
 0x2e5   : > { %v3324_v22 = vadd.f32 %v3323_v46, %v3305_v45 }
 0x2e6   : > { %3714 = vmatpush.bf16.msra.mxu0 %v11493_v38  ;;  %v6155_v38 = vld [vmem:[%s10900_s3 + $0x60] sm:$0xf] }
 0x2e7   : > { %v9706_v41 = vadd.f32 %v3324_v22, %v3138_v56  ;;  %v6157_v22 = vld [vmem:[%s10900_s3 + $0x68] sm:$0xf0] }
 0x2e8   : > { %3775 = vmatpush.bf16.msrb.mxu1 %v11494_v27  ;;  %v3132_v39 = vpop.f32.mrf.mxu2  ;;  %v3336_v20 = vpop.f32.mrf.mxu0  ;;  %v6710_v27 = vld [vmem:[%s10900_s3 + $0x64] sm:$0xf] }
 0x2e9   : > { %v3307_v60 = vpop.f32.mrf.mxu1 }
 0x2ea   : > { %3715 = vmatpush.bf16.msra.mxu0 %v11495_v63 }
 0x2ec   : > { %3776 = vmatpush.bf16.msrb.mxu1 %v11496_v43  ;;  %v3325_v40 = vpop.f32.mrf.mxu3  ;;  %v9797_v43 = vor.u32 %v6710_v27, %v6157_v22  ;;  %v6115_v27 = vld [vmem:[%s10900_s3 + $0x10] sm:$0xf] }
 0x2ee   : > { %3807 = vmatpush.bf16.msrb.mxu0 %v11497_v12 }
 0x2ef   : > { %6017 = vmatmul.msk.bf16.vlgmr.msra.gmra.mxu3 %vm368_vm2, %v9549_v15 }
 0x2f0   : > { %3777 = vmatpush.bf16.msrb.mxu1 %v11498_v49  ;;  %v3354_v1 = vpop.f32.mrf.mxu2  ;;  %v3338_v5 = vpop.f32.mrf.mxu0 }
 0x2f1   : > { %v3355_v32 = vadd.f32 %v3354_v1, %v3336_v20  ;;  %v3381_v42 = vpop.f32.mrf.mxu1  ;;  %3680 = vmatmul.bf16.vlgmr.msra.gmra.mxu1 %v9546_v35  ;;  %3716 = vmatmul.bf16.vlgmr.msra.gmra.mxu0 %v9546_v35  ;;  %v6147_v1 = vld [vmem:[%s10900_s3 + $0x50] sm:$0xf] }
 0x2f2   : > { %3808 = vmatpush.bf16.msrb.mxu0 %v9394_v16  ;;  %6019 = vmatmul.msk.bf16.vlgmr.msra.gmra.mxu2 %vm368_vm2, %v9549_v15  ;;  %v6711_v15 = vld [vmem:[%s10900_s3 + $0x64] sm:$0xf0] }
 0x2f3   : > { %v9716_v56 = vadd.f32 %v3355_v32, %v3135_v62  ;;  %4122 = vmatpush.bf16.msra.mxu2 %v9771_v0  ;;  %v9790_v63 = vor.u32 %v6711_v15, %v6155_v38  ;;  %v6709_v32 = vld [vmem:[%s10900_s3 + $0x54] sm:$0xf0] }
 0x2f4   : > { %3778 = vmatpush.bf16.msrb.mxu1 %v9385_v18  ;;  %v3399_v44 = vpop.f32.mrf.mxu3 }
 0x2f5   : > { %v3400_v30 = vadd.f32 %v3399_v44, %v3381_v42  ;;  %v6149_v44 = vld [vmem:[%s10900_s3 + $0x58] sm:$0xf0] }
 0x2f6   : > { %3809 = vmatpush.bf16.msrb.mxu0 %v9415_v8  ;;  %v6309_v8 = vld [vmem:[%s10900_s3 + $0x1d8] sm:$0xf0] }
 0x2f7   : > { %4123 = vmatpush.bf16.msra.mxu2 %v9797_v43 }
 0x2f8   : > { %v3356_v36 = vpop.f32.mrf.mxu2  ;;  %v3341_v18 = vpop.f32.mrf.mxu0 }
 0x2f9   : > { %v3357_v16 = vadd.f32 %v3356_v36, %v3338_v5  ;;  %v9725_v29 = vpop.f32.mrf.mxu1  ;;  %v6708_v5 = vld [vmem:[%s10900_s3 + $0x54] sm:$0xf]  ;;  %v9818_v36 = vor.u32 %v6709_v32, %v6147_v1  ;;  %v6699_v1 = vld [vmem:[%s10900_s3 + $0x4] sm:$0xf0]  ;;  %v6698_v32 = vld [vmem:[%s10900_s3 + $0x4] sm:$0xf] }
 0x2fa   : > { %3810 = vmatpush.bf16.msrb.mxu0 %v9442_v24 }
 0x2fb   : > { %v9727_v17 = vadd.f32 %v3357_v16, %v3137_v23  ;;  %v11501_v23 = vunpack.c.l.b16 %v11499_v51  ;;  %v9823_v16 = vor.u32 %v6708_v5, %v6149_v44  ;;  %v6131_v51 = vld [vmem:[%s10900_s3 + $0x30] sm:$0xf] }
 0x2fc   : > { %v9735_v24 = vpop.f32.mrf.mxu3 }
 0x2fd   : > { %v3754_v57 = vpack.c.b16 %v11501_v23, %v3752_v55  ;;  %4124 = vmatpush.bf16.msra.mxu2 %v9823_v16 }
 0x2fe   : > { %3811 = vmatpush.bf16.msrb.mxu0 %v9462_v2 }
 0x2ff   : > { %6018 = vmatmul.msk.bf16.gmra.mxu3 %vm368_vm2, %v9571_v54  ;;  %v3757_v45 = vrot.slane %v3754_v57, 1  ;;  %v6123_v57 = vld [vmem:[%s10900_s3 + $0x20] sm:$0xf] }
 0x300   : > { %v3359_v13 = vpop.f32.mrf.mxu2  ;;  %v3343_v37 = vpop.f32.mrf.mxu0 }
 0x301   : > { %v3360_v62 = vadd.f32 %v3359_v13, %v3341_v18  ;;  %v3386_v3 = vpop.f32.mrf.mxu1  ;;  %3685 = vmatmul.bf16.gmra.mxu1 %v9569_v26  ;;  %v6707_v18 = vld [vmem:[%s10900_s3 + $0x44] sm:$0xf0]  ;;  %v6706_v13 = vld [vmem:[%s10900_s3 + $0x44] sm:$0xf]  ;;  %3721 = vmatmul.bf16.gmra.mxu0 %v9569_v26  ;;  %v6133_v26 = vld [vmem:[%s10900_s3 + $0x38] sm:$0xf0] }
 0x302   : > { %3812 = vmatpush.bf16.msrb.mxu0 %v9486_v48  ;;  %6020 = vmatmul.msk.bf16.gmra.mxu2 %vm368_vm2, %v9571_v54 }
 0x303   : > { %v9739_v53 = vadd.f32 %v3360_v62, %v3139_v21  ;;  %v9777_v21 = vrot.slane %v11503_v4, 1 }
 0x304   : > { %v3404_v48 = vpop.f32.mrf.mxu3 }
 0x305   : > { %v9748_v11 = vadd.f32 %v3404_v48, %v3386_v3  ;;  %v9805_v40 = vsel %vm3756_vm4, %v3757_v45, %v9777_v21  ;;  %v9848_v48 = vor.u32 %v6706_v13, %v6141_v7 }
 0x306   : > { %3813 = vmatpush.bf16.msrb.mxu0 %v9502_v9  ;;  %v3755_v9 = vpack.c.b16 %v11500_v31, %v3753_v10  ;;  %v6705_v31 = vld [vmem:[%s10900_s3 + $0x34] sm:$0xf0] }
 0x307   : > { %4125 = vmatpush.bf16.msra.mxu2 %v9848_v48 }
 0x308   : > { %v3361_v25 = vpop.f32.mrf.mxu2  ;;  %v3417_v61 = vpop.f32.mrf.mxu0  ;;  %v3760_v35 = vrot.slane %v3755_v9, 1  ;;  %v6704_v9 = vld [vmem:[%s10900_s3 + $0x34] sm:$0xf] }
 0x309   : > { %v3388_v19 = vpop.f32.mrf.mxu1  ;;  %v9871_v23 = vor.u32 %v6704_v9, %v6133_v26 }
 0x30a   : > { %3814 = vmatpush.bf16.msrb.mxu0 %v9525_v47  ;;  %v6713_v47 = vld [vmem:[%s10900_s3 + $0x74] sm:$0xf0]  ;;  %v9801_v49 = vsel %vm3756_vm4, %v3760_v35, %v9774_v52  ;;  %v9864_v19 = vor.u32 %v6705_v31, %v6131_v51  ;;  %v6125_v35 = vld [vmem:[%s10900_s3 + $0x28] sm:$0xf0] }
 0x30b   : > { %v9764_v50 = vor.u32 %v6713_v47, %v6163_v28  ;;  %4126 = vmatpush.bf16.msra.mxu2 %v9871_v23  ;;  %v6703_v28 = vld [vmem:[%s10900_s3 + $0x24] sm:$0xf0]  ;;  %v6702_v47 = vld [vmem:[%s10900_s3 + $0x24] sm:$0xf] }
 0x30c   : > { %v3406_v39 = vpop.f32.mrf.mxu3  ;;  %v9886_v33 = vor.u32 %v6703_v28, %v6123_v57  ;;  %v9891_v4 = vor.u32 %v6702_v47, %v6125_v35 }
 0x30d   : > { %v6701_v39 = vld [vmem:[%s10900_s3 + $0x14] sm:$0xf0] }
 0x30e   : > { %4108 = vmatpush.bf16.msra.mxu0 %v9764_v50  ;;  %v9905_v22 = vor.u32 %v6701_v39, %v6115_v27  ;;  %v3867_v39 = vld [vmem:[#allocation2 + $0x8] sm:$0xff] }
 0x30f   : > { %6021 = vmatmul.msk.bf16.vlgmr.msrb.gmra.mxu3 %vm368_vm2, %v9801_v49  ;;  %4127 = vmatpush.bf16.msra.mxu2 %v9891_v4 }
 0x310   : > { %v3435_v46 = vpop.f32.mrf.mxu2  ;;  %v3419_v60 = vpop.f32.mrf.mxu0 }
 0x311   : > { %v9795_v20 = vadd.f32 %v3435_v46, %v3417_v61  ;;  %v3453_v12 = vpop.f32.mrf.mxu1  ;;  %3779 = vmatmul.bf16.vlgmr.msrb.gmra.mxu1 %v9805_v40  ;;  %v6700_v46 = vld [vmem:[%s10900_s3 + $0x14] sm:$0xf]  ;;  %3815 = vmatmul.bf16.vlgmr.msrb.gmra.mxu0 %v9805_v40 }
 0x312   : > { %4109 = vmatpush.bf16.msra.mxu0 %v9790_v63  ;;  %v3454_v42 = vadd.f32 %v3453_v12, %v3400_v30  ;;  %v6139_v30 = vld [vmem:[%s10900_s3 + $0x40] sm:$0xf]  ;;  %6023 = vmatmul.msk.bf16.vlgmr.msrb.gmra.mxu2 %vm368_vm2, %v9801_v49 }
 0x313   : > { %v9839_v3 = vor.u32 %v6707_v18, %v6139_v30  ;;  %v6107_v12 = vld [vmem:[%s10900_s3] sm:$0xf]  ;;  %v6109_v30 = vld [vmem:[%s10900_s3 + $0x8] sm:$0xf0] }
 0x314   : > { %v3471_v37 = vpop.f32.mrf.mxu3  ;;  %v9926_v44 = vor.u32 %v6699_v1, %v6107_v12  ;;  %v3866_v12 = vld [vmem:[#allocation2] sm:$0xff] }
 0x315   : > { %v9846_v55 = vadd.f32 %v3471_v37, %v3454_v42 }
 0x316   : > { %4110 = vmatpush.bf16.msra.mxu0 %v9818_v36  ;;  %11505 = vst [vmem:[#allocation4_spill] sm:$0xff] %v9926_v44 }
 0x318   : > { %v3437_v62 = vpop.f32.mrf.mxu2  ;;  %v3422_v25 = vpop.f32.mrf.mxu0 }
 0x319   : > { %v9844_v10 = vadd.f32 %v3437_v62, %v3419_v60  ;;  %v9850_v61 = vpop.f32.mrf.mxu1  ;;  %v9931_v62 = vor.u32 %v6698_v32, %v6109_v30  ;;  %v3868_v32 = vpack.c.bf16 %v3867_v39, %v3866_v12  ;;  %v6728_v12 = vld [vmem:[%s10900_s3 + $0xf4] sm:$0xf] }
 0x31a   : > { %4111 = vmatpush.bf16.msra.mxu0 %v9839_v3 }
 0x31b   : > { %11506 = vst [vmem:[#allocation26_spill] sm:$0xff] %v9931_v62 }
 0x31c   : > { %v9884_v54 = vpop.f32.mrf.mxu3 }
 0x31e   : > { %4112 = vmatpush.bf16.msra.mxu0 %v9864_v19 }
 0x31f   : > { %6022 = vmatmul.msk.bf16.gmra.mxu3 %vm368_vm2, %v9774_v52 }
 0x320   : > { %v3440_v34 = vpop.f32.mrf.mxu2  ;;  %v3424_v45 = vpop.f32.mrf.mxu0 }
 0x321   : > { %v3441_v58 = vadd.f32 %v3440_v34, %v3422_v25  ;;  %v3458_v38 = vpop.f32.mrf.mxu1  ;;  %3784 = vmatmul.bf16.gmra.mxu1 %v9777_v21  ;;  %3820 = vmatmul.bf16.gmra.mxu0 %v9777_v21 }
 0x322   : > { %4113 = vmatpush.bf16.msra.mxu0 %v9886_v33  ;;  %v3459_v15 = vadd.f32 %v3458_v38, %v9748_v11  ;;  %v6117_v11 = vld [vmem:[%s10900_s3 + $0x18] sm:$0xf0]  ;;  %6024 = vmatmul.msk.bf16.gmra.mxu2 %vm368_vm2, %v9774_v52 }
 0x323   : > { %v9913_v60 = vor.u32 %v6700_v46, %v6117_v11 }
 0x324   : > { %v3476_v42 = vpop.f32.mrf.mxu3 }
 0x325   : > { %11504 = vst [vmem:[#allocation5_spill] sm:$0xff] %v9913_v60  ;;  %4128 = vmatpush.bf16.msra.mxu2 %v9913_v60  ;;  %v3477_v18 = vadd.f32 %v3476_v42, %v3459_v15 }
 0x326   : > { %4114 = vmatpush.bf16.msra.mxu0 %v9905_v22 }
 0x328   : > { %v3442_v5 = vpop.f32.mrf.mxu2  ;;  %v3489_v13 = vpop.f32.mrf.mxu0 }
 0x329   : > { %v3490_v37 = vadd.f32 %v3489_v13, %v9795_v20  ;;  %v3460_v7 = vpop.f32.mrf.mxu1  ;;  %4129 = vmatpush.bf16.msra.mxu2 %v9931_v62  ;;  %v6735_v62 = vld [vmem:[%s10900_s3 + $0x124] sm:$0xf0] }
 0x32a   : > { %4115 = vmatpush.bf16.msra.mxu0 %v9926_v44 }
 0x32c   : > { %v3478_v25 = vpop.f32.mrf.mxu3 }
 0x330   : > { %v3507_v51 = vpop.f32.mrf.mxu2  ;;  %v9939_v9 = vpop.f32.mrf.mxu0 }
 0x331   : > { %v3508_v31 = vadd.f32 %v3507_v51, %v3490_v37  ;;  %v3525_v26 = vpop.f32.mrf.mxu1  ;;  %4116 = vmatmul.bf16.vlgmr.msra.gmra.mxu0 %v3868_v32 }
 0x332   : > { %4130 = vmatmul.bf16.vlgmr.msra.gmra.mxu2 %v3868_v32 }
 0x334   : > { %v3543_v28 = vpop.f32.mrf.mxu3 }
 0x335   : > { %v3544_v20 = vadd.f32 %v3543_v28, %v3525_v26 }
 0x337   : > { %v3588_v40 = vadd.f32 %v3544_v20, %v9846_v55 }
 0x338   : > { %v9941_v57 = vpop.f32.mrf.mxu2  ;;  %v3494_v47 = vpop.f32.mrf.mxu0 }
 0x339   : > { %v3495_v34 = vadd.f32 %v3494_v47, %v3441_v58  ;;  %v9943_v35 = vpop.f32.mrf.mxu1 }
 0x33c   : > { %v9949_v45 = vpop.f32.mrf.mxu3 }
 0x340   : > { %v3512_v49 = vpop.f32.mrf.mxu2  ;;  %v3496_v15 = vpop.f32.mrf.mxu0 }
 0x341   : > { %v3513_v38 = vadd.f32 %v3512_v49, %v3495_v34  ;;  %v3530_v27 = vpop.f32.mrf.mxu1 }
 0x344   : > { %v3548_v11 = vpop.f32.mrf.mxu3 }
 0x345   : > { %v3549_v58 = vadd.f32 %v3548_v11, %v3530_v27 }
 0x347   : > { %v3592_v55 = vadd.f32 %v3549_v58, %v3477_v18 }
 0x348   : > { %v3514_v46 = vpop.f32.mrf.mxu2  ;;  %v3561_v1 = vpop.f32.mrf.mxu0 }
 0x349   : > { %v3532_v5 = vpop.f32.mrf.mxu1 }
 0x34c   : > { %v3550_v21 = vpop.f32.mrf.mxu3 }
 0x350   : > { %v3579_v42 = vpop.f32.mrf.mxu2  ;;  %v3563_v30 = vpop.f32.mrf.mxu0 }
 0x351   : > { %v3580_v52 = vadd.f32 %v3579_v42, %v3561_v1  ;;  %v3603_v13 = vpop.f32.mrf.mxu1 }
 0x353   : > { %v3589_v37 = vadd.f32 %v3580_v52, %v3508_v31  ;;  %v6099_v31 = vld [vmem:[%s10900_s3 + $0xf0] sm:$0xf]  ;;  %v6091_v52 = vld [vmem:[%s10900_s3 + $0xe0] sm:$0xf] }
 0x354   : > { %v3621_v25 = vpop.f32.mrf.mxu3 }
 0x355   : > { %v3622_v51 = vadd.f32 %v3621_v25, %v3603_v13  ;;  %v6727_v13 = vld [vmem:[%s10900_s3 + $0xe4] sm:$0xf0]  ;;  %v6726_v25 = vld [vmem:[%s10900_s3 + $0xe4] sm:$0xf] }
 0x357   : > { %v9951_v20 = vadd.f32 %v3622_v51, %v3588_v40  ;;  %v6729_v40 = vld [vmem:[%s10900_s3 + $0xf4] sm:$0xf0]  ;;  %v9986_v51 = vor.u32 %v6727_v13, %v6091_v52 }
 0x358   : > { %v3581_v7 = vpop.f32.mrf.mxu2  ;;  %v3566_v26 = vpop.f32.mrf.mxu0  ;;  %v9966_v32 = vor.u32 %v6729_v40, %v6099_v31  ;;  %v6085_v31 = vld [vmem:[%s10900_s3 + $0xd8] sm:$0xf0] }
 0x359   : > { %v3605_v28 = vpop.f32.mrf.mxu1  ;;  %v3582_v52 = vadd.f32 %v3581_v7, %v3563_v30  ;;  %v6760_v30 = vld [vmem:[%s10900_s3 + $0x1f4] sm:$0xf] }
 0x35a   : > { %4000 = vmatpush.bf16.msra.mxu1 %v9966_v32 }
 0x35c   : > { %v3623_v34 = vpop.f32.mrf.mxu3 }
 0x35d   : > { %v9953_v15 = vadd.f32 %v3623_v34, %v3605_v28  ;;  %v6083_v34 = vld [vmem:[%s10900_s3 + $0xd0] sm:$0xf] }
 0x35e   : > { %4001 = vmatpush.bf16.msra.mxu1 %v9986_v51 }
 0x360   : > { %v3584_v47 = vpop.f32.mrf.mxu2  ;;  %v3568_v18 = vpop.f32.mrf.mxu0 }
 0x361   : > { %v3585_v49 = vadd.f32 %v3584_v47, %v3566_v26  ;;  %v3608_v27 = vpop.f32.mrf.mxu1  ;;  %v6724_v18 = vld [vmem:[%s10900_s3 + $0xd4] sm:$0xf] }
 0x363   : > { %v9955_v39 = vadd.f32 %v3585_v49, %v3513_v38  ;;  %v6101_v38 = vld [vmem:[%s10900_s3 + $0xf8] sm:$0xf0]  ;;  %v6725_v49 = vld [vmem:[%s10900_s3 + $0xd4] sm:$0xf0] }
 0x364   : > { %v3626_v11 = vpop.f32.mrf.mxu3  ;;  %v9971_v21 = vor.u32 %v6728_v12, %v6101_v38  ;;  %v10011_v12 = vor.u32 %v6724_v18, %v6085_v31  ;;  %v6723_v38 = vld [vmem:[%s10900_s3 + $0xc4] sm:$0xf0]  ;;  %v6067_v31 = vld [vmem:[%s10900_s3 + $0xb0] sm:$0xf] }
 0x365   : > { %v3627_v58 = vadd.f32 %v3626_v11, %v3608_v27  ;;  %v10004_v11 = vor.u32 %v6725_v49, %v6083_v34 }
 0x366   : > { %4014 = vmatpush.bf16.msra.mxu3 %v9971_v21  ;;  %11508 = vst [vmem:[#allocation3_spill] sm:$0xff] %v10011_v12 }
 0x367   : > { %v9973_v42 = vadd.f32 %v3627_v58, %v3592_v55  ;;  %v6093_v55 = vld [vmem:[%s10900_s3 + $0xe8] sm:$0xf0]  ;;  %11507 = vst [vmem:[#allocation7_spill] sm:$0xff] %v10004_v11  ;;  %4002 = vmatpush.bf16.msra.mxu1 %v10004_v11 }
 0x368   : > { %v3586_v46 = vpop.f32.mrf.mxu2  ;;  %v3639_v1 = vpop.f32.mrf.mxu0  ;;  %v9991_v26 = vor.u32 %v6726_v25, %v6093_v55  ;;  %v6077_v25 = vld [vmem:[%s10900_s3 + $0xc8] sm:$0xf0] }
 0x369   : > { %v3610_v5 = vpop.f32.mrf.mxu1 }
 0x36a   : > { %4015 = vmatpush.bf16.msra.mxu3 %v9991_v26  ;;  %v6722_v5 = vld [vmem:[%s10900_s3 + $0xc4] sm:$0xf] }
 0x36b   : > { %v10033_v55 = vor.u32 %v6722_v5, %v6077_v25 }
 0x36c   : > { %v3628_v28 = vpop.f32.mrf.mxu3 }
 0x36d   : > { %11510 = vst [vmem:[#allocation6_spill] sm:$0xff] %v10033_v55 }
 0x36e   : > { %4016 = vmatpush.bf16.msra.mxu3 %v10011_v12 }
 0x370   : > { %v3657_v47 = vpop.f32.mrf.mxu2  ;;  %v3641_v46 = vpop.f32.mrf.mxu0 }
 0x371   : > { %v3658_v27 = vadd.f32 %v3657_v47, %v3639_v1  ;;  %v10009_v40 = vpop.f32.mrf.mxu1  ;;  %v6075_v1 = vld [vmem:[%s10900_s3 + $0xc0] sm:$0xf] }
 0x372   : > { %v10028_v13 = vor.u32 %v6723_v38, %v6075_v1  ;;  %4017 = vmatpush.bf16.msra.mxu3 %v10033_v55  ;;  %v6721_v1 = vld [vmem:[%s10900_s3 + $0xb4] sm:$0xf0] }
 0x373   : > { %v10013_v58 = vadd.f32 %v3658_v27, %v3589_v37  ;;  %v3492_v37 = vadd.f32 %v9939_v9, %v9844_v10  ;;  %v6323_v10 = vld [vmem:[%s10900_s3 + $0x1f0] sm:$0xf]  ;;  %v6761_v9 = vld [vmem:[%s10900_s3 + $0x1f4] sm:$0xf0]  ;;  %v6325_v27 = vld [vmem:[%s10900_s3 + $0x1f8] sm:$0xf0] }
 0x374   : > { %11509 = vst [vmem:[#allocation9_spill] sm:$0xff] %v10028_v13  ;;  %4003 = vmatpush.bf16.msra.mxu1 %v10028_v13  ;;  %v10037_v34 = vpop.f32.mrf.mxu3  ;;  %v10049_v18 = vor.u32 %v6761_v9, %v6323_v10  ;;  %v10062_v5 = vor.u32 %v6760_v30, %v6325_v27  ;;  %v6758_v10 = vld [vmem:[%s10900_s3 + $0x1e4] sm:$0xf]  ;;  %v6719_v27 = vld [vmem:[%s10900_s3 + $0xa4] sm:$0xf0] }
 0x375   : > { %v3510_v28 = vadd.f32 %v9941_v57, %v3492_v37  ;;  %v6720_v37 = vld [vmem:[%s10900_s3 + $0xb4] sm:$0xf]  ;;  %v6211_v13 = vld [vmem:[%s10900_s3 + $0x130] sm:$0xf] }
 0x376   : > { %11511 = vst [vmem:[#allocation20_spill] sm:$0xff] %v10049_v18  ;;  %4362 = vmatpush.bf16.msrb.mxu0 %v10049_v18  ;;  %4376 = vmatpush.bf16.msrb.mxu2 %v10062_v5  ;;  %v6203_v18 = vld [vmem:[%s10900_s3 + $0x120] sm:$0xf] }
 0x377   : > { %v3591_v57 = vadd.f32 %v3582_v52, %v3510_v28  ;;  %11512 = vst [vmem:[#allocation11_spill] sm:$0xff] %v10062_v5  ;;  %v6069_v52 = vld [vmem:[%s10900_s3 + $0xb8] sm:$0xf0]  ;;  %v6315_v28 = vld [vmem:[%s10900_s3 + $0x1e0] sm:$0xf] }
 0x378   : > { %v3659_v47 = vpop.f32.mrf.mxu2  ;;  %v3644_v49 = vpop.f32.mrf.mxu0  ;;  %v10084_v9 = vor.u32 %v6720_v37, %v6069_v52  ;;  %v6718_v37 = vld [vmem:[%s10900_s3 + $0xa4] sm:$0xf]  ;;  %v6061_v52 = vld [vmem:[%s10900_s3 + $0xa8] sm:$0xf0] }
 0x379   : > { %v3660_v7 = vadd.f32 %v3659_v47, %v3641_v46  ;;  %v10060_v38 = vpop.f32.mrf.mxu1  ;;  %v10064_v46 = vor.u32 %v6721_v1, %v6067_v31  ;;  %v6759_v47 = vld [vmem:[%s10900_s3 + $0x1e4] sm:$0xf0] }
 0x37a   : > { %11514 = vst [vmem:[#allocation21_spill] sm:$0xff] %v10084_v9  ;;  %v10087_v30 = vor.u32 %v6759_v47, %v6315_v28  ;;  %4018 = vmatpush.bf16.msra.mxu3 %v10084_v9  ;;  %v10110_v28 = vor.u32 %v6718_v37, %v6061_v52  ;;  %v6717_v9 = vld [vmem:[%s10900_s3 + $0x94] sm:$0xf0] }
 0x37b   : > { %11513 = vst [vmem:[#allocation8_spill] sm:$0xff] %v10064_v46  ;;  %v10072_v25 = vadd.f32 %v3660_v7, %v3591_v57  ;;  %v6317_v57 = vld [vmem:[%s10900_s3 + $0x1e8] sm:$0xf0]  ;;  %4004 = vmatpush.bf16.msra.mxu1 %v10064_v46  ;;  %v6059_v7 = vld [vmem:[%s10900_s3 + $0xa0] sm:$0xf] }
 0x37c   : > { %11515 = vst [vmem:[#allocation10_spill] sm:$0xff] %v10087_v30  ;;  %v10099_v31 = vor.u32 %v6758_v10, %v6317_v57  ;;  %v10102_v1 = vor.u32 %v6719_v27, %v6059_v7  ;;  %4363 = vmatpush.bf16.msrb.mxu0 %v10087_v30  ;;  %v10113_v2 = vpop.f32.mrf.mxu3  ;;  %v6307_v10 = vld [vmem:[%s10900_s3 + $0x1d0] sm:$0xf]  ;;  %v6757_v57 = vld [vmem:[%s10900_s3 + $0x1d4] sm:$0xf0] }
 0x37d   : > { %11518 = vst [vmem:[#allocation14_spill] sm:$0xff] %v10110_v28  ;;  %v6756_v7 = vld [vmem:[%s10900_s3 + $0x1d4] sm:$0xf]  ;;  %v10126_v52 = vor.u32 %v6757_v57, %v6307_v10  ;;  %v6053_v57 = vld [vmem:[%s10900_s3 + $0x98] sm:$0xf0] }
 0x37e   : > { %11516 = vst [vmem:[#allocation12_spill] sm:$0xff] %v10099_v31  ;;  %4377 = vmatpush.bf16.msrb.mxu2 %v10099_v31  ;;  %4019 = vmatpush.bf16.msra.mxu3 %v10110_v28  ;;  %v6716_v10 = vld [vmem:[%s10900_s3 + $0x94] sm:$0xf]  ;;  %v6043_v28 = vld [vmem:[%s10900_s3 + $0x80] sm:$0xf] }
 0x37f   : > { %11517 = vst [vmem:[#allocation13_spill] sm:$0xff] %v10102_v1  ;;  %4005 = vmatpush.bf16.msra.mxu1 %v10102_v1  ;;  %v6715_v1 = vld [vmem:[%s10900_s3 + $0x84] sm:$0xf0]  ;;  %v6753_v31 = vld [vmem:[%s10900_s3 + $0x1b4] sm:$0xf0] }
 0x380   : > { %v3662_v47 = vpop.f32.mrf.mxu2  ;;  %v3646_v37 = vpop.f32.mrf.mxu0  ;;  %11519 = vst [vmem:[#allocation15_spill] sm:$0xff] %v10126_v52  ;;  %4364 = vmatpush.bf16.msrb.mxu0 %v10126_v52  ;;  %v6291_v52 = vld [vmem:[%s10900_s3 + $0x1b0] sm:$0xf] }
 0x381   : > { %v3663_v27 = vadd.f32 %v3662_v47, %v3644_v49  ;;  %v10138_v46 = vpop.f32.mrf.mxu1  ;;  %v10140_v49 = vor.u32 %v6756_v7, %v6309_v8  ;;  %v10142_v47 = vor.u32 %v6717_v9, %v6051_v59  ;;  %v6299_v8 = vld [vmem:[%s10900_s3 + $0x1c0] sm:$0xf]  ;;  %v6755_v59 = vld [vmem:[%s10900_s3 + $0x1c4] sm:$0xf0]  ;;  %v6754_v9 = vld [vmem:[%s10900_s3 + $0x1c4] sm:$0xf]  ;;  %v10163_v7 = vor.u32 %v6716_v10, %v6053_v57 }
 0x382   : > { %v10181_v57 = vor.u32 %v6715_v1, %v6043_v28  ;;  %v6744_v1 = vld [vmem:[%s10900_s3 + $0x174] sm:$0xf]  ;;  %v6245_v28 = vld [vmem:[%s10900_s3 + $0x178] sm:$0xf0] }
 0x383   : > { %11520 = vst [vmem:[#allocation16_spill] sm:$0xff] %v10140_v49  ;;  %v10151_v37 = vadd.f32 %v3663_v27, %v9955_v39  ;;  %4378 = vmatpush.bf16.msrb.mxu2 %v10140_v49  ;;  %v10166_v39 = vor.u32 %v6755_v59, %v6299_v8  ;;  %v6301_v27 = vld [vmem:[%s10900_s3 + $0x1c8] sm:$0xf0]  ;;  %4006 = vmatpush.bf16.msra.mxu1 %v10142_v47  ;;  %v6714_v8 = vld [vmem:[%s10900_s3 + $0x84] sm:$0xf] }
 0x384   : > { %11521 = vst [vmem:[#allocation18_spill] sm:$0xff] %v10142_v47  ;;  %v10178_v10 = vor.u32 %v6754_v9, %v6301_v27  ;;  %4020 = vmatpush.bf16.msra.mxu3 %v10163_v7  ;;  %v6045_v59 = vld [vmem:[%s10900_s3 + $0x88] sm:$0xf0]  ;;  %v6243_v47 = vld [vmem:[%s10900_s3 + $0x170] sm:$0xf] }
 0x385   : > { %11522 = vst [vmem:[#allocation19_spill] sm:$0xff] %v10163_v7  ;;  %v10192_v49 = vor.u32 %v6714_v8, %v6045_v59  ;;  %v6745_v9 = vld [vmem:[%s10900_s3 + $0x174] sm:$0xf0]  ;;  %4365 = vmatpush.bf16.msrb.mxu0 %v10166_v39  ;;  %v10206_v7 = vor.u32 %v6744_v1, %v6245_v28  ;;  %v10208_v59 = vpop.f32.mrf.mxu3  ;;  %v10223_v1 = vor.u32 %v6753_v31, %v6291_v52  ;;  %v6293_v28 = vld [vmem:[%s10900_s3 + $0x1b8] sm:$0xf0] }
 0x386   : > { %11523 = vst [vmem:[#allocation17_spill] sm:$0xff] %v10166_v39  ;;  %v10204_v27 = vor.u32 %v6745_v9, %v6243_v47  ;;  %v6752_v47 = vld [vmem:[%s10900_s3 + $0x1b4] sm:$0xf]  ;;  %v6742_v52 = vld [vmem:[%s10900_s3 + $0x164] sm:$0xf] }
 0x387   : > { %11524 = vst [vmem:[#allocation47_spill] sm:$0xff] %v10178_v10  ;;  %4379 = vmatpush.bf16.msrb.mxu2 %v10178_v10  ;;  %4007 = vmatpush.bf16.msra.mxu1 %v10181_v57  ;;  %v10236_v39 = vor.u32 %v6752_v47, %v6293_v28  ;;  %v6751_v47 = vld [vmem:[%s10900_s3 + $0x1a4] sm:$0xf0] }
 0x388   : > { %11525 = vst [vmem:[#allocation24_spill] sm:$0xff] %v10181_v57  ;;  %v3664_v8 = vpop.f32.mrf.mxu2  ;;  %v10221_v9 = vpop.f32.mrf.mxu0  ;;  %4021 = vmatpush.bf16.msra.mxu3 %v10192_v49  ;;  %v6743_v57 = vld [vmem:[%s10900_s3 + $0x164] sm:$0xf0] }
 0x389   : > { %11526 = vst [vmem:[#allocation22_spill] sm:$0xff] %v10192_v49  ;;  %v6235_v8 = vld [vmem:[%s10900_s3 + $0x160] sm:$0xf]  ;;  %v3688_v10 = vpop.f32.mrf.mxu1  ;;  %4366 = vmatpush.bf16.msrb.mxu0 %v10223_v1 }
 0x38a   : > { %11527 = vst [vmem:[#allocation27_spill] sm:$0xff] %v10204_v27  ;;  %v10239_v31 = vor.u32 %v6743_v57, %v6235_v8  ;;  %v6283_v10 = vld [vmem:[%s10900_s3 + $0x1a0] sm:$0xf]  ;;  %v6750_v57 = vld [vmem:[%s10900_s3 + $0x1a4] sm:$0xf] }
 0x38b   : > { %11528 = vst [vmem:[#allocation64_spill] sm:$0xff] %v10206_v7  ;;  %4233 = vmatpush.bf16.msrb.mxu1 %v10204_v27  ;;  %v6237_v27 = vld [vmem:[%s10900_s3 + $0x168] sm:$0xf0]  ;;  %4380 = vmatpush.bf16.msrb.mxu2 %v10236_v39  ;;  %v10260_v8 = vor.u32 %v6751_v47, %v6283_v10 }
 0x38c   : > { %11529 = vst [vmem:[#allocation67_spill] sm:$0xff] %v10223_v1  ;;  %4247 = vmatpush.bf16.msrb.mxu3 %v10206_v7  ;;  %v10257_v28 = vor.u32 %v6742_v52, %v6237_v27  ;;  %v6285_v7 = vld [vmem:[%s10900_s3 + $0x1a8] sm:$0xf0]  ;;  %v6227_v1 = vld [vmem:[%s10900_s3 + $0x150] sm:$0xf] }
 0x38d   : > { %11530 = vst [vmem:[#allocation23_spill] sm:$0xff] %v10236_v39  ;;  %v10265_v49 = vor.u32 %v6750_v57, %v6285_v7  ;;  %v6741_v27 = vld [vmem:[%s10900_s3 + $0x154] sm:$0xf0]  ;;  %v6740_v52 = vld [vmem:[%s10900_s3 + $0x154] sm:$0xf]  ;;  %4367 = vmatpush.bf16.msrb.mxu0 %v10260_v8  ;;  %v3706_v57 = vpop.f32.mrf.mxu3 }
 0x38e   : > { %11531 = vst [vmem:[#allocation42_spill] sm:$0xff] %v10239_v31  ;;  %v10278_v10 = vor.u32 %v6741_v27, %v6227_v1  ;;  %v6229_v7 = vld [vmem:[%s10900_s3 + $0x158] sm:$0xf0]  ;;  %v6275_v39 = vld [vmem:[%s10900_s3 + $0x190] sm:$0xf] }
 0x38f   : > { %11532 = vst [vmem:[#allocation29_spill] sm:$0xff] %v10257_v28  ;;  %4234 = vmatpush.bf16.msrb.mxu1 %v10239_v31  ;;  %v10284_v47 = vor.u32 %v6740_v52, %v6229_v7  ;;  %4381 = vmatpush.bf16.msrb.mxu2 %v10265_v49  ;;  %v6749_v1 = vld [vmem:[%s10900_s3 + $0x194] sm:$0xf0]  ;;  %v6748_v27 = vld [vmem:[%s10900_s3 + $0x194] sm:$0xf] }
 0x390   : > { %11533 = vst [vmem:[#allocation25_spill] sm:$0xff] %v10260_v8  ;;  %4248 = vmatpush.bf16.msrb.mxu3 %v10257_v28  ;;  %v10286_v31 = vpop.f32.mrf.mxu2  ;;  %v10298_v28 = vpop.f32.mrf.mxu0  ;;  %v10300_v52 = vor.u32 %v6749_v1, %v6275_v39  ;;  %v6277_v7 = vld [vmem:[%s10900_s3 + $0x198] sm:$0xf0]  ;;  %v6219_v57 = vld [vmem:[%s10900_s3 + $0x140] sm:$0xf] }
 0x391   : > { %11534 = vst [vmem:[#allocation31_spill] sm:$0xff] %v10265_v49  ;;  %v6739_v49 = vld [vmem:[%s10900_s3 + $0x144] sm:$0xf0]  ;;  %v10312_v8 = vpop.f32.mrf.mxu1  ;;  %v10314_v30 = vor.u32 %v6748_v27, %v6277_v7  ;;  %v6738_v1 = vld [vmem:[%s10900_s3 + $0x144] sm:$0xf] }
 0x392   : > { %11535 = vst [vmem:[#allocation28_spill] sm:$0xff] %v10278_v10  ;;  %v10317_v39 = vor.u32 %v6739_v49, %v6219_v57  ;;  %4368 = vmatpush.bf16.msrb.mxu0 %v10300_v52  ;;  %v6267_v27 = vld [vmem:[%s10900_s3 + $0x180] sm:$0xf]  ;;  %v6747_v49 = vld [vmem:[%s10900_s3 + $0x184] sm:$0xf0] }
 0x393   : > { %11536 = vst [vmem:[#allocation32_spill] sm:$0xff] %v10284_v47  ;;  %4235 = vmatpush.bf16.msrb.mxu1 %v10278_v10  ;;  %v6221_v10 = vld [vmem:[%s10900_s3 + $0x148] sm:$0xf0]  ;;  %4382 = vmatpush.bf16.msrb.mxu2 %v10314_v30  ;;  %v6746_v7 = vld [vmem:[%s10900_s3 + $0x184] sm:$0xf]  ;;  %v10338_v57 = vor.u32 %v6747_v49, %v6267_v27 }
 0x394   : > { %11537 = vst [vmem:[#allocation33_spill] sm:$0xff] %v10300_v52  ;;  %4249 = vmatpush.bf16.msrb.mxu3 %v10284_v47  ;;  %v10326_v55 = vor.u32 %v6738_v1, %v6221_v10  ;;  %v6269_v10 = vld [vmem:[%s10900_s3 + $0x188] sm:$0xf0]  ;;  %v6483_v1 = vld [vmem:[%s10900_s3 + $0x2f0] sm:$0xf] }
 0x395   : > { %11538 = vst [vmem:[#allocation35_spill] sm:$0xff] %v10314_v30  ;;  %v6793_v47 = vld [vmem:[%s10900_s3 + $0x2f4] sm:$0xf0]  ;;  %v10350_v30 = vor.u32 %v6746_v7, %v6269_v10  ;;  %v6792_v27 = vld [vmem:[%s10900_s3 + $0x2f4] sm:$0xf] }
 0x396   : > { %11539 = vst [vmem:[#allocation73_spill] sm:$0xff] %v10317_v39  ;;  %v10352_v52 = vor.u32 %v6793_v47, %v6483_v1  ;;  %v6485_v49 = vld [vmem:[%s10900_s3 + $0x2f8] sm:$0xf0]  ;;  %4369 = vmatpush.bf16.msrb.mxu0 %v10338_v57  ;;  %v6737_v47 = vld [vmem:[%s10900_s3 + $0x134] sm:$0xf0] }
 0x397   : > { %11540 = vst [vmem:[#allocation75_spill] sm:$0xff] %v10326_v55  ;;  %4236 = vmatpush.bf16.msrb.mxu1 %v10317_v39  ;;  %v10365_v7 = vor.u32 %v6792_v27, %v6485_v49  ;;  %v6736_v10 = vld [vmem:[%s10900_s3 + $0x134] sm:$0xf]  ;;  %v10375_v39 = vpop.f32.mrf.mxu3  ;;  %4383 = vmatpush.bf16.msrb.mxu2 %v10350_v30  ;;  %v6213_v27 = vld [vmem:[%s10900_s3 + $0x138] sm:$0xf0] }
 0x398   : > { %11541 = vst [vmem:[#allocation45_spill] sm:$0xff] %v10338_v57  ;;  %4250 = vmatpush.bf16.msrb.mxu3 %v10326_v55  ;;  %v10373_v1 = vpop.f32.mrf.mxu2  ;;  %v10379_v55 = vor.u32 %v6737_v47, %v6211_v13  ;;  %v10384_v49 = vpop.f32.mrf.mxu0  ;;  %v6475_v57 = vld [vmem:[%s10900_s3 + $0x2e0] sm:$0xf]  ;;  %v6790_v13 = vld [vmem:[%s10900_s3 + $0x2e4] sm:$0xf]  ;;  %v10396_v47 = vor.u32 %v6736_v10, %v6213_v27 }
 0x399   : > { %11542 = vst [vmem:[#allocation36_spill] sm:$0xff] %v10350_v30  ;;  %v6791_v30 = vld [vmem:[%s10900_s3 + $0x2e4] sm:$0xf0]  ;;  %v6205_v27 = vld [vmem:[%s10900_s3 + $0x128] sm:$0xf0] }
 0x39a   : > { %11543 = vst [vmem:[#allocation34_spill] sm:$0xff] %v10352_v52  ;;  %4620 = vmatpush.bf16.msra.mxu0 %v10352_v52  ;;  %v10398_v52 = vpop.f32.mrf.mxu1  ;;  %v10400_v5 = vor.u32 %v6791_v30, %v6475_v57  ;;  %v10415_v30 = vor.u32 %v6735_v62, %v6203_v18  ;;  %v6734_v57 = vld [vmem:[%s10900_s3 + $0x124] sm:$0xf]  ;;  %v6789_v62 = vld [vmem:[%s10900_s3 + $0x2d4] sm:$0xf0] }
 0x39b   : > { %11544 = vst [vmem:[#allocation39_spill] sm:$0xff] %v10365_v7  ;;  %4634 = vmatpush.bf16.msra.mxu2 %v10365_v7  ;;  %v6477_v7 = vld [vmem:[%s10900_s3 + $0x2e8] sm:$0xf0]  ;;  %4237 = vmatpush.bf16.msrb.mxu1 %v10379_v55  ;;  %v6788_v18 = vld [vmem:[%s10900_s3 + $0x2d4] sm:$0xf] }
 0x39c   : > { %11545 = vst [vmem:[#allocation37_spill] sm:$0xff] %v10379_v55  ;;  %v10412_v10 = vor.u32 %v6790_v13, %v6477_v7  ;;  %4251 = vmatpush.bf16.msrb.mxu3 %v10396_v47  ;;  %v10424_v55 = vor.u32 %v6734_v57, %v6205_v27  ;;  %v6467_v7 = vld [vmem:[%s10900_s3 + $0x2d0] sm:$0xf]  ;;  %v6469_v57 = vld [vmem:[%s10900_s3 + $0x2d8] sm:$0xf0] }
 0x39d   : > { %11546 = vst [vmem:[#allocation55_spill] sm:$0xff] %v10396_v47  ;;  %v10436_v13 = vor.u32 %v6789_v62, %v6467_v7  ;;  %v6195_v27 = vld [vmem:[%s10900_s3 + $0x110] sm:$0xf]  ;;  %v6733_v47 = vld [vmem:[%s10900_s3 + $0x114] sm:$0xf0] }
 0x39e   : > { %11547 = vst [vmem:[#allocation41_spill] sm:$0xff] %v10400_v5  ;;  %4621 = vmatpush.bf16.msra.mxu0 %v10400_v5  ;;  %v10451_v7 = vor.u32 %v6733_v47, %v6195_v27  ;;  %v6732_v62 = vld [vmem:[%s10900_s3 + $0x114] sm:$0xf]  ;;  %v6459_v47 = vld [vmem:[%s10900_s3 + $0x2c0] sm:$0xf] }
 0x39f   : > { %11548 = vst [vmem:[#allocation38_spill] sm:$0xff] %v10412_v10  ;;  %4635 = vmatpush.bf16.msra.mxu2 %v10412_v10  ;;  %4238 = vmatpush.bf16.msrb.mxu1 %v10415_v30  ;;  %v10448_v10 = vor.u32 %v6788_v18, %v6469_v57  ;;  %v10461_v44 = vpop.f32.mrf.mxu3  ;;  %v6787_v27 = vld [vmem:[%s10900_s3 + $0x2c4] sm:$0xf0] }
 0x3a0   : > { %11549 = vst [vmem:[#allocation44_spill] sm:$0xff] %v10415_v30  ;;  %4252 = vmatpush.bf16.msrb.mxu3 %v10424_v55  ;;  %v6197_v30 = vld [vmem:[%s10900_s3 + $0x118] sm:$0xf0]  ;;  %v10459_v5 = vpop.f32.mrf.mxu2  ;;  %v3724_v57 = vpop.f32.mrf.mxu0 }
 0x3a1   : > { %11550 = vst [vmem:[#allocation56_spill] sm:$0xff] %v10424_v55  ;;  %v10464_v18 = vor.u32 %v6732_v62, %v6197_v30  ;;  %v6786_v55 = vld [vmem:[%s10900_s3 + $0x2c4] sm:$0xf]  ;;  %v6461_v30 = vld [vmem:[%s10900_s3 + $0x2c8] sm:$0xf0] }
 0x3a2   : > { %11551 = vst [vmem:[#allocation61_spill] sm:$0xff] %v10436_v13  ;;  %4622 = vmatpush.bf16.msra.mxu0 %v10436_v13  ;;  %v10476_v12 = vpop.f32.mrf.mxu1  ;;  %v10478_v13 = vor.u32 %v6787_v27, %v6459_v47  ;;  %v6187_v62 = vld [vmem:[%s10900_s3 + $0x100] sm:$0xf]  ;;  %v6731_v57 = vld [vmem:[%s10900_s3 + $0x104] sm:$0xf0] }
 0x3a3   : > { %11552 = vst [vmem:[#allocation57_spill] sm:$0xff] %v10448_v10  ;;  %4636 = vmatpush.bf16.msra.mxu2 %v10448_v10  ;;  %4239 = vmatpush.bf16.msrb.mxu1 %v10451_v7  ;;  %v10490_v10 = vor.u32 %v6786_v55, %v6461_v30  ;;  %v10493_v47 = vor.u32 %v6731_v57, %v6187_v62  ;;  %v6730_v27 = vld [vmem:[%s10900_s3 + $0x104] sm:$0xf]  ;;  %v6451_v55 = vld [vmem:[%s10900_s3 + $0x2b0] sm:$0xf] }
 0x3a4   : > { %11553 = vst [vmem:[#allocation43_spill] sm:$0xff] %v10451_v7  ;;  %4253 = vmatpush.bf16.msrb.mxu3 %v10464_v18  ;;  %v6189_v7 = vld [vmem:[%s10900_s3 + $0x108] sm:$0xf0]  ;;  %v6785_v30 = vld [vmem:[%s10900_s3 + $0x2b4] sm:$0xf0] }
 0x3a5   : > { %11554 = vst [vmem:[#allocation46_spill] sm:$0xff] %v10464_v18  ;;  %v10502_v11 = vor.u32 %v6730_v27, %v6189_v7  ;;  %v6784_v62 = vld [vmem:[%s10900_s3 + $0x2b4] sm:$0xf]  ;;  %v10514_v57 = vor.u32 %v6785_v30, %v6451_v55  ;;  %v6453_v7 = vld [vmem:[%s10900_s3 + $0x2b8] sm:$0xf0] }
 0x3a6   : > { %11555 = vst [vmem:[#allocation50_spill] sm:$0xff] %v10478_v13  ;;  %4623 = vmatpush.bf16.msra.mxu0 %v10478_v13  ;;  %v10520_v27 = vor.u32 %v6784_v62, %v6453_v7  ;;  %v6443_v55 = vld [vmem:[%s10900_s3 + $0x2a0] sm:$0xf]  ;;  %v6783_v30 = vld [vmem:[%s10900_s3 + $0x2a4] sm:$0xf0] }
 0x3a7   : > { %11556 = vst [vmem:[#allocation49_spill] sm:$0xff] %v10490_v10  ;;  %4637 = vmatpush.bf16.msra.mxu2 %v10490_v10  ;;  %4240 = vmatpush.bf16.msrb.mxu1 %v10493_v47  ;;  %v10523_v10 = vpop.f32.mrf.mxu3  ;;  %v6782_v62 = vld [vmem:[%s10900_s3 + $0x2a4] sm:$0xf]  ;;  %v6445_v7 = vld [vmem:[%s10900_s3 + $0x2a8] sm:$0xf0] }
 0x3a8   : > { %11557 = vst [vmem:[#allocation63_spill] sm:$0xff] %v10493_v47  ;;  %4254 = vmatpush.bf16.msrb.mxu3 %v10502_v11  ;;  %v3742_v18 = vpop.f32.mrf.mxu2  ;;  %v3816_v13 = vpop.f32.mrf.mxu0  ;;  %v10541_v47 = vor.u32 %v6782_v62, %v6445_v7 }
 0x3a9   : > { %11558 = vst [vmem:[#allocation52_spill] sm:$0xff] %v10502_v11  ;;  %v10536_v18 = vor.u32 %v6783_v30, %v6443_v55  ;;  %v3402_v55 = vadd.f32 %v9735_v24, %v9725_v29  ;;  %v6435_v30 = vld [vmem:[%s10900_s3 + $0x290] sm:$0xf]  ;;  %v6437_v29 = vld [vmem:[%s10900_s3 + $0x298] sm:$0xf0] }
 0x3aa   : > { %11559 = vst [vmem:[#allocation40_spill] sm:$0xff] %v10514_v57  ;;  %4624 = vmatpush.bf16.msra.mxu0 %v10514_v57  ;;  %v3787_v11 = vpop.f32.mrf.mxu1  ;;  %v3736_v57 = vadd.f32 %v10286_v31, %v10221_v9 }
 0x3ab   : > { %11560 = vst [vmem:[#allocation30_spill] sm:$0xff] %v10520_v27  ;;  %4638 = vmatpush.bf16.msra.mxu2 %v10520_v27  ;;  %v3700_v27 = vadd.f32 %v10037_v34, %v10009_v40  ;;  %v6781_v11 = vld [vmem:[%s10900_s3 + $0x294] sm:$0xf0]  ;;  %v6780_v40 = vld [vmem:[%s10900_s3 + $0x294] sm:$0xf]  ;;  %v3799_v34 = vadd.f32 %v10375_v39, %v10312_v8  ;;  %v3456_v24 = vadd.f32 %v9850_v61, %v3402_v55 }
 0x3ac   : > { %11561 = vst [vmem:[#allocation51_spill] sm:$0xff] %v10536_v18  ;;  %v10562_v9 = vor.u32 %v6781_v11, %v6435_v30  ;;  %v10568_v62 = vor.u32 %v6780_v40, %v6437_v29  ;;  %v3745_v60 = vadd.f32 %v3736_v57, %v10013_v58  ;;  %v6427_v30 = vld [vmem:[%s10900_s3 + $0x280] sm:$0xf]  ;;  %v6779_v61 = vld [vmem:[%s10900_s3 + $0x284] sm:$0xf0]  ;;  %v3702_v11 = vadd.f32 %v10113_v2, %v10060_v38 }
 0x3ad   : > { %11562 = vst [vmem:[#allocation68_spill] sm:$0xff] %v10541_v47  ;;  %v3474_v58 = vadd.f32 %v9884_v54, %v3456_v24  ;;  %v3738_v40 = vadd.f32 %v10373_v1, %v10298_v28  ;;  %v11563_v2 = vmax.f32 %v9688_v14, %v9716_v56  ;;  %v6403_v14 = vld [vmem:[%s10900_s3 + $0x270] sm:$0xf]  ;;  %v3804_v56 = vadd.f32 %v10523_v10, %v10476_v12 }
 0x3ae   : > { %4625 = vmatpush.bf16.msra.mxu0 %v10536_v18  ;;  %v3744_v18 = vadd.f32 %v3700_v27, %v9951_v20  ;;  %v6429_v20 = vld [vmem:[%s10900_s3 + $0x288] sm:$0xf0] }
 0x3af   : > { %4639 = vmatpush.bf16.msra.mxu2 %v10541_v47  ;;  %v3805_v7 = vpop.f32.mrf.mxu3  ;;  %v3546_v47 = vadd.f32 %v9949_v45, %v9943_v35  ;;  %v6778_v35 = vld [vmem:[%s10900_s3 + $0x284] sm:$0xf]  ;;  %v10585_v45 = vor.u32 %v6779_v61, %v6427_v30  ;;  %v3747_v1 = vadd.f32 %v3738_v40, %v10072_v25  ;;  %v11564_v25 = vmax.f32 %v9697_v6, %v9727_v17  ;;  %v6777_v30 = vld [vmem:[%s10900_s3 + $0x274] sm:$0xf0] }
 0x3b0   : > { %v3834_v31 = vpop.f32.mrf.mxu2  ;;  %v3818_v39 = vpop.f32.mrf.mxu0  ;;  %v10591_v27 = vor.u32 %v6778_v35, %v6429_v20  ;;  %v10632_v61 = vor.u32 %v6777_v30, %v6403_v14  ;;  %v6395_v20 = vld [vmem:[%s10900_s3 + $0x260] sm:$0xf]  ;;  %v6768_v14 = vld [vmem:[%s10900_s3 + $0x234] sm:$0xf]  ;;  %v3873_v30 = vld [vmem:[#allocation2 + $0x9] sm:$0xff] }
 0x3b1   : > { %v3835_v8 = vadd.f32 %v3834_v31, %v3816_v13  ;;  %v3843_v13 = vadd.f32 %v3799_v34, %v3744_v18  ;;  %v3590_v55 = vadd.f32 %v3546_v47, %v3474_v58  ;;  %v6810_v31 = vld [vmem:[%s10899_s2] ss:$0 sm:$0xff]  ;;  %v6775_v58 = vld [vmem:[%s10900_s3 + $0x264] sm:$0xf0] }
 0x3b2   : > { %4626 = vmatpush.bf16.msra.mxu0 %v10562_v9  ;;  %v10654_v40 = vor.u32 %v6775_v58, %v6395_v20  ;;  %v6365_v20 = vld [vmem:[%s10900_s3 + $0x228] sm:$0xf0] }
 0x3b3   : > { %4640 = vmatpush.bf16.msra.mxu2 %v10568_v62  ;;  %v3844_v57 = vadd.f32 %v3835_v8, %v3745_v60  ;;  %v3668_v54 = vadd.f32 %v9953_v15, %v3590_v55  ;;  %v3801_v60 = vadd.f32 %v10461_v44, %v10398_v52  ;;  %v3705_v15 = vadd.f32 %v10208_v59, %v10138_v46  ;;  %v6405_v46 = vld [vmem:[%s10900_s3 + $0x278] sm:$0xf0]  ;;  %v6397_v55 = vld [vmem:[%s10900_s3 + $0x268] sm:$0xf0] }
 0x3b4   : > { %v3741_v44 = vadd.f32 %v10459_v5, %v10384_v49  ;;  %v6776_v5 = vld [vmem:[%s10900_s3 + $0x274] sm:$0xf] }
 0x3b5   : > { %v3849_v29 = vmax.f32 %v3843_v13, %v3844_v57  ;;  %v3746_v28 = vadd.f32 %v3702_v11, %v3668_v54  ;;  %v3748_v49 = vadd.f32 %v3705_v15, %v9973_v42  ;;  %v10634_v35 = vor.u32 %v6776_v5, %v6405_v46  ;;  %v6387_v54 = vld [vmem:[%s10900_s3 + $0x250] sm:$0xf]  ;;  %v3872_v46 = vld [vmem:[#allocation2 + $0x1] sm:$0xff] }
 0x3b6   : > { %4627 = vmatpush.bf16.msra.mxu0 %v10585_v45  ;;  %v3749_v12 = vadd.f32 %v3741_v44, %v10151_v37  ;;  %v6774_v37 = vld [vmem:[%s10900_s3 + $0x264] sm:$0xf]  ;;  %v6371_v44 = vld [vmem:[%s10900_s3 + $0x230] sm:$0xf] }
 0x3b7   : > { %4641 = vmatpush.bf16.msra.mxu2 %v10591_v27  ;;  %v3852_v38 = vmax.f32 %v11563_v2, %v3849_v29  ;;  %v3845_v7 = vadd.f32 %v3801_v60, %v3746_v28  ;;  %v3847_v13 = vadd.f32 %v3804_v56, %v3748_v49  ;;  %v10656_v29 = vor.u32 %v6774_v37, %v6397_v55  ;;  %v6389_v28 = vld [vmem:[%s10900_s3 + $0x258] sm:$0xf0] }
 0x3b8   : > { %v3836_v47 = vpop.f32.mrf.mxu2  ;;  %v3821_v24 = vpop.f32.mrf.mxu0  ;;  %v11565_v60 = vmax.f32 %v9706_v41, %v9739_v53  ;;  %v6373_v56 = vld [vmem:[%s10900_s3 + $0x238] sm:$0xf0] }
 0x3b9   : > { %v3859_v18 = vadd.f32 %v6810_v31, %v3852_v38  ;;  %v3837_v34 = vadd.f32 %v3836_v47, %v3818_v39  ;;  %v6773_v38 = vld [vmem:[%s10900_s3 + $0x254] sm:$0xf0]  ;;  %v6772_v47 = vld [vmem:[%s10900_s3 + $0x254] sm:$0xf]  ;;  %v10715_v49 = vor.u32 %v6768_v14, %v6373_v56  ;;  %v6357_v37 = vld [vmem:[%s10900_s3 + $0x218] sm:$0xf0] }
 0x3ba   : > { %v10675_v41 = vor.u32 %v6773_v38, %v6387_v54  ;;  %v10677_v53 = vor.u32 %v6772_v47, %v6389_v28  ;;  %v6347_v54 = vld [vmem:[%s10900_s3 + $0x200] sm:$0xf]  ;;  %v11584_v56 = vld [vmem:[#allocation47_spill] sm:$0xff] }
 0x3bb   : > { %3863 = vst [vmem:[#allocation2 + $0x18] sm:$0xff] %v3859_v18  ;;  %v3846_v8 = vadd.f32 %v3837_v34, %v3747_v1  ;;  %v6379_v34 = vld [vmem:[%s10900_s3 + $0x240] sm:$0xf] }
 0x3bc   : > { %v11583_v14 = vld [vmem:[#allocation17_spill] sm:$0xff] }
 0x3bd   : > { %v3850_v52 = vmax.f32 %v3845_v7, %v3846_v8  ;;  %v6381_v7 = vld [vmem:[%s10900_s3 + $0x248] sm:$0xf0] }
 0x3bf   : > { %v3853_v39 = vmax.f32 %v11564_v25, %v3850_v52  ;;  %v6769_v52 = vld [vmem:[%s10900_s3 + $0x234] sm:$0xf0] }
 0x3c0   : > { %v3839_v59 = vpop.f32.mrf.mxu2  ;;  %v3823_v17 = vpop.f32.mrf.mxu0 }
 0x3c1   : > { %v3860_v10 = vadd.f32 %v6810_v31, %v3853_v39  ;;  %v3840_v6 = vadd.f32 %v3839_v59, %v3821_v24  ;;  %v6771_v24 = vld [vmem:[%s10900_s3 + $0x244] sm:$0xf0]  ;;  %v10713_v59 = vor.u32 %v6769_v52, %v6371_v44  ;;  %v6766_v17 = vld [vmem:[%s10900_s3 + $0x224] sm:$0xf] }
 0x3c2   : > { %v10693_v8 = vor.u32 %v6771_v24, %v6379_v34  ;;  %v11577_v34 = vld [vmem:[#allocation8_spill] sm:$0xff]  ;;  %v11578_v24 = vld [vmem:[#allocation21_spill] sm:$0xff]  ;;  %v11582_v52 = vld [vmem:[#allocation14_spill] sm:$0xff] }
 0x3c3   : > { %3864 = vst [vmem:[#allocation2 + $0x20] sm:$0xff] %v3860_v10  ;;  %v3848_v42 = vadd.f32 %v3840_v6, %v3749_v12  ;;  %v10642_v57 = vpack.c.bf16 %v3860_v10, %v3859_v18  ;;  %v6363_v12 = vld [vmem:[%s10900_s3 + $0x220] sm:$0xf]  ;;  %v10722_v10 = vpack.c.bf16 %v3873_v30, %v3872_v46  ;;  %v6767_v6 = vld [vmem:[%s10900_s3 + $0x224] sm:$0xf0]  ;;  %v11588_v30 = vld [vmem:[#allocation23_spill] sm:$0xff] }
 0x3c4   : > { %v10739_v58 = vor.u32 %v6767_v6, %v6363_v12  ;;  %v11581_v44 = vld [vmem:[#allocation13_spill] sm:$0xff]  ;;  %v11589_v46 = vld [vmem:[#allocation24_spill] sm:$0xff]  ;;  %v11590_v12 = vld [vmem:[#allocation22_spill] sm:$0xff] }
 0x3c5   : > { %v3851_v11 = vmax.f32 %v3847_v13, %v3848_v42  ;;  %4008 = vmatmul.bf16.vlgmr.msra.gmra.mxu1 %v10642_v57  ;;  %4022 = vmatmul.bf16.vlgmr.msra.gmra.mxu3 %v10642_v57  ;;  %v10741_v13 = vor.u32 %v6766_v17, %v6365_v20  ;;  %v6355_v42 = vld [vmem:[%s10900_s3 + $0x210] sm:$0xf]  ;;  %v11592_v17 = vld [vmem:[#allocation64_spill] sm:$0xff]  ;;  %v11593_v20 = vld [vmem:[#allocation25_spill] sm:$0xff] }
 0x3c6   : > { %4491 = vmatpush.bf16.msra.mxu1 %v10632_v61  ;;  %4505 = vmatpush.bf16.msra.mxu3 %v10634_v35  ;;  %v11591_v6 = vld [vmem:[#allocation27_spill] sm:$0xff] }
 0x3c7   : > { %v3854_v2 = vmax.f32 %v11565_v60, %v3851_v11  ;;  %v6763_v60 = vld [vmem:[%s10900_s3 + $0x204] sm:$0xf0] }
 0x3c8   : > { %v3841_v1 = vpop.f32.mrf.mxu2  ;;  %v10779_v38 = vor.u32 %v6763_v60, %v6347_v54  ;;  %v11598_v54 = vld [vmem:[#allocation35_spill] sm:$0xff]  ;;  %v11599_v60 = vld [vmem:[#allocation28_spill] sm:$0xff] }
 0x3c9   : > { %v3861_v18 = vadd.f32 %v6810_v31, %v3854_v2  ;;  %v6770_v31 = vld [vmem:[%s10900_s3 + $0x244] sm:$0xf] }
 0x3ca   : > { %4492 = vmatpush.bf16.msra.mxu1 %v10654_v40  ;;  %4506 = vmatpush.bf16.msra.mxu3 %v10656_v29  ;;  %v10695_v15 = vor.u32 %v6770_v31, %v6381_v7  ;;  %v3875_v25 = vld [vmem:[#allocation2 + $0x19] sm:$0xff]  ;;  %v11579_v31 = vld [vmem:[#allocation15_spill] sm:$0xff] }
 0x3cb   : > { %3865 = vst [vmem:[#allocation2 + $0x28] sm:$0x3] %v3861_v18  ;;  %v3881_v28 = vld [vmem:[#allocation2 + $0x1a] sm:$0xff]  ;;  %v3879_v18 = vld [vmem:[#allocation2 + $0xa] sm:$0xff] }
 0x3cc   : > { %v11580_v7 = vld [vmem:[#allocation16_spill] sm:$0xff] }
 0x3ce   : > { %4493 = vmatpush.bf16.msra.mxu1 %v10675_v41  ;;  %4507 = vmatpush.bf16.msra.mxu3 %v10677_v53 }
 0x3d2   : > { %v3876_v39 = vld [vmem:[#allocation2 + $0x21] sm:$0xff]  ;;  %4494 = vmatpush.bf16.msra.mxu1 %v10693_v8  ;;  %4508 = vmatpush.bf16.msra.mxu3 %v10695_v15 }
 0x3d3   : > { %v10711_v5 = vpack.c.bf16 %v3876_v39, %v3875_v25  ;;  %v3882_v2 = vld [vmem:[#allocation2 + $0x22] sm:$0xff]  ;;  %v11586_v25 = vld [vmem:[#allocation19_spill] sm:$0xff] }
 0x3d4   : > { %v10785_v1 = vpack.c.bf16 %v3882_v2, %v3881_v28  ;;  %v11587_v39 = vld [vmem:[#allocation67_spill] sm:$0xff]  ;;  %v11602_v2 = vld [vmem:[#allocation36_spill] sm:$0xff]  ;;  %v11603_v28 = vld [vmem:[#allocation34_spill] sm:$0xff] }
 0x3d5   : > { %4370 = vmatmul.bf16.vlgmr.msrb.gmra.mxu0 %v10711_v5  ;;  %4384 = vmatmul.bf16.vlgmr.msrb.gmra.mxu2 %v10711_v5 }
 0x3d6   : > { %4682 = vmatpush.bf16.msrb.mxu0 %v9764_v50  ;;  %4696 = vmatpush.bf16.msrb.mxu2 %v9771_v0  ;;  %v6765_v50 = vld [vmem:[%s10900_s3 + $0x214] sm:$0xf0]  ;;  %v6764_v0 = vld [vmem:[%s10900_s3 + $0x214] sm:$0xf] }
 0x3d7   : > { %4241 = vmatmul.bf16.vlgmr.msrb.gmra.mxu1 %v10722_v10  ;;  %4255 = vmatmul.bf16.vlgmr.msrb.gmra.mxu3 %v10722_v10  ;;  %v10759_v55 = vor.u32 %v6765_v50, %v6355_v42  ;;  %v10761_v11 = vor.u32 %v6764_v0, %v6357_v37  ;;  %v11594_v42 = vld [vmem:[#allocation31_spill] sm:$0xff]  ;;  %v11595_v50 = vld [vmem:[#allocation42_spill] sm:$0xff]  ;;  %v11596_v0 = vld [vmem:[#allocation29_spill] sm:$0xff] }
 0x3d8   : > { %4495 = vmatpush.bf16.msra.mxu1 %v10713_v59  ;;  %4509 = vmatpush.bf16.msra.mxu3 %v10715_v49  ;;  %v11597_v37 = vld [vmem:[#allocation33_spill] sm:$0xff] }
 0x3da   : > { %4683 = vmatpush.bf16.msrb.mxu0 %v9790_v63  ;;  %4697 = vmatpush.bf16.msrb.mxu2 %v9797_v43  ;;  %v6762_v63 = vld [vmem:[%s10900_s3 + $0x204] sm:$0xf]  ;;  %v6349_v43 = vld [vmem:[%s10900_s3 + $0x208] sm:$0xf0] }
 0x3db   : > { %v10781_v47 = vor.u32 %v6762_v63, %v6349_v43  ;;  %v11600_v63 = vld [vmem:[#allocation32_spill] sm:$0xff]  ;;  %v11601_v43 = vld [vmem:[#allocation45_spill] sm:$0xff] }
 0x3dc   : > { %4496 = vmatpush.bf16.msra.mxu1 %v10739_v58  ;;  %4510 = vmatpush.bf16.msra.mxu3 %v10741_v13 }
 0x3de   : > { %4684 = vmatpush.bf16.msrb.mxu0 %v9818_v36  ;;  %4698 = vmatpush.bf16.msrb.mxu2 %v9823_v16  ;;  %v3878_v36 = vld [vmem:[#allocation2 + $0x2] sm:$0xff] }
 0x3df   : > { %v3880_v16 = vpack.c.bf16 %v3879_v18, %v3878_v36  ;;  %v11604_v18 = vld [vmem:[#allocation39_spill] sm:$0xff] }
 0x3e0   : > { %4497 = vmatpush.bf16.msra.mxu1 %v10759_v55  ;;  %4511 = vmatpush.bf16.msra.mxu3 %v10761_v11  ;;  %v11606_v36 = vld [vmem:[#allocation75_spill] sm:$0xff] }
 0x3e2   : > { %4685 = vmatpush.bf16.msrb.mxu0 %v9839_v3  ;;  %4699 = vmatpush.bf16.msrb.mxu2 %v9848_v48  ;;  %v11566_v3 = vld [vmem:[#allocation5_spill] sm:$0xff]  ;;  %v11567_v48 = vld [vmem:[#allocation7_spill] sm:$0xff] }
 0x3e4   : > { %4498 = vmatpush.bf16.msra.mxu1 %v10779_v38  ;;  %4512 = vmatpush.bf16.msra.mxu3 %v10781_v47 }
 0x3e5   : > { %4628 = vmatmul.bf16.vlgmr.msra.gmra.mxu0 %v10785_v1  ;;  %4642 = vmatmul.bf16.vlgmr.msra.gmra.mxu2 %v10785_v1 }
 0x3e6   : > { %4686 = vmatpush.bf16.msrb.mxu0 %v9864_v19  ;;  %4700 = vmatpush.bf16.msrb.mxu2 %v9871_v23  ;;  %v11568_v19 = vld [vmem:[#allocation3_spill] sm:$0xff]  ;;  %v11569_v23 = vld [vmem:[#allocation4_spill] sm:$0xff] }
 0x3e7   : > { %4499 = vmatmul.bf16.vlgmr.msra.gmra.mxu1 %v3880_v16  ;;  %4513 = vmatmul.bf16.vlgmr.msra.gmra.mxu3 %v3880_v16 }
 0x3e8   : > { %4654 = vmatpush.bf16.msrb.mxu1 %v9966_v32  ;;  %4668 = vmatpush.bf16.msrb.mxu3 %v9971_v21  ;;  %v11570_v32 = vld [vmem:[#allocation26_spill] sm:$0xff]  ;;  %v11571_v21 = vld [vmem:[#allocation20_spill] sm:$0xff] }
 0x3ea   : > { %4687 = vmatpush.bf16.msrb.mxu0 %v9886_v33  ;;  %4701 = vmatpush.bf16.msrb.mxu2 %v9891_v4  ;;  %v11572_v33 = vld [vmem:[#allocation11_spill] sm:$0xff]  ;;  %v11573_v4 = vld [vmem:[#allocation9_spill] sm:$0xff] }
 0x3ec   : > { %4655 = vmatpush.bf16.msrb.mxu1 %v9986_v51  ;;  %4669 = vmatpush.bf16.msrb.mxu3 %v9991_v26  ;;  %v11574_v51 = vld [vmem:[#allocation6_spill] sm:$0xff]  ;;  %v11576_v26 = vld [vmem:[#allocation12_spill] sm:$0xff] }
 0x3ee   : > { %4688 = vmatpush.bf16.msrb.mxu0 %v9905_v22  ;;  %4702 = vmatpush.bf16.msrb.mxu2 %v11566_v3  ;;  %v11575_v22 = vld [vmem:[#allocation10_spill] sm:$0xff]  ;;  %v11607_v3 = vld [vmem:[#allocation41_spill] sm:$0xff] }
 0x3f0   : > { %4656 = vmatpush.bf16.msrb.mxu1 %v11567_v48  ;;  %4670 = vmatpush.bf16.msrb.mxu3 %v11568_v19  ;;  %v11608_v48 = vld [vmem:[#allocation38_spill] sm:$0xff]  ;;  %v11609_v19 = vld [vmem:[#allocation37_spill] sm:$0xff] }
 0x3f2   : > { %4689 = vmatpush.bf16.msrb.mxu0 %v11569_v23  ;;  %4703 = vmatpush.bf16.msrb.mxu2 %v11570_v32  ;;  %v11610_v23 = vld [vmem:[#allocation55_spill] sm:$0xff]  ;;  %v11611_v32 = vld [vmem:[#allocation61_spill] sm:$0xff] }
 0x3f4   : > { %4657 = vmatpush.bf16.msrb.mxu1 %v11573_v4  ;;  %4671 = vmatpush.bf16.msrb.mxu3 %v11574_v51  ;;  %v11614_v4 = vld [vmem:[#allocation56_spill] sm:$0xff]  ;;  %v11615_v51 = vld [vmem:[#allocation50_spill] sm:$0xff] }
 0x3f5   : > { %4690 = vmatmul.bf16.vlgmr.msrb.gmra.mxu0 %v10642_v57  ;;  %4704 = vmatmul.bf16.vlgmr.msrb.gmra.mxu2 %v10642_v57  ;;  %v11585_v57 = vld [vmem:[#allocation18_spill] sm:$0xff] }
 0x3f6   : > { %4742 = vmatpush.bf16.msra.mxu0 %v11571_v21  ;;  %4756 = vmatpush.bf16.msra.mxu2 %v11572_v33  ;;  %v11612_v21 = vld [vmem:[#allocation57_spill] sm:$0xff]  ;;  %v11613_v33 = vld [vmem:[#allocation44_spill] sm:$0xff] }
 0x3f8   : > { %4658 = vmatpush.bf16.msrb.mxu1 %v11577_v34  ;;  %4672 = vmatpush.bf16.msrb.mxu3 %v11578_v24  ;;  %v11619_v34 = vld [vmem:[#allocation40_spill] sm:$0xff]  ;;  %v11620_v24 = vld [vmem:[#allocation30_spill] sm:$0xff] }
 0x3fa   : > { %4743 = vmatpush.bf16.msra.mxu0 %v11575_v22  ;;  %4757 = vmatpush.bf16.msra.mxu2 %v11576_v26  ;;  %v11616_v22 = vld [vmem:[#allocation49_spill] sm:$0xff]  ;;  %v11618_v26 = vld [vmem:[#allocation46_spill] sm:$0xff] }
 0x3fc   : > { %4659 = vmatpush.bf16.msrb.mxu1 %v11581_v44  ;;  %4673 = vmatpush.bf16.msrb.mxu3 %v11582_v52  ;;  %v11623_v44 = vld [vmem:[#allocation51_spill] sm:$0xff]  ;;  %v11624_v52 = vld [vmem:[#allocation68_spill] sm:$0xff] }
 0x3fe   : > { %4744 = vmatpush.bf16.msra.mxu0 %v11579_v31  ;;  %4758 = vmatpush.bf16.msra.mxu2 %v11580_v7  ;;  %v11621_v31 = vld [vmem:[#allocation63_spill] sm:$0xff]  ;;  %v11622_v7 = vld [vmem:[#allocation52_spill] sm:$0xff] }
 0x400   : > { %4660 = vmatpush.bf16.msrb.mxu1 %v11585_v57  ;;  %4674 = vmatpush.bf16.msrb.mxu3 %v11586_v25 }
 0x402   : > { %4745 = vmatpush.bf16.msra.mxu0 %v11583_v14  ;;  %4759 = vmatpush.bf16.msra.mxu2 %v11584_v56 }
 0x404   : > { %4661 = vmatpush.bf16.msrb.mxu1 %v11589_v46  ;;  %4675 = vmatpush.bf16.msrb.mxu3 %v11590_v12 }
 0x406   : > { %4746 = vmatpush.bf16.msra.mxu0 %v11587_v39  ;;  %4760 = vmatpush.bf16.msra.mxu2 %v11588_v30 }
 0x407   : > { %4662 = vmatmul.bf16.vlgmr.msrb.gmra.mxu1 %v10722_v10  ;;  %4676 = vmatmul.bf16.vlgmr.msrb.gmra.mxu3 %v10722_v10  ;;  %v11605_v10 = vld [vmem:[#allocation73_spill] sm:$0xff] }
 0x408   : > { %4710 = vmatpush.bf16.msra.mxu1 %v11591_v6  ;;  %4724 = vmatpush.bf16.msra.mxu3 %v11592_v17 }
 0x40a   : > { %4747 = vmatpush.bf16.msra.mxu0 %v11593_v20  ;;  %4761 = vmatpush.bf16.msra.mxu2 %v11594_v42 }
 0x40c   : > { %4711 = vmatpush.bf16.msra.mxu1 %v11595_v50  ;;  %4725 = vmatpush.bf16.msra.mxu3 %v11596_v0 }
 0x40e   : > { %4748 = vmatpush.bf16.msra.mxu0 %v11597_v37  ;;  %4762 = vmatpush.bf16.msra.mxu2 %v11598_v54 }
 0x410   : > { %4712 = vmatpush.bf16.msra.mxu1 %v11599_v60  ;;  %4726 = vmatpush.bf16.msra.mxu3 %v11600_v63 }
 0x412   : > { %4749 = vmatpush.bf16.msra.mxu0 %v11601_v43  ;;  %4763 = vmatpush.bf16.msra.mxu2 %v11602_v2 }
 0x414   : > { %4713 = vmatpush.bf16.msra.mxu1 %v11605_v10  ;;  %4727 = vmatpush.bf16.msra.mxu3 %v11606_v36 }
 0x415   : > { %4750 = vmatmul.bf16.vlgmr.msra.gmra.mxu0 %v3880_v16  ;;  %4764 = vmatmul.bf16.vlgmr.msra.gmra.mxu2 %v3880_v16  ;;  %v11617_v16 = vld [vmem:[#allocation43_spill] sm:$0xff] }
 0x416   : > { %4806 = vmatpush.bf16.msrb.mxu0 %v11603_v28  ;;  %4820 = vmatpush.bf16.msrb.mxu2 %v11604_v18 }
 0x418   : > { %4714 = vmatpush.bf16.msra.mxu1 %v11609_v19  ;;  %4728 = vmatpush.bf16.msra.mxu3 %v11610_v23 }
 0x41a   : > { %4807 = vmatpush.bf16.msrb.mxu0 %v11607_v3  ;;  %4821 = vmatpush.bf16.msrb.mxu2 %v11608_v48 }
 0x41c   : > { %4715 = vmatpush.bf16.msra.mxu1 %v11613_v33  ;;  %4729 = vmatpush.bf16.msra.mxu3 %v11614_v4 }
 0x41e   : > { %4808 = vmatpush.bf16.msrb.mxu0 %v11611_v32  ;;  %4822 = vmatpush.bf16.msrb.mxu2 %v11612_v21 }
 0x420   : > { %4716 = vmatpush.bf16.msra.mxu1 %v11617_v16  ;;  %4730 = vmatpush.bf16.msra.mxu3 %v11618_v26 }
 0x422   : > { %4809 = vmatpush.bf16.msrb.mxu0 %v11615_v51  ;;  %4823 = vmatpush.bf16.msrb.mxu2 %v11616_v22 }
 0x424   : > { %4717 = vmatpush.bf16.msra.mxu1 %v11621_v31  ;;  %4731 = vmatpush.bf16.msra.mxu3 %v11622_v7 }
 0x426   : > { %4810 = vmatpush.bf16.msrb.mxu0 %v11619_v34  ;;  %4824 = vmatpush.bf16.msrb.mxu2 %v11620_v24 }
 0x427   : > { %4718 = vmatmul.bf16.vlgmr.msra.gmra.mxu1 %v10711_v5  ;;  %4732 = vmatmul.bf16.vlgmr.msra.gmra.mxu3 %v10711_v5 }
 0x428   : > { %4774 = vmatpush.bf16.msrb.mxu1 %v10632_v61  ;;  %4788 = vmatpush.bf16.msrb.mxu3 %v10634_v35  ;;  %v3885_v61 = vld [vmem:[#allocation2 + $0xb] sm:$0xff]  ;;  %v3884_v35 = vld [vmem:[#allocation2 + $0x3] sm:$0xff] }
 0x429   : > { %v3886_v14 = vpack.c.bf16 %v3885_v61, %v3884_v35 }
 0x42a   : > { %4811 = vmatpush.bf16.msrb.mxu0 %v11623_v44  ;;  %4825 = vmatpush.bf16.msrb.mxu2 %v11624_v52 }
 0x42c   : > { %4775 = vmatpush.bf16.msrb.mxu1 %v10654_v40  ;;  %4789 = vmatpush.bf16.msrb.mxu3 %v10656_v29 }
 0x42e   : > { %4812 = vmatpush.bf16.msrb.mxu0 %v10562_v9  ;;  %4826 = vmatpush.bf16.msrb.mxu2 %v10568_v62  ;;  %v4117_v9 = vpop.f32.mrf.mxu0 }
 0x430   : > { %4776 = vmatpush.bf16.msrb.mxu1 %v10675_v41  ;;  %4790 = vmatpush.bf16.msrb.mxu3 %v10677_v53 }
 0x432   : > { %4813 = vmatpush.bf16.msrb.mxu0 %v10585_v45  ;;  %4827 = vmatpush.bf16.msrb.mxu2 %v10591_v27  ;;  %v4131_v45 = vpop.f32.mrf.mxu2 }
 0x434   : > { %4777 = vmatpush.bf16.msrb.mxu1 %v10693_v8  ;;  %4791 = vmatpush.bf16.msrb.mxu3 %v10695_v15 }
 0x435   : > { %4814 = vmatmul.bf16.vlgmr.msrb.gmra.mxu0 %v3886_v14  ;;  %4828 = vmatmul.bf16.vlgmr.msrb.gmra.mxu2 %v3886_v14 }
 0x436   : > { %v4119_v40 = vpop.f32.mrf.mxu0 }
 0x438   : > { %4778 = vmatpush.bf16.msrb.mxu1 %v10713_v59  ;;  %4792 = vmatpush.bf16.msrb.mxu3 %v10715_v49 }
 0x43a   : > { %v4133_v53 = vpop.f32.mrf.mxu2 }
 0x43c   : > { %4779 = vmatpush.bf16.msrb.mxu1 %v10739_v58  ;;  %4793 = vmatpush.bf16.msrb.mxu3 %v10741_v13 }
 0x440   : > { %4780 = vmatpush.bf16.msrb.mxu1 %v10759_v55  ;;  %4794 = vmatpush.bf16.msrb.mxu3 %v10761_v11 }
 0x442   : > { %v4009_v62 = vpop.f32.mrf.mxu1 }
 0x443   : > { %v4118_v5 = vadd.f32 %v4117_v9, %v4009_v62 }
 0x444   : > { %4781 = vmatpush.bf16.msrb.mxu1 %v10779_v38  ;;  %4795 = vmatpush.bf16.msrb.mxu3 %v10781_v47 }
 0x447   : > { %4782 = vmatmul.bf16.vlgmr.msrb.gmra.mxu1 %v10785_v1  ;;  %4796 = vmatmul.bf16.vlgmr.msrb.gmra.mxu3 %v10785_v1 }
 0x448   : > { %v4023_v27 = vpop.f32.mrf.mxu3 }
 0x449   : > { %v4132_v11 = vadd.f32 %v4131_v45, %v4023_v27 }
 0x44a   : > { %v4011_v29 = vpop.f32.mrf.mxu1 }
 0x44b   : > { %v4120_v41 = vadd.f32 %v4119_v40, %v4011_v29 }
 0x450   : > { %v4025_v8 = vpop.f32.mrf.mxu3 }
 0x451   : > { %v4134_v15 = vadd.f32 %v4133_v53, %v4025_v8 }
 0x452   : > { %v4371_v58 = vpop.f32.mrf.mxu0 }
 0x454   : > { %v4242_v59 = vpop.f32.mrf.mxu1 }
 0x455   : > { %v4261_v49 = vadd.f32 %v4242_v59, %v4118_v5 }
 0x457   : > { %v4390_v13 = vadd.f32 %v4371_v58, %v4261_v49 }
 0x458   : > { %v4385_v55 = vpop.f32.mrf.mxu2 }
 0x45a   : > { %v4256_v38 = vpop.f32.mrf.mxu3  ;;  %v4373_v57 = vpop.f32.mrf.mxu0 }
 0x45b   : > { %v4262_v47 = vadd.f32 %v4256_v38, %v4132_v11 }
 0x45c   : > { %v4244_v56 = vpop.f32.mrf.mxu1 }
 0x45d   : > { %v4391_v1 = vadd.f32 %v4385_v55, %v4262_v47  ;;  %v4263_v20 = vadd.f32 %v4244_v56, %v4120_v41 }
 0x45f   : > { %v4392_v63 = vadd.f32 %v4373_v57, %v4263_v20 }
 0x460   : > { %v4387_v25 = vpop.f32.mrf.mxu2 }
 0x462   : > { %v4258_v39 = vpop.f32.mrf.mxu3  ;;  %v4629_v46 = vpop.f32.mrf.mxu0 }
 0x463   : > { %v4264_v50 = vadd.f32 %v4258_v39, %v4134_v15 }
 0x464   : > { %v4500_v30 = vpop.f32.mrf.mxu1 }
 0x465   : > { %v4519_v12 = vadd.f32 %v4500_v30, %v4390_v13  ;;  %v4393_v2 = vadd.f32 %v4387_v25, %v4264_v50 }
 0x467   : > { %v4648_v0 = vadd.f32 %v4629_v46, %v4519_v12 }
 0x468   : > { %v4643_v6 = vpop.f32.mrf.mxu2 }
 0x46a   : > { %v4514_v17 = vpop.f32.mrf.mxu3  ;;  %v4631_v10 = vpop.f32.mrf.mxu0 }
 0x46b   : > { %v4520_v42 = vadd.f32 %v4514_v17, %v4391_v1  ;;  %v6811_v17 = vld [vmem:[%s10901_s4] ss:$0 sm:$0xff] }
 0x46c   : > { %v4502_v54 = vpop.f32.mrf.mxu1 }
 0x46d   : > { %v4649_v37 = vadd.f32 %v4643_v6, %v4520_v42  ;;  %v4521_v43 = vadd.f32 %v4502_v54, %v4392_v63 }
 0x46f   : > { %v4652_v60 = vmax.f32 %v4648_v0, %v4649_v37  ;;  %v4650_v3 = vadd.f32 %v4631_v10, %v4521_v43 }
 0x470   : > { %v4645_v36 = vpop.f32.mrf.mxu2 }
 0x472   : > { %v4516_v28 = vpop.f32.mrf.mxu3  ;;  %v4691_v32 = vpop.f32.mrf.mxu0 }
 0x473   : > { %v4522_v18 = vadd.f32 %v4516_v28, %v4393_v2 }
 0x475   : > { %v4651_v48 = vadd.f32 %v4645_v36, %v4522_v18 }
 0x477   : > { %v4653_v19 = vmax.f32 %v4650_v3, %v4651_v48 }
 0x478   : > { %v4705_v21 = vpop.f32.mrf.mxu2 }
 0x47a   : > { %v4693_v51 = vpop.f32.mrf.mxu0 }
 0x480   : > { %v4707_v22 = vpop.f32.mrf.mxu2 }
 0x484   : > { %v4663_v23 = vpop.f32.mrf.mxu1 }
 0x485   : > { %v4692_v9 = vadd.f32 %v4691_v32, %v4663_v23 }
 0x48a   : > { %v4677_v33 = vpop.f32.mrf.mxu3 }
 0x48b   : > { %v4706_v35 = vadd.f32 %v4705_v21, %v4677_v33 }
 0x48c   : > { %v4665_v4 = vpop.f32.mrf.mxu1 }
 0x48d   : > { %v4694_v27 = vadd.f32 %v4693_v51, %v4665_v4 }
 0x492   : > { %v4679_v16 = vpop.f32.mrf.mxu3  ;;  %v4751_v34 = vpop.f32.mrf.mxu0 }
 0x493   : > { %v4708_v8 = vadd.f32 %v4707_v22, %v4679_v16 }
 0x498   : > { %v4765_v24 = vpop.f32.mrf.mxu2 }
 0x49a   : > { %v4753_v44 = vpop.f32.mrf.mxu0 }
 0x4a0   : > { %v4767_v52 = vpop.f32.mrf.mxu2 }
 0x4a4   : > { %v4719_v26 = vpop.f32.mrf.mxu1 }
 0x4a5   : > { %v4738_v45 = vadd.f32 %v4719_v26, %v4692_v9 }
 0x4a7   : > { %v4770_v5 = vadd.f32 %v4751_v34, %v4738_v45 }
 0x4aa   : > { %v4733_v31 = vpop.f32.mrf.mxu3 }
 0x4ab   : > { %v4739_v62 = vadd.f32 %v4733_v31, %v4706_v35 }
 0x4ac   : > { %v4721_v7 = vpop.f32.mrf.mxu1 }
 0x4ad   : > { %v4771_v29 = vadd.f32 %v4765_v24, %v4739_v62  ;;  %v4740_v15 = vadd.f32 %v4721_v7, %v4694_v27 }
 0x4af   : > { %v4772_v11 = vadd.f32 %v4753_v44, %v4740_v15 }
 0x4b2   : > { %v4735_v61 = vpop.f32.mrf.mxu3  ;;  %v4815_v40 = vpop.f32.mrf.mxu0 }
 0x4b3   : > { %v4741_v49 = vadd.f32 %v4735_v61, %v4708_v8 }
 0x4b5   : > { %v4773_v56 = vadd.f32 %v4767_v52, %v4741_v49 }
 0x4b8   : > { %v4829_v41 = vpop.f32.mrf.mxu2 }
 0x4ba   : > { %v4817_v39 = vpop.f32.mrf.mxu0 }
 0x4c0   : > { %v4831_v30 = vpop.f32.mrf.mxu2 }
 0x4c4   : > { %v4783_v14 = vpop.f32.mrf.mxu1 }
 0x4c5   : > { %v4802_v58 = vadd.f32 %v4783_v14, %v4770_v5 }
 0x4c7   : > { %v4834_v38 = vadd.f32 %v4815_v40, %v4802_v58 }
 0x4ca   : > { %v4797_v53 = vpop.f32.mrf.mxu3 }
 0x4cb   : > { %v4803_v59 = vadd.f32 %v4797_v53, %v4771_v29 }
 0x4cc   : > { %v4785_v13 = vpop.f32.mrf.mxu1 }
 0x4cd   : > { %v4835_v55 = vadd.f32 %v4829_v41, %v4803_v59  ;;  %v4804_v47 = vadd.f32 %v4785_v13, %v4772_v11 }
 0x4cf   : > { %v4838_v57 = vmax.f32 %v4834_v38, %v4835_v55  ;;  %v4836_v46 = vadd.f32 %v4817_v39, %v4804_v47 }
 0x4d1   : > { %v4840_v6 = vmax.f32 %v4652_v60, %v4838_v57 }
 0x4d2   : > { %v4799_v1 = vpop.f32.mrf.mxu3 }
 0x4d3   : > { %v4805_v25 = vadd.f32 %v4799_v1, %v4773_v56  ;;  %v4846_v50 = vadd.f32 %v6811_v17, %v4840_v6 }
 0x4d5   : > { %v4837_v12 = vadd.f32 %v4831_v30, %v4805_v25 }
 0x4d7   : > { %v4839_v20 = vmax.f32 %v4836_v46, %v4837_v12 }
 0x4d9   : > { %v4841_v42 = vmax.f32 %v4653_v19, %v4839_v20 }
 0x4db   : > { %v4847_v0 = vadd.f32 %v6811_v17, %v4841_v42 }
 0x4dd   : > { %v6797_v37 = vpack.c.bf16 %v4847_v0, %v4846_v50 }
 0x4df   : > { %6798 = vst [vmem:[%s224_s9] sm:$0xff] %v6797_v37  }
 0x4e0 PF: > { %s15_s18 = sadd.s32 1, %s6818_s18  }
 0x4e1   : > { %p12_p4 = scmp.ge.s32.totalorder %s15_s18, 4  }
 0x4e3   :  { %14 = sbr.rel (!%p12_p4) target bundleno = 1 (0x1), region = 84 }

// kernel: critic_forward.3
= control target key start
LH: loop header
LB: loop body
LE: loop exit
PB: predicated region body
PF: predicated region fallthrough
CT: control target
= control target key end

     0   :  { %vm564_vm0 = vcmask 1041408   ;;  %vm560_vm1 = vcmask 15360   ;;  %vm4842_vm2 = vcmask 25600   ;;  %s11642_s2 = inlined_call_operand.vmem [shape: bf16[2048,512], index: 2, kind: input, shape index: {}]   ;;  %s11643_s3 = inlined_call_operand.vmem [shape: f32[2,512], index: 3, kind: input, shape index: {}]   ;;  %s11644_s1 = inlined_call_operand.vmem [shape: f32[2,2], index: 1, kind: input, shape index: {}]   ;;  %s11645_s0 = inlined_call_operand.vmem [shape: bf16[2,2048], index: 0, kind: input, shape index: {}]   ;;  %s11646_s5 = inlined_call_operand.vmem [shape: bf16[512,256], index: 5, kind: input, shape index: {}]   ;;  %s11647_s4 = inlined_call_operand.vmem [shape: f32[1,512], index: 4, kind: input, shape index: {}]   ;;  %s11648_s6 = inlined_call_operand.vmem [shape: f32[1,256], index: 6, kind: input, shape index: {}]   ;;  %s11649_s7 = inlined_call_operand.vmem [shape: bf16[256,128], index: 7, kind: input, shape index: {}]   ;;  %s11650_s8 = inlined_call_operand.vmem [shape: f32[1,128], index: 8, kind: input, shape index: {}]   ;;  %s11651_s9 = inlined_call_operand.vmem [shape: bf16[128,4], index: 9, kind: input, shape index: {}]   ;;  %s11652_s10 = inlined_call_operand.vmem [shape: f32[1,4], index: 10, kind: input, shape index: {}]   ;;  %s11653_s11 = inlined_call_operand.vmem [shape: f32[2,4], index: 11, kind: output, shape index: {}]  }
   0x1   :  { %v4970_v0 = vld [vmem:[%s11642_s2 + $0xe0] sm:$0xf]  ;;  %v7286_v1 = vld [vmem:[%s11642_s2 + $0xec] sm:$0xf0] }
   0x2   :  { %v5098_v2 = vld [vmem:[%s11642_s2 + $0x1e0] sm:$0xf]  ;;  %v4971_v3 = vor.u32 %v7286_v1, %v4970_v0  ;;  %v7318_v4 = vld [vmem:[%s11642_s2 + $0x1ec] sm:$0xf0] }
   0x3   :  { %v5226_v5 = vld [vmem:[%s11642_s2 + $0x2e0] sm:$0xf]  ;;  %v7350_v6 = vld [vmem:[%s11642_s2 + $0x2ec] sm:$0xf0]  ;;  %v5099_v7 = vor.u32 %v7318_v4, %v5098_v2 }
   0x4   :  { %v5227_v8 = vor.u32 %v7350_v6, %v5226_v5  ;;  %v4954_v9 = vld [vmem:[%s11642_s2 + $0xc0] sm:$0xf]  ;;  %v7282_v10 = vld [vmem:[%s11642_s2 + $0xcc] sm:$0xf0]  ;;  %3249 = vmatpush.bf16.msra.mxu0 %v4971_v3 }
   0x5   :  { %v5082_v11 = vld [vmem:[%s11642_s2 + $0x1c0] sm:$0xf]  ;;  %v4955_v12 = vor.u32 %v7282_v10, %v4954_v9  ;;  %v7314_v13 = vld [vmem:[%s11642_s2 + $0x1cc] sm:$0xf0]  ;;  %3262 = vmatpush.bf16.msra.mxu1 %v5099_v7 }
   0x6   :  { %v5210_v14 = vld [vmem:[%s11642_s2 + $0x2c0] sm:$0xf]  ;;  %v7346_v15 = vld [vmem:[%s11642_s2 + $0x2cc] sm:$0xf0]  ;;  %3275 = vmatpush.bf16.msra.mxu2 %v5227_v8  ;;  %v5083_v16 = vor.u32 %v7314_v13, %v5082_v11 }
   0x7   :  { %v5211_v17 = vor.u32 %v7346_v15, %v5210_v14  ;;  %v553_v18 = vld [vmem:[%s11643_s3] sm:$0xff]  ;;  %v7278_v20 = vld [vmem:[%s11642_s2 + $0xac] sm:$0xf0] }
   0x8   :  { %v4938_v19 = vld [vmem:[%s11642_s2 + $0xa0] sm:$0xf]  ;;  %555 = vst [vmem:[#allocation1] ss:$4 sm:$0xff] %v553_v18  ;;  %v7310_v22 = vld [vmem:[%s11642_s2 + $0x1ac] sm:$0xf0]  ;;  %3250 = vmatpush.bf16.msra.mxu0 %v4955_v12 }
   0x9   :  { %v5066_v21 = vld [vmem:[%s11642_s2 + $0x1a0] sm:$0xf]  ;;  %v7342_v24 = vld [vmem:[%s11642_s2 + $0x2ac] sm:$0xf0]  ;;  %v4939_v25 = vor.u32 %v7278_v20, %v4938_v19  ;;  %3263 = vmatpush.bf16.msra.mxu1 %v5083_v16 }
   0xa   :  { %v5194_v23 = vld [vmem:[%s11642_s2 + $0x2a0] sm:$0xf]  ;;  %3276 = vmatpush.bf16.msra.mxu2 %v5211_v17  ;;  %v5067_v26 = vor.u32 %v7310_v22, %v5066_v21  ;;  %v7274_v29 = vld [vmem:[%s11642_s2 + $0x8c] sm:$0xf0] }
   0xb   :  { %v5195_v27 = vor.u32 %v7342_v24, %v5194_v23  ;;  %v4922_v28 = vld [vmem:[%s11642_s2 + $0x80] sm:$0xf]  ;;  %v7306_v31 = vld [vmem:[%s11642_s2 + $0x18c] sm:$0xf0] }
   0xc   :  { %v5050_v30 = vld [vmem:[%s11642_s2 + $0x180] sm:$0xf]  ;;  %v7338_v33 = vld [vmem:[%s11642_s2 + $0x28c] sm:$0xf0]  ;;  %3251 = vmatpush.bf16.msra.mxu0 %v4939_v25  ;;  %v4923_v35 = vor.u32 %v7274_v29, %v4922_v28 }
   0xd   :  { %v5178_v32 = vld [vmem:[%s11642_s2 + $0x280] sm:$0xf]  ;;  %v7270_v37 = vld [vmem:[%s11642_s2 + $0x6c] sm:$0xf0]  ;;  %3264 = vmatpush.bf16.msra.mxu1 %v5067_v26  ;;  %v5051_v40 = vor.u32 %v7306_v31, %v5050_v30 }
   0xe   :  { %v8020_v34 = vld [vmem:[%s11644_s1] sm:$0x3]  ;;  %3277 = vmatpush.bf16.msra.mxu2 %v5195_v27  ;;  %v5179_v41 = vor.u32 %v7338_v33, %v5178_v32  ;;  %v7302_v43 = vld [vmem:[%s11642_s2 + $0x16c] sm:$0xf0] }
   0xf   :  { %v4906_v36 = vld [vmem:[%s11642_s2 + $0x60] sm:$0xf]  ;;  %v557_v42 = vld.sshfl [vmem:[#allocation1 + $0x8] sm:$0xff pattern:$0x73625140] }
  0x10   :  { %v5034_v38 = vld [vmem:[%s11642_s2 + $0x160] sm:$0xf]  ;;  %v7334_v45 = vld [vmem:[%s11642_s2 + $0x26c] sm:$0xf0]  ;;  %3252 = vmatpush.bf16.msra.mxu0 %v4923_v35  ;;  %v4907_v48 = vor.u32 %v7270_v37, %v4906_v36 }
  0x11   :  { %v556_v39 = vld.sshfl [vmem:[#allocation1] sm:$0xff pattern:$0x73625140]  ;;  %v558_v46 = vld.sshfl [vmem:[#allocation1 + $0x10] sm:$0xff pattern:$0x73625140]  ;;  %3265 = vmatpush.bf16.msra.mxu1 %v5051_v40  ;;  %v5035_v51 = vor.u32 %v7302_v43, %v5034_v38 }
  0x12   :  { %4848 = vmatpush.msk.msra.mxu3 %vm564_vm0, %v556_v39  ;;  %v5162_v44 = vld [vmem:[%s11642_s2 + $0x260] sm:$0xf]  ;;  %v559_v50 = vld.sshfl [vmem:[#allocation1 + $0x18] sm:$0xff pattern:$0x73625140]  ;;  %3278 = vmatpush.bf16.msra.mxu2 %v5179_v41 }
  0x13   :  { %4849 = vmatmul.msk.f32.vlgmr.msra.gmra.mxu3 %vm560_vm1, %v8020_v34  ;;  %v38_v47 = vld [vmem:[%s11645_s0] sm:$0xff]  ;;  %v5163_v52 = vor.u32 %v7334_v45, %v5162_v44  ;;  %v7266_v53 = vld [vmem:[%s11642_s2 + $0x4c] sm:$0xf0] }
  0x14   :  { %4850 = vmatpush.msk.msrb.mxu3 %vm564_vm0, %v557_v42  ;;  %v4890_v49 = vld [vmem:[%s11642_s2 + $0x40] sm:$0xf]  ;;  %654 = vst [vmem:[#allocation1] ss:$9 sm:$0xff] %v38_v47  ;;  %v7298_v55 = vld [vmem:[%s11642_s2 + $0x14c] sm:$0xf0]  ;;  %3253 = vmatpush.bf16.msra.mxu0 %v4907_v48 }
  0x15   :  { %v5018_v54 = vld [vmem:[%s11642_s2 + $0x140] sm:$0xf]  ;;  %v7330_v57 = vld [vmem:[%s11642_s2 + $0x24c] sm:$0xf0]  ;;  %v4891_v58 = vor.u32 %v7266_v53, %v4890_v49  ;;  %3266 = vmatpush.bf16.msra.mxu1 %v5035_v51 }
  0x16   :  { %v5146_v56 = vld [vmem:[%s11642_s2 + $0x240] sm:$0xf]  ;;  %4852 = vmatpush.msk.msra.mxu3 %vm564_vm0, %v558_v46  ;;  %3279 = vmatpush.bf16.msra.mxu2 %v5163_v52  ;;  %v5019_v59 = vor.u32 %v7298_v55, %v5018_v54  ;;  %v7262_v62 = vld [vmem:[%s11642_s2 + $0x2c] sm:$0xf0] }
  0x17   :  { %v5147_v60 = vor.u32 %v7330_v57, %v5146_v56  ;;  %v4874_v61 = vld [vmem:[%s11642_s2 + $0x20] sm:$0xf]  ;;  %v7294_v0 = vld [vmem:[%s11642_s2 + $0x12c] sm:$0xf0] }
  0x18   :  { %v5002_v63 = vld [vmem:[%s11642_s2 + $0x120] sm:$0xf]  ;;  %v7326_v2 = vld [vmem:[%s11642_s2 + $0x22c] sm:$0xf0]  ;;  %3254 = vmatpush.bf16.msra.mxu0 %v4891_v58  ;;  %v4875_v5 = vor.u32 %v7262_v62, %v4874_v61 }
  0x19   :  { %v5130_v1 = vld [vmem:[%s11642_s2 + $0x220] sm:$0xf]  ;;  %v7382_v4 = vld [vmem:[%s11642_s2 + $0x3ec] sm:$0xf0]  ;;  %3267 = vmatpush.bf16.msra.mxu1 %v5019_v59  ;;  %v5003_v7 = vor.u32 %v7294_v0, %v5002_v63 }
  0x1a   :  { %v5354_v3 = vld [vmem:[%s11642_s2 + $0x3e0] sm:$0xf]  ;;  %3280 = vmatpush.bf16.msra.mxu2 %v5147_v60  ;;  %v5131_v8 = vor.u32 %v7326_v2, %v5130_v1  ;;  %v7258_v9 = vld [vmem:[%s11642_s2 + $0xc] sm:$0xf0] }
  0x1b   :  { %4851 = vmatmul.msk.f32.vlgmr.msrb.gmra.mxu3 %vm560_vm1, %v8020_v34  ;;  %v4858_v6 = vld [vmem:[%s11642_s2] sm:$0xf]  ;;  %v7290_v11 = vld [vmem:[%s11642_s2 + $0x10c] sm:$0xf0]  ;;  %v5355_v18 = vor.u32 %v7382_v4, %v5354_v3 }
  0x1c   :  { %4854 = vmatpush.msk.msrb.mxu3 %vm564_vm0, %v559_v50  ;;  %v4986_v10 = vld [vmem:[%s11642_s2 + $0x100] sm:$0xf]  ;;  %v7322_v13 = vld [vmem:[%s11642_s2 + $0x20c] sm:$0xf0]  ;;  %3255 = vmatpush.bf16.msra.mxu0 %v4875_v5  ;;  %v4859_v19 = vor.u32 %v7258_v9, %v4858_v6 }
  0x1d   :  { %v5114_v12 = vld [vmem:[%s11642_s2 + $0x200] sm:$0xf]  ;;  %v7414_v15 = vld [vmem:[%s11642_s2 + $0x4ec] sm:$0xf0]  ;;  %3268 = vmatpush.bf16.msra.mxu1 %v5003_v7  ;;  %v4987_v24 = vor.u32 %v7290_v11, %v4986_v10 }
  0x1e   :  { %v5482_v14 = vld [vmem:[%s11642_s2 + $0x4e0] sm:$0xf]  ;;  %v7446_v17 = vld [vmem:[%s11642_s2 + $0x5ec] sm:$0xf0]  ;;  %3281 = vmatpush.bf16.msra.mxu2 %v5131_v8  ;;  %v5115_v25 = vor.u32 %v7322_v13, %v5114_v12 }
  0x1f   :  { %v5610_v16 = vld [vmem:[%s11642_s2 + $0x5e0] sm:$0xf]  ;;  %v7478_v21 = vld [vmem:[%s11642_s2 + $0x6ec] sm:$0xf0]  ;;  %v5483_v26 = vor.u32 %v7414_v15, %v5482_v14 }
  0x20   :  { %v5738_v20 = vld [vmem:[%s11642_s2 + $0x6e0] sm:$0xf]  ;;  %v7378_v23 = vld [vmem:[%s11642_s2 + $0x3cc] sm:$0xf0]  ;;  %v5611_v27 = vor.u32 %v7446_v17, %v5610_v16  ;;  %3256 = vmatpush.bf16.msra.mxu0 %v4859_v19 }
  0x21   :  { %v5338_v22 = vld [vmem:[%s11642_s2 + $0x3c0] sm:$0xf]  ;;  %v5739_v29 = vor.u32 %v7478_v21, %v5738_v20  ;;  %v7410_v30 = vld [vmem:[%s11642_s2 + $0x4cc] sm:$0xf0]  ;;  %3269 = vmatpush.bf16.msra.mxu1 %v4987_v24 }
  0x22   :  { %v5466_v28 = vld [vmem:[%s11642_s2 + $0x4c0] sm:$0xf]  ;;  %v7442_v32 = vld [vmem:[%s11642_s2 + $0x5cc] sm:$0xf0]  ;;  %v5339_v33 = vor.u32 %v7378_v23, %v5338_v22  ;;  %3282 = vmatpush.bf16.msra.mxu2 %v5115_v25 }
  0x23   :  { %4853 = vmatmul.msk.f32.vlgmr.msra.gmra.mxu3 %vm560_vm1, %v8020_v34  ;;  %v5594_v31 = vld [vmem:[%s11642_s2 + $0x5c0] sm:$0xf]  ;;  %v7474_v37 = vld [vmem:[%s11642_s2 + $0x6cc] sm:$0xf0]  ;;  %v5467_v42 = vor.u32 %v7410_v30, %v5466_v28 }
  0x24   :  { %3288 = vmatpush.bf16.msra.mxu3 %v5355_v18  ;;  %v8149_v35 = vld [vmem:[#allocation1] sm:$0xff]  ;;  %v8157_v38 = vld [vmem:[#allocation1 + $0x12] sm:$0xff]  ;;  %3301 = vmatpush.bf16.msrb.mxu0 %v5483_v26  ;;  %v8165_v41 = vld [vmem:[#allocation1 + $0x9] sm:$0xff]  ;;  %v5595_v43 = vor.u32 %v7442_v32, %v5594_v31 }
  0x25   :  { %v5722_v36 = vld [vmem:[%s11642_s2 + $0x6c0] sm:$0xf]  ;;  %v7374_v40 = vld [vmem:[%s11642_s2 + $0x3ac] sm:$0xf0]  ;;  %3314 = vmatpush.bf16.msrb.mxu1 %v5611_v27  ;;  %3257 = vmatmul.bf16.vlgmr.msra.gmra.mxu0 %v8149_v35 }
  0x26   :  { %v5322_v39 = vld [vmem:[%s11642_s2 + $0x3a0] sm:$0xf]  ;;  %3327 = vmatpush.bf16.msrb.mxu2 %v5739_v29  ;;  %v5723_v45 = vor.u32 %v7474_v37, %v5722_v36  ;;  %v7406_v46 = vld [vmem:[%s11642_s2 + $0x4ac] sm:$0xf0]  ;;  %3270 = vmatmul.bf16.vlgmr.msra.gmra.mxu1 %v8165_v41 }
  0x27   :  { %v5450_v44 = vld [vmem:[%s11642_s2 + $0x4a0] sm:$0xf]  ;;  %v7438_v48 = vld [vmem:[%s11642_s2 + $0x5ac] sm:$0xf0]  ;;  %3283 = vmatmul.bf16.vlgmr.msra.gmra.mxu2 %v8157_v38  ;;  %v5323_v49 = vor.u32 %v7374_v40, %v5322_v39 }
  0x28   :  { %v5578_v47 = vld [vmem:[%s11642_s2 + $0x5a0] sm:$0xf]  ;;  %3289 = vmatpush.bf16.msra.mxu3 %v5339_v33  ;;  %v7470_v51 = vld [vmem:[%s11642_s2 + $0x6ac] sm:$0xf0]  ;;  %3302 = vmatpush.bf16.msrb.mxu0 %v5467_v42  ;;  %v5451_v54 = vor.u32 %v7406_v46, %v5450_v44 }
  0x29   :  { %v5706_v50 = vld [vmem:[%s11642_s2 + $0x6a0] sm:$0xf]  ;;  %v7370_v53 = vld [vmem:[%s11642_s2 + $0x38c] sm:$0xf0]  ;;  %3315 = vmatpush.bf16.msrb.mxu1 %v5595_v43  ;;  %v5579_v55 = vor.u32 %v7438_v48, %v5578_v47 }
  0x2a   :  { %v5306_v52 = vld [vmem:[%s11642_s2 + $0x380] sm:$0xf]  ;;  %3328 = vmatpush.bf16.msrb.mxu2 %v5723_v45  ;;  %v5707_v57 = vor.u32 %v7470_v51, %v5706_v50  ;;  %v7402_v58 = vld [vmem:[%s11642_s2 + $0x48c] sm:$0xf0] }
  0x2b   :  { %v5434_v56 = vld [vmem:[%s11642_s2 + $0x480] sm:$0xf]  ;;  %v7434_v60 = vld [vmem:[%s11642_s2 + $0x58c] sm:$0xf0]  ;;  %4855 = vmatmul.msk.f32.vlgmr.msrb.gmra.mxu3 %vm560_vm1, %v8020_v34  ;;  %v5307_v61 = vor.u32 %v7370_v53, %v5306_v52 }
  0x2c   :  { %v5562_v59 = vld [vmem:[%s11642_s2 + $0x580] sm:$0xf]  ;;  %3290 = vmatpush.bf16.msra.mxu3 %v5323_v49  ;;  %v7466_v63 = vld [vmem:[%s11642_s2 + $0x68c] sm:$0xf0]  ;;  %3303 = vmatpush.bf16.msrb.mxu0 %v5451_v54  ;;  %v5435_v34 = vor.u32 %v7402_v58, %v5434_v56 }
  0x2d   :  { %v5690_v62 = vld [vmem:[%s11642_s2 + $0x680] sm:$0xf]  ;;  %v7366_v1 = vld [vmem:[%s11642_s2 + $0x36c] sm:$0xf0]  ;;  %3316 = vmatpush.bf16.msrb.mxu1 %v5579_v55  ;;  %v5563_v2 = vor.u32 %v7434_v60, %v5562_v59 }
  0x2e   :  { %v5290_v0 = vld [vmem:[%s11642_s2 + $0x360] sm:$0xf]  ;;  %3329 = vmatpush.bf16.msrb.mxu2 %v5707_v57  ;;  %v5691_v4 = vor.u32 %v7466_v63, %v5690_v62  ;;  %v7398_v5 = vld [vmem:[%s11642_s2 + $0x46c] sm:$0xf0] }
  0x2f   :  { %v5418_v3 = vld [vmem:[%s11642_s2 + $0x460] sm:$0xf]  ;;  %v7430_v7 = vld [vmem:[%s11642_s2 + $0x56c] sm:$0xf0]  ;;  %v5291_v8 = vor.u32 %v7366_v1, %v5290_v0  ;;  %v39_v1 = vld [vmem:[%s11645_s0 + $0x8] sm:$0xff] }
  0x30   :  { %v5546_v6 = vld [vmem:[%s11642_s2 + $0x560] sm:$0xf]  ;;  %3291 = vmatpush.bf16.msra.mxu3 %v5307_v61  ;;  %v7462_v10 = vld [vmem:[%s11642_s2 + $0x66c] sm:$0xf0]  ;;  %3304 = vmatpush.bf16.msrb.mxu0 %v5435_v34  ;;  %v5419_v13 = vor.u32 %v7398_v5, %v5418_v3 }
  0x31   :  { %v5674_v9 = vld [vmem:[%s11642_s2 + $0x660] sm:$0xf]  ;;  %v7362_v12 = vld [vmem:[%s11642_s2 + $0x34c] sm:$0xf0]  ;;  %3317 = vmatpush.bf16.msrb.mxu1 %v5563_v2  ;;  %v5547_v14 = vor.u32 %v7430_v7, %v5546_v6 }
  0x32   :  { %v5274_v11 = vld [vmem:[%s11642_s2 + $0x340] sm:$0xf]  ;;  %3330 = vmatpush.bf16.msrb.mxu2 %v5691_v4  ;;  %v5675_v16 = vor.u32 %v7462_v10, %v5674_v9  ;;  %v7394_v17 = vld [vmem:[%s11642_s2 + $0x44c] sm:$0xf0] }
  0x33   :  { %v5402_v15 = vld [vmem:[%s11642_s2 + $0x440] sm:$0xf]  ;;  %v7426_v19 = vld [vmem:[%s11642_s2 + $0x54c] sm:$0xf0]  ;;  %v5275_v20 = vor.u32 %v7362_v12, %v5274_v11 }
  0x34   :  { %v5530_v18 = vld [vmem:[%s11642_s2 + $0x540] sm:$0xf]  ;;  %3292 = vmatpush.bf16.msra.mxu3 %v5291_v8  ;;  %v7458_v22 = vld [vmem:[%s11642_s2 + $0x64c] sm:$0xf0]  ;;  %3305 = vmatpush.bf16.msrb.mxu0 %v5419_v13  ;;  %v5403_v25 = vor.u32 %v7394_v17, %v5402_v15  ;;  %v8372_v15 = vld [vmem:[#allocation1 + $0x24] sm:$0xff] }
  0x35   :  { %v5658_v21 = vld [vmem:[%s11642_s2 + $0x640] sm:$0xf]  ;;  %v7358_v24 = vld [vmem:[%s11642_s2 + $0x32c] sm:$0xf0]  ;;  %3318 = vmatpush.bf16.msrb.mxu1 %v5547_v14  ;;  %v5531_v26 = vor.u32 %v7426_v19, %v5530_v18  ;;  %v8370_v14 = vld [vmem:[#allocation1 + $0x36] sm:$0xff] }
  0x36   :  { %v5258_v23 = vld [vmem:[%s11642_s2 + $0x320] sm:$0xf]  ;;  %3331 = vmatpush.bf16.msrb.mxu2 %v5675_v16  ;;  %v5659_v28 = vor.u32 %v7458_v22, %v5658_v21  ;;  %v7390_v29 = vld [vmem:[%s11642_s2 + $0x42c] sm:$0xf0] }
  0x37   :  { %v5386_v27 = vld [vmem:[%s11642_s2 + $0x420] sm:$0xf]  ;;  %v7422_v31 = vld [vmem:[%s11642_s2 + $0x52c] sm:$0xf0]  ;;  %v5259_v32 = vor.u32 %v7358_v24, %v5258_v23 }
  0x38   :  { %v5514_v30 = vld [vmem:[%s11642_s2 + $0x520] sm:$0xf]  ;;  %3293 = vmatpush.bf16.msra.mxu3 %v5275_v20  ;;  %v7454_v36 = vld [vmem:[%s11642_s2 + $0x62c] sm:$0xf0]  ;;  %3306 = vmatpush.bf16.msrb.mxu0 %v5403_v25  ;;  %v5387_v43 = vor.u32 %v7390_v29, %v5386_v27 }
  0x39   :  { %v5642_v33 = vld [vmem:[%s11642_s2 + $0x620] sm:$0xf]  ;;  %v7354_v39 = vld [vmem:[%s11642_s2 + $0x30c] sm:$0xf0]  ;;  %3319 = vmatpush.bf16.msrb.mxu1 %v5531_v26  ;;  %v5515_v44 = vor.u32 %v7422_v31, %v5514_v30 }
  0x3a   :  { %v5242_v37 = vld [vmem:[%s11642_s2 + $0x300] sm:$0xf]  ;;  %v7510_v42 = vld [vmem:[%s11642_s2 + $0x7ec] sm:$0xf0]  ;;  %3332 = vmatpush.bf16.msrb.mxu2 %v5659_v28  ;;  %v5643_v46 = vor.u32 %v7454_v36, %v5642_v33 }
  0x3b   :  { %v5866_v40 = vld [vmem:[%s11642_s2 + $0x7e0] sm:$0xf]  ;;  %v7386_v47 = vld [vmem:[%s11642_s2 + $0x40c] sm:$0xf0]  ;;  %v5243_v50 = vor.u32 %v7354_v39, %v5242_v37 }
  0x3c   :  { %v5370_v45 = vld [vmem:[%s11642_s2 + $0x400] sm:$0xf]  ;;  %v7418_v49 = vld [vmem:[%s11642_s2 + $0x50c] sm:$0xf0]  ;;  %3294 = vmatpush.bf16.msra.mxu3 %v5259_v32  ;;  %v5867_v55 = vor.u32 %v7510_v42, %v5866_v40  ;;  %3307 = vmatpush.bf16.msrb.mxu0 %v5387_v43 }
  0x3d   :  { %v5498_v48 = vld [vmem:[%s11642_s2 + $0x500] sm:$0xf]  ;;  %v7450_v53 = vld [vmem:[%s11642_s2 + $0x60c] sm:$0xf0]  ;;  %3320 = vmatpush.bf16.msrb.mxu1 %v5515_v44  ;;  %v5371_v60 = vor.u32 %v7386_v47, %v5370_v45 }
  0x3e   :  { %v5850_v51 = vld [vmem:[%s11642_s2 + $0x7c0] sm:$0xf]  ;;  %v7542_v56 = vld [vmem:[%s11642_s2 + $0x8ec] sm:$0xf0]  ;;  %v5499_v61 = vor.u32 %v7418_v49, %v5498_v48  ;;  %3333 = vmatpush.bf16.msrb.mxu2 %v5643_v46 }
  0x3f   :  { %v5626_v52 = vld [vmem:[%s11642_s2 + $0x600] sm:$0xf]  ;;  %v7574_v58 = vld [vmem:[%s11642_s2 + $0x9ec] sm:$0xf0] }
  0x40   :  { %v5994_v54 = vld [vmem:[%s11642_s2 + $0x8e0] sm:$0xf]  ;;  %v7506_v59 = vld [vmem:[%s11642_s2 + $0x7cc] sm:$0xf0]  ;;  %v5627_v0 = vor.u32 %v7450_v53, %v5626_v52  ;;  %3295 = vmatpush.bf16.msra.mxu3 %v5243_v50  ;;  %3308 = vmatpush.bf16.msrb.mxu0 %v5371_v60 }
  0x41   :  { %v6122_v57 = vld [vmem:[%s11642_s2 + $0x9e0] sm:$0xf]  ;;  %v7606_v63 = vld [vmem:[%s11642_s2 + $0xaec] sm:$0xf0]  ;;  %v5995_v2 = vor.u32 %v7542_v56, %v5994_v54  ;;  %v5851_v6 = vor.u32 %v7506_v59, %v5850_v51  ;;  %3321 = vmatpush.bf16.msrb.mxu1 %v5499_v61 }
  0x42   :  { %v6250_v62 = vld [vmem:[%s11642_s2 + $0xae0] sm:$0xf]  ;;  %v6123_v3 = vor.u32 %v7574_v58, %v6122_v57  ;;  %v7538_v8 = vld [vmem:[%s11642_s2 + $0x8cc] sm:$0xf0]  ;;  %3334 = vmatpush.bf16.msrb.mxu2 %v5627_v0 }
  0x43   :  { %v8343_v34 = vld [vmem:[#allocation1 + $0x1b] sm:$0xff]  ;;  %v6251_v7 = vor.u32 %v7606_v63, %v6250_v62  ;;  %v7570_v10 = vld [vmem:[%s11642_s2 + $0x9cc] sm:$0xf0]  ;;  %3309 = vmatmul.bf16.vlgmr.msrb.gmra.mxu0 %v8372_v15 }
  0x44   :  { %v5834_v4 = vld [vmem:[%s11642_s2 + $0x7a0] sm:$0xf]  ;;  %3340 = vmatpush.bf16.msrb.mxu3 %v5867_v55  ;;  %v7502_v11 = vld [vmem:[%s11642_s2 + $0x7ac] sm:$0xf0]  ;;  %3353 = vmatpush.bf16.msra.mxu0 %v5995_v2 }
  0x45   :  { %v5978_v5 = vld [vmem:[%s11642_s2 + $0x8c0] sm:$0xf]  ;;  %v7602_v13 = vld [vmem:[%s11642_s2 + $0xacc] sm:$0xf0]  ;;  %3296 = vmatmul.bf16.vlgmr.msra.gmra.mxu3 %v8343_v34  ;;  %3366 = vmatpush.bf16.msra.mxu1 %v6123_v3  ;;  %v5835_v23 = vor.u32 %v7502_v11, %v5834_v4 }
  0x46   :  { %v6106_v9 = vld [vmem:[%s11642_s2 + $0x9c0] sm:$0xf]  ;;  %v8374_v16 = vld [vmem:[#allocation1 + $0x2d] sm:$0xff]  ;;  %v5979_v17 = vor.u32 %v7538_v8, %v5978_v5  ;;  %3379 = vmatpush.bf16.msra.mxu2 %v6251_v7 }
  0x47   :  { %v6234_v12 = vld [vmem:[%s11642_s2 + $0xac0] sm:$0xf]  ;;  %v6107_v18 = vor.u32 %v7570_v10, %v6106_v9  ;;  %v7534_v21 = vld [vmem:[%s11642_s2 + $0x8ac] sm:$0xf0]  ;;  %3335 = vmatmul.bf16.vlgmr.msrb.gmra.mxu2 %v8370_v14  ;;  %3322 = vmatmul.bf16.vlgmr.msrb.gmra.mxu1 %v8374_v16 }
  0x48   :  { %v5818_v19 = vld [vmem:[%s11642_s2 + $0x780] sm:$0xf]  ;;  %3341 = vmatpush.bf16.msrb.mxu3 %v5851_v6  ;;  %v6235_v24 = vor.u32 %v7602_v13, %v6234_v12  ;;  %v7566_v26 = vld [vmem:[%s11642_s2 + $0x9ac] sm:$0xf0]  ;;  %3354 = vmatpush.bf16.msra.mxu0 %v5979_v17 }
  0x49   :  { %v5962_v20 = vld [vmem:[%s11642_s2 + $0x8a0] sm:$0xf]  ;;  %v7498_v27 = vld [vmem:[%s11642_s2 + $0x78c] sm:$0xf0]  ;;  %3367 = vmatpush.bf16.msra.mxu1 %v6107_v18 }
  0x4a   :  { %v8385_v22 = vld [vmem:[#allocation1 + $0x3f] sm:$0xff]  ;;  %v7598_v29 = vld [vmem:[%s11642_s2 + $0xaac] sm:$0xf0]  ;;  %v5963_v30 = vor.u32 %v7534_v21, %v5962_v20  ;;  %3380 = vmatpush.bf16.msra.mxu2 %v6235_v24  ;;  %v5819_v36 = vor.u32 %v7498_v27, %v5818_v19 }
  0x4b   :  { %v6090_v25 = vld [vmem:[%s11642_s2 + $0x9a0] sm:$0xf]  ;;  %664 = vst [vmem:[#allocation1] ss:$9 sm:$0xff] %v39_v1  ;;  %v7530_v39 = vld [vmem:[%s11642_s2 + $0x88c] sm:$0xf0] }
  0x4c   :  { %v6218_v28 = vld [vmem:[%s11642_s2 + $0xaa0] sm:$0xf]  ;;  %v6091_v31 = vor.u32 %v7566_v26, %v6090_v25  ;;  %3342 = vmatpush.bf16.msrb.mxu3 %v5835_v23  ;;  %v7562_v42 = vld [vmem:[%s11642_s2 + $0x98c] sm:$0xf0]  ;;  %3355 = vmatpush.bf16.msra.mxu0 %v5963_v30 }
  0x4d   :  { %v5802_v32 = vld [vmem:[%s11642_s2 + $0x760] sm:$0xf]  ;;  %v6219_v37 = vor.u32 %v7598_v29, %v6218_v28  ;;  %v7494_v43 = vld [vmem:[%s11642_s2 + $0x76c] sm:$0xf0] }
  0x4e   :  { %v5946_v33 = vld [vmem:[%s11642_s2 + $0x880] sm:$0xf]  ;;  %v7594_v45 = vld [vmem:[%s11642_s2 + $0xa8c] sm:$0xf0]  ;;  %3368 = vmatpush.bf16.msra.mxu1 %v6091_v31  ;;  %v5803_v50 = vor.u32 %v7494_v43, %v5802_v32 }
  0x4f   :  { %v6074_v40 = vld [vmem:[%s11642_s2 + $0x980] sm:$0xf]  ;;  %v5947_v46 = vor.u32 %v7530_v39, %v5946_v33  ;;  %3381 = vmatpush.bf16.msra.mxu2 %v6219_v37  ;;  %v7526_v52 = vld [vmem:[%s11642_s2 + $0x86c] sm:$0xf0] }
  0x50   :  { %v6202_v44 = vld [vmem:[%s11642_s2 + $0xa80] sm:$0xf]  ;;  %v6075_v47 = vor.u32 %v7562_v42, %v6074_v40  ;;  %3343 = vmatpush.bf16.msrb.mxu3 %v5819_v36  ;;  %v7558_v54 = vld [vmem:[%s11642_s2 + $0x96c] sm:$0xf0] }
  0x51   :  { %v5786_v48 = vld [vmem:[%s11642_s2 + $0x740] sm:$0xf]  ;;  %v6203_v51 = vor.u32 %v7594_v45, %v6202_v44  ;;  %v7490_v55 = vld [vmem:[%s11642_s2 + $0x74c] sm:$0xf0]  ;;  %3356 = vmatpush.bf16.msra.mxu0 %v5947_v46 }
  0x52   :  { %v5930_v49 = vld [vmem:[%s11642_s2 + $0x860] sm:$0xf]  ;;  %v7590_v57 = vld [vmem:[%s11642_s2 + $0xa6c] sm:$0xf0]  ;;  %3369 = vmatpush.bf16.msra.mxu1 %v6075_v47  ;;  %v5787_v62 = vor.u32 %v7490_v55, %v5786_v48 }
  0x53   :  { %v6058_v53 = vld [vmem:[%s11642_s2 + $0x960] sm:$0xf]  ;;  %v5931_v58 = vor.u32 %v7526_v52, %v5930_v49  ;;  %3382 = vmatpush.bf16.msra.mxu2 %v6203_v51  ;;  %v7522_v0 = vld [vmem:[%s11642_s2 + $0x84c] sm:$0xf0] }
  0x54   :  { %v6186_v56 = vld [vmem:[%s11642_s2 + $0xa60] sm:$0xf]  ;;  %v6059_v59 = vor.u32 %v7558_v54, %v6058_v53  ;;  %3344 = vmatpush.bf16.msrb.mxu3 %v5803_v50  ;;  %v7554_v2 = vld [vmem:[%s11642_s2 + $0x94c] sm:$0xf0] }
  0x55   :  { %v5770_v60 = vld [vmem:[%s11642_s2 + $0x720] sm:$0xf]  ;;  %v6187_v63 = vor.u32 %v7590_v57, %v6186_v56  ;;  %v7486_v3 = vld [vmem:[%s11642_s2 + $0x72c] sm:$0xf0]  ;;  %3357 = vmatpush.bf16.msra.mxu0 %v5931_v58 }
  0x56   :  { %v5914_v61 = vld [vmem:[%s11642_s2 + $0x840] sm:$0xf]  ;;  %v7586_v5 = vld [vmem:[%s11642_s2 + $0xa4c] sm:$0xf0]  ;;  %3370 = vmatpush.bf16.msra.mxu1 %v6059_v59  ;;  %v5771_v10 = vor.u32 %v7486_v3, %v5770_v60 }
  0x57   :  { %v6042_v1 = vld [vmem:[%s11642_s2 + $0x940] sm:$0xf]  ;;  %v5915_v6 = vor.u32 %v7522_v0, %v5914_v61  ;;  %3383 = vmatpush.bf16.msra.mxu2 %v6187_v63  ;;  %v7518_v12 = vld [vmem:[%s11642_s2 + $0x82c] sm:$0xf0] }
  0x58   :  { %v6170_v4 = vld [vmem:[%s11642_s2 + $0xa40] sm:$0xf]  ;;  %v6043_v7 = vor.u32 %v7554_v2, %v6042_v1  ;;  %3345 = vmatpush.bf16.msrb.mxu3 %v5787_v62  ;;  %v7550_v17 = vld [vmem:[%s11642_s2 + $0x92c] sm:$0xf0] }
  0x59   :  { %v5754_v8 = vld [vmem:[%s11642_s2 + $0x700] sm:$0xf]  ;;  %v6171_v11 = vor.u32 %v7586_v5, %v6170_v4  ;;  %v7482_v18 = vld [vmem:[%s11642_s2 + $0x70c] sm:$0xf0]  ;;  %3358 = vmatpush.bf16.msra.mxu0 %v5915_v6 }
  0x5a   :  { %v5898_v9 = vld [vmem:[%s11642_s2 + $0x820] sm:$0xf]  ;;  %v7582_v20 = vld [vmem:[%s11642_s2 + $0xa2c] sm:$0xf0]  ;;  %3371 = vmatpush.bf16.msra.mxu1 %v6043_v7  ;;  %v5755_v26 = vor.u32 %v7482_v18, %v5754_v8 }
  0x5b   :  { %v6026_v13 = vld [vmem:[%s11642_s2 + $0x920] sm:$0xf]  ;;  %v7638_v23 = vld [vmem:[%s11642_s2 + $0xbec] sm:$0xf0]  ;;  %v5899_v24 = vor.u32 %v7518_v12, %v5898_v9  ;;  %3384 = vmatpush.bf16.msra.mxu2 %v6171_v11 }
  0x5c   :  { %v6154_v19 = vld [vmem:[%s11642_s2 + $0xa20] sm:$0xf]  ;;  %v6027_v25 = vor.u32 %v7550_v17, %v6026_v13  ;;  %3346 = vmatpush.bf16.msrb.mxu3 %v5771_v10  ;;  %v7634_v29 = vld [vmem:[%s11642_s2 + $0xbcc] sm:$0xf0] }
  0x5d   :  { %v6378_v21 = vld [vmem:[%s11642_s2 + $0xbe0] sm:$0xf]  ;;  %v6155_v27 = vor.u32 %v7582_v20, %v6154_v19  ;;  %v7514_v31 = vld [vmem:[%s11642_s2 + $0x80c] sm:$0xf0]  ;;  %3359 = vmatpush.bf16.msra.mxu0 %v5899_v24 }
  0x5e   :  { %v6362_v28 = vld [vmem:[%s11642_s2 + $0xbc0] sm:$0xf]  ;;  %v6379_v33 = vor.u32 %v7638_v23, %v6378_v21  ;;  %v7546_v36 = vld [vmem:[%s11642_s2 + $0x90c] sm:$0xf0]  ;;  %3372 = vmatpush.bf16.msra.mxu1 %v6027_v25 }
  0x5f   :  { %v5882_v30 = vld [vmem:[%s11642_s2 + $0x800] sm:$0xf]  ;;  %v7578_v39 = vld [vmem:[%s11642_s2 + $0xa0c] sm:$0xf0]  ;;  %3385 = vmatpush.bf16.msra.mxu2 %v6155_v27  ;;  %v6363_v50 = vor.u32 %v7634_v29, %v6362_v28 }
  0x60   :  { %v6010_v32 = vld [vmem:[%s11642_s2 + $0x900] sm:$0xf]  ;;  %v7670_v42 = vld [vmem:[%s11642_s2 + $0xcec] sm:$0xf0]  ;;  %v5883_v44 = vor.u32 %v7514_v31, %v5882_v30  ;;  %3347 = vmatpush.bf16.msrb.mxu3 %v5755_v26 }
  0x61   :  { %v6138_v37 = vld [vmem:[%s11642_s2 + $0xa00] sm:$0xf]  ;;  %v7702_v45 = vld [vmem:[%s11642_s2 + $0xdec] sm:$0xf0]  ;;  %v6011_v48 = vor.u32 %v7546_v36, %v6010_v32 }
  0x62   :  { %v6506_v40 = vld [vmem:[%s11642_s2 + $0xce0] sm:$0xf]  ;;  %v7734_v47 = vld [vmem:[%s11642_s2 + $0xeec] sm:$0xf0]  ;;  %v6139_v49 = vor.u32 %v7578_v39, %v6138_v37  ;;  %3360 = vmatpush.bf16.msra.mxu0 %v5883_v44 }
  0x63   :  { %v6634_v43 = vld [vmem:[%s11642_s2 + $0xde0] sm:$0xf]  ;;  %v6507_v51 = vor.u32 %v7670_v42, %v6506_v40  ;;  %v7630_v53 = vld [vmem:[%s11642_s2 + $0xbac] sm:$0xf0]  ;;  %3348 = vmatmul.bf16.vlgmr.msrb.gmra.mxu3 %v8385_v22  ;;  %3373 = vmatpush.bf16.msra.mxu1 %v6011_v48 }
  0x64   :  { %v6762_v46 = vld [vmem:[%s11642_s2 + $0xee0] sm:$0xf]  ;;  %3392 = vmatpush.bf16.msra.mxu3 %v6379_v33  ;;  %v6635_v54 = vor.u32 %v7702_v45, %v6634_v43  ;;  %v7666_v57 = vld [vmem:[%s11642_s2 + $0xccc] sm:$0xf0]  ;;  %3386 = vmatpush.bf16.msra.mxu2 %v6139_v49 }
  0x65   :  { %v6346_v52 = vld [vmem:[%s11642_s2 + $0xba0] sm:$0xf]  ;;  %v6763_v55 = vor.u32 %v7734_v47, %v6762_v46  ;;  %v7698_v59 = vld [vmem:[%s11642_s2 + $0xdcc] sm:$0xf0] }
  0x66   :  { %v6490_v56 = vld [vmem:[%s11642_s2 + $0xcc0] sm:$0xf]  ;;  %v7730_v61 = vld [vmem:[%s11642_s2 + $0xecc] sm:$0xf0]  ;;  %3405 = vmatpush.bf16.msrb.mxu0 %v6507_v51  ;;  %v6347_v0 = vor.u32 %v7630_v53, %v6346_v52 }
  0x67   :  { %v6618_v58 = vld [vmem:[%s11642_s2 + $0xdc0] sm:$0xf]  ;;  %v667_v62 = vld [vmem:[#allocation1 + $0x12] sm:$0xff]  ;;  %v6491_v1 = vor.u32 %v7666_v57, %v6490_v56  ;;  %v666_v2 = vld [vmem:[#allocation1 + $0x9] sm:$0xff]  ;;  %3418 = vmatpush.bf16.msrb.mxu1 %v6635_v54 }
  0x68   :  { %v6746_v60 = vld [vmem:[%s11642_s2 + $0xec0] sm:$0xf]  ;;  %3393 = vmatpush.bf16.msra.mxu3 %v6363_v50  ;;  %v7626_v4 = vld [vmem:[%s11642_s2 + $0xb8c] sm:$0xf0]  ;;  %3431 = vmatpush.bf16.msrb.mxu2 %v6763_v55  ;;  %v6619_v5 = vor.u32 %v7698_v59, %v6618_v58 }
  0x69   :  { %v665_v63 = vld [vmem:[#allocation1] sm:$0xff]  ;;  %v6747_v6 = vor.u32 %v7730_v61, %v6746_v60  ;;  %v7662_v8 = vld [vmem:[%s11642_s2 + $0xcac] sm:$0xf0]  ;;  %3387 = vmatmul.bf16.vlgmr.msra.gmra.mxu2 %v667_v62  ;;  %3374 = vmatmul.bf16.vlgmr.msra.gmra.mxu1 %v666_v2 }
  0x6a   :  { %v6330_v3 = vld [vmem:[%s11642_s2 + $0xb80] sm:$0xf]  ;;  %3361 = vmatmul.bf16.vlgmr.msra.gmra.mxu0 %v665_v63  ;;  %v7694_v10 = vld [vmem:[%s11642_s2 + $0xdac] sm:$0xf0] }
  0x6b   :  { %v6474_v7 = vld [vmem:[%s11642_s2 + $0xca0] sm:$0xf]  ;;  %v7726_v12 = vld [vmem:[%s11642_s2 + $0xeac] sm:$0xf0]  ;;  %3406 = vmatpush.bf16.msrb.mxu0 %v6491_v1  ;;  %v6331_v13 = vor.u32 %v7626_v4, %v6330_v3  ;;  %3419 = vmatpush.bf16.msrb.mxu1 %v6619_v5 }
  0x6c   :  { %v6602_v9 = vld [vmem:[%s11642_s2 + $0xda0] sm:$0xf]  ;;  %3394 = vmatpush.bf16.msra.mxu3 %v6347_v0  ;;  %v6475_v17 = vor.u32 %v7662_v8, %v6474_v7  ;;  %v7622_v19 = vld [vmem:[%s11642_s2 + $0xb6c] sm:$0xf0]  ;;  %3432 = vmatpush.bf16.msrb.mxu2 %v6747_v6 }
  0x6d   :  { %v6730_v11 = vld [vmem:[%s11642_s2 + $0xea0] sm:$0xf]  ;;  %v6603_v20 = vor.u32 %v7694_v10, %v6602_v9  ;;  %v7658_v24 = vld [vmem:[%s11642_s2 + $0xc8c] sm:$0xf0] }
  0x6e   :  { %v6314_v18 = vld [vmem:[%s11642_s2 + $0xb60] sm:$0xf]  ;;  %v6731_v21 = vor.u32 %v7726_v12, %v6730_v11  ;;  %v7690_v26 = vld [vmem:[%s11642_s2 + $0xd8c] sm:$0xf0] }
  0x6f   :  { %v6458_v23 = vld [vmem:[%s11642_s2 + $0xc80] sm:$0xf]  ;;  %v7722_v28 = vld [vmem:[%s11642_s2 + $0xe8c] sm:$0xf0]  ;;  %3407 = vmatpush.bf16.msrb.mxu0 %v6475_v17  ;;  %v6315_v29 = vor.u32 %v7622_v19, %v6314_v18  ;;  %3420 = vmatpush.bf16.msrb.mxu1 %v6603_v20 }
  0x70   :  { %v6586_v25 = vld [vmem:[%s11642_s2 + $0xd80] sm:$0xf]  ;;  %3395 = vmatpush.bf16.msra.mxu3 %v6331_v13  ;;  %v6459_v30 = vor.u32 %v7658_v24, %v6458_v23  ;;  %v7618_v32 = vld [vmem:[%s11642_s2 + $0xb4c] sm:$0xf0]  ;;  %3433 = vmatpush.bf16.msrb.mxu2 %v6731_v21 }
  0x71   :  { %v6714_v27 = vld [vmem:[%s11642_s2 + $0xe80] sm:$0xf]  ;;  %v6587_v33 = vor.u32 %v7690_v26, %v6586_v25  ;;  %v7654_v39 = vld [vmem:[%s11642_s2 + $0xc6c] sm:$0xf0]  ;;  %v7284_v25 = vld [vmem:[%s11642_s2 + $0xe4] sm:$0xf] }
  0x72   :  { %v6298_v31 = vld [vmem:[%s11642_s2 + $0xb40] sm:$0xf]  ;;  %v6715_v36 = vor.u32 %v7722_v28, %v6714_v27  ;;  %v7686_v42 = vld [vmem:[%s11642_s2 + $0xd6c] sm:$0xf0]  ;;  %v4972_v26 = vld [vmem:[%s11642_s2 + $0xf0] sm:$0xf0] }
  0x73   :  { %v6442_v37 = vld [vmem:[%s11642_s2 + $0xc60] sm:$0xf]  ;;  %v7718_v44 = vld [vmem:[%s11642_s2 + $0xe6c] sm:$0xf0]  ;;  %3408 = vmatpush.bf16.msrb.mxu0 %v6459_v30  ;;  %v6299_v45 = vor.u32 %v7618_v32, %v6298_v31  ;;  %3421 = vmatpush.bf16.msrb.mxu1 %v6587_v33  ;;  %v7316_v27 = vld [vmem:[%s11642_s2 + $0x1e4] sm:$0xf] }
  0x74   :  { %v6570_v40 = vld [vmem:[%s11642_s2 + $0xd60] sm:$0xf]  ;;  %3396 = vmatpush.bf16.msra.mxu3 %v6315_v29  ;;  %v6443_v46 = vor.u32 %v7654_v39, %v6442_v37  ;;  %v7614_v48 = vld [vmem:[%s11642_s2 + $0xb2c] sm:$0xf0]  ;;  %3434 = vmatpush.bf16.msrb.mxu2 %v6715_v36  ;;  %v5100_v29 = vld [vmem:[%s11642_s2 + $0x1f0] sm:$0xf0]  ;;  %v4975_v37 = vor.u32 %v7284_v25, %v4972_v26 }
  0x75   :  { %v6698_v43 = vld [vmem:[%s11642_s2 + $0xe60] sm:$0xf]  ;;  %v6571_v49 = vor.u32 %v7686_v42, %v6570_v40  ;;  %v7650_v52 = vld [vmem:[%s11642_s2 + $0xc4c] sm:$0xf0]  ;;  %v7348_v30 = vld [vmem:[%s11642_s2 + $0x2e4] sm:$0xf]  ;;  %v5103_v42 = vor.u32 %v7316_v27, %v5100_v29 }
  0x76   :  { %v6282_v47 = vld [vmem:[%s11642_s2 + $0xb20] sm:$0xf]  ;;  %v6699_v50 = vor.u32 %v7718_v44, %v6698_v43  ;;  %v7682_v54 = vld [vmem:[%s11642_s2 + $0xd4c] sm:$0xf0]  ;;  %v5228_v31 = vld [vmem:[%s11642_s2 + $0x2f0] sm:$0xf0] }
  0x77   :  { %v6426_v51 = vld [vmem:[%s11642_s2 + $0xc40] sm:$0xf]  ;;  %v7714_v56 = vld [vmem:[%s11642_s2 + $0xe4c] sm:$0xf0]  ;;  %3409 = vmatpush.bf16.msrb.mxu0 %v6443_v46  ;;  %v6283_v57 = vor.u32 %v7614_v48, %v6282_v47  ;;  %3422 = vmatpush.bf16.msrb.mxu1 %v6571_v49  ;;  %v5231_v43 = vor.u32 %v7348_v30, %v5228_v31  ;;  %v7280_v44 = vld [vmem:[%s11642_s2 + $0xc4] sm:$0xf] }
  0x78   :  { %v6554_v53 = vld [vmem:[%s11642_s2 + $0xd40] sm:$0xf]  ;;  %3397 = vmatpush.bf16.msra.mxu3 %v6299_v45  ;;  %v6427_v58 = vor.u32 %v7650_v52, %v6426_v51  ;;  %v7610_v60 = vld [vmem:[%s11642_s2 + $0xb0c] sm:$0xf0]  ;;  %3435 = vmatpush.bf16.msrb.mxu2 %v6699_v50  ;;  %v4956_v45 = vld [vmem:[%s11642_s2 + $0xd0] sm:$0xf0] }
  0x79   :  { %v6682_v55 = vld [vmem:[%s11642_s2 + $0xe40] sm:$0xf]  ;;  %v6555_v61 = vor.u32 %v7682_v54, %v6554_v53  ;;  %v7646_v1 = vld [vmem:[%s11642_s2 + $0xc2c] sm:$0xf0]  ;;  %v7312_v46 = vld [vmem:[%s11642_s2 + $0x1c4] sm:$0xf]  ;;  %v4959_v54 = vor.u32 %v7280_v44, %v4956_v45 }
  0x7a   :  { %v6266_v59 = vld [vmem:[%s11642_s2 + $0xb00] sm:$0xf]  ;;  %v6683_v62 = vor.u32 %v7714_v56, %v6682_v55  ;;  %v7766_v2 = vld [vmem:[%s11642_s2 + $0xfec] sm:$0xf0]  ;;  %v5084_v47 = vld [vmem:[%s11642_s2 + $0x1d0] sm:$0xf0] }
  0x7b   :  { %v6890_v63 = vld [vmem:[%s11642_s2 + $0xfe0] sm:$0xf]  ;;  %v7678_v4 = vld [vmem:[%s11642_s2 + $0xd2c] sm:$0xf0]  ;;  %3410 = vmatpush.bf16.msrb.mxu0 %v6427_v58  ;;  %v6267_v7 = vor.u32 %v7610_v60, %v6266_v59  ;;  %3423 = vmatpush.bf16.msrb.mxu1 %v6555_v61  ;;  %v7344_v48 = vld [vmem:[%s11642_s2 + $0x2c4] sm:$0xf] }
  0x7c   :  { %v6410_v0 = vld [vmem:[%s11642_s2 + $0xc20] sm:$0xf]  ;;  %v7710_v6 = vld [vmem:[%s11642_s2 + $0xe2c] sm:$0xf0]  ;;  %3398 = vmatpush.bf16.msra.mxu3 %v6283_v57  ;;  %3436 = vmatpush.bf16.msrb.mxu2 %v6683_v62  ;;  %v6891_v11 = vor.u32 %v7766_v2, %v6890_v63  ;;  %v5212_v49 = vld [vmem:[%s11642_s2 + $0x2d0] sm:$0xf0]  ;;  %v5087_v57 = vor.u32 %v7312_v46, %v5084_v47 }
  0x7d   :  { %v6538_v3 = vld [vmem:[%s11642_s2 + $0xd20] sm:$0xf]  ;;  %v6411_v8 = vor.u32 %v7646_v1, %v6410_v0  ;;  %v7762_v10 = vld [vmem:[%s11642_s2 + $0xfcc] sm:$0xf0]  ;;  %v669_v51 = vld [vmem:[#allocation1 + $0x24] sm:$0xff]  ;;  %v5215_v58 = vor.u32 %v7344_v48, %v5212_v49 }
  0x7e   :  { %v6666_v5 = vld [vmem:[%s11642_s2 + $0xe20] sm:$0xf]  ;;  %v6539_v12 = vor.u32 %v7678_v4, %v6538_v3  ;;  %v7642_v17 = vld [vmem:[%s11642_s2 + $0xc0c] sm:$0xf0]  ;;  %v671_v53 = vld [vmem:[#allocation1 + $0x36] sm:$0xff] }
  0x7f   :  { %v6874_v9 = vld [vmem:[%s11642_s2 + $0xfc0] sm:$0xf]  ;;  %v6667_v19 = vor.u32 %v7710_v6, %v6666_v5  ;;  %v7674_v21 = vld [vmem:[%s11642_s2 + $0xd0c] sm:$0xf0]  ;;  %3411 = vmatpush.bf16.msrb.mxu0 %v6411_v8  ;;  %v7276_v59 = vld [vmem:[%s11642_s2 + $0xa4] sm:$0xf] }
  0x80   :  { %v6394_v13 = vld [vmem:[%s11642_s2 + $0xc00] sm:$0xf]  ;;  %v7706_v24 = vld [vmem:[%s11642_s2 + $0xe0c] sm:$0xf0]  ;;  %3399 = vmatpush.bf16.msra.mxu3 %v6267_v7  ;;  %3424 = vmatpush.bf16.msrb.mxu1 %v6539_v12  ;;  %v6875_v32 = vor.u32 %v7762_v10, %v6874_v9  ;;  %v4940_v60 = vld [vmem:[%s11642_s2 + $0xb0] sm:$0xf0] }
  0x81   :  { %v6522_v18 = vld [vmem:[%s11642_s2 + $0xd00] sm:$0xf]  ;;  %v6395_v28 = vor.u32 %v7642_v17, %v6394_v13  ;;  %3437 = vmatpush.bf16.msrb.mxu2 %v6667_v19  ;;  %v7758_v40 = vld [vmem:[%s11642_s2 + $0xfac] sm:$0xf0]  ;;  %v7308_v61 = vld [vmem:[%s11642_s2 + $0x1a4] sm:$0xf]  ;;  %v4943_v2 = vor.u32 %v7276_v59, %v4940_v60 }
  0x82   :  { %v668_v20 = vld [vmem:[#allocation1 + $0x1b] sm:$0xff]  ;;  %v6523_v33 = vor.u32 %v7674_v21, %v6522_v18  ;;  %v670_v52 = vld [vmem:[#allocation1 + $0x2d] sm:$0xff]  ;;  %v7340_v63 = vld [vmem:[%s11642_s2 + $0x2a4] sm:$0xf] }
  0x83   :  { %v6650_v23 = vld [vmem:[%s11642_s2 + $0xe00] sm:$0xf]  ;;  %3400 = vmatmul.bf16.vlgmr.msra.gmra.mxu3 %v668_v20  ;;  %3412 = vmatpush.bf16.msrb.mxu0 %v6395_v28  ;;  %v7754_v56 = vld [vmem:[%s11642_s2 + $0xf8c] sm:$0xf0]  ;;  %v5068_v62 = vld [vmem:[%s11642_s2 + $0x1b0] sm:$0xf0] }
  0x84   :  { %3444 = vmatpush.bf16.msrb.mxu3 %v6891_v11  ;;  %v6651_v36 = vor.u32 %v7706_v24, %v6650_v23  ;;  %v6858_v39 = vld [vmem:[%s11642_s2 + $0xfa0] sm:$0xf]  ;;  %3425 = vmatpush.bf16.msrb.mxu1 %v6523_v33  ;;  %v5196_v0 = vld [vmem:[%s11642_s2 + $0x2b0] sm:$0xf0]  ;;  %v7750_v4 = vld [vmem:[%s11642_s2 + $0xf6c] sm:$0xf0]  ;;  %v5071_v5 = vor.u32 %v7308_v61, %v5068_v62 }
  0x85   :  { %v6859_v50 = vor.u32 %v7758_v40, %v6858_v39  ;;  %v6842_v55 = vld [vmem:[%s11642_s2 + $0xf80] sm:$0xf]  ;;  %v5199_v6 = vor.u32 %v7340_v63, %v5196_v0  ;;  %v7272_v7 = vld [vmem:[%s11642_s2 + $0x84] sm:$0xf]  ;;  %v4924_v8 = vld [vmem:[%s11642_s2 + $0x90] sm:$0xf0] }
  0x86   :  { %3438 = vmatpush.bf16.msrb.mxu2 %v6651_v36  ;;  %3413 = vmatmul.bf16.vlgmr.msrb.gmra.mxu0 %v669_v51  ;;  %v6843_v1 = vor.u32 %v7754_v56, %v6842_v55  ;;  %v6826_v3 = vld [vmem:[%s11642_s2 + $0xf60] sm:$0xf]  ;;  %v7304_v9 = vld [vmem:[%s11642_s2 + $0x184] sm:$0xf]  ;;  %v5052_v10 = vld [vmem:[%s11642_s2 + $0x190] sm:$0xf0]  ;;  %v4927_v17 = vor.u32 %v7272_v7, %v4924_v8 }
  0x87   :  { %3457 = vmatpush.bf16.msra.mxu0 %v4975_v37  ;;  %3426 = vmatmul.bf16.vlgmr.msrb.gmra.mxu1 %v670_v52  ;;  %v7336_v11 = vld [vmem:[%s11642_s2 + $0x284] sm:$0xf]  ;;  %v5180_v12 = vld [vmem:[%s11642_s2 + $0x290] sm:$0xf0]  ;;  %v6827_v13 = vor.u32 %v7750_v4, %v6826_v3  ;;  %v6810_v18 = vld [vmem:[%s11642_s2 + $0xf40] sm:$0xf]  ;;  %v5055_v20 = vor.u32 %v7304_v9, %v5052_v10 }
  0x88   :  { %3445 = vmatpush.bf16.msrb.mxu3 %v6875_v32  ;;  %3470 = vmatpush.bf16.msra.mxu1 %v5103_v42  ;;  %v7746_v19 = vld [vmem:[%s11642_s2 + $0xf4c] sm:$0xf0]  ;;  %v5183_v21 = vor.u32 %v7336_v11, %v5180_v12  ;;  %v7268_v23 = vld [vmem:[%s11642_s2 + $0x64] sm:$0xf]  ;;  %v4908_v24 = vld [vmem:[%s11642_s2 + $0x70] sm:$0xf0] }
  0x89   :  { %3439 = vmatmul.bf16.vlgmr.msrb.gmra.mxu2 %v671_v53  ;;  %v7300_v25 = vld [vmem:[%s11642_s2 + $0x164] sm:$0xf]  ;;  %v5036_v26 = vld [vmem:[%s11642_s2 + $0x170] sm:$0xf0]  ;;  %v6811_v29 = vor.u32 %v7746_v19, %v6810_v18  ;;  %v4911_v30 = vor.u32 %v7268_v23, %v4908_v24  ;;  %v6794_v31 = vld [vmem:[%s11642_s2 + $0xf20] sm:$0xf] }
  0x8a   :  { %3483 = vmatpush.bf16.msra.mxu2 %v5231_v43  ;;  %v7332_v27 = vld [vmem:[%s11642_s2 + $0x264] sm:$0xf]  ;;  %v5164_v28 = vld [vmem:[%s11642_s2 + $0x270] sm:$0xf0]  ;;  %v7742_v32 = vld [vmem:[%s11642_s2 + $0xf2c] sm:$0xf0]  ;;  %v5039_v33 = vor.u32 %v7300_v25, %v5036_v26 }
  0x8b   :  { %3458 = vmatpush.bf16.msra.mxu0 %v4959_v54  ;;  %v5167_v36 = vor.u32 %v7332_v27, %v5164_v28  ;;  %v7264_v37 = vld [vmem:[%s11642_s2 + $0x44] sm:$0xf]  ;;  %v4892_v39 = vld [vmem:[%s11642_s2 + $0x50] sm:$0xf0]  ;;  %v6795_v45 = vor.u32 %v7742_v32, %v6794_v31  ;;  %v6778_v46 = vld [vmem:[%s11642_s2 + $0xf00] sm:$0xf] }
  0x8c   :  { %3446 = vmatpush.bf16.msrb.mxu3 %v6859_v50  ;;  %3471 = vmatpush.bf16.msra.mxu1 %v5087_v57  ;;  %v7296_v40 = vld [vmem:[%s11642_s2 + $0x144] sm:$0xf]  ;;  %v5020_v42 = vld [vmem:[%s11642_s2 + $0x150] sm:$0xf0]  ;;  %v4895_v47 = vor.u32 %v7264_v37, %v4892_v39  ;;  %v7738_v48 = vld [vmem:[%s11642_s2 + $0xf0c] sm:$0xf0] }
  0x8d   :  { %v7328_v43 = vld [vmem:[%s11642_s2 + $0x244] sm:$0xf]  ;;  %v5148_v44 = vld [vmem:[%s11642_s2 + $0x250] sm:$0xf0]  ;;  %v5023_v51 = vor.u32 %v7296_v40, %v5020_v42  ;;  %v6779_v59 = vor.u32 %v7738_v48, %v6778_v46 }
  0x8e   :  { %3484 = vmatpush.bf16.msra.mxu2 %v5215_v58  ;;  %v7380_v49 = vld [vmem:[%s11642_s2 + $0x3e4] sm:$0xf]  ;;  %v5356_v50 = vld [vmem:[%s11642_s2 + $0x3f0] sm:$0xf0]  ;;  %v5151_v52 = vor.u32 %v7328_v43, %v5148_v44 }
  0x8f   :  { %3459 = vmatpush.bf16.msra.mxu0 %v4943_v2  ;;  %v7260_v53 = vld [vmem:[%s11642_s2 + $0x24] sm:$0xf]  ;;  %v4876_v54 = vld [vmem:[%s11642_s2 + $0x30] sm:$0xf0]  ;;  %v5359_v60 = vor.u32 %v7380_v49, %v5356_v50 }
  0x90   :  { %3447 = vmatpush.bf16.msrb.mxu3 %v6843_v1  ;;  %3472 = vmatpush.bf16.msra.mxu1 %v5071_v5  ;;  %v7292_v55 = vld [vmem:[%s11642_s2 + $0x124] sm:$0xf]  ;;  %v5004_v56 = vld [vmem:[%s11642_s2 + $0x130] sm:$0xf0]  ;;  %v4879_v61 = vor.u32 %v7260_v53, %v4876_v54 }
  0x91   :  { %v7324_v57 = vld [vmem:[%s11642_s2 + $0x224] sm:$0xf]  ;;  %v5132_v58 = vld [vmem:[%s11642_s2 + $0x230] sm:$0xf0]  ;;  %v5007_v1 = vor.u32 %v7292_v55, %v5004_v56 }
  0x92   :  { %3485 = vmatpush.bf16.msra.mxu2 %v5199_v6  ;;  %v7376_v62 = vld [vmem:[%s11642_s2 + $0x3c4] sm:$0xf]  ;;  %v5340_v63 = vld [vmem:[%s11642_s2 + $0x3d0] sm:$0xf0]  ;;  %v5135_v2 = vor.u32 %v7324_v57, %v5132_v58 }
  0x93   :  { %3460 = vmatpush.bf16.msra.mxu0 %v4927_v17  ;;  %v7256_v0 = vld [vmem:[%s11642_s2 + $0x4] sm:$0xf]  ;;  %v4860_v4 = vld [vmem:[%s11642_s2 + $0x10] sm:$0xf0] }
  0x94   :  { %3448 = vmatpush.bf16.msrb.mxu3 %v6827_v13  ;;  %3473 = vmatpush.bf16.msra.mxu1 %v5055_v20  ;;  %v672_v3 = vld [vmem:[#allocation1 + $0x3f] sm:$0xff]  ;;  %v4988_v6 = vld [vmem:[%s11642_s2 + $0x110] sm:$0xf0]  ;;  %v5343_v13 = vor.u32 %v7376_v62, %v5340_v63  ;;  %v4863_v17 = vor.u32 %v7256_v0, %v4860_v4 }
  0x95   :  { %v7288_v5 = vld [vmem:[%s11642_s2 + $0x104] sm:$0xf]  ;;  %v5116_v8 = vld [vmem:[%s11642_s2 + $0x210] sm:$0xf0] }
  0x96   :  { %3486 = vmatpush.bf16.msra.mxu2 %v5183_v21  ;;  %v7320_v7 = vld [vmem:[%s11642_s2 + $0x204] sm:$0xf]  ;;  %v5484_v10 = vld [vmem:[%s11642_s2 + $0x4f0] sm:$0xf0]  ;;  %v4991_v20 = vor.u32 %v7288_v5, %v4988_v6  ;;  %v590_v48 = vpop.f32.mrf.mxu3 }
  0x97   :  { %3461 = vmatpush.bf16.msra.mxu0 %v4911_v30  ;;  %v7412_v9 = vld [vmem:[%s11642_s2 + $0x4e4] sm:$0xf]  ;;  %v5612_v12 = vld [vmem:[%s11642_s2 + $0x5f0] sm:$0xf0]  ;;  %v5119_v21 = vor.u32 %v7320_v7, %v5116_v8 }
  0x98   :  { %3449 = vmatpush.bf16.msrb.mxu3 %v6811_v29  ;;  %3474 = vmatpush.bf16.msra.mxu1 %v5039_v33  ;;  %v7444_v11 = vld [vmem:[%s11642_s2 + $0x5e4] sm:$0xf]  ;;  %v5740_v19 = vld [vmem:[%s11642_s2 + $0x6f0] sm:$0xf0]  ;;  %v5487_v25 = vor.u32 %v7412_v9, %v5484_v10 }
  0x99   :  { %v7476_v18 = vld [vmem:[%s11642_s2 + $0x6e4] sm:$0xf]  ;;  %v5324_v24 = vld [vmem:[%s11642_s2 + $0x3b0] sm:$0xf0]  ;;  %v5615_v26 = vor.u32 %v7444_v11, %v5612_v12 }
  0x9a   :  { %3487 = vmatpush.bf16.msra.mxu2 %v5167_v36  ;;  %v7372_v23 = vld [vmem:[%s11642_s2 + $0x3a4] sm:$0xf]  ;;  %v5743_v28 = vor.u32 %v7476_v18, %v5740_v19  ;;  %v5468_v29 = vld [vmem:[%s11642_s2 + $0x4d0] sm:$0xf0] }
  0x9b   :  { %3462 = vmatpush.bf16.msra.mxu0 %v4895_v47  ;;  %v7408_v27 = vld [vmem:[%s11642_s2 + $0x4c4] sm:$0xf]  ;;  %v5596_v31 = vld [vmem:[%s11642_s2 + $0x5d0] sm:$0xf0]  ;;  %v5327_v32 = vor.u32 %v7372_v23, %v5324_v24 }
  0x9c   :  { %3450 = vmatpush.bf16.msrb.mxu3 %v6795_v45  ;;  %3475 = vmatpush.bf16.msra.mxu1 %v5023_v51  ;;  %v7440_v30 = vld [vmem:[%s11642_s2 + $0x5c4] sm:$0xf]  ;;  %v5724_v36 = vld [vmem:[%s11642_s2 + $0x6d0] sm:$0xf0]  ;;  %v5471_v40 = vor.u32 %v7408_v27, %v5468_v29 }
  0x9d   :  { %v7472_v33 = vld [vmem:[%s11642_s2 + $0x6c4] sm:$0xf]  ;;  %v5308_v39 = vld [vmem:[%s11642_s2 + $0x390] sm:$0xf0]  ;;  %v5599_v42 = vor.u32 %v7440_v30, %v5596_v31 }
  0x9e   :  { %3488 = vmatpush.bf16.msra.mxu2 %v5151_v52  ;;  %v7368_v37 = vld [vmem:[%s11642_s2 + $0x384] sm:$0xf]  ;;  %v5727_v44 = vor.u32 %v7472_v33, %v5724_v36  ;;  %v5452_v45 = vld [vmem:[%s11642_s2 + $0x4b0] sm:$0xf0] }
  0x9f   :  { %3463 = vmatpush.bf16.msra.mxu0 %v4879_v61  ;;  %v7404_v43 = vld [vmem:[%s11642_s2 + $0x4a4] sm:$0xf]  ;;  %v5580_v47 = vld [vmem:[%s11642_s2 + $0x5b0] sm:$0xf0]  ;;  %v5311_v49 = vor.u32 %v7368_v37, %v5308_v39 }
  0xa0   :  { %3451 = vmatpush.bf16.msrb.mxu3 %v6779_v59  ;;  %3476 = vmatpush.bf16.msra.mxu1 %v5007_v1  ;;  %v7436_v46 = vld [vmem:[%s11642_s2 + $0x5a4] sm:$0xf]  ;;  %v5708_v51 = vld [vmem:[%s11642_s2 + $0x6b0] sm:$0xf0]  ;;  %v5455_v54 = vor.u32 %v7404_v43, %v5452_v45 }
  0xa1   :  { %v7468_v50 = vld [vmem:[%s11642_s2 + $0x6a4] sm:$0xf]  ;;  %v5292_v53 = vld [vmem:[%s11642_s2 + $0x370] sm:$0xf0]  ;;  %v5583_v55 = vor.u32 %v7436_v46, %v5580_v47 }
  0xa2   :  { %3489 = vmatpush.bf16.msra.mxu2 %v5135_v2  ;;  %v7364_v52 = vld [vmem:[%s11642_s2 + $0x364] sm:$0xf]  ;;  %v5711_v57 = vor.u32 %v7468_v50, %v5708_v51  ;;  %v5436_v58 = vld [vmem:[%s11642_s2 + $0x490] sm:$0xf0]  ;;  %v3258_v62 = vpop.f32.mrf.mxu0 }
  0xa3   :  { %3452 = vmatmul.bf16.vlgmr.msrb.gmra.mxu3 %v672_v3  ;;  %3464 = vmatpush.bf16.msra.mxu0 %v4863_v17  ;;  %v7400_v56 = vld [vmem:[%s11642_s2 + $0x484] sm:$0xf]  ;;  %v5295_v61 = vor.u32 %v7364_v52, %v5292_v53  ;;  %v5692_v0 = vld [vmem:[%s11642_s2 + $0x690] sm:$0xf0]  ;;  %v3259_v1 = vadd.f32 %v3258_v62, %v590_v48  ;;  %v3271_v6 = vpop.f32.mrf.mxu1 }
  0xa4   :  { %3496 = vmatpush.bf16.msra.mxu3 %v5359_v60  ;;  %3477 = vmatpush.bf16.msra.mxu1 %v4991_v20  ;;  %v7432_v59 = vld [vmem:[%s11642_s2 + $0x584] sm:$0xf]  ;;  %v5564_v60 = vld [vmem:[%s11642_s2 + $0x590] sm:$0xf0]  ;;  %v5439_v4 = vor.u32 %v7400_v56, %v5436_v58 }
  0xa5   :  { %v7464_v63 = vld [vmem:[%s11642_s2 + $0x684] sm:$0xf]  ;;  %v5276_v3 = vld [vmem:[%s11642_s2 + $0x350] sm:$0xf0]  ;;  %v5567_v5 = vor.u32 %v7432_v59, %v5564_v60  ;;  %v3272_v9 = vadd.f32 %v3271_v6, %v3259_v1 }
  0xa6   :  { %3490 = vmatpush.bf16.msra.mxu2 %v5119_v21  ;;  %3465 = vmatmul.bf16.vlgmr.msra.gmra.mxu0 %v8149_v35  ;;  %v7360_v2 = vld [vmem:[%s11642_s2 + $0x344] sm:$0xf]  ;;  %v5695_v8 = vor.u32 %v7464_v63, %v5692_v0  ;;  %v5420_v10 = vld [vmem:[%s11642_s2 + $0x470] sm:$0xf0]  ;;  %v9039_v21 = vpop.f32.mrf.mxu3 }
  0xa7   :  { %3509 = vmatpush.bf16.msrb.mxu0 %v5487_v25  ;;  %3478 = vmatmul.bf16.vlgmr.msra.gmra.mxu1 %v8165_v41  ;;  %v7396_v7 = vld [vmem:[%s11642_s2 + $0x464] sm:$0xf]  ;;  %v5548_v12 = vld [vmem:[%s11642_s2 + $0x570] sm:$0xf0] }
  0xa8   :  { %3497 = vmatpush.bf16.msra.mxu3 %v5343_v13  ;;  %3522 = vmatpush.bf16.msrb.mxu1 %v5615_v26  ;;  %v7428_v11 = vld [vmem:[%s11642_s2 + $0x564] sm:$0xf]  ;;  %v5279_v13 = vor.u32 %v7360_v2, %v5276_v3  ;;  %v5676_v18 = vld [vmem:[%s11642_s2 + $0x670] sm:$0xf0]  ;;  %v5423_v23 = vor.u32 %v7396_v7, %v5420_v10 }
  0xa9   :  { %3491 = vmatmul.bf16.vlgmr.msra.gmra.mxu2 %v8157_v38  ;;  %v7460_v17 = vld [vmem:[%s11642_s2 + $0x664] sm:$0xf]  ;;  %v5260_v20 = vld [vmem:[%s11642_s2 + $0x330] sm:$0xf0]  ;;  %v5551_v24 = vor.u32 %v7428_v11, %v5548_v12 }
  0xaa   :  { %3535 = vmatpush.bf16.msrb.mxu2 %v5743_v28  ;;  %v7356_v19 = vld [vmem:[%s11642_s2 + $0x324] sm:$0xf]  ;;  %v5679_v26 = vor.u32 %v7460_v17, %v5676_v18  ;;  %v3284_v27 = vpop.f32.mrf.mxu2  ;;  %v5404_v28 = vld [vmem:[%s11642_s2 + $0x450] sm:$0xf0]  ;;  %v3260_v37 = vpop.f32.mrf.mxu0 }
  0xab   :  { %3510 = vmatpush.bf16.msrb.mxu0 %v5471_v40  ;;  %v7392_v25 = vld [vmem:[%s11642_s2 + $0x444] sm:$0xf]  ;;  %v5532_v30 = vld [vmem:[%s11642_s2 + $0x550] sm:$0xf0]  ;;  %v9053_v31 = vadd.f32 %v3284_v27, %v3272_v9  ;;  %v3273_v47 = vpop.f32.mrf.mxu1 }
  0xac   :  { %3498 = vmatpush.bf16.msra.mxu3 %v5327_v32  ;;  %3523 = vmatpush.bf16.msrb.mxu1 %v5599_v42  ;;  %v7424_v29 = vld [vmem:[%s11642_s2 + $0x544] sm:$0xf]  ;;  %v5263_v32 = vor.u32 %v7356_v19, %v5260_v20  ;;  %v5660_v36 = vld [vmem:[%s11642_s2 + $0x650] sm:$0xf0]  ;;  %v5407_v42 = vor.u32 %v7392_v25, %v5404_v28 }
  0xad   :  { %v7456_v33 = vld [vmem:[%s11642_s2 + $0x644] sm:$0xf]  ;;  %v5244_v40 = vld [vmem:[%s11642_s2 + $0x310] sm:$0xf0]  ;;  %v5535_v43 = vor.u32 %v7424_v29, %v5532_v30 }
  0xae   :  { %3536 = vmatpush.bf16.msrb.mxu2 %v5727_v44  ;;  %v7352_v39 = vld [vmem:[%s11642_s2 + $0x304] sm:$0xf]  ;;  %v5868_v45 = vld [vmem:[%s11642_s2 + $0x7f0] sm:$0xf0]  ;;  %v5663_v48 = vor.u32 %v7456_v33, %v5660_v36 }
  0xaf   :  { %3511 = vmatpush.bf16.msrb.mxu0 %v5455_v54  ;;  %v7508_v44 = vld [vmem:[%s11642_s2 + $0x7e4] sm:$0xf]  ;;  %v5516_v51 = vld [vmem:[%s11642_s2 + $0x530] sm:$0xf0]  ;;  %v5247_v52 = vor.u32 %v7352_v39, %v5244_v40 }
  0xb0   :  { %3499 = vmatpush.bf16.msra.mxu3 %v5311_v49  ;;  %3524 = vmatpush.bf16.msrb.mxu1 %v5583_v55  ;;  %v7388_v46 = vld [vmem:[%s11642_s2 + $0x424] sm:$0xf]  ;;  %v5388_v49 = vld [vmem:[%s11642_s2 + $0x430] sm:$0xf0]  ;;  %v5871_v55 = vor.u32 %v7508_v44, %v5868_v45 }
  0xb1   :  { %v7420_v50 = vld [vmem:[%s11642_s2 + $0x524] sm:$0xf]  ;;  %v5644_v54 = vld [vmem:[%s11642_s2 + $0x630] sm:$0xf0]  ;;  %v5391_v58 = vor.u32 %v7388_v46, %v5388_v49 }
  0xb2   :  { %3537 = vmatpush.bf16.msrb.mxu2 %v5711_v57  ;;  %v7452_v53 = vld [vmem:[%s11642_s2 + $0x624] sm:$0xf]  ;;  %v5852_v57 = vld [vmem:[%s11642_s2 + $0x7d0] sm:$0xf0]  ;;  %v5519_v59 = vor.u32 %v7420_v50, %v5516_v51  ;;  %v3286_v3 = vpop.f32.mrf.mxu2 }
  0xb3   :  { %3512 = vmatpush.bf16.msrb.mxu0 %v5439_v4  ;;  %v7504_v56 = vld [vmem:[%s11642_s2 + $0x7c4] sm:$0xf]  ;;  %v5647_v63 = vor.u32 %v7452_v53, %v5644_v54  ;;  %v5500_v0 = vld [vmem:[%s11642_s2 + $0x510] sm:$0xf0]  ;;  %v9115_v4 = vpop.f32.mrf.mxu3 }
  0xb4   :  { %3500 = vmatpush.bf16.msra.mxu3 %v5295_v61  ;;  %3525 = vmatpush.bf16.msrb.mxu1 %v5567_v5  ;;  %v7384_v60 = vld [vmem:[%s11642_s2 + $0x404] sm:$0xf]  ;;  %v5372_v61 = vld [vmem:[%s11642_s2 + $0x410] sm:$0xf0] }
  0xb5   :  { %v7416_v62 = vld [vmem:[%s11642_s2 + $0x504] sm:$0xf]  ;;  %v5628_v2 = vld [vmem:[%s11642_s2 + $0x610] sm:$0xf0]  ;;  %v5375_v12 = vor.u32 %v7384_v60, %v5372_v61 }
  0xb6   :  { %3538 = vmatpush.bf16.msrb.mxu2 %v5695_v8  ;;  %v7448_v1 = vld [vmem:[%s11642_s2 + $0x604] sm:$0xf]  ;;  %v5996_v6 = vld [vmem:[%s11642_s2 + $0x8f0] sm:$0xf0]  ;;  %v5855_v8 = vor.u32 %v7504_v56, %v5852_v57 }
  0xb7   :  { %3513 = vmatpush.bf16.msrb.mxu0 %v5423_v23  ;;  %v7540_v5 = vld [vmem:[%s11642_s2 + $0x8e4] sm:$0xf]  ;;  %v6124_v9 = vld [vmem:[%s11642_s2 + $0x9f0] sm:$0xf0]  ;;  %v5631_v19 = vor.u32 %v7448_v1, %v5628_v2 }
  0xb8   :  { %3501 = vmatpush.bf16.msra.mxu3 %v5279_v13  ;;  %3526 = vmatpush.bf16.msrb.mxu1 %v5551_v24  ;;  %v7572_v7 = vld [vmem:[%s11642_s2 + $0x9e4] sm:$0xf]  ;;  %v6252_v11 = vld [vmem:[%s11642_s2 + $0xaf0] sm:$0xf0]  ;;  %v5503_v13 = vor.u32 %v7416_v62, %v5500_v0  ;;  %v5999_v20 = vor.u32 %v7540_v5, %v5996_v6 }
  0xb9   :  { %v7604_v10 = vld [vmem:[%s11642_s2 + $0xae4] sm:$0xf]  ;;  %v5836_v18 = vld [vmem:[%s11642_s2 + $0x7b0] sm:$0xf0]  ;;  %v6127_v23 = vor.u32 %v7572_v7, %v6124_v9 }
  0xba   :  { %3539 = vmatpush.bf16.msrb.mxu2 %v5679_v26  ;;  %v7500_v17 = vld [vmem:[%s11642_s2 + $0x7a4] sm:$0xf]  ;;  %v6255_v24 = vor.u32 %v7604_v10, %v6252_v11  ;;  %v5980_v26 = vld [vmem:[%s11642_s2 + $0x8d0] sm:$0xf0] }
  0xbb   :  { %3514 = vmatpush.bf16.msrb.mxu0 %v5407_v42  ;;  %v7536_v25 = vld [vmem:[%s11642_s2 + $0x8c4] sm:$0xf]  ;;  %v5839_v28 = vor.u32 %v7500_v17, %v5836_v18  ;;  %v6108_v29 = vld [vmem:[%s11642_s2 + $0x9d0] sm:$0xf0]  ;;  %v9166_v39 = vpop.f32.mrf.mxu3 }
  0xbc   :  { %3502 = vmatpush.bf16.msra.mxu3 %v5263_v32  ;;  %3527 = vmatpush.bf16.msrb.mxu1 %v5535_v43  ;;  %v7568_v27 = vld [vmem:[%s11642_s2 + $0x9c4] sm:$0xf]  ;;  %v6236_v32 = vld [vmem:[%s11642_s2 + $0xad0] sm:$0xf0]  ;;  %v5983_v37 = vor.u32 %v7536_v25, %v5980_v26 }
  0xbd   :  { %v7600_v30 = vld [vmem:[%s11642_s2 + $0xac4] sm:$0xf]  ;;  %v5820_v36 = vld [vmem:[%s11642_s2 + $0x790] sm:$0xf0]  ;;  %v6111_v40 = vor.u32 %v7568_v27, %v6108_v29 }
  0xbe   :  { %3540 = vmatpush.bf16.msrb.mxu2 %v5663_v48  ;;  %v7496_v33 = vld [vmem:[%s11642_s2 + $0x784] sm:$0xf]  ;;  %v6239_v42 = vor.u32 %v7600_v30, %v6236_v32  ;;  %v5964_v44 = vld [vmem:[%s11642_s2 + $0x8b0] sm:$0xf0] }
  0xbf   :  { %3515 = vmatpush.bf16.msrb.mxu0 %v5391_v58  ;;  %v7532_v43 = vld [vmem:[%s11642_s2 + $0x8a4] sm:$0xf]  ;;  %v5823_v46 = vor.u32 %v7496_v33, %v5820_v36  ;;  %v6092_v47 = vld [vmem:[%s11642_s2 + $0x9b0] sm:$0xf0] }
  0xc0   :  { %3503 = vmatpush.bf16.msra.mxu3 %v5247_v52  ;;  %3528 = vmatpush.bf16.msrb.mxu1 %v5519_v59  ;;  %v7564_v45 = vld [vmem:[%s11642_s2 + $0x9a4] sm:$0xf]  ;;  %v6220_v49 = vld [vmem:[%s11642_s2 + $0xab0] sm:$0xf0]  ;;  %v5967_v52 = vor.u32 %v7532_v43, %v5964_v44  ;;  %v3310_v1 = vpop.f32.mrf.mxu0 }
  0xc1   :  { %v7596_v48 = vld [vmem:[%s11642_s2 + $0xaa4] sm:$0xf]  ;;  %v5804_v51 = vld [vmem:[%s11642_s2 + $0x770] sm:$0xf0]  ;;  %v6095_v53 = vor.u32 %v7564_v45, %v6092_v47 }
  0xc2   :  { %3541 = vmatpush.bf16.msrb.mxu2 %v5647_v63  ;;  %v7492_v50 = vld [vmem:[%s11642_s2 + $0x764] sm:$0xf]  ;;  %v6223_v54 = vor.u32 %v7596_v48, %v6220_v49  ;;  %v5948_v56 = vld [vmem:[%s11642_s2 + $0x890] sm:$0xf0] }
  0xc3   :  { %3504 = vmatmul.bf16.vlgmr.msra.gmra.mxu3 %v8343_v34  ;;  %3516 = vmatpush.bf16.msrb.mxu0 %v5375_v12  ;;  %v7560_v57 = vld [vmem:[%s11642_s2 + $0x984] sm:$0xf]  ;;  %v5807_v58 = vor.u32 %v7492_v50, %v5804_v51  ;;  %v6076_v59 = vld [vmem:[%s11642_s2 + $0x990] sm:$0xf0] }
  0xc4   :  { %3548 = vmatpush.bf16.msrb.mxu3 %v5871_v55  ;;  %3529 = vmatpush.bf16.msrb.mxu1 %v5503_v13  ;;  %v7528_v55 = vld [vmem:[%s11642_s2 + $0x884] sm:$0xf]  ;;  %v6204_v61 = vld [vmem:[%s11642_s2 + $0xa90] sm:$0xf0]  ;;  %v6079_v2 = vor.u32 %v7560_v57, %v6076_v59  ;;  %v3323_v5 = vpop.f32.mrf.mxu1 }
  0xc5   :  { %v7592_v60 = vld [vmem:[%s11642_s2 + $0xa84] sm:$0xf]  ;;  %v5788_v63 = vld [vmem:[%s11642_s2 + $0x750] sm:$0xf0]  ;;  %v5951_v0 = vor.u32 %v7528_v55, %v5948_v56 }
  0xc6   :  { %3542 = vmatpush.bf16.msrb.mxu2 %v5631_v19  ;;  %3517 = vmatmul.bf16.vlgmr.msrb.gmra.mxu0 %v8372_v15  ;;  %v7488_v62 = vld [vmem:[%s11642_s2 + $0x744] sm:$0xf]  ;;  %v6207_v3 = vor.u32 %v7592_v60, %v6204_v61  ;;  %v5932_v7 = vld [vmem:[%s11642_s2 + $0x870] sm:$0xf0] }
  0xc7   :  { %3561 = vmatpush.bf16.msra.mxu0 %v5999_v20  ;;  %3530 = vmatmul.bf16.vlgmr.msrb.gmra.mxu1 %v8374_v16  ;;  %v7524_v6 = vld [vmem:[%s11642_s2 + $0x864] sm:$0xf]  ;;  %v5791_v9 = vor.u32 %v7488_v62, %v5788_v63  ;;  %v6060_v10 = vld [vmem:[%s11642_s2 + $0x970] sm:$0xf0] }
  0xc8   :  { %3549 = vmatpush.bf16.msrb.mxu3 %v5855_v8  ;;  %3574 = vmatpush.bf16.msra.mxu1 %v6127_v23  ;;  %v7556_v8 = vld [vmem:[%s11642_s2 + $0x964] sm:$0xf]  ;;  %v6188_v12 = vld [vmem:[%s11642_s2 + $0xa70] sm:$0xf0]  ;;  %v3297_v13 = vpop.f32.mrf.mxu3  ;;  %v5935_v20 = vor.u32 %v7524_v6, %v5932_v7  ;;  %v3312_v45 = vpop.f32.mrf.mxu0 }
  0xc9   :  { %3543 = vmatmul.bf16.vlgmr.msrb.gmra.mxu2 %v8370_v14  ;;  %v7588_v11 = vld [vmem:[%s11642_s2 + $0xa64] sm:$0xf]  ;;  %v5772_v18 = vld [vmem:[%s11642_s2 + $0x730] sm:$0xf0]  ;;  %v3298_v19 = vadd.f32 %v3297_v13, %v9053_v31  ;;  %v6063_v23 = vor.u32 %v7556_v8, %v6060_v10 }
  0xca   :  { %3587 = vmatpush.bf16.msra.mxu2 %v6255_v24  ;;  %v7484_v17 = vld [vmem:[%s11642_s2 + $0x724] sm:$0xf]  ;;  %v6191_v24 = vor.u32 %v7588_v11, %v6188_v12  ;;  %v5916_v26 = vld [vmem:[%s11642_s2 + $0x850] sm:$0xf0]  ;;  %v3336_v31 = vpop.f32.mrf.mxu2 }
  0xcb   :  { %3562 = vmatpush.bf16.msra.mxu0 %v5983_v37  ;;  %v7520_v25 = vld [vmem:[%s11642_s2 + $0x844] sm:$0xf]  ;;  %v5775_v29 = vor.u32 %v7484_v17, %v5772_v18  ;;  %v6044_v30 = vld [vmem:[%s11642_s2 + $0x950] sm:$0xf0] }
  0xcc   :  { %3550 = vmatpush.bf16.msrb.mxu3 %v5839_v28  ;;  %3575 = vmatpush.bf16.msra.mxu1 %v6111_v40  ;;  %v7552_v27 = vld [vmem:[%s11642_s2 + $0x944] sm:$0xf]  ;;  %v3311_v28 = vadd.f32 %v3310_v1, %v3298_v19  ;;  %v6172_v33 = vld [vmem:[%s11642_s2 + $0xa50] sm:$0xf0]  ;;  %v3325_v51 = vpop.f32.mrf.mxu1 }
  0xcd   :  { %v7584_v32 = vld [vmem:[%s11642_s2 + $0xa44] sm:$0xf]  ;;  %v5756_v37 = vld [vmem:[%s11642_s2 + $0x710] sm:$0xf0] }
  0xce   :  { %3588 = vmatpush.bf16.msra.mxu2 %v6239_v42  ;;  %v7480_v36 = vld [vmem:[%s11642_s2 + $0x704] sm:$0xf]  ;;  %v3324_v40 = vadd.f32 %v3323_v5, %v3311_v28  ;;  %v5919_v42 = vor.u32 %v7520_v25, %v5916_v26  ;;  %v6380_v44 = vld [vmem:[%s11642_s2 + $0xbf0] sm:$0xf0]  ;;  %v6175_v47 = vor.u32 %v7584_v32, %v6172_v33 }
  0xcf   :  { %3563 = vmatpush.bf16.msra.mxu0 %v5967_v52  ;;  %v7636_v43 = vld [vmem:[%s11642_s2 + $0xbe4] sm:$0xf]  ;;  %v5900_v49 = vld [vmem:[%s11642_s2 + $0x830] sm:$0xf0] }
  0xd0   :  { %3551 = vmatpush.bf16.msrb.mxu3 %v5823_v46  ;;  %3576 = vmatpush.bf16.msra.mxu1 %v6095_v53  ;;  %v6047_v46 = vor.u32 %v7552_v27, %v6044_v30  ;;  %v7516_v48 = vld [vmem:[%s11642_s2 + $0x824] sm:$0xf]  ;;  %v9283_v52 = vadd.f32 %v3336_v31, %v3324_v40  ;;  %v5759_v53 = vor.u32 %v7480_v36, %v5756_v37  ;;  %v6156_v56 = vld [vmem:[%s11642_s2 + $0xa30] sm:$0xf0]  ;;  %v3299_v59 = vpop.f32.mrf.mxu3 }
  0xd1   :  { %v7548_v50 = vld [vmem:[%s11642_s2 + $0x924] sm:$0xf]  ;;  %v6383_v57 = vor.u32 %v7636_v43, %v6380_v44  ;;  %v5903_v60 = vor.u32 %v7516_v48, %v5900_v49  ;;  %v6364_v61 = vld [vmem:[%s11642_s2 + $0xbd0] sm:$0xf0] }
  0xd2   :  { %3589 = vmatpush.bf16.msra.mxu2 %v6223_v54  ;;  %v6028_v54 = vld [vmem:[%s11642_s2 + $0x930] sm:$0xf0]  ;;  %v7580_v55 = vld [vmem:[%s11642_s2 + $0xa24] sm:$0xf] }
  0xd3   :  { %3564 = vmatpush.bf16.msra.mxu0 %v5951_v0  ;;  %v7512_v62 = vld [vmem:[%s11642_s2 + $0x804] sm:$0xf]  ;;  %v5884_v63 = vld [vmem:[%s11642_s2 + $0x810] sm:$0xf0]  ;;  %v6031_v0 = vor.u32 %v7548_v50, %v6028_v54  ;;  %v6159_v1 = vor.u32 %v7580_v55, %v6156_v56 }
  0xd4   :  { %3552 = vmatpush.bf16.msrb.mxu3 %v5807_v58  ;;  %3577 = vmatpush.bf16.msra.mxu1 %v6079_v2  ;;  %v7632_v58 = vld [vmem:[%s11642_s2 + $0xbc4] sm:$0xf]  ;;  %v6140_v6 = vld [vmem:[%s11642_s2 + $0xa10] sm:$0xf0]  ;;  %v5887_v17 = vor.u32 %v7512_v62, %v5884_v63 }
  0xd5   :  { %v7544_v2 = vld [vmem:[%s11642_s2 + $0x904] sm:$0xf]  ;;  %v6508_v8 = vld [vmem:[%s11642_s2 + $0xcf0] sm:$0xf0]  ;;  %v6367_v10 = vor.u32 %v7632_v58, %v6364_v61 }
  0xd6   :  { %3590 = vmatpush.bf16.msra.mxu2 %v6207_v3  ;;  %v6012_v3 = vld [vmem:[%s11642_s2 + $0x910] sm:$0xf0]  ;;  %v7576_v5 = vld [vmem:[%s11642_s2 + $0xa04] sm:$0xf] }
  0xd7   :  { %3565 = vmatpush.bf16.msra.mxu0 %v5935_v20  ;;  %v7668_v7 = vld [vmem:[%s11642_s2 + $0xce4] sm:$0xf]  ;;  %v6636_v12 = vld [vmem:[%s11642_s2 + $0xdf0] sm:$0xf0] }
  0xd8   :  { %3553 = vmatpush.bf16.msrb.mxu3 %v5791_v9  ;;  %3578 = vmatpush.bf16.msra.mxu1 %v6063_v23  ;;  %v3338_v9 = vpop.f32.mrf.mxu2  ;;  %v7700_v11 = vld [vmem:[%s11642_s2 + $0xde4] sm:$0xf]  ;;  %v6764_v18 = vld [vmem:[%s11642_s2 + $0xef0] sm:$0xf0]  ;;  %v6015_v23 = vor.u32 %v7544_v2, %v6012_v3  ;;  %v6511_v25 = vor.u32 %v7668_v7, %v6508_v8 }
  0xd9   :  { %v7732_v13 = vld [vmem:[%s11642_s2 + $0xee4] sm:$0xf]  ;;  %v6348_v20 = vld [vmem:[%s11642_s2 + $0xbb0] sm:$0xf0]  ;;  %v6639_v26 = vor.u32 %v7700_v11, %v6636_v12 }
  0xda   :  { %3591 = vmatpush.bf16.msra.mxu2 %v6191_v24  ;;  %v7628_v19 = vld [vmem:[%s11642_s2 + $0xba4] sm:$0xf]  ;;  %v6143_v24 = vor.u32 %v7576_v5, %v6140_v6  ;;  %v6492_v28 = vld [vmem:[%s11642_s2 + $0xcd0] sm:$0xf0]  ;;  %v6767_v31 = vor.u32 %v7732_v13, %v6764_v18 }
  0xdb   :  { %3566 = vmatpush.bf16.msra.mxu0 %v5919_v42  ;;  %v7664_v27 = vld [vmem:[%s11642_s2 + $0xcc4] sm:$0xf]  ;;  %v6620_v32 = vld [vmem:[%s11642_s2 + $0xdd0] sm:$0xf0] }
  0xdc   :  { %3554 = vmatpush.bf16.msrb.mxu3 %v5775_v29  ;;  %3579 = vmatpush.bf16.msra.mxu1 %v6047_v46  ;;  %v6351_v29 = vor.u32 %v7628_v19, %v6348_v20  ;;  %v7696_v30 = vld [vmem:[%s11642_s2 + $0xdc4] sm:$0xf]  ;;  %v6748_v36 = vld [vmem:[%s11642_s2 + $0xed0] sm:$0xf0]  ;;  %v6495_v42 = vor.u32 %v7664_v27, %v6492_v28 }
  0xdd   :  { %v7728_v33 = vld [vmem:[%s11642_s2 + $0xec4] sm:$0xf]  ;;  %v6332_v40 = vld [vmem:[%s11642_s2 + $0xb90] sm:$0xf0]  ;;  %v6623_v43 = vor.u32 %v7696_v30, %v6620_v32 }
  0xde   :  { %3592 = vmatpush.bf16.msra.mxu2 %v6175_v47  ;;  %v7624_v37 = vld [vmem:[%s11642_s2 + $0xb84] sm:$0xf]  ;;  %v6476_v45 = vld [vmem:[%s11642_s2 + $0xcb0] sm:$0xf0]  ;;  %v6751_v46 = vor.u32 %v7728_v33, %v6748_v36 }
  0xdf   :  { %3567 = vmatpush.bf16.msra.mxu0 %v5903_v60  ;;  %v7660_v44 = vld [vmem:[%s11642_s2 + $0xca4] sm:$0xf]  ;;  %v6335_v47 = vor.u32 %v7624_v37, %v6332_v40  ;;  %v6604_v49 = vld [vmem:[%s11642_s2 + $0xdb0] sm:$0xf0] }
  0xe0   :  { %3555 = vmatpush.bf16.msrb.mxu3 %v5759_v53  ;;  %3580 = vmatpush.bf16.msra.mxu1 %v6031_v0  ;;  %v7692_v48 = vld [vmem:[%s11642_s2 + $0xda4] sm:$0xf]  ;;  %v7858_v51 = vld [vmem:[#allocation1 + $0x12] sm:$0xff]  ;;  %v6479_v58 = vor.u32 %v7660_v44, %v6476_v45 }
  0xe1   :  { %v7724_v50 = vld [vmem:[%s11642_s2 + $0xea4] sm:$0xf]  ;;  %v6732_v54 = vld [vmem:[%s11642_s2 + $0xeb0] sm:$0xf0]  ;;  %v6607_v59 = vor.u32 %v7692_v48, %v6604_v49 }
  0xe2   :  { %3593 = vmatpush.bf16.msra.mxu2 %v6159_v1  ;;  %v7859_v53 = vld [vmem:[#allocation1] sm:$0xff]  ;;  %v6316_v56 = vld [vmem:[%s11642_s2 + $0xb70] sm:$0xf0]  ;;  %v6735_v62 = vor.u32 %v7724_v50, %v6732_v54 }
  0xe3   :  { %3556 = vmatmul.bf16.vlgmr.msrb.gmra.mxu3 %v8385_v22  ;;  %3568 = vmatpush.bf16.msra.mxu0 %v5887_v17  ;;  %v7620_v55 = vld [vmem:[%s11642_s2 + $0xb64] sm:$0xf]  ;;  %v6460_v61 = vld [vmem:[%s11642_s2 + $0xc90] sm:$0xf0] }
  0xe4   :  { %3600 = vmatpush.bf16.msra.mxu3 %v6383_v57  ;;  %3581 = vmatpush.bf16.msra.mxu1 %v6015_v23  ;;  %v7860_v57 = vld [vmem:[#allocation1 + $0x9] sm:$0xff]  ;;  %v7656_v60 = vld [vmem:[%s11642_s2 + $0xc84] sm:$0xf]  ;;  %v6319_v63 = vor.u32 %v7620_v55, %v6316_v56  ;;  %v6588_v1 = vld [vmem:[%s11642_s2 + $0xd90] sm:$0xf0] }
  0xe5   :  { %v7688_v0 = vld [vmem:[%s11642_s2 + $0xd84] sm:$0xf]  ;;  %v6716_v3 = vld [vmem:[%s11642_s2 + $0xe90] sm:$0xf0]  ;;  %v6463_v7 = vor.u32 %v7656_v60, %v6460_v61 }
  0xe6   :  { %3594 = vmatpush.bf16.msra.mxu2 %v6143_v24  ;;  %3569 = vmatmul.bf16.vlgmr.msra.gmra.mxu0 %v7859_v53  ;;  %v7720_v2 = vld [vmem:[%s11642_s2 + $0xe84] sm:$0xf]  ;;  %v6300_v6 = vld [vmem:[%s11642_s2 + $0xb50] sm:$0xf0]  ;;  %v6591_v8 = vor.u32 %v7688_v0, %v6588_v1  ;;  %v3375_v17 = vpop.f32.mrf.mxu1  ;;  %v3349_v23 = vpop.f32.mrf.mxu3 }
  0xe7   :  { %3613 = vmatpush.bf16.msrb.mxu0 %v6511_v25  ;;  %3582 = vmatmul.bf16.vlgmr.msra.gmra.mxu1 %v7860_v57  ;;  %v7616_v5 = vld [vmem:[%s11642_s2 + $0xb44] sm:$0xf]  ;;  %v3362_v9 = vpop.f32.mrf.mxu0  ;;  %v6444_v11 = vld [vmem:[%s11642_s2 + $0xc70] sm:$0xf0]  ;;  %v6719_v12 = vor.u32 %v7720_v2, %v6716_v3  ;;  %v3350_v27 = vadd.f32 %v3349_v23, %v9283_v52  ;;  %v7319_v23 = vld [vmem:[%s11642_s2 + $0x1f4] sm:$0xf0] }
  0xe8   :  { %3601 = vmatpush.bf16.msra.mxu3 %v6367_v10  ;;  %3626 = vmatpush.bf16.msrb.mxu1 %v6639_v26  ;;  %v7652_v10 = vld [vmem:[%s11642_s2 + $0xc64] sm:$0xf]  ;;  %v6303_v13 = vor.u32 %v7616_v5, %v6300_v6  ;;  %v6572_v19 = vld [vmem:[%s11642_s2 + $0xd70] sm:$0xf0] }
  0xe9   :  { %3595 = vmatmul.bf16.vlgmr.msra.gmra.mxu2 %v7858_v51  ;;  %v7684_v18 = vld [vmem:[%s11642_s2 + $0xd64] sm:$0xf]  ;;  %v6700_v24 = vld [vmem:[%s11642_s2 + $0xe70] sm:$0xf0]  ;;  %v6447_v28 = vor.u32 %v7652_v10, %v6444_v11  ;;  %v3363_v32 = vadd.f32 %v3362_v9, %v3350_v27 }
  0xea   :  { %3639 = vmatpush.bf16.msrb.mxu2 %v6767_v31  ;;  %v7716_v20 = vld [vmem:[%s11642_s2 + $0xe64] sm:$0xf]  ;;  %v6284_v26 = vld [vmem:[%s11642_s2 + $0xb30] sm:$0xf0]  ;;  %v6575_v31 = vor.u32 %v7684_v18, %v6572_v19  ;;  %v7287_v18 = vld [vmem:[%s11642_s2 + $0xf4] sm:$0xf0] }
  0xeb   :  { %3614 = vmatpush.bf16.msrb.mxu0 %v6495_v42  ;;  %v7612_v25 = vld [vmem:[%s11642_s2 + $0xb24] sm:$0xf]  ;;  %v6428_v30 = vld [vmem:[%s11642_s2 + $0xc50] sm:$0xf0]  ;;  %v6703_v33 = vor.u32 %v7716_v20, %v6700_v24  ;;  %v5106_v19 = vld [vmem:[%s11642_s2 + $0x1e8] sm:$0xf] }
  0xec   :  { %3602 = vmatpush.bf16.msra.mxu3 %v6351_v29  ;;  %3627 = vmatpush.bf16.msrb.mxu1 %v6623_v43  ;;  %v7648_v29 = vld [vmem:[%s11642_s2 + $0xc44] sm:$0xf]  ;;  %v6287_v36 = vor.u32 %v7612_v25, %v6284_v26  ;;  %v6556_v37 = vld [vmem:[%s11642_s2 + $0xd50] sm:$0xf0]  ;;  %v3388_v42 = vpop.f32.mrf.mxu2  ;;  %v5234_v24 = vld [vmem:[%s11642_s2 + $0x2e8] sm:$0xf] }
  0xed   :  { %v7680_v52 = vld [vmem:[%s11642_s2 + $0xd44] sm:$0xf]  ;;  %v6684_v43 = vld [vmem:[%s11642_s2 + $0xe50] sm:$0xf0]  ;;  %v6431_v49 = vor.u32 %v7648_v29, %v6428_v30  ;;  %v7351_v25 = vld [vmem:[%s11642_s2 + $0x2f4] sm:$0xf0] }
  0xee   :  { %3640 = vmatpush.bf16.msrb.mxu2 %v6751_v46  ;;  %v7712_v40 = vld [vmem:[%s11642_s2 + $0xe44] sm:$0xf]  ;;  %v6268_v45 = vld [vmem:[%s11642_s2 + $0xb10] sm:$0xf0]  ;;  %v3376_v46 = vadd.f32 %v3375_v17, %v3363_v32  ;;  %v6559_v50 = vor.u32 %v7680_v52, %v6556_v37  ;;  %v3377_v60 = vpop.f32.mrf.mxu1  ;;  %v3351_v0 = vpop.f32.mrf.mxu3  ;;  %v4978_v17 = vld [vmem:[%s11642_s2 + $0xe8] sm:$0xf] }
  0xef   :  { %3615 = vmatpush.bf16.msrb.mxu0 %v6479_v58  ;;  %v7608_v44 = vld [vmem:[%s11642_s2 + $0xb04] sm:$0xf]  ;;  %v6892_v48 = vld [vmem:[%s11642_s2 + $0xff0] sm:$0xf0]  ;;  %v3364_v53 = vpop.f32.mrf.mxu0  ;;  %v6687_v55 = vor.u32 %v7712_v40, %v6684_v43  ;;  %v7861_v29 = vld [vmem:[#allocation1 + $0x1b] sm:$0xff]  ;;  %v4979_v32 = vor.u32 %v7287_v18, %v4978_v17 }
  0xf0   :  { %3603 = vmatpush.bf16.msra.mxu3 %v6335_v47  ;;  %3628 = vmatpush.bf16.msrb.mxu1 %v6607_v59  ;;  %v7764_v47 = vld [vmem:[%s11642_s2 + $0xfe4] sm:$0xf]  ;;  %v9473_v54 = vadd.f32 %v3388_v42, %v3376_v46  ;;  %v6271_v56 = vor.u32 %v7608_v44, %v6268_v45  ;;  %v6412_v57 = vld [vmem:[%s11642_s2 + $0xc30] sm:$0xf0]  ;;  %v4962_v52 = vld [vmem:[%s11642_s2 + $0xc8] sm:$0xf] }
  0xf1   :  { %v7644_v51 = vld [vmem:[%s11642_s2 + $0xc24] sm:$0xf]  ;;  %v6540_v59 = vld [vmem:[%s11642_s2 + $0xd30] sm:$0xf0]  ;;  %v6895_v61 = vor.u32 %v7764_v47, %v6892_v48  ;;  %v7283_v37 = vld [vmem:[%s11642_s2 + $0xd4] sm:$0xf0] }
  0xf2   :  { %3641 = vmatpush.bf16.msrb.mxu2 %v6735_v62  ;;  %v7676_v58 = vld [vmem:[%s11642_s2 + $0xd24] sm:$0xf]  ;;  %v6876_v2 = vld [vmem:[%s11642_s2 + $0xfd0] sm:$0xf0]  ;;  %v6415_v3 = vor.u32 %v7644_v51, %v6412_v57  ;;  %v5090_v40 = vld [vmem:[%s11642_s2 + $0x1c8] sm:$0xf]  ;;  %v4963_v48 = vor.u32 %v7283_v37, %v4962_v52 }
  0xf3   :  { %3616 = vmatpush.bf16.msrb.mxu0 %v6463_v7  ;;  %v7708_v62 = vld [vmem:[%s11642_s2 + $0xe24] sm:$0xf]  ;;  %v6543_v5 = vor.u32 %v7676_v58, %v6540_v59  ;;  %v6396_v7 = vld [vmem:[%s11642_s2 + $0xc10] sm:$0xf0]  ;;  %v7315_v43 = vld [vmem:[%s11642_s2 + $0x1d4] sm:$0xf0] }
  0xf4   :  { %3604 = vmatpush.bf16.msra.mxu3 %v6319_v63  ;;  %3629 = vmatpush.bf16.msrb.mxu1 %v6591_v8  ;;  %v6668_v63 = vld [vmem:[%s11642_s2 + $0xe30] sm:$0xf0]  ;;  %v7760_v1 = vld [vmem:[%s11642_s2 + $0xfc4] sm:$0xf]  ;;  %v3390_v20 = vpop.f32.mrf.mxu2  ;;  %v5218_v44 = vld [vmem:[%s11642_s2 + $0x2c8] sm:$0xf] }
  0xf5   :  { %v7640_v6 = vld [vmem:[%s11642_s2 + $0xc04] sm:$0xf]  ;;  %v6671_v9 = vor.u32 %v7708_v62, %v6668_v63  ;;  %v6524_v10 = vld [vmem:[%s11642_s2 + $0xd10] sm:$0xf0]  ;;  %v7347_v45 = vld [vmem:[%s11642_s2 + $0x2d4] sm:$0xf0] }
  0xf6   :  { %3642 = vmatpush.bf16.msrb.mxu2 %v6719_v12  ;;  %v7672_v8 = vld [vmem:[%s11642_s2 + $0xd04] sm:$0xf]  ;;  %v6652_v12 = vld [vmem:[%s11642_s2 + $0xe10] sm:$0xf0]  ;;  %v6399_v26 = vor.u32 %v7640_v6, %v6396_v7  ;;  %v4946_v51 = vld [vmem:[%s11642_s2 + $0xa8] sm:$0xf] }
  0xf7   :  { %3617 = vmatpush.bf16.msrb.mxu0 %v6447_v28  ;;  %v7704_v11 = vld [vmem:[%s11642_s2 + $0xe04] sm:$0xf]  ;;  %v6527_v27 = vor.u32 %v7672_v8, %v6524_v10  ;;  %v6844_v47 = vld [vmem:[%s11642_s2 + $0xf90] sm:$0xf0]  ;;  %v7279_v53 = vld [vmem:[%s11642_s2 + $0xb4] sm:$0xf0] }
  0xf8   :  { %3605 = vmatpush.bf16.msra.mxu3 %v6303_v13  ;;  %3630 = vmatpush.bf16.msrb.mxu1 %v6575_v31  ;;  %v6879_v13 = vor.u32 %v7760_v1, %v6876_v2  ;;  %v7756_v28 = vld [vmem:[%s11642_s2 + $0xfa4] sm:$0xf]  ;;  %v6860_v31 = vld [vmem:[%s11642_s2 + $0xfb0] sm:$0xf0]  ;;  %v6655_v30 = vor.u32 %v7704_v11, %v6652_v12  ;;  %v7311_v58 = vld [vmem:[%s11642_s2 + $0x1b4] sm:$0xf0]  ;;  %v4947_v1 = vor.u32 %v7279_v53, %v4946_v51 }
  0xf9   :  { %v6863_v42 = vor.u32 %v7756_v28, %v6860_v31  ;;  %v7752_v46 = vld [vmem:[%s11642_s2 + $0xf84] sm:$0xf]  ;;  %v5202_v59 = vld [vmem:[%s11642_s2 + $0x2a8] sm:$0xf]  ;;  %v7343_v60 = vld [vmem:[%s11642_s2 + $0x2b4] sm:$0xf0] }
  0xfa   :  { %3643 = vmatpush.bf16.msrb.mxu2 %v6703_v33  ;;  %v5107_v33 = vor.u32 %v7319_v23, %v5106_v19  ;;  %v6847_v57 = vor.u32 %v7752_v46, %v6844_v47  ;;  %v7864_v62 = vld [vmem:[#allocation1 + $0x2d] sm:$0xff]  ;;  %v7748_v63 = vld [vmem:[%s11642_s2 + $0xf64] sm:$0xf]  ;;  %v7275_v6 = vld [vmem:[%s11642_s2 + $0x94] sm:$0xf0] }
  0xfb   :  { %3618 = vmatpush.bf16.msrb.mxu0 %v6431_v49  ;;  %v5091_v49 = vor.u32 %v7315_v43, %v5090_v40  ;;  %v6828_v0 = vld [vmem:[%s11642_s2 + $0xf70] sm:$0xf0]  ;;  %v5058_v7 = vld [vmem:[%s11642_s2 + $0x188] sm:$0xf]  ;;  %v7339_v11 = vld [vmem:[%s11642_s2 + $0x294] sm:$0xf0] }
  0xfc   :  { %3606 = vmatpush.bf16.msra.mxu3 %v6287_v36  ;;  %3631 = vmatpush.bf16.msrb.mxu1 %v6559_v50  ;;  %v5235_v36 = vor.u32 %v7351_v25, %v5234_v24  ;;  %v5219_v50 = vor.u32 %v7347_v45, %v5218_v44  ;;  %v6831_v8 = vor.u32 %v7748_v63, %v6828_v0  ;;  %v5186_v10 = vld [vmem:[%s11642_s2 + $0x288] sm:$0xf]  ;;  %v7744_v12 = vld [vmem:[%s11642_s2 + $0xf44] sm:$0xf]  ;;  %v7271_v25 = vld [vmem:[%s11642_s2 + $0x74] sm:$0xf0] }
  0xfd   :  { %v5187_v19 = vor.u32 %v7339_v11, %v5186_v10  ;;  %v4914_v24 = vld [vmem:[%s11642_s2 + $0x68] sm:$0xf]  ;;  %v7303_v31 = vld [vmem:[%s11642_s2 + $0x174] sm:$0xf0]  ;;  %v6780_v51 = vld [vmem:[%s11642_s2 + $0xf10] sm:$0xf0] }
  0xfe   :  { %3644 = vmatpush.bf16.msrb.mxu2 %v6687_v55  ;;  %v5074_v55 = vld [vmem:[%s11642_s2 + $0x1a8] sm:$0xf]  ;;  %v4915_v52 = vor.u32 %v7271_v25, %v4914_v24  ;;  %v7299_v46 = vld [vmem:[%s11642_s2 + $0x154] sm:$0xf0] }
  0xff   :  { %3619 = vmatpush.bf16.msrb.mxu0 %v6415_v3  ;;  %v5075_v2 = vor.u32 %v7311_v58, %v5074_v55  ;;  %v5203_v3 = vor.u32 %v7343_v60, %v5202_v59  ;;  %v4898_v43 = vld [vmem:[%s11642_s2 + $0x48] sm:$0xf]  ;;  %v7379_v11 = vld [vmem:[%s11642_s2 + $0x3d4] sm:$0xf0] }
 0x100   :  { %3607 = vmatpush.bf16.msra.mxu3 %v6271_v56  ;;  %3632 = vmatpush.bf16.msrb.mxu1 %v6543_v5  ;;  %v7862_v56 = vld [vmem:[#allocation1 + $0x24] sm:$0xff]  ;;  %v7323_v24 = vld [vmem:[%s11642_s2 + $0x214] sm:$0xf0] }
 0x101   :  { %v4930_v5 = vld [vmem:[%s11642_s2 + $0x88] sm:$0xf] }
 0x102   :  { %3645 = vmatpush.bf16.msrb.mxu2 %v6671_v9  ;;  %v7307_v9 = vld [vmem:[%s11642_s2 + $0x194] sm:$0xf0]  ;;  %v4931_v17 = vor.u32 %v7275_v6, %v4930_v5  ;;  %v5026_v44 = vld [vmem:[%s11642_s2 + $0x148] sm:$0xf] }
 0x103   :  { %3608 = vmatmul.bf16.vlgmr.msra.gmra.mxu3 %v7861_v29  ;;  %3620 = vmatpush.bf16.msrb.mxu0 %v6399_v26  ;;  %v5059_v18 = vor.u32 %v7307_v9, %v5058_v7  ;;  %v3414_v20 = vpop.f32.mrf.mxu0  ;;  %v5042_v26 = vld [vmem:[%s11642_s2 + $0x168] sm:$0xf]  ;;  %v5027_v59 = vor.u32 %v7299_v46, %v5026_v44  ;;  %v7327_v6 = vld [vmem:[%s11642_s2 + $0x234] sm:$0xf0] }
 0x104   :  { %3652 = vmatpush.bf16.msrb.mxu3 %v6895_v61  ;;  %3633 = vmatpush.bf16.msrb.mxu1 %v6527_v27  ;;  %v7863_v61 = vld [vmem:[#allocation1 + $0x36] sm:$0xff]  ;;  %v3427_v23 = vpop.f32.mrf.mxu1  ;;  %v5170_v29 = vld [vmem:[%s11642_s2 + $0x268] sm:$0xf]  ;;  %v5043_v40 = vor.u32 %v7303_v31, %v5042_v26 }
 0x105   :  { %v5154_v47 = vld [vmem:[%s11642_s2 + $0x248] sm:$0xf]  ;;  %v7447_v31 = vld [vmem:[%s11642_s2 + $0x5f4] sm:$0xf0] }
 0x106   :  { %3646 = vmatpush.bf16.msrb.mxu2 %v6655_v30  ;;  %3621 = vmatmul.bf16.vlgmr.msrb.gmra.mxu0 %v7862_v56  ;;  %v3401_v27 = vpop.f32.mrf.mxu3  ;;  %v7335_v30 = vld [vmem:[%s11642_s2 + $0x274] sm:$0xf0]  ;;  %v5362_v56 = vld [vmem:[%s11642_s2 + $0x3e8] sm:$0xf] }
 0x107   :  { %3665 = vmatpush.bf16.msra.mxu0 %v4979_v32  ;;  %3634 = vmatmul.bf16.vlgmr.msrb.gmra.mxu1 %v7864_v62  ;;  %v3402_v32 = vadd.f32 %v3401_v27, %v9473_v54  ;;  %v7267_v54 = vld [vmem:[%s11642_s2 + $0x54] sm:$0xf0]  ;;  %v5010_v63 = vld [vmem:[%s11642_s2 + $0x128] sm:$0xf] }
 0x108   :  { %3653 = vmatpush.bf16.msrb.mxu3 %v6879_v13  ;;  %3678 = vmatpush.bf16.msra.mxu1 %v5107_v33  ;;  %v6812_v13 = vld [vmem:[%s11642_s2 + $0xf50] sm:$0xf0]  ;;  %v7740_v33 = vld [vmem:[%s11642_s2 + $0xf24] sm:$0xf]  ;;  %v4899_v55 = vor.u32 %v7267_v54, %v4898_v43  ;;  %v7263_v62 = vld [vmem:[%s11642_s2 + $0x34] sm:$0xf0] }
 0x109   :  { %3647 = vmatmul.bf16.vlgmr.msrb.gmra.mxu2 %v7863_v61  ;;  %v6815_v28 = vor.u32 %v7744_v12, %v6812_v13  ;;  %v3415_v37 = vadd.f32 %v3414_v20, %v3402_v32  ;;  %v4882_v61 = vld [vmem:[%s11642_s2 + $0x28] sm:$0xf]  ;;  %v7291_v20 = vld [vmem:[%s11642_s2 + $0x114] sm:$0xf0] }
 0x10a   :  { %3691 = vmatpush.bf16.msra.mxu2 %v5235_v36  ;;  %v6796_v36 = vld [vmem:[%s11642_s2 + $0xf30] sm:$0xf0]  ;;  %v5138_v5 = vld [vmem:[%s11642_s2 + $0x228] sm:$0xf]  ;;  %v4883_v9 = vor.u32 %v7263_v62, %v4882_v61  ;;  %v7415_v27 = vld [vmem:[%s11642_s2 + $0x4f4] sm:$0xf0] }
 0x10b   :  { %3666 = vmatpush.bf16.msra.mxu0 %v4963_v48  ;;  %v6799_v45 = vor.u32 %v7740_v33, %v6796_v36  ;;  %v7331_v48 = vld [vmem:[%s11642_s2 + $0x254] sm:$0xf0]  ;;  %v3416_v0 = vpop.f32.mrf.mxu0  ;;  %v5346_v10 = vld [vmem:[%s11642_s2 + $0x3c8] sm:$0xf] }
 0x10c   :  { %3654 = vmatpush.bf16.msrb.mxu3 %v6863_v42  ;;  %3679 = vmatpush.bf16.msra.mxu1 %v5091_v49  ;;  %v5171_v42 = vor.u32 %v7335_v30, %v5170_v29  ;;  %v3428_v49 = vadd.f32 %v3427_v23, %v3415_v37  ;;  %v3440_v53 = vpop.f32.mrf.mxu2  ;;  %v5155_v60 = vor.u32 %v7331_v48, %v5154_v47  ;;  %v4866_v12 = vld [vmem:[%s11642_s2 + $0x8] sm:$0xf]  ;;  %v7479_v32 = vld [vmem:[%s11642_s2 + $0x6f4] sm:$0xf0] }
 0x10d   :  { %v5122_v23 = vld [vmem:[%s11642_s2 + $0x208] sm:$0xf]  ;;  %v5347_v26 = vor.u32 %v7379_v11, %v5346_v10  ;;  %v7411_v46 = vld [vmem:[%s11642_s2 + $0x4d4] sm:$0xf0] }
 0x10e   :  { %3692 = vmatpush.bf16.msra.mxu2 %v5219_v50  ;;  %v7736_v50 = vld [vmem:[%s11642_s2 + $0xf04] sm:$0xf]  ;;  %v9665_v58 = vadd.f32 %v3440_v53, %v3428_v49  ;;  %v3403_v7 = vpop.f32.mrf.mxu3  ;;  %v5490_v25 = vld [vmem:[%s11642_s2 + $0x4e8] sm:$0xf]  ;;  %v7443_v48 = vld [vmem:[%s11642_s2 + $0x5d4] sm:$0xf0] }
 0x10f   :  { %3667 = vmatpush.bf16.msra.mxu0 %v4947_v1  ;;  %v3429_v1 = vpop.f32.mrf.mxu1  ;;  %v5746_v30 = vld [vmem:[%s11642_s2 + $0x6e8] sm:$0xf]  ;;  %v5491_v43 = vor.u32 %v7415_v27, %v5490_v25  ;;  %v7407_v61 = vld [vmem:[%s11642_s2 + $0x4b4] sm:$0xf0] }
 0x110   :  { %3655 = vmatpush.bf16.msrb.mxu3 %v6847_v57  ;;  %3680 = vmatpush.bf16.msra.mxu1 %v5075_v2  ;;  %v7383_v57 = vld [vmem:[%s11642_s2 + $0x3f4] sm:$0xf0]  ;;  %v6783_v2 = vor.u32 %v7736_v50, %v6780_v51  ;;  %v5330_v37 = vld [vmem:[%s11642_s2 + $0x3a8] sm:$0xf] }
 0x111   :  { %v5474_v44 = vld [vmem:[%s11642_s2 + $0x4c8] sm:$0xf]  ;;  %v7475_v51 = vld [vmem:[%s11642_s2 + $0x6d4] sm:$0xf0] }
 0x112   :  { %3693 = vmatpush.bf16.msra.mxu2 %v5203_v3  ;;  %v7295_v3 = vld [vmem:[%s11642_s2 + $0x134] sm:$0xf0]  ;;  %v5602_v47 = vld [vmem:[%s11642_s2 + $0x5c8] sm:$0xf] }
 0x113   :  { %3668 = vmatpush.bf16.msra.mxu0 %v4931_v17  ;;  %v5011_v13 = vor.u32 %v7295_v3, %v5010_v63  ;;  %v5139_v17 = vor.u32 %v7327_v6, %v5138_v5  ;;  %v5730_v50 = vld [vmem:[%s11642_s2 + $0x6c8] sm:$0xf]  ;;  %v7439_v63 = vld [vmem:[%s11642_s2 + $0x5b4] sm:$0xf0] }
 0x114   :  { %3656 = vmatpush.bf16.msrb.mxu3 %v6831_v8  ;;  %3681 = vmatpush.bf16.msra.mxu1 %v5059_v18  ;;  %v5363_v8 = vor.u32 %v7383_v57, %v5362_v56  ;;  %v7259_v18 = vld [vmem:[%s11642_s2 + $0x14] sm:$0xf0]  ;;  %v3442_v33 = vpop.f32.mrf.mxu2  ;;  %v5314_v53 = vld [vmem:[%s11642_s2 + $0x388] sm:$0xf]  ;;  %v5475_v56 = vor.u32 %v7411_v46, %v5474_v44  ;;  %v5603_v57 = vor.u32 %v7443_v48, %v5602_v47 }
 0x115   :  { %v4867_v29 = vor.u32 %v7259_v18, %v4866_v12  ;;  %v5586_v62 = vld [vmem:[%s11642_s2 + $0x5a8] sm:$0xf]  ;;  %v7367_v5 = vld [vmem:[%s11642_s2 + $0x374] sm:$0xf0] }
 0x116   :  { %3694 = vmatpush.bf16.msra.mxu2 %v5187_v19  ;;  %v4994_v19 = vld [vmem:[%s11642_s2 + $0x108] sm:$0xf]  ;;  %v5587_v7 = vor.u32 %v7439_v63, %v5586_v62  ;;  %v7403_v10 = vld [vmem:[%s11642_s2 + $0x494] sm:$0xf0] }
 0x117   :  { %3669 = vmatpush.bf16.msra.mxu0 %v4915_v52  ;;  %v4995_v36 = vor.u32 %v7291_v20, %v4994_v19  ;;  %v5123_v52 = vor.u32 %v7323_v24, %v5122_v23  ;;  %v5714_v1 = vld [vmem:[%s11642_s2 + $0x6a8] sm:$0xf]  ;;  %v7435_v12 = vld [vmem:[%s11642_s2 + $0x594] sm:$0xf0] }
 0x118   :  { %3657 = vmatpush.bf16.msrb.mxu3 %v6815_v28  ;;  %3682 = vmatpush.bf16.msra.mxu1 %v5043_v40  ;;  %v5618_v28 = vld [vmem:[%s11642_s2 + $0x5e8] sm:$0xf]  ;;  %v7375_v40 = vld [vmem:[%s11642_s2 + $0x3b4] sm:$0xf0] }
 0x119   :  { %v5619_v54 = vor.u32 %v7447_v31, %v5618_v28  ;;  %v5331_v49 = vor.u32 %v7375_v40, %v5330_v37  ;;  %v5298_v3 = vld [vmem:[%s11642_s2 + $0x368] sm:$0xf]  ;;  %v7467_v18 = vld [vmem:[%s11642_s2 + $0x694] sm:$0xf0] }
 0x11a   :  { %3695 = vmatpush.bf16.msra.mxu2 %v5171_v42  ;;  %v7865_v42 = vld [vmem:[#allocation1 + $0x3f] sm:$0xff]  ;;  %v5570_v11 = vld [vmem:[%s11642_s2 + $0x588] sm:$0xf]  ;;  %v7363_v20 = vld [vmem:[%s11642_s2 + $0x354] sm:$0xf0] }
 0x11b   :  { %3670 = vmatpush.bf16.msra.mxu0 %v4899_v55  ;;  %v7371_v55 = vld [vmem:[%s11642_s2 + $0x394] sm:$0xf0]  ;;  %v5282_v19 = vld [vmem:[%s11642_s2 + $0x348] sm:$0xf]  ;;  %v5571_v25 = vor.u32 %v7435_v12, %v5570_v11 }
 0x11c   :  { %3658 = vmatpush.bf16.msrb.mxu3 %v6799_v45  ;;  %3683 = vmatpush.bf16.msra.mxu1 %v5027_v59  ;;  %v5747_v45 = vor.u32 %v7479_v32, %v5746_v30  ;;  %v5458_v59 = vld [vmem:[%s11642_s2 + $0x4a8] sm:$0xf]  ;;  %v5315_v0 = vor.u32 %v7371_v55, %v5314_v53  ;;  %v7431_v32 = vld [vmem:[%s11642_s2 + $0x574] sm:$0xf0] }
 0x11d   :  { %v5459_v6 = vor.u32 %v7407_v61, %v5458_v59  ;;  %v5554_v30 = vld [vmem:[%s11642_s2 + $0x568] sm:$0xf]  ;;  %v7463_v37 = vld [vmem:[%s11642_s2 + $0x674] sm:$0xf0] }
 0x11e   :  { %3696 = vmatpush.bf16.msra.mxu2 %v5155_v60  ;;  %v5731_v60 = vor.u32 %v7475_v51, %v5730_v50  ;;  %v5410_v44 = vld [vmem:[%s11642_s2 + $0x448] sm:$0xf]  ;;  %v7395_v46 = vld [vmem:[%s11642_s2 + $0x454] sm:$0xf0] }
 0x11f   :  { %3671 = vmatpush.bf16.msra.mxu0 %v4883_v9  ;;  %v5538_v47 = vld [vmem:[%s11642_s2 + $0x548] sm:$0xf]  ;;  %v7427_v48 = vld [vmem:[%s11642_s2 + $0x554] sm:$0xf0]  ;;  %v5411_v59 = vor.u32 %v7395_v46, %v5410_v44 }
 0x120   :  { %3659 = vmatpush.bf16.msrb.mxu3 %v6783_v2  ;;  %3684 = vmatpush.bf16.msra.mxu1 %v5011_v13  ;;  %v7471_v2 = vld [vmem:[%s11642_s2 + $0x6b4] sm:$0xf0]  ;;  %v5299_v13 = vor.u32 %v7367_v5, %v5298_v3  ;;  %v5666_v50 = vld [vmem:[%s11642_s2 + $0x648] sm:$0xf] }
 0x121   :  { %v5715_v9 = vor.u32 %v7471_v2, %v5714_v1  ;;  %v7459_v51 = vld [vmem:[%s11642_s2 + $0x654] sm:$0xf0]  ;;  %v5250_v55 = vld [vmem:[%s11642_s2 + $0x308] sm:$0xf] }
 0x122   :  { %3697 = vmatpush.bf16.msra.mxu2 %v5139_v17  ;;  %v5698_v17 = vld [vmem:[%s11642_s2 + $0x688] sm:$0xf]  ;;  %v7511_v62 = vld [vmem:[%s11642_s2 + $0x7f4] sm:$0xf0]  ;;  %v5667_v1 = vor.u32 %v7459_v51, %v5666_v50 }
 0x123   :  { %3660 = vmatmul.bf16.vlgmr.msrb.gmra.mxu3 %v7865_v42  ;;  %3672 = vmatpush.bf16.msra.mxu0 %v4867_v29  ;;  %v3466_v23 = vpop.f32.mrf.mxu0  ;;  %v5699_v31 = vor.u32 %v7467_v18, %v5698_v17  ;;  %v7399_v29 = vld [vmem:[%s11642_s2 + $0x474] sm:$0xf0]  ;;  %v5266_v42 = vld [vmem:[%s11642_s2 + $0x328] sm:$0xf] }
 0x124   :  { %3704 = vmatpush.bf16.msra.mxu3 %v5363_v8  ;;  %3685 = vmatpush.bf16.msra.mxu1 %v4995_v36  ;;  %v5442_v8 = vld [vmem:[%s11642_s2 + $0x488] sm:$0xf]  ;;  %v3467_v28 = vadd.f32 %v3466_v23, %v9039_v21  ;;  %v3479_v36 = vpop.f32.mrf.mxu1  ;;  %v7391_v2 = vld [vmem:[%s11642_s2 + $0x434] sm:$0xf0] }
 0x125   :  { %v5443_v24 = vor.u32 %v7403_v10, %v5442_v8  ;;  %v5682_v21 = vld [vmem:[%s11642_s2 + $0x668] sm:$0xf]  ;;  %v7423_v5 = vld [vmem:[%s11642_s2 + $0x534] sm:$0xf0] }
 0x126   :  { %3698 = vmatpush.bf16.msra.mxu2 %v5123_v52  ;;  %3673 = vmatmul.bf16.vlgmr.msra.gmra.mxu0 %v8149_v35  ;;  %v3453_v27 = vpop.f32.mrf.mxu3  ;;  %v5283_v52 = vor.u32 %v7363_v20, %v5282_v19  ;;  %v3480_v40 = vadd.f32 %v3479_v36, %v3467_v28  ;;  %v5874_v61 = vld [vmem:[%s11642_s2 + $0x7e8] sm:$0xf]  ;;  %v7387_v20 = vld [vmem:[%s11642_s2 + $0x414] sm:$0xf0] }
 0x127   :  { %3717 = vmatpush.bf16.msrb.mxu0 %v5491_v43  ;;  %3686 = vmatmul.bf16.vlgmr.msra.gmra.mxu1 %v8165_v41  ;;  %v9822_v33 = vadd.f32 %v3453_v27, %v9665_v58  ;;  %v7359_v58 = vld [vmem:[%s11642_s2 + $0x334] sm:$0xf0]  ;;  %v5394_v63 = vld [vmem:[%s11642_s2 + $0x428] sm:$0xf]  ;;  %v5875_v11 = vor.u32 %v7511_v62, %v5874_v61 }
 0x128   :  { %3705 = vmatpush.bf16.msra.mxu3 %v5347_v26  ;;  %3730 = vmatpush.bf16.msrb.mxu1 %v5619_v54  ;;  %v5426_v26 = vld [vmem:[%s11642_s2 + $0x468] sm:$0xf]  ;;  %v5555_v54 = vor.u32 %v7431_v32, %v5554_v30  ;;  %v5395_v17 = vor.u32 %v7391_v2, %v5394_v63  ;;  %v7451_v27 = vld [vmem:[%s11642_s2 + $0x614] sm:$0xf0] }
 0x129   :  { %3699 = vmatmul.bf16.vlgmr.msra.gmra.mxu2 %v8157_v38  ;;  %v5427_v43 = vor.u32 %v7399_v29, %v5426_v26  ;;  %v5522_v3 = vld [vmem:[%s11642_s2 + $0x528] sm:$0xf]  ;;  %v7575_v32 = vld [vmem:[%s11642_s2 + $0x9f4] sm:$0xf0] }
 0x12a   :  { %3743 = vmatpush.bf16.msrb.mxu2 %v5747_v45  ;;  %v5683_v45 = vor.u32 %v7463_v37, %v5682_v21  ;;  %v5650_v8 = vld [vmem:[%s11642_s2 + $0x628] sm:$0xf]  ;;  %v5523_v18 = vor.u32 %v7423_v5, %v5522_v3  ;;  %v7571_v50 = vld [vmem:[%s11642_s2 + $0x9d4] sm:$0xf0] }
 0x12b   :  { %3718 = vmatpush.bf16.msrb.mxu0 %v5475_v56  ;;  %v7355_v56 = vld [vmem:[%s11642_s2 + $0x314] sm:$0xf0]  ;;  %v5858_v12 = vld [vmem:[%s11642_s2 + $0x7c8] sm:$0xf] }
 0x12c   :  { %3706 = vmatpush.bf16.msra.mxu3 %v5331_v49  ;;  %3731 = vmatpush.bf16.msrb.mxu1 %v5603_v57  ;;  %v5267_v49 = vor.u32 %v7359_v58, %v5266_v42  ;;  %v3492_v53 = vpop.f32.mrf.mxu2  ;;  %v3481_v10 = vpop.f32.mrf.mxu1  ;;  %v5378_v19 = vld [vmem:[%s11642_s2 + $0x408] sm:$0xf]  ;;  %v7503_v58 = vld [vmem:[%s11642_s2 + $0x7b4] sm:$0xf0] }
 0x12d   :  { %v9860_v57 = vadd.f32 %v3492_v53, %v3480_v40  ;;  %v5506_v23 = vld [vmem:[%s11642_s2 + $0x508] sm:$0xf]  ;;  %v5379_v37 = vor.u32 %v7387_v20, %v5378_v19  ;;  %v7603_v53 = vld [vmem:[%s11642_s2 + $0xad4] sm:$0xf0] }
 0x12e   :  { %3744 = vmatpush.bf16.msrb.mxu2 %v5731_v60  ;;  %v5539_v60 = vor.u32 %v7427_v48, %v5538_v47  ;;  %v5634_v26 = vld [vmem:[%s11642_s2 + $0x608] sm:$0xf]  ;;  %v7539_v47 = vld [vmem:[%s11642_s2 + $0x8d4] sm:$0xf0] }
 0x12f   :  { %3719 = vmatpush.bf16.msrb.mxu0 %v5459_v6  ;;  %v3455_v6 = vpop.f32.mrf.mxu3  ;;  %v6002_v28 = vld [vmem:[%s11642_s2 + $0x8e8] sm:$0xf]  ;;  %v7535_v63 = vld [vmem:[%s11642_s2 + $0x8b4] sm:$0xf0] }
 0x130   :  { %3707 = vmatpush.bf16.msra.mxu3 %v5315_v0  ;;  %3732 = vmatpush.bf16.msrb.mxu1 %v5587_v7  ;;  %v3468_v0 = vpop.f32.mrf.mxu0  ;;  %v5251_v7 = vor.u32 %v7355_v56, %v5250_v55  ;;  %v6130_v29 = vld [vmem:[%s11642_s2 + $0x9e8] sm:$0xf]  ;;  %v7499_v56 = vld [vmem:[%s11642_s2 + $0x794] sm:$0xf0] }
 0x131   :  { %v6258_v36 = vld [vmem:[%s11642_s2 + $0xae8] sm:$0xf]  ;;  %v6131_v44 = vor.u32 %v7575_v32, %v6130_v29  ;;  %v7567_v2 = vld [vmem:[%s11642_s2 + $0x9b4] sm:$0xf0] }
 0x132   :  { %3745 = vmatpush.bf16.msrb.mxu2 %v5715_v9  ;;  %v7455_v9 = vld [vmem:[%s11642_s2 + $0x634] sm:$0xf0]  ;;  %v5842_v42 = vld [vmem:[%s11642_s2 + $0x7a8] sm:$0xf] }
 0x133   :  { %3720 = vmatpush.bf16.msrb.mxu0 %v5443_v24  ;;  %v5651_v24 = vor.u32 %v7455_v9, %v5650_v8  ;;  %v5986_v46 = vld [vmem:[%s11642_s2 + $0x8c8] sm:$0xf]  ;;  %v7599_v5 = vld [vmem:[%s11642_s2 + $0xab4] sm:$0xf0] }
 0x134   :  { %3708 = vmatpush.bf16.msra.mxu3 %v5299_v13  ;;  %3733 = vmatpush.bf16.msrb.mxu1 %v5571_v25  ;;  %v7507_v13 = vld [vmem:[%s11642_s2 + $0x7d4] sm:$0xf0]  ;;  %v3494_v21 = vpop.f32.mrf.mxu2  ;;  %v6114_v48 = vld [vmem:[%s11642_s2 + $0x9c8] sm:$0xf] }
 0x135   :  { %v7419_v25 = vld [vmem:[%s11642_s2 + $0x514] sm:$0xf0]  ;;  %v5859_v30 = vor.u32 %v7507_v13, %v5858_v12  ;;  %v6242_v51 = vld [vmem:[%s11642_s2 + $0xac8] sm:$0xf] }
 0x136   :  { %3746 = vmatpush.bf16.msrb.mxu2 %v5699_v31  ;;  %v7543_v31 = vld [vmem:[%s11642_s2 + $0x8f4] sm:$0xf0]  ;;  %v5507_v40 = vor.u32 %v7419_v25, %v5506_v23  ;;  %v5826_v55 = vld [vmem:[%s11642_s2 + $0x788] sm:$0xf]  ;;  %v6243_v61 = vor.u32 %v7603_v53, %v6242_v51 }
 0x137   :  { %3721 = vmatpush.bf16.msrb.mxu0 %v5427_v43  ;;  %v5635_v43 = vor.u32 %v7451_v27, %v5634_v26  ;;  %v5970_v62 = vld [vmem:[%s11642_s2 + $0x8a8] sm:$0xf]  ;;  %v7531_v12 = vld [vmem:[%s11642_s2 + $0x894] sm:$0xf0] }
 0x138   :  { %3709 = vmatpush.bf16.msra.mxu3 %v5283_v52  ;;  %3734 = vmatpush.bf16.msrb.mxu1 %v5555_v54  ;;  %v7607_v52 = vld [vmem:[%s11642_s2 + $0xaf4] sm:$0xf0]  ;;  %v6003_v54 = vor.u32 %v7543_v31, %v6002_v28  ;;  %v6098_v0 = vld [vmem:[%s11642_s2 + $0x9a8] sm:$0xf]  ;;  %v5971_v8 = vor.u32 %v7535_v63, %v5970_v62 }
 0x139   :  { %v6226_v3 = vld [vmem:[%s11642_s2 + $0xaa8] sm:$0xf]  ;;  %v6099_v9 = vor.u32 %v7567_v2, %v6098_v0  ;;  %v7595_v20 = vld [vmem:[%s11642_s2 + $0xa94] sm:$0xf0] }
 0x13a   :  { %3747 = vmatpush.bf16.msrb.mxu2 %v5683_v45  ;;  %v6259_v45 = vor.u32 %v7607_v52, %v6258_v36  ;;  %v5810_v6 = vld [vmem:[%s11642_s2 + $0x768] sm:$0xf]  ;;  %v6227_v10 = vor.u32 %v7599_v5, %v6226_v3  ;;  %v7555_v51 = vld [vmem:[%s11642_s2 + $0x954] sm:$0xf0] }
 0x13b   :  { %3722 = vmatpush.bf16.msrb.mxu0 %v5411_v59  ;;  %v5987_v59 = vor.u32 %v7539_v47, %v5986_v46  ;;  %v6082_v13 = vld [vmem:[%s11642_s2 + $0x988] sm:$0xf]  ;;  %v7523_v47 = vld [vmem:[%s11642_s2 + $0x854] sm:$0xf0] }
 0x13c   :  { %3710 = vmatpush.bf16.msra.mxu3 %v5267_v49  ;;  %3735 = vmatpush.bf16.msrb.mxu1 %v5539_v60  ;;  %v5843_v49 = vor.u32 %v7503_v58, %v5842_v42  ;;  %v6115_v60 = vor.u32 %v7571_v50, %v6114_v48  ;;  %v6210_v19 = vld [vmem:[%s11642_s2 + $0xa88] sm:$0xf]  ;;  %v7591_v42 = vld [vmem:[%s11642_s2 + $0xa74] sm:$0xf0] }
 0x13d   :  { %v5794_v23 = vld [vmem:[%s11642_s2 + $0x748] sm:$0xf]  ;;  %v6211_v28 = vor.u32 %v7595_v20, %v6210_v19  ;;  %v7639_v63 = vld [vmem:[%s11642_s2 + $0xbf4] sm:$0xf0] }
 0x13e   :  { %3748 = vmatpush.bf16.msrb.mxu2 %v5667_v1  ;;  %v5827_v1 = vor.u32 %v7499_v56, %v5826_v55  ;;  %v5938_v29 = vld [vmem:[%s11642_s2 + $0x868] sm:$0xf]  ;;  %v7587_v55 = vld [vmem:[%s11642_s2 + $0xa54] sm:$0xf0] }
 0x13f   :  { %3723 = vmatpush.bf16.msrb.mxu0 %v5395_v17  ;;  %v6066_v32 = vld [vmem:[%s11642_s2 + $0x968] sm:$0xf]  ;;  %v7519_v5 = vld [vmem:[%s11642_s2 + $0x834] sm:$0xf0] }
 0x140   :  { %3711 = vmatpush.bf16.msra.mxu3 %v5251_v7  ;;  %3736 = vmatpush.bf16.msrb.mxu1 %v5523_v18  ;;  %v7495_v7 = vld [vmem:[%s11642_s2 + $0x774] sm:$0xf0]  ;;  %v5778_v58 = vld [vmem:[%s11642_s2 + $0x728] sm:$0xf] }
 0x141   :  { %v5811_v17 = vor.u32 %v7495_v7, %v5810_v6  ;;  %v7563_v18 = vld [vmem:[%s11642_s2 + $0x994] sm:$0xf0]  ;;  %v5922_v46 = vld [vmem:[%s11642_s2 + $0x848] sm:$0xf] }
 0x142   :  { %3749 = vmatpush.bf16.msrb.mxu2 %v5651_v24  ;;  %v7491_v24 = vld [vmem:[%s11642_s2 + $0x754] sm:$0xf0]  ;;  %v6083_v27 = vor.u32 %v7563_v18, %v6082_v13  ;;  %v6050_v48 = vld [vmem:[%s11642_s2 + $0x948] sm:$0xf] }
 0x143   :  { %3712 = vmatmul.bf16.vlgmr.msra.gmra.mxu3 %v8343_v34  ;;  %3724 = vmatpush.bf16.msrb.mxu0 %v5379_v37  ;;  %v3518_v31 = vpop.f32.mrf.mxu0  ;;  %v5795_v52 = vor.u32 %v7491_v24, %v5794_v23  ;;  %v7559_v37 = vld [vmem:[%s11642_s2 + $0x974] sm:$0xf0]  ;;  %v6178_v53 = vld [vmem:[%s11642_s2 + $0xa48] sm:$0xf] }
 0x144   :  { %3756 = vmatpush.bf16.msrb.mxu3 %v5875_v11  ;;  %3737 = vmatpush.bf16.msrb.mxu1 %v5507_v40  ;;  %v5954_v11 = vld [vmem:[%s11642_s2 + $0x888] sm:$0xf]  ;;  %v3531_v21 = vpop.f32.mrf.mxu1  ;;  %v6179_v2 = vor.u32 %v7587_v55, %v6178_v53  ;;  %v7635_v20 = vld [vmem:[%s11642_s2 + $0xbd4] sm:$0xf0] }
 0x145   :  { %v5955_v25 = vor.u32 %v7531_v12, %v5954_v11  ;;  %v6194_v40 = vld [vmem:[%s11642_s2 + $0xa68] sm:$0xf]  ;;  %v7583_v12 = vld [vmem:[%s11642_s2 + $0xa34] sm:$0xf0] }
 0x146   :  { %3750 = vmatpush.bf16.msrb.mxu2 %v5635_v43  ;;  %3725 = vmatmul.bf16.vlgmr.msrb.gmra.mxu0 %v8372_v15  ;;  %v3505_v26 = vpop.f32.mrf.mxu3  ;;  %v5762_v56 = vld [vmem:[%s11642_s2 + $0x708] sm:$0xf]  ;;  %v7515_v24 = vld [vmem:[%s11642_s2 + $0x814] sm:$0xf0] }
 0x147   :  { %3769 = vmatpush.bf16.msra.mxu0 %v6003_v54  ;;  %3738 = vmatmul.bf16.vlgmr.msrb.gmra.mxu1 %v8374_v16  ;;  %v3506_v36 = vadd.f32 %v3505_v26, %v9860_v57  ;;  %v7487_v57 = vld [vmem:[%s11642_s2 + $0x734] sm:$0xf0]  ;;  %v6386_v62 = vld [vmem:[%s11642_s2 + $0xbe8] sm:$0xf] }
 0x148   :  { %3757 = vmatpush.bf16.msrb.mxu3 %v5859_v30  ;;  %3782 = vmatpush.bf16.msra.mxu1 %v6131_v44  ;;  %v7527_v30 = vld [vmem:[%s11642_s2 + $0x874] sm:$0xf0]  ;;  %v6067_v44 = vor.u32 %v7559_v37, %v6066_v32  ;;  %v5779_v50 = vor.u32 %v7487_v57, %v5778_v58  ;;  %v5906_v3 = vld [vmem:[%s11642_s2 + $0x828] sm:$0xf] }
 0x149   :  { %3751 = vmatmul.bf16.vlgmr.msrb.gmra.mxu2 %v8370_v14  ;;  %v3519_v43 = vadd.f32 %v3518_v31, %v3506_v36  ;;  %v5939_v54 = vor.u32 %v7527_v30, %v5938_v29  ;;  %v6034_v6 = vld [vmem:[%s11642_s2 + $0x928] sm:$0xf]  ;;  %v5907_v19 = vor.u32 %v7519_v5, %v5906_v3  ;;  %v7579_v29 = vld [vmem:[%s11642_s2 + $0xa14] sm:$0xf0] }
 0x14a   :  { %3795 = vmatpush.bf16.msra.mxu2 %v6259_v45  ;;  %v6195_v45 = vor.u32 %v7591_v42, %v6194_v40  ;;  %v6162_v11 = vld [vmem:[%s11642_s2 + $0xa28] sm:$0xf]  ;;  %v7671_v32 = vld [vmem:[%s11642_s2 + $0xcf4] sm:$0xf0] }
 0x14b   :  { %3770 = vmatpush.bf16.msra.mxu0 %v5987_v59  ;;  %v7483_v59 = vld [vmem:[%s11642_s2 + $0x714] sm:$0xf0]  ;;  %v6370_v18 = vld [vmem:[%s11642_s2 + $0xbc8] sm:$0xf]  ;;  %v6163_v26 = vor.u32 %v7583_v12, %v6162_v11 }
 0x14c   :  { %3758 = vmatpush.bf16.msrb.mxu3 %v5843_v49  ;;  %3783 = vmatpush.bf16.msra.mxu1 %v6115_v60  ;;  %v3532_v49 = vadd.f32 %v3531_v21, %v3519_v43  ;;  %v3544_v60 = vpop.f32.mrf.mxu2  ;;  %v3533_v13 = vpop.f32.mrf.mxu1  ;;  %v5890_v23 = vld [vmem:[%s11642_s2 + $0x808] sm:$0xf]  ;;  %v6371_v36 = vor.u32 %v7635_v20, %v6370_v18  ;;  %v7703_v21 = vld [vmem:[%s11642_s2 + $0xdf4] sm:$0xf0] }
 0x14d   :  { %v6146_v31 = vld [vmem:[%s11642_s2 + $0xa08] sm:$0xf]  ;;  %v5891_v40 = vor.u32 %v7515_v24, %v5890_v23  ;;  %v7735_v42 = vld [vmem:[%s11642_s2 + $0xef4] sm:$0xf0] }
 0x14e   :  { %3796 = vmatpush.bf16.msra.mxu2 %v6243_v61  ;;  %v5923_v61 = vor.u32 %v7523_v47, %v5922_v46  ;;  %v10065_v0 = vadd.f32 %v3544_v60, %v3532_v49  ;;  %v3507_v7 = vpop.f32.mrf.mxu3  ;;  %v6514_v30 = vld [vmem:[%s11642_s2 + $0xce8] sm:$0xf]  ;;  %v7631_v57 = vld [vmem:[%s11642_s2 + $0xbb4] sm:$0xf0] }
 0x14f   :  { %3771 = vmatpush.bf16.msra.mxu0 %v5971_v8  ;;  %v3520_v8 = vpop.f32.mrf.mxu0  ;;  %v6770_v37 = vld [vmem:[%s11642_s2 + $0xee8] sm:$0xf]  ;;  %v7699_v53 = vld [vmem:[%s11642_s2 + $0xdd4] sm:$0xf0] }
 0x150   :  { %3759 = vmatpush.bf16.msrb.mxu3 %v5827_v1  ;;  %3784 = vmatpush.bf16.msra.mxu1 %v6099_v9  ;;  %v6051_v1 = vor.u32 %v7555_v51, %v6050_v48  ;;  %v5763_v9 = vor.u32 %v7483_v59, %v5762_v56  ;;  %v6354_v58 = vld [vmem:[%s11642_s2 + $0xba8] sm:$0xf]  ;;  %v7667_v48 = vld [vmem:[%s11642_s2 + $0xcd4] sm:$0xf0]  ;;  %v6771_v49 = vor.u32 %v7735_v42, %v6770_v37 }
 0x151   :  { %v6498_v47 = vld [vmem:[%s11642_s2 + $0xcc8] sm:$0xf]  ;;  %v7731_v56 = vld [vmem:[%s11642_s2 + $0xed4] sm:$0xf0] }
 0x152   :  { %3797 = vmatpush.bf16.msra.mxu2 %v6227_v10  ;;  %v7551_v10 = vld [vmem:[%s11642_s2 + $0x934] sm:$0xf0]  ;;  %v6626_v51 = vld [vmem:[%s11642_s2 + $0xdc8] sm:$0xf] }
 0x153   :  { %3772 = vmatpush.bf16.msra.mxu0 %v5955_v25  ;;  %v6035_v25 = vor.u32 %v7551_v10, %v6034_v6  ;;  %v6754_v55 = vld [vmem:[%s11642_s2 + $0xec8] sm:$0xf]  ;;  %v7627_v60 = vld [vmem:[%s11642_s2 + $0xb94] sm:$0xf0] }
 0x154   :  { %3760 = vmatpush.bf16.msrb.mxu3 %v5811_v17  ;;  %3785 = vmatpush.bf16.msra.mxu1 %v6083_v27  ;;  %v6387_v17 = vor.u32 %v7639_v63, %v6386_v62  ;;  %v6018_v27 = vld [vmem:[%s11642_s2 + $0x908] sm:$0xf]  ;;  %v3546_v43 = vpop.f32.mrf.mxu2  ;;  %v6627_v62 = vor.u32 %v7699_v53, %v6626_v51  ;;  %v7695_v6 = vld [vmem:[%s11642_s2 + $0xdb4] sm:$0xf0] }
 0x155   :  { %v6338_v59 = vld [vmem:[%s11642_s2 + $0xb88] sm:$0xf]  ;;  %v7866_v8 = vld [vmem:[#allocation1 + $0x12] sm:$0xff] }
 0x156   :  { %3798 = vmatpush.bf16.msra.mxu2 %v6211_v28  ;;  %v7547_v28 = vld [vmem:[%s11642_s2 + $0x914] sm:$0xf0]  ;;  %v6482_v63 = vld [vmem:[%s11642_s2 + $0xca8] sm:$0xf]  ;;  %v6339_v3 = vor.u32 %v7627_v60, %v6338_v59 }
 0x157   :  { %3773 = vmatpush.bf16.msra.mxu0 %v5939_v54  ;;  %v6019_v54 = vor.u32 %v7547_v28, %v6018_v27  ;;  %v6610_v5 = vld [vmem:[%s11642_s2 + $0xda8] sm:$0xf]  ;;  %v7727_v10 = vld [vmem:[%s11642_s2 + $0xeb4] sm:$0xf0] }
 0x158   :  { %3761 = vmatpush.bf16.msrb.mxu3 %v5795_v52  ;;  %3786 = vmatpush.bf16.msra.mxu1 %v6067_v44  ;;  %v6642_v52 = vld [vmem:[%s11642_s2 + $0xde8] sm:$0xf]  ;;  %v6147_v44 = vor.u32 %v7579_v29, %v6146_v31  ;;  %v7623_v12 = vld [vmem:[%s11642_s2 + $0xb74] sm:$0xf0]  ;;  %v6611_v18 = vor.u32 %v7695_v6, %v6610_v5 }
 0x159   :  { %v6643_v46 = vor.u32 %v7703_v21, %v6642_v52  ;;  %v6738_v7 = vld [vmem:[%s11642_s2 + $0xea8] sm:$0xf]  ;;  %v7659_v20 = vld [vmem:[%s11642_s2 + $0xc94] sm:$0xf0] }
 0x15a   :  { %3799 = vmatpush.bf16.msra.mxu2 %v6195_v45  ;;  %v6515_v45 = vor.u32 %v7671_v32, %v6514_v30  ;;  %v6322_v11 = vld [vmem:[%s11642_s2 + $0xb68] sm:$0xf]  ;;  %v6739_v23 = vor.u32 %v7727_v10, %v6738_v7  ;;  %v7723_v28 = vld [vmem:[%s11642_s2 + $0xe94] sm:$0xf0] }
 0x15b   :  { %3774 = vmatpush.bf16.msra.mxu0 %v5923_v61  ;;  %v6499_v61 = vor.u32 %v7667_v48, %v6498_v47  ;;  %v7868_v13 = vld [vmem:[#allocation1 + $0x9] sm:$0xff]  ;;  %v6323_v24 = vor.u32 %v7623_v12, %v6322_v11  ;;  %v7619_v29 = vld [vmem:[%s11642_s2 + $0xb54] sm:$0xf0] }
 0x15c   :  { %3762 = vmatpush.bf16.msrb.mxu3 %v5779_v50  ;;  %3787 = vmatpush.bf16.msra.mxu1 %v6051_v1  ;;  %v6355_v50 = vor.u32 %v7631_v57, %v6354_v58  ;;  %v7663_v1 = vld [vmem:[%s11642_s2 + $0xcb4] sm:$0xf0]  ;;  %v6722_v27 = vld [vmem:[%s11642_s2 + $0xe88] sm:$0xf] }
 0x15d   :  { %v6306_v31 = vld [vmem:[%s11642_s2 + $0xb48] sm:$0xf]  ;;  %v7655_v52 = vld [vmem:[%s11642_s2 + $0xc74] sm:$0xf0]  ;;  %v6723_v37 = vor.u32 %v7723_v28, %v6722_v27 }
 0x15e   :  { %3800 = vmatpush.bf16.msra.mxu2 %v6179_v2  ;;  %v6755_v2 = vor.u32 %v7731_v56, %v6754_v55  ;;  %v6307_v42 = vor.u32 %v7619_v29, %v6306_v31  ;;  %v6578_v58 = vld [vmem:[%s11642_s2 + $0xd68] sm:$0xf]  ;;  %v7687_v57 = vld [vmem:[%s11642_s2 + $0xd74] sm:$0xf0] }
 0x15f   :  { %3775 = vmatpush.bf16.msra.mxu0 %v5907_v19  ;;  %v6466_v19 = vld [vmem:[%s11642_s2 + $0xc88] sm:$0xf]  ;;  %v7615_v47 = vld [vmem:[%s11642_s2 + $0xb34] sm:$0xf0] }
 0x160   :  { %3763 = vmatpush.bf16.msrb.mxu3 %v5763_v9  ;;  %3788 = vmatpush.bf16.msra.mxu1 %v6035_v25  ;;  %v7867_v9 = vld [vmem:[#allocation1] sm:$0xff]  ;;  %v6594_v25 = vld [vmem:[%s11642_s2 + $0xd88] sm:$0xf]  ;;  %v6467_v30 = vor.u32 %v7659_v20, %v6466_v19  ;;  %v7651_v51 = vld [vmem:[%s11642_s2 + $0xc54] sm:$0xf0] }
 0x161   :  { %v6706_v43 = vld [vmem:[%s11642_s2 + $0xe68] sm:$0xf]  ;;  %v7683_v59 = vld [vmem:[%s11642_s2 + $0xd54] sm:$0xf0] }
 0x162   :  { %3801 = vmatpush.bf16.msra.mxu2 %v6163_v26  ;;  %v7691_v26 = vld [vmem:[%s11642_s2 + $0xd94] sm:$0xf0]  ;;  %v6562_v56 = vld [vmem:[%s11642_s2 + $0xd48] sm:$0xf] }
 0x163   :  { %3764 = vmatmul.bf16.vlgmr.msrb.gmra.mxu3 %v8385_v22  ;;  %3776 = vmatpush.bf16.msra.mxu0 %v5891_v40  ;;  %v6595_v32 = vor.u32 %v7691_v26, %v6594_v25  ;;  %v3570_v40 = vpop.f32.mrf.mxu0  ;;  %v6690_v60 = vld [vmem:[%s11642_s2 + $0xe48] sm:$0xf]  ;;  %v7767_v5 = vld [vmem:[%s11642_s2 + $0xff4] sm:$0xf0] }
 0x164   :  { %3808 = vmatpush.bf16.msra.mxu3 %v6387_v17  ;;  %3789 = vmatpush.bf16.msra.mxu1 %v6019_v54  ;;  %v6483_v17 = vor.u32 %v7663_v1, %v6482_v63  ;;  %v6274_v63 = vld [vmem:[%s11642_s2 + $0xb08] sm:$0xf]  ;;  %v7611_v1 = vld [vmem:[%s11642_s2 + $0xb14] sm:$0xf0] }
 0x165   :  { %v6275_v11 = vor.u32 %v7611_v1, %v6274_v63  ;;  %v7647_v12 = vld [vmem:[%s11642_s2 + $0xc34] sm:$0xf0]  ;;  %v6882_v26 = vld [vmem:[%s11642_s2 + $0xfc8] sm:$0xf]  ;;  %v7345_v63 = vld [vmem:[%s11642_s2 + $0x2cc] sm:$0xf] }
 0x166   :  { %3802 = vmatpush.bf16.msra.mxu2 %v6147_v44  ;;  %3777 = vmatmul.bf16.vlgmr.msra.gmra.mxu0 %v7867_v9  ;;  %v3557_v21 = vpop.f32.mrf.mxu3  ;;  %v3583_v44 = vpop.f32.mrf.mxu1  ;;  %v6418_v9 = vld [vmem:[%s11642_s2 + $0xc28] sm:$0xf]  ;;  %v7763_v27 = vld [vmem:[%s11642_s2 + $0xfd4] sm:$0xf0]  ;;  %v5220_v1 = vld [vmem:[%s11642_s2 + $0x2d8] sm:$0xf0] }
 0x167   :  { %3821 = vmatpush.bf16.msrb.mxu0 %v6515_v45  ;;  %3790 = vmatmul.bf16.vlgmr.msra.gmra.mxu1 %v7868_v13  ;;  %v3558_v54 = vadd.f32 %v3557_v21, %v10065_v0  ;;  %v7719_v45 = vld [vmem:[%s11642_s2 + $0xe74] sm:$0xf0]  ;;  %v6434_v0 = vld [vmem:[%s11642_s2 + $0xc48] sm:$0xf]  ;;  %v6419_v28 = vor.u32 %v7647_v12, %v6418_v9  ;;  %v7277_v9 = vld [vmem:[%s11642_s2 + $0xac] sm:$0xf] }
 0x168   :  { %3809 = vmatpush.bf16.msra.mxu3 %v6371_v36  ;;  %3834 = vmatpush.bf16.msrb.mxu1 %v6643_v46  ;;  %v6450_v36 = vld [vmem:[%s11642_s2 + $0xc68] sm:$0xf]  ;;  %v6707_v53 = vor.u32 %v7719_v45, %v6706_v43  ;;  %v6435_v7 = vor.u32 %v7651_v51, %v6434_v0  ;;  %v5108_v43 = vld [vmem:[%s11642_s2 + $0x1f8] sm:$0xf0] }
 0x169   :  { %3803 = vmatmul.bf16.vlgmr.msra.gmra.mxu2 %v7866_v8  ;;  %v6290_v46 = vld [vmem:[%s11642_s2 + $0xb28] sm:$0xf]  ;;  %v3571_v48 = vadd.f32 %v3570_v40, %v3558_v54  ;;  %v6563_v8 = vor.u32 %v7683_v59, %v6562_v56  ;;  %v6883_v40 = vor.u32 %v7763_v27, %v6882_v26  ;;  %v7349_v54 = vld [vmem:[%s11642_s2 + $0x2ec] sm:$0xf]  ;;  %v4964_v59 = vld [vmem:[%s11642_s2 + $0xd8] sm:$0xf0] }
 0x16a   :  { %3847 = vmatpush.bf16.msrb.mxu2 %v6771_v49  ;;  %v6451_v49 = vor.u32 %v7655_v52, %v6450_v36  ;;  %v6291_v55 = vor.u32 %v7615_v47, %v6290_v46  ;;  %v6546_v13 = vld [vmem:[%s11642_s2 + $0xd28] sm:$0xf]  ;;  %v7675_v52 = vld [vmem:[%s11642_s2 + $0xd14] sm:$0xf0]  ;;  %v7281_v56 = vld [vmem:[%s11642_s2 + $0xcc] sm:$0xf] }
 0x16b   :  { %3822 = vmatpush.bf16.msrb.mxu0 %v6499_v61  ;;  %v3584_v61 = vadd.f32 %v3583_v44, %v3571_v48  ;;  %v3572_v19 = vpop.f32.mrf.mxu0  ;;  %v6402_v29 = vld [vmem:[%s11642_s2 + $0xc08] sm:$0xf]  ;;  %v5236_v44 = vld [vmem:[%s11642_s2 + $0x2f8] sm:$0xf0] }
 0x16c   :  { %3810 = vmatpush.bf16.msra.mxu3 %v6355_v50  ;;  %3835 = vmatpush.bf16.msrb.mxu1 %v6627_v62  ;;  %v6579_v50 = vor.u32 %v7687_v57, %v6578_v58  ;;  %v7715_v62 = vld [vmem:[%s11642_s2 + $0xe54] sm:$0xf0]  ;;  %v6658_v21 = vld [vmem:[%s11642_s2 + $0xe08] sm:$0xf]  ;;  %v4980_v58 = vld [vmem:[%s11642_s2 + $0xf8] sm:$0xf0] }
 0x16d   :  { %v6691_v10 = vor.u32 %v7715_v62, %v6690_v60  ;;  %v7317_v57 = vld [vmem:[%s11642_s2 + $0x1ec] sm:$0xf]  ;;  %v6866_v48 = vld [vmem:[%s11642_s2 + $0xfa8] sm:$0xf]  ;;  %v5092_v62 = vld [vmem:[%s11642_s2 + $0x1d8] sm:$0xf0] }
 0x16e   :  { %3848 = vmatpush.bf16.msrb.mxu2 %v6755_v2  ;;  %v3596_v2 = vpop.f32.mrf.mxu2  ;;  %v3585_v25 = vpop.f32.mrf.mxu1  ;;  %v7313_v60 = vld [vmem:[%s11642_s2 + $0x1cc] sm:$0xf]  ;;  %v7870_v12 = vld [vmem:[#allocation1 + $0x24] sm:$0xff]  ;;  %v5204_v19 = vld [vmem:[%s11642_s2 + $0x2b8] sm:$0xf0] }
 0x16f   :  { %3823 = vmatpush.bf16.msrb.mxu0 %v6483_v17  ;;  %v10261_v6 = vadd.f32 %v3596_v2, %v3584_v61  ;;  %v7679_v17 = vld [vmem:[%s11642_s2 + $0xd34] sm:$0xf0]  ;;  %v6850_v2 = vld [vmem:[%s11642_s2 + $0xf88] sm:$0xf] }
 0x170   :  { %3811 = vmatpush.bf16.msra.mxu3 %v6339_v3  ;;  %3836 = vmatpush.bf16.msrb.mxu1 %v6611_v18  ;;  %v6898_v3 = vld [vmem:[%s11642_s2 + $0xfe8] sm:$0xf]  ;;  %v3559_v18 = vpop.f32.mrf.mxu3  ;;  %v6547_v31 = vor.u32 %v7679_v17, %v6546_v13  ;;  %v5076_v17 = vld [vmem:[%s11642_s2 + $0x1b8] sm:$0xf0]  ;;  %v7751_v25 = vld [vmem:[%s11642_s2 + $0xf74] sm:$0xf0] }
 0x171   :  { %v6899_v20 = vor.u32 %v7767_v5, %v6898_v3  ;;  %v7755_v3 = vld [vmem:[%s11642_s2 + $0xf94] sm:$0xf0]  ;;  %v4967_v5 = vor.u32 %v7281_v56, %v4964_v59  ;;  %v7341_v18 = vld [vmem:[%s11642_s2 + $0x2ac] sm:$0xf] }
 0x172   :  { %3849 = vmatpush.bf16.msrb.mxu2 %v6739_v23  ;;  %v6674_v23 = vld [vmem:[%s11642_s2 + $0xe28] sm:$0xf]  ;;  %v6851_v13 = vor.u32 %v7755_v3, %v6850_v2  ;;  %v5028_v3 = vld [vmem:[%s11642_s2 + $0x158] sm:$0xf0] }
 0x173   :  { %3824 = vmatpush.bf16.msrb.mxu0 %v6467_v30  ;;  %v7643_v30 = vld [vmem:[%s11642_s2 + $0xc14] sm:$0xf0] }
 0x174   :  { %3812 = vmatpush.bf16.msra.mxu3 %v6323_v24  ;;  %3837 = vmatpush.bf16.msrb.mxu1 %v6595_v32  ;;  %v7711_v24 = vld [vmem:[%s11642_s2 + $0xe34] sm:$0xf0]  ;;  %v6530_v32 = vld [vmem:[%s11642_s2 + $0xd08] sm:$0xf]  ;;  %v6403_v46 = vor.u32 %v7643_v30, %v6402_v29  ;;  %v4932_v29 = vld [vmem:[%s11642_s2 + $0x98] sm:$0xf0] }
 0x175   :  { %v6675_v36 = vor.u32 %v7711_v24, %v6674_v23  ;;  %v6531_v47 = vor.u32 %v7675_v52, %v6530_v32  ;;  %v7872_v23 = vld [vmem:[#allocation1 + $0x2d] sm:$0xff]  ;;  %v6834_v24 = vld [vmem:[%s11642_s2 + $0xf68] sm:$0xf] }
 0x176   :  { %3850 = vmatpush.bf16.msrb.mxu2 %v6723_v37  ;;  %v7707_v37 = vld [vmem:[%s11642_s2 + $0xe14] sm:$0xf0]  ;;  %v3598_v45 = vpop.f32.mrf.mxu2  ;;  %v7305_v30 = vld [vmem:[%s11642_s2 + $0x18c] sm:$0xf]  ;;  %v6835_v32 = vor.u32 %v7751_v25, %v6834_v24 }
 0x177   :  { %3825 = vmatpush.bf16.msrb.mxu0 %v6451_v49  ;;  %v7759_v49 = vld [vmem:[%s11642_s2 + $0xfb4] sm:$0xf0]  ;;  %v6659_v0 = vor.u32 %v7707_v37, %v6658_v21  ;;  %v7337_v52 = vld [vmem:[%s11642_s2 + $0x28c] sm:$0xf]  ;;  %v5188_v21 = vld [vmem:[%s11642_s2 + $0x298] sm:$0xf0] }
 0x178   :  { %3813 = vmatpush.bf16.msra.mxu3 %v6307_v42  ;;  %3838 = vmatpush.bf16.msrb.mxu1 %v6579_v50  ;;  %v7285_v42 = vld [vmem:[%s11642_s2 + $0xec] sm:$0xf]  ;;  %v7869_v50 = vld [vmem:[#allocation1 + $0x1b] sm:$0xff]  ;;  %v6867_v61 = vor.u32 %v7759_v49, %v6866_v48  ;;  %v6818_v37 = vld [vmem:[%s11642_s2 + $0xf48] sm:$0xf] }
 0x179   :  { %v4983_v51 = vor.u32 %v7285_v42, %v4980_v58  ;;  %v4916_v45 = vld [vmem:[%s11642_s2 + $0x78] sm:$0xf0]  ;;  %v7293_v24 = vld [vmem:[%s11642_s2 + $0x12c] sm:$0xf] }
 0x17a   :  { %3851 = vmatpush.bf16.msrb.mxu2 %v6707_v53  ;;  %v5111_v53 = vor.u32 %v7317_v57, %v5108_v43  ;;  %v5191_v43 = vor.u32 %v7337_v52, %v5188_v21  ;;  %v7377_v52 = vld [vmem:[%s11642_s2 + $0x3cc] sm:$0xf]  ;;  %v5348_v21 = vld [vmem:[%s11642_s2 + $0x3d8] sm:$0xf0] }
 0x17b   :  { %3826 = vmatpush.bf16.msrb.mxu0 %v6435_v7  ;;  %v5095_v7 = vor.u32 %v7313_v60, %v5092_v62  ;;  %v4900_v62 = vld [vmem:[%s11642_s2 + $0x58] sm:$0xf0] }
 0x17c   :  { %3814 = vmatpush.bf16.msra.mxu3 %v6291_v55  ;;  %3839 = vmatpush.bf16.msrb.mxu1 %v6563_v8  ;;  %v5239_v55 = vor.u32 %v7349_v54, %v5236_v44  ;;  %v5223_v8 = vor.u32 %v7345_v63, %v5220_v1  ;;  %v7269_v44 = vld [vmem:[%s11642_s2 + $0x6c] sm:$0xf] }
 0x17d   :  { %v4919_v56 = vor.u32 %v7269_v44, %v4916_v45  ;;  %v7297_v63 = vld [vmem:[%s11642_s2 + $0x14c] sm:$0xf]  ;;  %v5124_v44 = vld [vmem:[%s11642_s2 + $0x218] sm:$0xf0] }
 0x17e   :  { %3852 = vmatpush.bf16.msrb.mxu2 %v6691_v10  ;;  %v4948_v10 = vld [vmem:[%s11642_s2 + $0xb8] sm:$0xf0]  ;;  %v7413_v45 = vld [vmem:[%s11642_s2 + $0x4ec] sm:$0xf] }
 0x17f   :  { %3827 = vmatpush.bf16.msrb.mxu0 %v6419_v28  ;;  %v4951_v26 = vor.u32 %v7277_v9, %v4948_v10  ;;  %v5207_v28 = vor.u32 %v7341_v18, %v5204_v19  ;;  %v7739_v9 = vld [vmem:[%s11642_s2 + $0xf14] sm:$0xf0]  ;;  %v5031_v18 = vor.u32 %v7297_v63, %v5028_v3  ;;  %v7409_v63 = vld [vmem:[%s11642_s2 + $0x4cc] sm:$0xf] }
 0x180   :  { %3815 = vmatpush.bf16.msra.mxu3 %v6275_v11  ;;  %3840 = vmatpush.bf16.msrb.mxu1 %v6547_v31  ;;  %v7309_v11 = vld [vmem:[%s11642_s2 + $0x1ac] sm:$0xf] }
 0x181   :  { %v5079_v27 = vor.u32 %v7309_v11, %v5076_v17  ;;  %v7273_v31 = vld [vmem:[%s11642_s2 + $0x8c] sm:$0xf] }
 0x182   :  { %3853 = vmatpush.bf16.msrb.mxu2 %v6675_v36  ;;  %v5060_v36 = vld [vmem:[%s11642_s2 + $0x198] sm:$0xf0]  ;;  %v4935_v42 = vor.u32 %v7273_v31, %v4932_v29  ;;  %v7325_v31 = vld [vmem:[%s11642_s2 + $0x22c] sm:$0xf] }
 0x183   :  { %3816 = vmatmul.bf16.vlgmr.msra.gmra.mxu3 %v7869_v50  ;;  %3828 = vmatpush.bf16.msrb.mxu0 %v6403_v46  ;;  %v5063_v57 = vor.u32 %v7305_v30, %v5060_v36  ;;  %v3622_v54 = vpop.f32.mrf.mxu0  ;;  %v7301_v46 = vld [vmem:[%s11642_s2 + $0x16c] sm:$0xf]  ;;  %v5044_v50 = vld [vmem:[%s11642_s2 + $0x178] sm:$0xf0] }
 0x184   :  { %3860 = vmatpush.bf16.msrb.mxu3 %v6899_v20  ;;  %3841 = vmatpush.bf16.msrb.mxu1 %v6531_v47  ;;  %v7871_v20 = vld [vmem:[#allocation1 + $0x36] sm:$0xff]  ;;  %v3635_v49 = vpop.f32.mrf.mxu1  ;;  %v5047_v59 = vor.u32 %v7301_v46, %v5044_v50  ;;  %v5351_v46 = vor.u32 %v7377_v52, %v5348_v21  ;;  %v7441_v3 = vld [vmem:[%s11642_s2 + $0x5cc] sm:$0xf] }
 0x185   :  { %v5140_v29 = vld [vmem:[%s11642_s2 + $0x238] sm:$0xf0]  ;;  %v7465_v21 = vld [vmem:[%s11642_s2 + $0x68c] sm:$0xf] }
 0x186   :  { %3854 = vmatpush.bf16.msrb.mxu2 %v6659_v0  ;;  %3829 = vmatmul.bf16.vlgmr.msrb.gmra.mxu0 %v7870_v12  ;;  %v3609_v58 = vpop.f32.mrf.mxu3  ;;  %v7333_v0 = vld [vmem:[%s11642_s2 + $0x26c] sm:$0xf] }
 0x187   :  { %3873 = vmatpush.bf16.msra.mxu0 %v4983_v51  ;;  %3842 = vmatmul.bf16.vlgmr.msrb.gmra.mxu1 %v7872_v23  ;;  %v3610_v47 = vadd.f32 %v3609_v58, %v10261_v6  ;;  %v5172_v51 = vld [vmem:[%s11642_s2 + $0x278] sm:$0xf0]  ;;  %v7743_v6 = vld [vmem:[%s11642_s2 + $0xf34] sm:$0xf0]  ;;  %v7381_v12 = vld [vmem:[%s11642_s2 + $0x3ec] sm:$0xf] }
 0x188   :  { %3861 = vmatpush.bf16.msrb.mxu3 %v6883_v40  ;;  %3886 = vmatpush.bf16.msra.mxu1 %v5111_v53  ;;  %v7747_v40 = vld [vmem:[%s11642_s2 + $0xf54] sm:$0xf0]  ;;  %v6802_v53 = vld [vmem:[%s11642_s2 + $0xf28] sm:$0xf]  ;;  %v5175_v60 = vor.u32 %v7333_v0, %v5172_v51  ;;  %v4884_v23 = vld [vmem:[%s11642_s2 + $0x38] sm:$0xf0] }
 0x189   :  { %3855 = vmatmul.bf16.vlgmr.msrb.gmra.mxu2 %v7871_v20  ;;  %v6819_v48 = vor.u32 %v7747_v40, %v6818_v37  ;;  %v6803_v2 = vor.u32 %v7743_v6, %v6802_v53  ;;  %v7261_v20 = vld [vmem:[%s11642_s2 + $0x2c] sm:$0xf]  ;;  %v4868_v58 = vld [vmem:[%s11642_s2 + $0x18] sm:$0xf0] }
 0x18a   :  { %3899 = vmatpush.bf16.msra.mxu2 %v5239_v55  ;;  %v3623_v55 = vadd.f32 %v3622_v54, %v3610_v47  ;;  %v4887_v36 = vor.u32 %v7261_v20, %v4884_v23  ;;  %v7257_v37 = vld [vmem:[%s11642_s2 + $0xc] sm:$0xf]  ;;  %v5492_v47 = vld [vmem:[%s11642_s2 + $0x4f8] sm:$0xf0] }
 0x18b   :  { %3874 = vmatpush.bf16.msra.mxu0 %v4967_v5  ;;  %v7329_v5 = vld [vmem:[%s11642_s2 + $0x24c] sm:$0xf]  ;;  %v4871_v50 = vor.u32 %v7257_v37, %v4868_v58  ;;  %v5748_v51 = vld [vmem:[%s11642_s2 + $0x6f8] sm:$0xf0] }
 0x18c   :  { %3862 = vmatpush.bf16.msrb.mxu3 %v6867_v61  ;;  %3887 = vmatpush.bf16.msra.mxu1 %v5095_v7  ;;  %v7265_v61 = vld [vmem:[%s11642_s2 + $0x4c] sm:$0xf]  ;;  %v3636_v1 = vadd.f32 %v3635_v49, %v3623_v55  ;;  %v5156_v7 = vld [vmem:[%s11642_s2 + $0x258] sm:$0xf0]  ;;  %v3648_v10 = vpop.f32.mrf.mxu2  ;;  %v3637_v30 = vpop.f32.mrf.mxu1 }
 0x18d   :  { %v4903_v11 = vor.u32 %v7265_v61, %v4900_v62  ;;  %v5159_v19 = vor.u32 %v7329_v5, %v5156_v7  ;;  %v7321_v54 = vld [vmem:[%s11642_s2 + $0x20c] sm:$0xf]  ;;  %v5620_v49 = vld [vmem:[%s11642_s2 + $0x5f8] sm:$0xf0]  ;;  %v5495_v61 = vor.u32 %v7413_v45, %v5492_v47 }
 0x18e   :  { %3900 = vmatpush.bf16.msra.mxu2 %v5223_v8  ;;  %v6786_v8 = vld [vmem:[%s11642_s2 + $0xf08] sm:$0xf]  ;;  %v10456_v17 = vadd.f32 %v3648_v10, %v3636_v1  ;;  %v3611_v25 = vpop.f32.mrf.mxu3  ;;  %v7477_v0 = vld [vmem:[%s11642_s2 + $0x6ec] sm:$0xf]  ;;  %v5127_v55 = vor.u32 %v7321_v54, %v5124_v44  ;;  %v5604_v5 = vld [vmem:[%s11642_s2 + $0x5d8] sm:$0xf0] }
 0x18f   :  { %3875 = vmatpush.bf16.msra.mxu0 %v4951_v26  ;;  %v3624_v26 = vpop.f32.mrf.mxu0  ;;  %v5751_v1 = vor.u32 %v7477_v0, %v5748_v51  ;;  %v7369_v10 = vld [vmem:[%s11642_s2 + $0x38c] sm:$0xf]  ;;  %v5460_v20 = vld [vmem:[%s11642_s2 + $0x4b8] sm:$0xf0] }
 0x190   :  { %3863 = vmatpush.bf16.msrb.mxu3 %v6851_v13  ;;  %3888 = vmatpush.bf16.msra.mxu1 %v5079_v27  ;;  %v5364_v13 = vld [vmem:[%s11642_s2 + $0x3f8] sm:$0xf0]  ;;  %v6787_v27 = vor.u32 %v7739_v9, %v6786_v8  ;;  %v7473_v8 = vld [vmem:[%s11642_s2 + $0x6cc] sm:$0xf] }
 0x191   :  { %v5732_v9 = vld [vmem:[%s11642_s2 + $0x6d8] sm:$0xf0]  ;;  %v7437_v23 = vld [vmem:[%s11642_s2 + $0x5ac] sm:$0xf] }
 0x192   :  { %3901 = vmatpush.bf16.msra.mxu2 %v5207_v28  ;;  %v5012_v28 = vld [vmem:[%s11642_s2 + $0x138] sm:$0xf0]  ;;  %v7397_v54 = vld [vmem:[%s11642_s2 + $0x46c] sm:$0xf] }
 0x193   :  { %3876 = vmatpush.bf16.msra.mxu0 %v4935_v42  ;;  %v5015_v40 = vor.u32 %v7293_v24, %v5012_v28  ;;  %v5143_v42 = vor.u32 %v7325_v31, %v5140_v29  ;;  %v5588_v24 = vld [vmem:[%s11642_s2 + $0x5b8] sm:$0xf0]  ;;  %v7401_v29 = vld [vmem:[%s11642_s2 + $0x48c] sm:$0xf] }
 0x194   :  { %3864 = vmatpush.bf16.msrb.mxu3 %v6835_v32  ;;  %3889 = vmatpush.bf16.msra.mxu1 %v5063_v57  ;;  %v5367_v32 = vor.u32 %v7381_v12, %v5364_v13  ;;  %v7289_v57 = vld [vmem:[%s11642_s2 + $0x10c] sm:$0xf]  ;;  %v3650_v53 = vpop.f32.mrf.mxu2  ;;  %v5607_v13 = vor.u32 %v7441_v3, %v5604_v5  ;;  %v5716_v26 = vld [vmem:[%s11642_s2 + $0x6b8] sm:$0xf0]  ;;  %v5591_v31 = vor.u32 %v7437_v23, %v5588_v24 }
 0x195   :  { %v5700_v37 = vld [vmem:[%s11642_s2 + $0x698] sm:$0xf0]  ;;  %v7457_v3 = vld [vmem:[%s11642_s2 + $0x64c] sm:$0xf] }
 0x196   :  { %3902 = vmatpush.bf16.msra.mxu2 %v5191_v43  ;;  %v4996_v43 = vld [vmem:[%s11642_s2 + $0x118] sm:$0xf0] }
 0x197   :  { %3877 = vmatpush.bf16.msra.mxu0 %v4919_v56  ;;  %v4999_v6 = vor.u32 %v7289_v57, %v4996_v43  ;;  %v7373_v56 = vld [vmem:[%s11642_s2 + $0x3ac] sm:$0xf]  ;;  %v5428_v47 = vld [vmem:[%s11642_s2 + $0x478] sm:$0xf0] }
 0x198   :  { %3865 = vmatpush.bf16.msrb.mxu3 %v6819_v48  ;;  %3890 = vmatpush.bf16.msra.mxu1 %v5047_v59  ;;  %v7445_v48 = vld [vmem:[%s11642_s2 + $0x5ec] sm:$0xf]  ;;  %v5332_v59 = vld [vmem:[%s11642_s2 + $0x3b8] sm:$0xf0] }
 0x199   :  { %v5623_v62 = vor.u32 %v7445_v48, %v5620_v49  ;;  %v5335_v7 = vor.u32 %v7373_v56, %v5332_v59  ;;  %v7429_v48 = vld [vmem:[%s11642_s2 + $0x56c] sm:$0xf]  ;;  %v5556_v49 = vld [vmem:[%s11642_s2 + $0x578] sm:$0xf0]  ;;  %v5431_v56 = vor.u32 %v7397_v54, %v5428_v47 }
 0x19a   :  { %3903 = vmatpush.bf16.msra.mxu2 %v5175_v60  ;;  %v7873_v60 = vld [vmem:[#allocation1 + $0x3f] sm:$0xff]  ;;  %v5559_v59 = vor.u32 %v7429_v48, %v5556_v49  ;;  %v7605_v47 = vld [vmem:[%s11642_s2 + $0xaec] sm:$0xf] }
 0x19b   :  { %3878 = vmatpush.bf16.msra.mxu0 %v4903_v11  ;;  %v5316_v11 = vld [vmem:[%s11642_s2 + $0x398] sm:$0xf0] }
 0x19c   :  { %3866 = vmatpush.bf16.msrb.mxu3 %v6803_v2  ;;  %3891 = vmatpush.bf16.msra.mxu1 %v5031_v18  ;;  %v5476_v2 = vld [vmem:[%s11642_s2 + $0x4d8] sm:$0xf0]  ;;  %v7405_v18 = vld [vmem:[%s11642_s2 + $0x4ac] sm:$0xf]  ;;  %v5319_v25 = vor.u32 %v7369_v10, %v5316_v11 }
 0x19d   :  { %v5479_v12 = vor.u32 %v7409_v63, %v5476_v2  ;;  %v5463_v28 = vor.u32 %v7405_v18, %v5460_v20  ;;  %v5684_v53 = vld [vmem:[%s11642_s2 + $0x678] sm:$0xf0]  ;;  %v7425_v63 = vld [vmem:[%s11642_s2 + $0x54c] sm:$0xf] }
 0x19e   :  { %3904 = vmatpush.bf16.msra.mxu2 %v5159_v19  ;;  %v5735_v19 = vor.u32 %v7473_v8, %v5732_v9  ;;  %v5668_v5 = vld [vmem:[%s11642_s2 + $0x658] sm:$0xf0]  ;;  %v7353_v8 = vld [vmem:[%s11642_s2 + $0x30c] sm:$0xf] }
 0x19f   :  { %3879 = vmatpush.bf16.msra.mxu0 %v4887_v36  ;;  %v5572_v36 = vld [vmem:[%s11642_s2 + $0x598] sm:$0xf0]  ;;  %v5671_v23 = vor.u32 %v7457_v3, %v5668_v5 }
 0x1a0   :  { %3867 = vmatpush.bf16.msrb.mxu3 %v6787_v27  ;;  %3892 = vmatpush.bf16.msra.mxu1 %v5015_v40  ;;  %v7365_v27 = vld [vmem:[%s11642_s2 + $0x36c] sm:$0xf]  ;;  %v5252_v9 = vld [vmem:[%s11642_s2 + $0x318] sm:$0xf0] }
 0x1a1   :  { %v7361_v40 = vld [vmem:[%s11642_s2 + $0x34c] sm:$0xf]  ;;  %v5876_v18 = vld [vmem:[%s11642_s2 + $0x7f8] sm:$0xf0] }
 0x1a2   :  { %3905 = vmatpush.bf16.msra.mxu2 %v5143_v42  ;;  %v5284_v42 = vld [vmem:[%s11642_s2 + $0x358] sm:$0xf0] }
 0x1a3   :  { %3868 = vmatmul.bf16.vlgmr.msrb.gmra.mxu3 %v7873_v60  ;;  %3880 = vmatpush.bf16.msra.mxu0 %v4871_v50  ;;  %v3674_v58 = vpop.f32.mrf.mxu0  ;;  %v5287_v51 = vor.u32 %v7361_v40, %v5284_v42  ;;  %v7393_v60 = vld [vmem:[%s11642_s2 + $0x44c] sm:$0xf]  ;;  %v5396_v24 = vld [vmem:[%s11642_s2 + $0x438] sm:$0xf0] }
 0x1a4   :  { %3912 = vmatpush.bf16.msra.mxu3 %v5367_v32  ;;  %3893 = vmatpush.bf16.msra.mxu1 %v4999_v6  ;;  %v7433_v32 = vld [vmem:[%s11642_s2 + $0x58c] sm:$0xf]  ;;  %v3675_v45 = vadd.f32 %v3674_v58, %v9115_v4  ;;  %v3687_v0 = vpop.f32.mrf.mxu1  ;;  %v5508_v42 = vld [vmem:[%s11642_s2 + $0x518] sm:$0xf0] }
 0x1a5   :  { %v5575_v43 = vor.u32 %v7433_v32, %v5572_v36  ;;  %v7461_v4 = vld [vmem:[%s11642_s2 + $0x66c] sm:$0xf]  ;;  %v6004_v54 = vld [vmem:[%s11642_s2 + $0x8f8] sm:$0xf0] }
 0x1a6   :  { %3906 = vmatpush.bf16.msra.mxu2 %v5127_v55  ;;  %3881 = vmatmul.bf16.vlgmr.msra.gmra.mxu0 %v8149_v35  ;;  %v7469_v35 = vld [vmem:[%s11642_s2 + $0x6ac] sm:$0xf]  ;;  %v3661_v44 = vpop.f32.mrf.mxu3  ;;  %v3688_v6 = vadd.f32 %v3687_v0, %v3675_v45  ;;  %v6260_v48 = vld [vmem:[%s11642_s2 + $0xaf8] sm:$0xf0] }
 0x1a7   :  { %3925 = vmatpush.bf16.msrb.mxu0 %v5495_v61  ;;  %3894 = vmatmul.bf16.vlgmr.msra.gmra.mxu1 %v8165_v41  ;;  %v5719_v30 = vor.u32 %v7469_v35, %v5716_v26  ;;  %v5444_v41 = vld [vmem:[%s11642_s2 + $0x498] sm:$0xf0]  ;;  %v10613_v50 = vadd.f32 %v3661_v44, %v10456_v17  ;;  %v7357_v55 = vld [vmem:[%s11642_s2 + $0x32c] sm:$0xf]  ;;  %v5687_v61 = vor.u32 %v7461_v4, %v5684_v53 }
 0x1a8   :  { %3913 = vmatpush.bf16.msra.mxu3 %v5351_v46  ;;  %3938 = vmatpush.bf16.msrb.mxu1 %v5623_v62  ;;  %v5447_v57 = vor.u32 %v7401_v29, %v5444_v41  ;;  %v5703_v46 = vor.u32 %v7465_v21, %v5700_v37  ;;  %v5268_v17 = vld [vmem:[%s11642_s2 + $0x338] sm:$0xf0]  ;;  %v7417_v37 = vld [vmem:[%s11642_s2 + $0x50c] sm:$0xf] }
 0x1a9   :  { %3907 = vmatmul.bf16.vlgmr.msra.gmra.mxu2 %v8157_v38  ;;  %v5300_v38 = vld [vmem:[%s11642_s2 + $0x378] sm:$0xf0]  ;;  %v5271_v2 = vor.u32 %v7357_v55, %v5268_v17  ;;  %v7449_v58 = vld [vmem:[%s11642_s2 + $0x60c] sm:$0xf] }
 0x1aa   :  { %3951 = vmatpush.bf16.msrb.mxu2 %v5751_v1  ;;  %v5303_v52 = vor.u32 %v7365_v27, %v5300_v38  ;;  %v5412_v62 = vld [vmem:[%s11642_s2 + $0x458] sm:$0xf0]  ;;  %v5255_v27 = vor.u32 %v7353_v8, %v5252_v9  ;;  %v7453_v38 = vld [vmem:[%s11642_s2 + $0x62c] sm:$0xf] }
 0x1ab   :  { %3926 = vmatpush.bf16.msrb.mxu0 %v5479_v12  ;;  %v5540_v1 = vld [vmem:[%s11642_s2 + $0x558] sm:$0xf0]  ;;  %v5415_v11 = vor.u32 %v7393_v60, %v5412_v62  ;;  %v3676_v20 = vpop.f32.mrf.mxu0  ;;  %v7573_v44 = vld [vmem:[%s11642_s2 + $0x9ec] sm:$0xf] }
 0x1ac   :  { %3914 = vmatpush.bf16.msra.mxu3 %v5335_v7  ;;  %3939 = vmatpush.bf16.msrb.mxu1 %v5607_v13  ;;  %v3700_v7 = vpop.f32.mrf.mxu2  ;;  %v5543_v12 = vor.u32 %v7425_v63, %v5540_v1  ;;  %v7509_v13 = vld [vmem:[%s11642_s2 + $0x7ec] sm:$0xf]  ;;  %v5524_v35 = vld [vmem:[%s11642_s2 + $0x538] sm:$0xf0] }
 0x1ad   :  { %v10651_v10 = vadd.f32 %v3700_v7, %v3688_v6  ;;  %v5879_v29 = vor.u32 %v7509_v13, %v5876_v18  ;;  %v5860_v41 = vld [vmem:[%s11642_s2 + $0x7d8] sm:$0xf0]  ;;  %v7501_v4 = vld [vmem:[%s11642_s2 + $0x7ac] sm:$0xf] }
 0x1ae   :  { %3952 = vmatpush.bf16.msrb.mxu2 %v5735_v19  ;;  %v7389_v19 = vld [vmem:[%s11642_s2 + $0x42c] sm:$0xf]  ;;  %v3663_v26 = vpop.f32.mrf.mxu3  ;;  %v5380_v21 = vld [vmem:[%s11642_s2 + $0x418] sm:$0xf0] }
 0x1af   :  { %3927 = vmatpush.bf16.msrb.mxu0 %v5463_v28  ;;  %v5652_v28 = vld [vmem:[%s11642_s2 + $0x638] sm:$0xf0]  ;;  %v5399_v32 = vor.u32 %v7389_v19, %v5396_v24  ;;  %v7601_v63 = vld [vmem:[%s11642_s2 + $0xacc] sm:$0xf] }
 0x1b0   :  { %3915 = vmatpush.bf16.msra.mxu3 %v5319_v25  ;;  %3940 = vmatpush.bf16.msrb.mxu1 %v5591_v31  ;;  %v7421_v25 = vld [vmem:[%s11642_s2 + $0x52c] sm:$0xf]  ;;  %v3689_v31 = vpop.f32.mrf.mxu1  ;;  %v5655_v40 = vor.u32 %v7453_v38, %v5652_v28  ;;  %v5844_v53 = vld [vmem:[%s11642_s2 + $0x7b8] sm:$0xf0] }
 0x1b1   :  { %v5527_v36 = vor.u32 %v7421_v25, %v5524_v35  ;;  %v5988_v60 = vld [vmem:[%s11642_s2 + $0x8d8] sm:$0xf0]  ;;  %v5847_v62 = vor.u32 %v7501_v4, %v5844_v53  ;;  %v7533_v9 = vld [vmem:[%s11642_s2 + $0x8ac] sm:$0xf] }
 0x1b2   :  { %3953 = vmatpush.bf16.msrb.mxu2 %v5719_v30  ;;  %v7505_v30 = vld [vmem:[%s11642_s2 + $0x7cc] sm:$0xf]  ;;  %v6244_v1 = vld [vmem:[%s11642_s2 + $0xad8] sm:$0xf0] }
 0x1b3   :  { %3928 = vmatpush.bf16.msrb.mxu0 %v5447_v57  ;;  %v5636_v57 = vld [vmem:[%s11642_s2 + $0x618] sm:$0xf0]  ;;  %v5863_v45 = vor.u32 %v7505_v30, %v5860_v41  ;;  %v6247_v8 = vor.u32 %v7601_v63, %v6244_v1  ;;  %v7597_v19 = vld [vmem:[%s11642_s2 + $0xaac] sm:$0xf] }
 0x1b4   :  { %3916 = vmatpush.bf16.msra.mxu3 %v5303_v52  ;;  %3941 = vmatpush.bf16.msrb.mxu1 %v5575_v43  ;;  %v7385_v52 = vld [vmem:[%s11642_s2 + $0x40c] sm:$0xf]  ;;  %v3702_v49 = vpop.f32.mrf.mxu2  ;;  %v5639_v6 = vor.u32 %v7449_v58, %v5636_v57  ;;  %v5828_v3 = vld [vmem:[%s11642_s2 + $0x798] sm:$0xf0] }
 0x1b5   :  { %v7541_v43 = vld [vmem:[%s11642_s2 + $0x8ec] sm:$0xf]  ;;  %v5383_v0 = vor.u32 %v7385_v52, %v5380_v21  ;;  %v6100_v18 = vld [vmem:[%s11642_s2 + $0x9b8] sm:$0xf0] }
 0x1b6   :  { %3954 = vmatpush.bf16.msrb.mxu2 %v5703_v46  ;;  %v6132_v46 = vld [vmem:[%s11642_s2 + $0x9f8] sm:$0xf0]  ;;  %v6007_v55 = vor.u32 %v7541_v43, %v6004_v54  ;;  %v7561_v26 = vld [vmem:[%s11642_s2 + $0x98c] sm:$0xf] }
 0x1b7   :  { %3929 = vmatpush.bf16.msrb.mxu0 %v5431_v56  ;;  %v6135_v17 = vor.u32 %v7573_v44, %v6132_v46  ;;  %v6263_v56 = vor.u32 %v7605_v47, %v6260_v48  ;;  %v6228_v20 = vld [vmem:[%s11642_s2 + $0xab8] sm:$0xf0]  ;;  %v7593_v28 = vld [vmem:[%s11642_s2 + $0xa8c] sm:$0xf] }
 0x1b8   :  { %3917 = vmatpush.bf16.msra.mxu3 %v5287_v51  ;;  %3942 = vmatpush.bf16.msrb.mxu1 %v5559_v59  ;;  %v5511_v51 = vor.u32 %v7417_v37, %v5508_v42  ;;  %v7537_v59 = vld [vmem:[%s11642_s2 + $0x8cc] sm:$0xf]  ;;  %v6231_v35 = vor.u32 %v7597_v19, %v6228_v20  ;;  %v6084_v38 = vld [vmem:[%s11642_s2 + $0x998] sm:$0xf0] }
 0x1b9   :  { %v5991_v5 = vor.u32 %v7537_v59, %v5988_v60  ;;  %v6212_v31 = vld [vmem:[%s11642_s2 + $0xa98] sm:$0xf0]  ;;  %v7525_v37 = vld [vmem:[%s11642_s2 + $0x86c] sm:$0xf] }
 0x1ba   :  { %3955 = vmatpush.bf16.msrb.mxu2 %v5687_v61  ;;  %v7569_v61 = vld [vmem:[%s11642_s2 + $0x9cc] sm:$0xf]  ;;  %v5796_v30 = vld [vmem:[%s11642_s2 + $0x758] sm:$0xf0]  ;;  %v6215_v52 = vor.u32 %v7593_v28, %v6212_v31 }
 0x1bb   :  { %3930 = vmatpush.bf16.msrb.mxu0 %v5415_v11  ;;  %v5972_v11 = vld [vmem:[%s11642_s2 + $0x8b8] sm:$0xf0]  ;;  %v7557_v42 = vld [vmem:[%s11642_s2 + $0x96c] sm:$0xf] }
 0x1bc   :  { %3918 = vmatpush.bf16.msra.mxu3 %v5271_v2  ;;  %3943 = vmatpush.bf16.msrb.mxu1 %v5543_v12  ;;  %v7497_v2 = vld [vmem:[%s11642_s2 + $0x78c] sm:$0xf]  ;;  %v5975_v24 = vor.u32 %v7533_v9, %v5972_v11  ;;  %v6068_v54 = vld [vmem:[%s11642_s2 + $0x978] sm:$0xf0] }
 0x1bd   :  { %v7565_v12 = vld [vmem:[%s11642_s2 + $0x9ac] sm:$0xf]  ;;  %v5831_v13 = vor.u32 %v7497_v2, %v5828_v3  ;;  %v6071_v49 = vor.u32 %v7557_v42, %v6068_v54  ;;  %v5924_v4 = vld [vmem:[%s11642_s2 + $0x858] sm:$0xf0] }
 0x1be   :  { %3956 = vmatpush.bf16.msrb.mxu2 %v5671_v23  ;;  %v5812_v23 = vld [vmem:[%s11642_s2 + $0x778] sm:$0xf0]  ;;  %v6103_v25 = vor.u32 %v7565_v12, %v6100_v18  ;;  %v7589_v44 = vld [vmem:[%s11642_s2 + $0xa6c] sm:$0xf] }
 0x1bf   :  { %3931 = vmatpush.bf16.msrb.mxu0 %v5399_v32  ;;  %v7485_v46 = vld [vmem:[%s11642_s2 + $0x72c] sm:$0xf]  ;;  %v6180_v59 = vld [vmem:[%s11642_s2 + $0xa58] sm:$0xf0] }
 0x1c0   :  { %3919 = vmatpush.bf16.msra.mxu3 %v5255_v27  ;;  %3944 = vmatpush.bf16.msrb.mxu1 %v5527_v36  ;;  %v6087_v36 = vor.u32 %v7561_v26, %v6084_v38  ;;  %v7553_v53 = vld [vmem:[%s11642_s2 + $0x94c] sm:$0xf]  ;;  %v6388_v1 = vld [vmem:[%s11642_s2 + $0xbf8] sm:$0xf0] }
 0x1c1   :  { %v7481_v60 = vld [vmem:[%s11642_s2 + $0x70c] sm:$0xf]  ;;  %v6036_v18 = vld [vmem:[%s11642_s2 + $0x938] sm:$0xf0] }
 0x1c2   :  { %3957 = vmatpush.bf16.msrb.mxu2 %v5655_v40  ;;  %v5940_v40 = vld [vmem:[%s11642_s2 + $0x878] sm:$0xf0]  ;;  %v7637_v63 = vld [vmem:[%s11642_s2 + $0xbec] sm:$0xf] }
 0x1c3   :  { %3920 = vmatmul.bf16.vlgmr.msra.gmra.mxu3 %v8343_v34  ;;  %v6116_v34 = vld [vmem:[%s11642_s2 + $0x9d8] sm:$0xf0]  ;;  %3932 = vmatpush.bf16.msrb.mxu0 %v5383_v0  ;;  %v3726_v21 = vpop.f32.mrf.mxu0  ;;  %v5943_v48 = vor.u32 %v7525_v37, %v5940_v40  ;;  %v7549_v9 = vld [vmem:[%s11642_s2 + $0x92c] sm:$0xf] }
 0x1c4   :  { %3964 = vmatpush.bf16.msrb.mxu3 %v5879_v29  ;;  %3945 = vmatpush.bf16.msrb.mxu1 %v5511_v51  ;;  %v6119_v7 = vor.u32 %v7569_v61, %v6116_v34  ;;  %v7489_v29 = vld [vmem:[%s11642_s2 + $0x74c] sm:$0xf]  ;;  %v3739_v43 = vpop.f32.mrf.mxu1  ;;  %v5764_v61 = vld [vmem:[%s11642_s2 + $0x718] sm:$0xf0]  ;;  %v6039_v26 = vor.u32 %v7549_v9, %v6036_v18 }
 0x1c5   :  { %v5799_v57 = vor.u32 %v7489_v29, %v5796_v30  ;;  %v7521_v51 = vld [vmem:[%s11642_s2 + $0x84c] sm:$0xf]  ;;  %v6164_v20 = vld [vmem:[%s11642_s2 + $0xa38] sm:$0xf0] }
 0x1c6   :  { %3958 = vmatpush.bf16.msrb.mxu2 %v5639_v6  ;;  %3933 = vmatmul.bf16.vlgmr.msrb.gmra.mxu0 %v8372_v15  ;;  %v7493_v15 = vld [vmem:[%s11642_s2 + $0x76c] sm:$0xf]  ;;  %v3713_v32 = vpop.f32.mrf.mxu3  ;;  %v5927_v34 = vor.u32 %v7521_v51, %v5924_v4  ;;  %v6020_v28 = vld [vmem:[%s11642_s2 + $0x918] sm:$0xf0] }
 0x1c7   :  { %3977 = vmatpush.bf16.msra.mxu0 %v6007_v55  ;;  %3946 = vmatmul.bf16.vlgmr.msrb.gmra.mxu1 %v8374_v16  ;;  %v5956_v16 = vld [vmem:[%s11642_s2 + $0x898] sm:$0xf0]  ;;  %v5815_v27 = vor.u32 %v7493_v15, %v5812_v23  ;;  %v3714_v58 = vadd.f32 %v3713_v32, %v10651_v10  ;;  %v7581_v19 = vld [vmem:[%s11642_s2 + $0xa2c] sm:$0xf]  ;;  %v6391_v23 = vor.u32 %v7637_v63, %v6388_v1  ;;  %v7874_v63 = vld [vmem:[#allocation1 + $0x12] sm:$0xff] }
 0x1c8   :  { %3965 = vmatpush.bf16.msrb.mxu3 %v5863_v45  ;;  %3990 = vmatpush.bf16.msra.mxu1 %v6135_v17  ;;  %v6196_v45 = vld [vmem:[%s11642_s2 + $0xa78] sm:$0xf0]  ;;  %v7545_v38 = vld [vmem:[%s11642_s2 + $0x90c] sm:$0xf]  ;;  %v7875_v1 = vld [vmem:[#allocation1] sm:$0xff] }
 0x1c9   :  { %3959 = vmatmul.bf16.vlgmr.msrb.gmra.mxu2 %v8370_v14  ;;  %v7529_v14 = vld [vmem:[%s11642_s2 + $0x88c] sm:$0xf]  ;;  %v5780_v10 = vld [vmem:[%s11642_s2 + $0x738] sm:$0xf0]  ;;  %v3727_v47 = vadd.f32 %v3726_v21, %v3714_v58  ;;  %v6199_v0 = vor.u32 %v7589_v44, %v6196_v45 }
 0x1ca   :  { %4003 = vmatpush.bf16.msra.mxu2 %v6263_v56  ;;  %v5959_v41 = vor.u32 %v7529_v14, %v5956_v16  ;;  %v5783_v55 = vor.u32 %v7485_v46, %v5780_v10  ;;  %v6052_v17 = vld [vmem:[%s11642_s2 + $0x958] sm:$0xf0]  ;;  %v7585_v56 = vld [vmem:[%s11642_s2 + $0xa4c] sm:$0xf] }
 0x1cb   :  { %3978 = vmatpush.bf16.msra.mxu0 %v5991_v5  ;;  %v3740_v6 = vadd.f32 %v3739_v43, %v3727_v47  ;;  %v6055_v3 = vor.u32 %v7553_v53, %v6052_v17  ;;  %v6183_v5 = vor.u32 %v7585_v56, %v6180_v59  ;;  %v3728_v12 = vpop.f32.mrf.mxu0  ;;  %v7513_v14 = vld [vmem:[%s11642_s2 + $0x80c] sm:$0xf]  ;;  %v5892_v16 = vld [vmem:[%s11642_s2 + $0x818] sm:$0xf0]  ;;  %v6023_v43 = vor.u32 %v7545_v38, %v6020_v28 }
 0x1cc   :  { %3966 = vmatpush.bf16.msrb.mxu3 %v5847_v62  ;;  %3991 = vmatpush.bf16.msra.mxu1 %v6119_v7  ;;  %v3752_v62 = vpop.f32.mrf.mxu2  ;;  %v7517_v7 = vld [vmem:[%s11642_s2 + $0x82c] sm:$0xf]  ;;  %v3741_v15 = vpop.f32.mrf.mxu1  ;;  %v6148_v29 = vld [vmem:[%s11642_s2 + $0xa18] sm:$0xf0]  ;;  %v5895_v37 = vor.u32 %v7513_v14, %v5892_v16 }
 0x1cd   :  { %v10856_v2 = vadd.f32 %v3752_v62, %v3740_v6  ;;  %v7577_v31 = vld [vmem:[%s11642_s2 + $0xa0c] sm:$0xf]  ;;  %v6772_v40 = vld [vmem:[%s11642_s2 + $0xef8] sm:$0xf0] }
 0x1ce   :  { %4004 = vmatpush.bf16.msra.mxu2 %v6247_v8  ;;  %v5908_v8 = vld [vmem:[%s11642_s2 + $0x838] sm:$0xf0]  ;;  %v3715_v11 = vpop.f32.mrf.mxu3  ;;  %v7669_v30 = vld [vmem:[%s11642_s2 + $0xcec] sm:$0xf]  ;;  %v6151_v54 = vor.u32 %v7577_v31, %v6148_v29 }
 0x1cf   :  { %3979 = vmatpush.bf16.msra.mxu0 %v5975_v24  ;;  %v7633_v24 = vld [vmem:[%s11642_s2 + $0xbcc] sm:$0xf]  ;;  %v6356_v58 = vld [vmem:[%s11642_s2 + $0xbb8] sm:$0xf0] }
 0x1d0   :  { %3967 = vmatpush.bf16.msrb.mxu3 %v5831_v13  ;;  %3992 = vmatpush.bf16.msra.mxu1 %v6103_v25  ;;  %v5767_v13 = vor.u32 %v7481_v60, %v5764_v61  ;;  %v5911_v25 = vor.u32 %v7517_v7, %v5908_v8  ;;  %v7733_v21 = vld [vmem:[%s11642_s2 + $0xeec] sm:$0xf]  ;;  %v6500_v10 = vld [vmem:[%s11642_s2 + $0xcd8] sm:$0xf0] }
 0x1d1   :  { %v7629_v42 = vld [vmem:[%s11642_s2 + $0xbac] sm:$0xf]  ;;  %v6775_v47 = vor.u32 %v7733_v21, %v6772_v40  ;;  %v6756_v51 = vld [vmem:[%s11642_s2 + $0xed8] sm:$0xf0] }
 0x1d2   :  { %4005 = vmatpush.bf16.msra.mxu2 %v6231_v35  ;;  %v6372_v35 = vld [vmem:[%s11642_s2 + $0xbd8] sm:$0xf0]  ;;  %v7665_v46 = vld [vmem:[%s11642_s2 + $0xccc] sm:$0xf] }
 0x1d3   :  { %3980 = vmatpush.bf16.msra.mxu0 %v5959_v41  ;;  %v6516_v41 = vld [vmem:[%s11642_s2 + $0xcf8] sm:$0xf0]  ;;  %v6375_v32 = vor.u32 %v7633_v24, %v6372_v35  ;;  %v7625_v4 = vld [vmem:[%s11642_s2 + $0xb8c] sm:$0xf]  ;;  %v6503_v6 = vor.u32 %v7665_v46, %v6500_v10 }
 0x1d4   :  { %3968 = vmatpush.bf16.msrb.mxu3 %v5815_v27  ;;  %3993 = vmatpush.bf16.msra.mxu1 %v6087_v36  ;;  %v6167_v27 = vor.u32 %v7581_v19, %v6164_v20  ;;  %v7701_v36 = vld [vmem:[%s11642_s2 + $0xdec] sm:$0xf]  ;;  %v6519_v44 = vor.u32 %v7669_v30, %v6516_v41  ;;  %v6340_v53 = vld [vmem:[%s11642_s2 + $0xb98] sm:$0xf0] }
 0x1d5   :  { %v7661_v17 = vld [vmem:[%s11642_s2 + $0xcac] sm:$0xf]  ;;  %v6484_v56 = vld [vmem:[%s11642_s2 + $0xcb8] sm:$0xf0]  ;;  %v6343_v60 = vor.u32 %v7625_v4, %v6340_v53 }
 0x1d6   :  { %4006 = vmatpush.bf16.msra.mxu2 %v6215_v52  ;;  %v6644_v52 = vld [vmem:[%s11642_s2 + $0xdf8] sm:$0xf0]  ;;  %v7693_v61 = vld [vmem:[%s11642_s2 + $0xdac] sm:$0xf]  ;;  %v6487_v9 = vor.u32 %v7661_v17, %v6484_v56 }
 0x1d7   :  { %3981 = vmatpush.bf16.msra.mxu0 %v5943_v48  ;;  %v6647_v45 = vor.u32 %v7701_v36, %v6644_v52  ;;  %v6359_v48 = vor.u32 %v7629_v42, %v6356_v58  ;;  %v6612_v62 = vld [vmem:[%s11642_s2 + $0xdb8] sm:$0xf0]  ;;  %v7876_v8 = vld [vmem:[#allocation1 + $0x9] sm:$0xff] }
 0x1d8   :  { %3969 = vmatpush.bf16.msrb.mxu3 %v5799_v57  ;;  %3994 = vmatpush.bf16.msra.mxu1 %v6071_v49  ;;  %v3754_v57 = vpop.f32.mrf.mxu2  ;;  %v7697_v49 = vld [vmem:[%s11642_s2 + $0xdcc] sm:$0xf]  ;;  %v6324_v7 = vld [vmem:[%s11642_s2 + $0xb78] sm:$0xf0]  ;;  %v6615_v11 = vor.u32 %v7693_v61, %v6612_v62 }
 0x1d9   :  { %v7657_v12 = vld [vmem:[%s11642_s2 + $0xc8c] sm:$0xf]  ;;  %v6596_v15 = vld [vmem:[%s11642_s2 + $0xd98] sm:$0xf0] }
 0x1da   :  { %4007 = vmatpush.bf16.msra.mxu2 %v6199_v0  ;;  %v7729_v0 = vld [vmem:[%s11642_s2 + $0xecc] sm:$0xf]  ;;  %v6724_v24 = vld [vmem:[%s11642_s2 + $0xe98] sm:$0xf0] }
 0x1db   :  { %3982 = vmatpush.bf16.msra.mxu0 %v5927_v34  ;;  %v6759_v59 = vor.u32 %v7729_v0, %v6756_v51  ;;  %v7725_v34 = vld [vmem:[%s11642_s2 + $0xeac] sm:$0xf]  ;;  %v6308_v35 = vld [vmem:[%s11642_s2 + $0xb58] sm:$0xf0] }
 0x1dc   :  { %3970 = vmatpush.bf16.msrb.mxu3 %v5783_v55  ;;  %3995 = vmatpush.bf16.msra.mxu1 %v6055_v3  ;;  %v6740_v3 = vld [vmem:[%s11642_s2 + $0xeb8] sm:$0xf0]  ;;  %v7689_v20 = vld [vmem:[%s11642_s2 + $0xd8c] sm:$0xf] }
 0x1dd   :  { %v6743_v18 = vor.u32 %v7725_v34, %v6740_v3  ;;  %v6599_v16 = vor.u32 %v7689_v20, %v6596_v15  ;;  %v7685_v30 = vld [vmem:[%s11642_s2 + $0xd6c] sm:$0xf]  ;;  %v6580_v41 = vld [vmem:[%s11642_s2 + $0xd78] sm:$0xf0] }
 0x1de   :  { %4008 = vmatpush.bf16.msra.mxu2 %v6183_v5  ;;  %v7621_v5 = vld [vmem:[%s11642_s2 + $0xb6c] sm:$0xf]  ;;  %v6708_v52 = vld [vmem:[%s11642_s2 + $0xe78] sm:$0xf0]  ;;  %v6583_v42 = vor.u32 %v7685_v30, %v6580_v41  ;;  %v7815_v30 = vld [vmem:[%s11646_s5 + $0x174] sm:$0xf0] }
 0x1df   :  { %3983 = vmatpush.bf16.msra.mxu0 %v5911_v25  ;;  %v6327_v19 = vor.u32 %v7621_v5, %v6324_v7  ;;  %v7617_v25 = vld [vmem:[%s11642_s2 + $0xb4c] sm:$0xf]  ;;  %v6436_v57 = vld [vmem:[%s11642_s2 + $0xc58] sm:$0xf0] }
 0x1e0   :  { %3971 = vmatpush.bf16.msrb.mxu3 %v5767_v13  ;;  %3996 = vmatpush.bf16.msra.mxu1 %v6039_v26  ;;  %v6468_v13 = vld [vmem:[%s11642_s2 + $0xc98] sm:$0xf0]  ;;  %v7653_v26 = vld [vmem:[%s11642_s2 + $0xc6c] sm:$0xf]  ;;  %v6311_v29 = vor.u32 %v7617_v25, %v6308_v35  ;;  %v7026_v25 = vld [vmem:[%s11646_s5 + $0xf0] sm:$0xf] }
 0x1e1   :  { %v6471_v14 = vor.u32 %v7657_v12, %v6468_v13  ;;  %v7613_v21 = vld [vmem:[%s11642_s2 + $0xb2c] sm:$0xf]  ;;  %v6692_v10 = vld [vmem:[%s11642_s2 + $0xe58] sm:$0xf0]  ;;  %v7799_v35 = vld [vmem:[%s11646_s5 + $0xf4] sm:$0xf0] }
 0x1e2   :  { %4009 = vmatpush.bf16.msra.mxu2 %v6167_v27  ;;  %v6452_v27 = vld [vmem:[%s11642_s2 + $0xc78] sm:$0xf0]  ;;  %v7649_v58 = vld [vmem:[%s11642_s2 + $0xc4c] sm:$0xf] }
 0x1e3   :  { %3972 = vmatmul.bf16.vlgmr.msrb.gmra.mxu3 %v8385_v22  ;;  %v6628_v22 = vld [vmem:[%s11642_s2 + $0xdd8] sm:$0xf0]  ;;  %3984 = vmatpush.bf16.msra.mxu0 %v5895_v37  ;;  %v11005_v31 = vpop.f32.mrf.mxu0  ;;  %v6455_v40 = vor.u32 %v7653_v26, %v6452_v27  ;;  %v7713_v46 = vld [vmem:[%s11642_s2 + $0xe4c] sm:$0xf]  ;;  %v6439_v51 = vor.u32 %v7649_v58, %v6436_v57  ;;  %v7018_v58 = vld [vmem:[%s11646_s5 + $0xe0] sm:$0xf] }
 0x1e4   :  { %4016 = vmatpush.bf16.msra.mxu3 %v6391_v23  ;;  %3997 = vmatpush.bf16.msra.mxu1 %v6023_v43  ;;  %v6631_v55 = vor.u32 %v7697_v49, %v6628_v22  ;;  %v7721_v23 = vld [vmem:[%s11642_s2 + $0xe8c] sm:$0xf]  ;;  %v11016_v36 = vpop.f32.mrf.mxu1  ;;  %v6292_v37 = vld [vmem:[%s11642_s2 + $0xb38] sm:$0xf0]  ;;  %v7797_v57 = vld [vmem:[%s11646_s5 + $0xe4] sm:$0xf0] }
 0x1e5   :  { %v6727_v28 = vor.u32 %v7721_v23, %v6724_v24  ;;  %v7765_v22 = vld [vmem:[%s11642_s2 + $0xfec] sm:$0xf]  ;;  %v6900_v0 = vld [vmem:[%s11642_s2 + $0xff8] sm:$0xf0]  ;;  %v6962_v23 = vld [vmem:[%s11646_s5 + $0x70] sm:$0xf] }
 0x1e6   :  { %4010 = vmatpush.bf16.msra.mxu2 %v6151_v54  ;;  %3985 = vmatmul.bf16.vlgmr.msra.gmra.mxu0 %v7875_v1  ;;  %v11003_v38 = vpop.f32.mrf.mxu3  ;;  %v6295_v54 = vor.u32 %v7613_v21, %v6292_v37  ;;  %v7645_v53 = vld [vmem:[%s11642_s2 + $0xc2c] sm:$0xf]  ;;  %v6420_v17 = vld [vmem:[%s11642_s2 + $0xc38] sm:$0xf0]  ;;  %v6903_v62 = vor.u32 %v7765_v22, %v6900_v0  ;;  %v7783_v24 = vld [vmem:[%s11646_s5 + $0x74] sm:$0xf0]  ;;  %v7027_v21 = vor.u32 %v7799_v35, %v7026_v25 }
 0x1e7   :  { %4029 = vmatpush.bf16.msrb.mxu0 %v6519_v44  ;;  %3998 = vmatmul.bf16.vlgmr.msra.gmra.mxu1 %v7876_v8  ;;  %v7681_v44 = vld [vmem:[%s11642_s2 + $0xd4c] sm:$0xf]  ;;  %v6884_v5 = vld [vmem:[%s11642_s2 + $0xfd8] sm:$0xf0]  ;;  %v6423_v7 = vor.u32 %v7645_v53, %v6420_v17  ;;  %v6946_v22 = vld [vmem:[%s11646_s5 + $0x50] sm:$0xf] }
 0x1e8   :  { %4017 = vmatpush.bf16.msra.mxu3 %v6375_v32  ;;  %4042 = vmatpush.bf16.msrb.mxu1 %v6647_v45  ;;  %v7717_v32 = vld [vmem:[%s11642_s2 + $0xe6c] sm:$0xf]  ;;  %v6564_v45 = vld [vmem:[%s11642_s2 + $0xd58] sm:$0xf0]  ;;  %v7779_v0 = vld [vmem:[%s11646_s5 + $0x54] sm:$0xf0] }
 0x1e9   :  { %4011 = vmatmul.bf16.vlgmr.msra.gmra.mxu2 %v7874_v63  ;;  %v6711_v43 = vor.u32 %v7717_v32, %v6708_v52  ;;  %v6567_v4 = vor.u32 %v7681_v44, %v6564_v45  ;;  %v7677_v56 = vld [vmem:[%s11642_s2 + $0xd2c] sm:$0xf]  ;;  %v6676_v63 = vld [vmem:[%s11642_s2 + $0xe38] sm:$0xf0]  ;;  %v6963_v52 = vor.u32 %v7783_v24, %v6962_v23  ;;  %v7082_v45 = vld [vmem:[%s11646_s5 + $0x160] sm:$0xf] }
 0x1ea   :  { %4055 = vmatpush.bf16.msrb.mxu2 %v6775_v47  ;;  %v7609_v47 = vld [vmem:[%s11642_s2 + $0xb0c] sm:$0xf]  ;;  %v6660_v20 = vld [vmem:[%s11642_s2 + $0xe18] sm:$0xf0]  ;;  %v7795_v53 = vld [vmem:[%s11646_s5 + $0xd4] sm:$0xf0] }
 0x1eb   :  { %4030 = vmatpush.bf16.msrb.mxu0 %v6503_v6  ;;  %v6695_v6 = vor.u32 %v7713_v46, %v6692_v10  ;;  %v3780_v61 = vpop.f32.mrf.mxu0  ;;  %v7709_v34 = vld [vmem:[%s11642_s2 + $0xe2c] sm:$0xf]  ;;  %v7877_v41 = vld [vmem:[#allocation1 + $0x1b] sm:$0xff]  ;;  %v7813_v46 = vld [vmem:[%s11646_s5 + $0x164] sm:$0xf0] }
 0x1ec   :  { %4018 = vmatpush.bf16.msra.mxu3 %v6359_v48  ;;  %4043 = vmatpush.bf16.msrb.mxu1 %v6631_v55  ;;  %v6276_v48 = vld [vmem:[%s11642_s2 + $0xb18] sm:$0xf0]  ;;  %v11051_v49 = vpop.f32.mrf.mxu2  ;;  %v3793_v1 = vpop.f32.mrf.mxu1  ;;  %v7761_v3 = vld [vmem:[%s11642_s2 + $0xfcc] sm:$0xf]  ;;  %v6679_v13 = vor.u32 %v7709_v34, %v6676_v63  ;;  %v7811_v61 = vld [vmem:[%s11646_s5 + $0x154] sm:$0xf0] }
 0x1ed   :  { %v6279_v55 = vor.u32 %v7609_v47, %v6276_v48  ;;  %v7673_v12 = vld [vmem:[%s11642_s2 + $0xd0c] sm:$0xf]  ;;  %v6887_v15 = vor.u32 %v7761_v3, %v6884_v5  ;;  %v6852_v44 = vld [vmem:[%s11642_s2 + $0xf98] sm:$0xf0]  ;;  %v7019_v47 = vor.u32 %v7797_v57, %v7018_v58  ;;  %v6938_v1 = vld [vmem:[%s11646_s5 + $0x40] sm:$0xf] }
 0x1ee   :  { %4056 = vmatpush.bf16.msrb.mxu2 %v6759_v59  ;;  %v6548_v59 = vld [vmem:[%s11642_s2 + $0xd38] sm:$0xf0]  ;;  %v7777_v3 = vld [vmem:[%s11646_s5 + $0x44] sm:$0xf0]  ;;  %v7002_v5 = vld [vmem:[%s11646_s5 + $0xc0] sm:$0xf] }
 0x1ef   :  { %4031 = vmatpush.bf16.msrb.mxu0 %v6487_v9  ;;  %v6551_v8 = vor.u32 %v7677_v56, %v6548_v59  ;;  %v7641_v9 = vld [vmem:[%s11642_s2 + $0xc0c] sm:$0xf]  ;;  %v6836_v17 = vld [vmem:[%s11642_s2 + $0xf78] sm:$0xf0]  ;;  %v6930_v24 = vld [vmem:[%s11646_s5 + $0x30] sm:$0xf] }
 0x1f0   :  { %4019 = vmatpush.bf16.msra.mxu3 %v6343_v60  ;;  %4044 = vmatpush.bf16.msrb.mxu1 %v6615_v11  ;;  %v3767_v60 = vpop.f32.mrf.mxu3  ;;  %v6404_v11 = vld [vmem:[%s11642_s2 + $0xc18] sm:$0xf0]  ;;  %v7880_v59 = vld [vmem:[#allocation1 + $0x2d] sm:$0xff]  ;;  %v7775_v25 = vld [vmem:[%s11646_s5 + $0x34] sm:$0xf0] }
 0x1f1   :  { %v6407_v27 = vor.u32 %v7641_v9, %v6404_v11  ;;  %v7879_v56 = vld [vmem:[#allocation1 + $0x36] sm:$0xff]  ;;  %v7074_v60 = vld [vmem:[%s11646_s5 + $0x150] sm:$0xf]  ;;  %v7745_v9 = vld [vmem:[%s11642_s2 + $0xf4c] sm:$0xf] }
 0x1f2   :  { %4057 = vmatpush.bf16.msrb.mxu2 %v6743_v18  ;;  %v6532_v18 = vld [vmem:[%s11642_s2 + $0xd18] sm:$0xf0]  ;;  %v6994_v35 = vld [vmem:[%s11646_s5 + $0xb0] sm:$0xf]  ;;  %v6986_v58 = vld [vmem:[%s11646_s5 + $0xa0] sm:$0xf] }
 0x1f3   :  { %4032 = vmatpush.bf16.msrb.mxu0 %v6471_v14  ;;  %v7757_v14 = vld [vmem:[%s11642_s2 + $0xfac] sm:$0xf]  ;;  %v6820_v11 = vld [vmem:[%s11642_s2 + $0xf58] sm:$0xf0] }
 0x1f4   :  { %4020 = vmatpush.bf16.msra.mxu3 %v6327_v19  ;;  %4045 = vmatpush.bf16.msrb.mxu1 %v6599_v16  ;;  %v7705_v19 = vld [vmem:[%s11642_s2 + $0xe0c] sm:$0xf]  ;;  %v6868_v16 = vld [vmem:[%s11642_s2 + $0xfb8] sm:$0xf0]  ;;  %v3806_v26 = vpop.f32.mrf.mxu2  ;;  %v6823_v23 = vor.u32 %v7745_v9, %v6820_v11  ;;  %v7798_v11 = vld [vmem:[%s11646_s5 + $0xf4] sm:$0xf] }
 0x1f5   :  { %v6663_v32 = vor.u32 %v7705_v19, %v6660_v20  ;;  %v6871_v37 = vor.u32 %v7757_v14, %v6868_v16  ;;  %v7791_v16 = vld [vmem:[%s11646_s5 + $0xb4] sm:$0xf0]  ;;  %v7737_v57 = vld [vmem:[%s11642_s2 + $0xf0c] sm:$0xf]  ;;  %v6964_v9 = vld [vmem:[%s11646_s5 + $0x78] sm:$0xf0] }
 0x1f6   :  { %4058 = vmatpush.bf16.msrb.mxu2 %v6727_v28  ;;  %v6535_v28 = vor.u32 %v7673_v12, %v6532_v18  ;;  %v7066_v12 = vld [vmem:[%s11646_s5 + $0x140] sm:$0xf]  ;;  %v6939_v18 = vor.u32 %v7777_v3, %v6938_v1  ;;  %v7769_v3 = vld [vmem:[%s11646_s5 + $0x4] sm:$0xf0] }
 0x1f7   :  { %4033 = vmatpush.bf16.msrb.mxu0 %v6455_v40  ;;  %v6954_v40 = vld [vmem:[%s11646_s5 + $0x60] sm:$0xf] }
 0x1f8   :  { %4021 = vmatpush.bf16.msra.mxu3 %v6311_v29  ;;  %4046 = vmatpush.bf16.msrb.mxu1 %v6583_v42  ;;  %v7090_v29 = vld [vmem:[%s11646_s5 + $0x170] sm:$0xf]  ;;  %v7781_v42 = vld [vmem:[%s11646_s5 + $0x64] sm:$0xf0] }
 0x1f9   :  { %v6955_v10 = vor.u32 %v7781_v42, %v6954_v40  ;;  %v6922_v40 = vld [vmem:[%s11646_s5 + $0x20] sm:$0xf]  ;;  %v7773_v42 = vld [vmem:[%s11646_s5 + $0x24] sm:$0xf0] }
 0x1fa   :  { %4059 = vmatpush.bf16.msrb.mxu2 %v6711_v43  ;;  %v7091_v43 = vor.u32 %v7815_v30, %v7090_v29  ;;  %v7058_v29 = vld [vmem:[%s11646_s5 + $0x130] sm:$0xf]  ;;  %v7807_v30 = vld [vmem:[%s11646_s5 + $0x134] sm:$0xf0] }
 0x1fb   :  { %4034 = vmatpush.bf16.msrb.mxu0 %v6439_v51  ;;  %v7010_v51 = vld [vmem:[%s11646_s5 + $0xd0] sm:$0xf] }
 0x1fc   :  { %4022 = vmatpush.bf16.msra.mxu3 %v6295_v54  ;;  %4047 = vmatpush.bf16.msrb.mxu1 %v6567_v4  ;;  %v7753_v54 = vld [vmem:[%s11642_s2 + $0xf8c] sm:$0xf]  ;;  %v7878_v4 = vld [vmem:[#allocation1 + $0x24] sm:$0xff]  ;;  %v7011_v34 = vor.u32 %v7795_v53, %v7010_v51  ;;  %v7771_v51 = vld [vmem:[%s11646_s5 + $0x14] sm:$0xf0] }
 0x1fd   :  { %v6855_v48 = vor.u32 %v7753_v54, %v6852_v44  ;;  %v7050_v54 = vld [vmem:[%s11646_s5 + $0x120] sm:$0xf]  ;;  %v7805_v44 = vld [vmem:[%s11646_s5 + $0x124] sm:$0xf0] }
 0x1fe   :  { %4060 = vmatpush.bf16.msrb.mxu2 %v6695_v6  ;;  %v7083_v6 = vor.u32 %v7813_v46, %v7082_v45 }
 0x1ff   :  { %4035 = vmatpush.bf16.msrb.mxu0 %v6423_v7  ;;  %v7793_v7 = vld [vmem:[%s11646_s5 + $0xc4] sm:$0xf0] }
 0x200   :  { %4023 = vmatpush.bf16.msra.mxu3 %v6279_v55  ;;  %4048 = vmatpush.bf16.msrb.mxu1 %v6551_v8  ;;  %v7749_v55 = vld [vmem:[%s11642_s2 + $0xf6c] sm:$0xf]  ;;  %v7075_v8 = vor.u32 %v7811_v61, %v7074_v60  ;;  %v7003_v20 = vor.u32 %v7793_v7, %v7002_v5  ;;  %v7803_v60 = vld [vmem:[%s11646_s5 + $0x114] sm:$0xf0]  ;;  %v6970_v5 = vld [vmem:[%s11646_s5 + $0x80] sm:$0xf] }
 0x201   :  { %v6839_v63 = vor.u32 %v7749_v55, %v6836_v17  ;;  %v7787_v55 = vld [vmem:[%s11646_s5 + $0x94] sm:$0xf0]  ;;  %v7051_v17 = vor.u32 %v7805_v44, %v7050_v54  ;;  %v7778_v54 = vld [vmem:[%s11646_s5 + $0x54] sm:$0xf]  ;;  %v6948_v44 = vld [vmem:[%s11646_s5 + $0x58] sm:$0xf0] }
 0x202   :  { %4061 = vmatpush.bf16.msrb.mxu2 %v6679_v13  ;;  %v7809_v13 = vld [vmem:[%s11646_s5 + $0x144] sm:$0xf0] }
 0x203   :  { %4024 = vmatmul.bf16.vlgmr.msra.gmra.mxu3 %v7877_v41  ;;  %4036 = vmatpush.bf16.msrb.mxu0 %v6407_v27  ;;  %v7067_v26 = vor.u32 %v7809_v13, %v7066_v12  ;;  %v7741_v27 = vld [vmem:[%s11642_s2 + $0xf2c] sm:$0xf]  ;;  %v11230_v41 = vld [vmem:[%s11647_s4] sm:$0xf]  ;;  %v7028_v12 = vld [vmem:[%s11646_s5 + $0xf8] sm:$0xf0] }
 0x204   :  { %4068 = vmatpush.bf16.msrb.mxu3 %v6903_v62  ;;  %4049 = vmatpush.bf16.msrb.mxu1 %v6535_v28  ;;  %v6947_v62 = vor.u32 %v7779_v0, %v6946_v22  ;;  %v11210_v14 = vpop.f32.mrf.mxu1  ;;  %v6804_v28 = vld [vmem:[%s11642_s2 + $0xf38] sm:$0xf0]  ;;  %v6914_v0 = vld [vmem:[%s11646_s5 + $0x10] sm:$0xf]  ;;  %v4084_v53 = vperm.slane %v11230_v41, 1 }
 0x205   :  { %v7801_v13 = vld [vmem:[%s11646_s5 + $0x104] sm:$0xf0] }
 0x206   :  { %4062 = vmatpush.bf16.msrb.mxu2 %v6663_v32  ;;  %4037 = vmatmul.bf16.vlgmr.msrb.gmra.mxu0 %v7878_v4  ;;  %v11197_v19 = vpop.f32.mrf.mxu3  ;;  %v3766_v32 = vadd.f32 %v11003_v38, %v10856_v2  ;;  %v7789_v2 = vld [vmem:[%s11646_s5 + $0xa4] sm:$0xf0]  ;;  %v7059_v38 = vor.u32 %v7807_v30, %v7058_v29  ;;  %v4092_v7 = vadd.f32 %v4084_v53, %v10613_v50  ;;  %v7034_v50 = vld [vmem:[%s11646_s5 + $0x100] sm:$0xf]  ;;  %v7792_v53 = vld [vmem:[%s11646_s5 + $0xc4] sm:$0xf] }
 0x207   :  { %4493 = vmatpush.bf16.msra.mxu0 %v6963_v52  ;;  %4050 = vmatmul.bf16.vlgmr.msrb.gmra.mxu1 %v7880_v59  ;;  %v6931_v52 = vor.u32 %v7775_v25, %v6930_v24  ;;  %v7042_v59 = vld [vmem:[%s11646_s5 + $0x110] sm:$0xf]  ;;  %v7814_v24 = vld [vmem:[%s11646_s5 + $0x174] sm:$0xf]  ;;  %v7092_v25 = vld [vmem:[%s11646_s5 + $0x178] sm:$0xf0]  ;;  %v7031_v29 = vor.u32 %v7798_v11, %v7028_v12  ;;  %v7035_v30 = vor.u32 %v7801_v13, %v7034_v50 }
 0x208   :  { %4069 = vmatpush.bf16.msrb.mxu3 %v6887_v15  ;;  %4506 = vmatpush.bf16.msra.mxu1 %v7027_v21  ;;  %v11199_v15 = vpop.f32.mrf.mxu0  ;;  %v6995_v21 = vor.u32 %v7791_v16, %v6994_v35  ;;  %v3779_v45 = vadd.f32 %v11005_v31, %v3766_v32  ;;  %v7780_v32 = vld [vmem:[%s11646_s5 + $0x64] sm:$0xf] }
 0x209   :  { %4063 = vmatmul.bf16.vlgmr.msrb.gmra.mxu2 %v7879_v56  ;;  %v7772_v13 = vld [vmem:[%s11646_s5 + $0x24] sm:$0xf] }
 0x20a   :  { %4519 = vmatpush.bf16.msra.mxu2 %v7091_v43  ;;  %v6788_v43 = vld [vmem:[%s11642_s2 + $0xf18] sm:$0xf0]  ;;  %v3792_v61 = vadd.f32 %v11016_v36, %v3779_v45  ;;  %v7785_v36 = vld [vmem:[%s11646_s5 + $0x84] sm:$0xf0]  ;;  %v7794_v45 = vld [vmem:[%s11646_s5 + $0xd4] sm:$0xf] }
 0x20b   :  { %4494 = vmatpush.bf16.msra.mxu0 %v6955_v10  ;;  %v6923_v10 = vor.u32 %v7773_v42, %v6922_v40  ;;  %v6791_v22 = vor.u32 %v7737_v57, %v6788_v43  ;;  %v7812_v40 = vld [vmem:[%s11646_s5 + $0x164] sm:$0xf]  ;;  %v7084_v42 = vld [vmem:[%s11646_s5 + $0x168] sm:$0xf0] }
 0x20c   :  { %4070 = vmatpush.bf16.msrb.mxu3 %v6871_v37  ;;  %4507 = vmatpush.bf16.msra.mxu1 %v7019_v47  ;;  %v6807_v37 = vor.u32 %v7741_v27, %v6804_v28  ;;  %v11259_v46 = vpop.f32.mrf.mxu2  ;;  %v4083_v47 = vperm.slane %v11230_v41, 0  ;;  %v3845_v56 = vpop.f32.mrf.mxu1  ;;  %v4096_v28 = vmax.f32 %v4092_v7, 0.0 }
 0x20e   :  { %4520 = vmatpush.bf16.msra.mxu2 %v7083_v6  ;;  %v3819_v4 = vpop.f32.mrf.mxu3  ;;  %v6978_v6 = vld [vmem:[%s11646_s5 + $0x90] sm:$0xf] }
 0x20f   :  { %4495 = vmatpush.bf16.msra.mxu0 %v6947_v62  ;;  %v6915_v62 = vor.u32 %v7771_v51, %v6914_v0  ;;  %v6979_v1 = vor.u32 %v7787_v55, %v6978_v6  ;;  %v7776_v4 = vld [vmem:[%s11646_s5 + $0x44] sm:$0xf]  ;;  %v7004_v6 = vld [vmem:[%s11646_s5 + $0xc8] sm:$0xf0] }
 0x210   :  { %4071 = vmatpush.bf16.msrb.mxu3 %v6855_v48  ;;  %4508 = vmatpush.bf16.msra.mxu1 %v7011_v34  ;;  %v6987_v48 = vor.u32 %v7789_v2, %v6986_v58  ;;  %v3832_v31 = vpop.f32.mrf.mxu0  ;;  %v6906_v34 = vld [vmem:[%s11646_s5] sm:$0xf]  ;;  %v7808_v55 = vld [vmem:[%s11646_s5 + $0x144] sm:$0xf] }
 0x211   :  { %v6940_v31 = vld [vmem:[%s11646_s5 + $0x48] sm:$0xf0] }
 0x212   :  { %4521 = vmatpush.bf16.msra.mxu2 %v7075_v8  ;;  %v7043_v8 = vor.u32 %v7803_v60, %v7042_v59  ;;  %v6943_v56 = vor.u32 %v7776_v4, %v6940_v31  ;;  %v4085_v60 = vperm.slane %v11230_v41, 2 }
 0x213   :  { %4496 = vmatpush.bf16.msra.mxu0 %v6939_v18  ;;  %v3805_v18 = vadd.f32 %v11051_v49, %v3792_v61 }
 0x214   :  { %4072 = vmatpush.bf16.msrb.mxu3 %v6839_v63  ;;  %4509 = vmatpush.bf16.msra.mxu1 %v7003_v20  ;;  %v4091_v63 = vadd.f32 %v4083_v47, %v9822_v33  ;;  %v7782_v33 = vld [vmem:[%s11646_s5 + $0x74] sm:$0xf]  ;;  %v7881_v20 = vld [vmem:[#allocation1 + $0x3f] sm:$0xff]  ;;  %v3858_v35 = vpop.f32.mrf.mxu2 }
 0x215   :  { %v6967_v27 = vor.u32 %v7782_v33, %v6964_v9  ;;  %v3818_v49 = vadd.f32 %v11197_v19, %v3805_v18  ;;  %v7095_v19 = vor.u32 %v7814_v24, %v7092_v25  ;;  %v7810_v47 = vld [vmem:[%s11646_s5 + $0x154] sm:$0xf]  ;;  %v6924_v18 = vld [vmem:[%s11646_s5 + $0x28] sm:$0xf0]  ;;  %v7804_v35 = vld [vmem:[%s11646_s5 + $0x124] sm:$0xf] }
 0x216   :  { %4522 = vmatpush.bf16.msra.mxu2 %v7067_v26  ;;  %v4095_v16 = vmax.f32 %v4091_v63, 0.0  ;;  %v6971_v26 = vor.u32 %v7785_v36, %v6970_v5  ;;  %v6932_v63 = vld [vmem:[%s11646_s5 + $0x38] sm:$0xf0]  ;;  %v7806_v33 = vld [vmem:[%s11646_s5 + $0x134] sm:$0xf] }
 0x217   :  { %4497 = vmatpush.bf16.msra.mxu0 %v6931_v52  ;;  %v6956_v52 = vld [vmem:[%s11646_s5 + $0x68] sm:$0xf0]  ;;  %v3831_v57 = vadd.f32 %v11199_v15, %v3818_v49  ;;  %v7012_v15 = vld [vmem:[%s11646_s5 + $0xd8] sm:$0xf0] }
 0x218   :  { %4073 = vmatpush.bf16.msrb.mxu3 %v6823_v23  ;;  %4510 = vmatpush.bf16.msra.mxu1 %v6995_v21  ;;  %v6907_v23 = vor.u32 %v7769_v3, %v6906_v34  ;;  %v7796_v21 = vld [vmem:[%s11646_s5 + $0xe4] sm:$0xf]  ;;  %v11340_v58 = vpack.c.bf16 %v4095_v16, %v4095_v16  ;;  %v6959_v2 = vor.u32 %v7780_v32, %v6956_v52  ;;  %v7774_v34 = vld [vmem:[%s11646_s5 + $0x34] sm:$0xf]  ;;  %v6996_v5 = vld [vmem:[%s11646_s5 + $0xb8] sm:$0xf0] }
 0x219   :  { %v3844_v0 = vadd.f32 %v11210_v14, %v3831_v57  ;;  %v7015_v51 = vor.u32 %v7794_v45, %v7012_v15  ;;  %v6935_v11 = vor.u32 %v7774_v34, %v6932_v63  ;;  %v7052_v16 = vld [vmem:[%s11646_s5 + $0x128] sm:$0xf0]  ;;  %v6916_v32 = vld [vmem:[%s11646_s5 + $0x18] sm:$0xf0]  ;;  %v7784_v15 = vld [vmem:[%s11646_s5 + $0x84] sm:$0xf] }
 0x21a   :  { %4523 = vmatpush.bf16.msra.mxu2 %v7059_v38  ;;  %v11342_v38 = vpack.c.bf16 %v4096_v28, %v4096_v28  ;;  %v6908_v45 = vld [vmem:[%s11646_s5 + $0x8] sm:$0xf0]  ;;  %v7146_v63 = vld [vmem:[%s11646_s5 + $0x1e0] sm:$0xf] }
 0x21b   :  { %4498 = vmatpush.bf16.msra.mxu0 %v6923_v10  ;;  %v7087_v10 = vor.u32 %v7812_v40, %v7084_v42  ;;  %v3857_v59 = vadd.f32 %v11259_v46, %v3844_v0  ;;  %v7790_v46 = vld [vmem:[%s11646_s5 + $0xb4] sm:$0xf] }
 0x21c   :  { %4074 = vmatpush.bf16.msrb.mxu3 %v6807_v37  ;;  %4511 = vmatpush.bf16.msra.mxu1 %v6987_v48  ;;  %v7020_v37 = vld [vmem:[%s11646_s5 + $0xe8] sm:$0xf0]  ;;  %v7076_v48 = vld [vmem:[%s11646_s5 + $0x158] sm:$0xf0]  ;;  %v6999_v50 = vor.u32 %v7790_v46, %v6996_v5  ;;  %v7802_v42 = vld [vmem:[%s11646_s5 + $0x114] sm:$0xf] }
 0x21d   :  { %v7023_v43 = vor.u32 %v7796_v21, %v7020_v37  ;;  %v7079_v14 = vor.u32 %v7810_v47, %v7076_v48  ;;  %v7786_v21 = vld [vmem:[%s11646_s5 + $0x94] sm:$0xf]  ;;  %v6980_v37 = vld [vmem:[%s11646_s5 + $0x98] sm:$0xf0]  ;;  %v7800_v48 = vld [vmem:[%s11646_s5 + $0x104] sm:$0xf] }
 0x21e   :  { %4524 = vmatpush.bf16.msra.mxu2 %v7051_v17  ;;  %v7068_v17 = vld [vmem:[%s11646_s5 + $0x148] sm:$0xf0]  ;;  %v7138_v5 = vld [vmem:[%s11646_s5 + $0x1d0] sm:$0xf] }
 0x21f   :  { %4499 = vmatpush.bf16.msra.mxu0 %v6915_v62  ;;  %v7007_v62 = vor.u32 %v7792_v53, %v7004_v6  ;;  %v7071_v36 = vor.u32 %v7808_v55, %v7068_v17 }
 0x220   :  { %4075 = vmatpush.bf16.msrb.mxu3 %v6791_v22  ;;  %4512 = vmatpush.bf16.msra.mxu1 %v6979_v1  ;;  %v6951_v22 = vor.u32 %v7778_v54, %v6948_v44  ;;  %v6983_v54 = vor.u32 %v7786_v21, %v6980_v37  ;;  %v7768_v44 = vld [vmem:[%s11646_s5 + $0x4] sm:$0xf]  ;;  %v7156_v21 = vld [vmem:[%s11646_s5 + $0x1f8] sm:$0xf0] }
 0x221   :  { %v6911_v0 = vor.u32 %v7768_v44, %v6908_v45 }
 0x222   :  { %4525 = vmatpush.bf16.msra.mxu2 %v7043_v8 }
 0x223   :  { %4076 = vmatmul.bf16.vlgmr.msrb.gmra.mxu3 %v7881_v20  ;;  %4500 = vmatpush.bf16.msra.mxu0 %v6907_v23  ;;  %v3882_v61 = vpop.f32.mrf.mxu0  ;;  %v7788_v20 = vld [vmem:[%s11646_s5 + $0xa4] sm:$0xf]  ;;  %v6988_v23 = vld [vmem:[%s11646_s5 + $0xa8] sm:$0xf0] }
 0x224   :  { %4513 = vmatpush.bf16.msra.mxu1 %v6971_v26  ;;  %v3883_v3 = vadd.f32 %v3882_v61, %v9166_v39  ;;  %v3895_v8 = vpop.f32.mrf.mxu1  ;;  %v7060_v39 = vld [vmem:[%s11646_s5 + $0x138] sm:$0xf0] }
 0x225   :  { %v7063_v24 = vor.u32 %v7806_v33, %v7060_v39 }
 0x226   :  { %4526 = vmatpush.bf16.msra.mxu2 %v7035_v30  ;;  %4501 = vmatmul.bf16.vlgmr.msra.gmra.mxu0 %v11340_v58  ;;  %v3869_v1 = vpop.f32.mrf.mxu3  ;;  %v3896_v9 = vadd.f32 %v3895_v8, %v3883_v3  ;;  %v7770_v30 = vld [vmem:[%s11646_s5 + $0x14] sm:$0xf] }
 0x227   :  { %4545 = vmatpush.bf16.msrb.mxu0 %v6967_v27  ;;  %4514 = vmatmul.bf16.vlgmr.msra.gmra.mxu1 %v11342_v38  ;;  %v3870_v7 = vadd.f32 %v3869_v1, %v3857_v59  ;;  %v6927_v27 = vor.u32 %v7772_v13, %v6924_v18  ;;  %v7154_v59 = vld [vmem:[%s11646_s5 + $0x1f0] sm:$0xf]  ;;  %v7829_v1 = vld [vmem:[%s11646_s5 + $0x1e4] sm:$0xf0]  ;;  %v7823_v13 = vld [vmem:[%s11646_s5 + $0x1b4] sm:$0xf0] }
 0x228   :  { %4558 = vmatpush.bf16.msrb.mxu1 %v7031_v29  ;;  %v6991_v29 = vor.u32 %v7788_v20, %v6988_v23  ;;  %v7147_v3 = vor.u32 %v7829_v1, %v7146_v63  ;;  %v7114_v18 = vld [vmem:[%s11646_s5 + $0x1a0] sm:$0xf]  ;;  %v7816_v63 = vld [vmem:[%s11646_s5 + $0x184] sm:$0xf]  ;;  %v7100_v1 = vld [vmem:[%s11646_s5 + $0x188] sm:$0xf0] }
 0x229   :  { %v4093_v12 = vadd.f32 %v4085_v60, %v3870_v7  ;;  %v7831_v60 = vld [vmem:[%s11646_s5 + $0x1f4] sm:$0xf0] }
 0x22a   :  { %4571 = vmatpush.bf16.msrb.mxu2 %v7095_v19  ;;  %v7055_v19 = vor.u32 %v7804_v35, %v7052_v16 }
 0x22b   :  { %4546 = vmatpush.bf16.msrb.mxu0 %v6959_v2  ;;  %v4097_v25 = vmax.f32 %v4093_v12, 0.0  ;;  %v3884_v52 = vpop.f32.mrf.mxu0  ;;  %v7044_v2 = vld [vmem:[%s11646_s5 + $0x118] sm:$0xf0] }
 0x22c   :  { %4559 = vmatpush.bf16.msrb.mxu1 %v7023_v43  ;;  %v3908_v26 = vpop.f32.mrf.mxu2  ;;  %v3897_v57 = vpop.f32.mrf.mxu1  ;;  %v6919_v43 = vor.u32 %v7770_v30, %v6916_v32  ;;  %v7047_v47 = vor.u32 %v7802_v42, %v7044_v2  ;;  %v7817_v30 = vld [vmem:[%s11646_s5 + $0x184] sm:$0xf0]  ;;  %v7830_v52 = vld [vmem:[%s11646_s5 + $0x1f4] sm:$0xf]  ;;  %v7148_v42 = vld [vmem:[%s11646_s5 + $0x1e8] sm:$0xf0] }
 0x22d   :  { %v4101_v28 = vpack.c.bf16 %v4097_v25, %v4097_v25  ;;  %v3909_v49 = vadd.f32 %v3908_v26, %v3896_v9  ;;  %v7130_v9 = vld [vmem:[%s11646_s5 + $0x1c0] sm:$0xf]  ;;  %v7826_v57 = vld [vmem:[%s11646_s5 + $0x1d4] sm:$0xf] }
 0x22e   :  { %4572 = vmatpush.bf16.msrb.mxu2 %v7087_v10  ;;  %v3871_v40 = vpop.f32.mrf.mxu3  ;;  %v6972_v10 = vld [vmem:[%s11646_s5 + $0x88] sm:$0xf0] }
 0x22f   :  { %4547 = vmatpush.bf16.msrb.mxu0 %v6951_v22  ;;  %4527 = vmatmul.bf16.vlgmr.msra.gmra.mxu2 %v4101_v28  ;;  %v7036_v22 = vld [vmem:[%s11646_s5 + $0x108] sm:$0xf0]  ;;  %v6975_v4 = vor.u32 %v7784_v15, %v6972_v10  ;;  %v7828_v40 = vld [vmem:[%s11646_s5 + $0x1e4] sm:$0xf] }
 0x230   :  { %4560 = vmatpush.bf16.msrb.mxu1 %v7015_v51  ;;  %v7039_v31 = vor.u32 %v7800_v48, %v7036_v22  ;;  %v7151_v2 = vor.u32 %v7828_v40, %v7148_v42  ;;  %v7824_v48 = vld [vmem:[%s11646_s5 + $0x1c4] sm:$0xf]  ;;  %v7132_v22 = vld [vmem:[%s11646_s5 + $0x1c8] sm:$0xf0] }
 0x232   :  { %4573 = vmatpush.bf16.msrb.mxu2 %v7079_v14 }
 0x233   :  { %4548 = vmatpush.bf16.msrb.mxu0 %v6943_v56 }
 0x234   :  { %4561 = vmatpush.bf16.msrb.mxu1 %v7007_v62  ;;  %v3910_v51 = vpop.f32.mrf.mxu2  ;;  %v7155_v62 = vor.u32 %v7831_v60, %v7154_v59 }
 0x236   :  { %4574 = vmatpush.bf16.msrb.mxu2 %v7071_v36  ;;  %4532 = vmatpush.bf16.msra.mxu3 %v7155_v62  ;;  %v7827_v36 = vld [vmem:[%s11646_s5 + $0x1d4] sm:$0xf0]  ;;  %v7818_v62 = vld [vmem:[%s11646_s5 + $0x194] sm:$0xf] }
 0x237   :  { %4549 = vmatpush.bf16.msrb.mxu0 %v6935_v11  ;;  %v7139_v7 = vor.u32 %v7827_v36, %v7138_v5  ;;  %v7825_v11 = vld [vmem:[%s11646_s5 + $0x1c4] sm:$0xf0]  ;;  %v7103_v5 = vor.u32 %v7816_v63, %v7100_v1  ;;  %v7852_v1 = vld [vmem:[%s11651_s9 + $0x20] sm:$0xff] }
 0x238   :  { %4562 = vmatpush.bf16.msrb.mxu1 %v6999_v50  ;;  %v7131_v12 = vor.u32 %v7825_v11, %v7130_v9  ;;  %v7122_v50 = vld [vmem:[%s11646_s5 + $0x1b0] sm:$0xf]  ;;  %v4086_v9 = vperm.slane %v11230_v41, 3  ;;  %v7847_v41 = vld [vmem:[%s11649_s7 + $0x78] sm:$0xff]  ;;  %v7853_v63 = vld [vmem:[%s11651_s9 + $0x28] sm:$0xff] }
 0x239   :  { %v7123_v23 = vor.u32 %v7823_v13, %v7122_v50 }
 0x23a   :  { %4575 = vmatpush.bf16.msrb.mxu2 %v7063_v24  ;;  %4533 = vmatpush.bf16.msra.mxu3 %v7147_v3  ;;  %v7821_v24 = vld [vmem:[%s11646_s5 + $0x1a4] sm:$0xf0] }
 0x23b   :  { %4550 = vmatpush.bf16.msrb.mxu0 %v6927_v27  ;;  %v7115_v16 = vor.u32 %v7821_v24, %v7114_v18  ;;  %v7106_v27 = vld [vmem:[%s11646_s5 + $0x190] sm:$0xf] }
 0x23c   :  { %4563 = vmatpush.bf16.msrb.mxu1 %v6991_v29  ;;  %v7098_v29 = vld [vmem:[%s11646_s5 + $0x180] sm:$0xf] }
 0x23d   :  { %v7099_v37 = vor.u32 %v7817_v30, %v7098_v29  ;;  %v7837_v29 = vld [vmem:[%s11649_s7 + $0x28] sm:$0xff] }
 0x23e   :  { %4576 = vmatpush.bf16.msrb.mxu2 %v7055_v19  ;;  %4534 = vmatpush.bf16.msra.mxu3 %v7139_v7  ;;  %v7159_v19 = vor.u32 %v7830_v52, %v7156_v21  ;;  %v7836_v52 = vld [vmem:[%s11649_s7 + $0x20] sm:$0xff] }
 0x23f   :  { %4551 = vmatpush.bf16.msrb.mxu0 %v6919_v43  ;;  %v7140_v43 = vld [vmem:[%s11646_s5 + $0x1d8] sm:$0xf0] }
 0x240   :  { %4564 = vmatpush.bf16.msrb.mxu1 %v6983_v54  ;;  %v7143_v54 = vor.u32 %v7826_v57, %v7140_v43  ;;  %v7834_v43 = vld [vmem:[%s11649_s7 + $0x10] sm:$0xff] }
 0x242   :  { %4577 = vmatpush.bf16.msrb.mxu2 %v7047_v47  ;;  %4535 = vmatpush.bf16.msra.mxu3 %v7131_v12 }
 0x243   :  { %4552 = vmatpush.bf16.msrb.mxu0 %v6911_v0  ;;  %v3934_v6 = vpop.f32.mrf.mxu0  ;;  %v7135_v0 = vor.u32 %v7824_v48, %v7132_v22  ;;  %v7845_v48 = vld [vmem:[%s11649_s7 + $0x68] sm:$0xff]  ;;  %v7832_v22 = vld [vmem:[%s11649_s7] sm:$0xff] }
 0x244   :  { %4565 = vmatpush.bf16.msrb.mxu1 %v6975_v4  ;;  %v3947_v55 = vpop.f32.mrf.mxu1  ;;  %v7822_v4 = vld [vmem:[%s11646_s5 + $0x1b4] sm:$0xf] }
 0x246   :  { %4578 = vmatpush.bf16.msrb.mxu2 %v7039_v31  ;;  %4553 = vmatmul.bf16.vlgmr.msrb.gmra.mxu0 %v11340_v58  ;;  %v3921_v53 = vpop.f32.mrf.mxu3  ;;  %v7124_v31 = vld [vmem:[%s11646_s5 + $0x1b8] sm:$0xf0] }
 0x247   :  { %4566 = vmatmul.bf16.vlgmr.msrb.gmra.mxu1 %v11342_v38  ;;  %v3922_v14 = vadd.f32 %v3921_v53, %v3909_v49  ;;  %4536 = vmatpush.bf16.msra.mxu3 %v7123_v23  ;;  %v7127_v53 = vor.u32 %v7822_v4, %v7124_v31  ;;  %v7842_v4 = vld [vmem:[%s11649_s7 + $0x50] sm:$0xff]  ;;  %v7841_v31 = vld [vmem:[%s11649_s7 + $0x48] sm:$0xff] }
 0x248   :  { %4746 = vmatpush.bf16.msra.mxu1 %v7847_v41 }
 0x249   :  { %4579 = vmatmul.bf16.vlgmr.msrb.gmra.mxu2 %v4101_v28  ;;  %v3935_v17 = vadd.f32 %v3934_v6, %v3922_v14  ;;  %v7819_v28 = vld [vmem:[%s11646_s5 + $0x194] sm:$0xf0]  ;;  %v7820_v6 = vld [vmem:[%s11646_s5 + $0x1a4] sm:$0xf]  ;;  %v7116_v14 = vld [vmem:[%s11646_s5 + $0x1a8] sm:$0xf0] }
 0x24a   :  { %v7107_v49 = vor.u32 %v7819_v28, %v7106_v27  ;;  %v7119_v59 = vor.u32 %v7820_v6, %v7116_v14  ;;  %v7839_v27 = vld [vmem:[%s11649_s7 + $0x38] sm:$0xff]  ;;  %v7838_v28 = vld [vmem:[%s11649_s7 + $0x30] sm:$0xff] }
 0x24b   :  { %v3948_v56 = vadd.f32 %v3947_v55, %v3935_v17  ;;  %v3936_v34 = vpop.f32.mrf.mxu0  ;;  %4537 = vmatpush.bf16.msra.mxu3 %v7115_v16  ;;  %4733 = vmatpush.bf16.msra.mxu0 %v7839_v27  ;;  %v7855_v6 = vld [vmem:[%s11651_s9 + $0x38] sm:$0xff]  ;;  %v7854_v14 = vld [vmem:[%s11651_s9 + $0x30] sm:$0xff] }
 0x24c   :  { %v3960_v61 = vpop.f32.mrf.mxu2  ;;  %v3949_v38 = vpop.f32.mrf.mxu1  ;;  %4829 = vmatpush.bf16.msra.mxu2 %v7855_v6 }
 0x24d   :  { %v3961_v44 = vadd.f32 %v3960_v61, %v3948_v56 }
 0x24e   :  { %v3923_v58 = vpop.f32.mrf.mxu3 }
 0x24f   :  { %4538 = vmatpush.bf16.msra.mxu3 %v7107_v49  ;;  %v7108_v58 = vld [vmem:[%s11646_s5 + $0x198] sm:$0xf0]  ;;  %v7846_v49 = vld [vmem:[%s11649_s7 + $0x70] sm:$0xff]  ;;  %4734 = vmatpush.bf16.msra.mxu0 %v7838_v28 }
 0x250   :  { %v7111_v34 = vor.u32 %v7818_v62, %v7108_v58  ;;  %4747 = vmatpush.bf16.msra.mxu1 %v7846_v49  ;;  %4830 = vmatpush.bf16.msra.mxu2 %v7854_v14 }
 0x253   :  { %4539 = vmatpush.bf16.msra.mxu3 %v7099_v37  ;;  %4735 = vmatpush.bf16.msra.mxu0 %v7837_v29 }
 0x254   :  { %v3962_v46 = vpop.f32.mrf.mxu2  ;;  %4748 = vmatpush.bf16.msra.mxu1 %v7845_v48  ;;  %4831 = vmatpush.bf16.msra.mxu2 %v7853_v63 }
 0x257   :  { %4584 = vmatpush.bf16.msrb.mxu3 %v7159_v19  ;;  %4736 = vmatpush.bf16.msra.mxu0 %v7836_v52  ;;  %v7835_v19 = vld [vmem:[%s11649_s7 + $0x18] sm:$0xff] }
 0x258   :  { %4832 = vmatpush.bf16.msra.mxu2 %v7852_v1 }
 0x25b   :  { %4585 = vmatpush.bf16.msrb.mxu3 %v7151_v2  ;;  %4737 = vmatpush.bf16.msra.mxu0 %v7835_v19 }
 0x25f   :  { %4586 = vmatpush.bf16.msrb.mxu3 %v7143_v54  ;;  %4738 = vmatpush.bf16.msra.mxu0 %v7834_v43 }
 0x263   :  { %v3986_v33 = vpop.f32.mrf.mxu0  ;;  %4587 = vmatpush.bf16.msrb.mxu3 %v7135_v0  ;;  %v7844_v0 = vld [vmem:[%s11649_s7 + $0x60] sm:$0xff] }
 0x264   :  { %v3999_v39 = vpop.f32.mrf.mxu1  ;;  %4749 = vmatpush.bf16.msra.mxu1 %v7844_v0 }
 0x266   :  { %v3973_v8 = vpop.f32.mrf.mxu3 }
 0x267   :  { %v3974_v10 = vadd.f32 %v3973_v8, %v3961_v44  ;;  %4588 = vmatpush.bf16.msrb.mxu3 %v7127_v53  ;;  %v4167_v8 = vld [vmem:[%s11648_s6] sm:$0x3] }
 0x268   :  { %v4170_v21 = vperm.slane %v4167_v8, 1  ;;  %v7840_v53 = vld [vmem:[%s11649_s7 + $0x40] sm:$0xff] }
 0x269   :  { %v3987_v51 = vadd.f32 %v3986_v33, %v3974_v10  ;;  %v4169_v33 = vperm.slane %v4167_v8, 0 }
 0x26b   :  { %v3988_v35 = vpop.f32.mrf.mxu0  ;;  %v4000_v60 = vadd.f32 %v3999_v39, %v3987_v51  ;;  %4589 = vmatpush.bf16.msrb.mxu3 %v7119_v59  ;;  %v7843_v51 = vld [vmem:[%s11649_s7 + $0x58] sm:$0xff] }
 0x26c   :  { %v4012_v20 = vpop.f32.mrf.mxu2  ;;  %v4001_v26 = vpop.f32.mrf.mxu1  ;;  %4750 = vmatpush.bf16.msra.mxu1 %v7843_v51 }
 0x26d   :  { %v4013_v38 = vadd.f32 %v4012_v20, %v4000_v60 }
 0x26e   :  { %v3975_v25 = vpop.f32.mrf.mxu3 }
 0x26f   :  { %4590 = vmatpush.bf16.msrb.mxu3 %v7111_v34 }
 0x270   :  { %4751 = vmatpush.bf16.msra.mxu1 %v7842_v4 }
 0x273   :  { %4591 = vmatpush.bf16.msrb.mxu3 %v7103_v5  ;;  %v7849_v5 = vld [vmem:[%s11651_s9 + $0x8] sm:$0xff] }
 0x274   :  { %v4014_v32 = vpop.f32.mrf.mxu2  ;;  %4752 = vmatpush.bf16.msra.mxu1 %v7841_v31 }
 0x278   :  { %4753 = vmatpush.bf16.msra.mxu1 %v7840_v53 }
 0x283   :  { %v4038_v15 = vpop.f32.mrf.mxu0 }
 0x284   :  { %v4051_v47 = vpop.f32.mrf.mxu1 }
 0x286   :  { %v4025_v45 = vpop.f32.mrf.mxu3 }
 0x287   :  { %v4026_v3 = vadd.f32 %v4025_v45, %v4013_v38 }
 0x289   :  { %v4039_v36 = vadd.f32 %v4038_v15, %v4026_v3  ;;  %v7851_v3 = vld [vmem:[%s11651_s9 + $0x18] sm:$0xff] }
 0x28a   :  { %4833 = vmatpush.bf16.msra.mxu2 %v7851_v3 }
 0x28b   :  { %v4040_v56 = vpop.f32.mrf.mxu0  ;;  %v4052_v7 = vadd.f32 %v4051_v47, %v4039_v36  ;;  %v7833_v47 = vld [vmem:[%s11649_s7 + $0x8] sm:$0xff]  ;;  %v7848_v36 = vld [vmem:[%s11651_s9] sm:$0xff] }
 0x28c   :  { %v4064_v55 = vpop.f32.mrf.mxu2  ;;  %v4053_v61 = vpop.f32.mrf.mxu1  ;;  %4739 = vmatpush.bf16.msra.mxu0 %v7833_v47 }
 0x28d   :  { %v4065_v39 = vadd.f32 %v4064_v55, %v4052_v7 }
 0x28e   :  { %v4027_v17 = vpop.f32.mrf.mxu3 }
 0x290   :  { %4740 = vmatpush.bf16.msra.mxu0 %v7832_v22 }
 0x294   :  { %v4066_v46 = vpop.f32.mrf.mxu2 }
 0x295   :  { %v7850_v46 = vld [vmem:[%s11651_s9 + $0x10] sm:$0xff] }
 0x296   :  { %4834 = vmatpush.bf16.msra.mxu2 %v7850_v46 }
 0x29a   :  { %4835 = vmatpush.bf16.msra.mxu2 %v7849_v5 }
 0x29e   :  { %4836 = vmatpush.bf16.msra.mxu2 %v7848_v36 }
 0x2a3   :  { %v4502_v50 = vpop.f32.mrf.mxu0 }
 0x2a4   :  { %v4503_v13 = vadd.f32 %v4502_v50, %v4169_v33  ;;  %v4515_v18 = vpop.f32.mrf.mxu1  ;;  %v7856_v33 = vld [vmem:[%s11650_s8] ss:$0 sm:$0xff] }
 0x2a6   :  { %v4077_v11 = vpop.f32.mrf.mxu3  ;;  %v4516_v23 = vadd.f32 %v4515_v18, %v4503_v13  ;;  %v7857_v18 = vld [vmem:[%s11652_s10] ss:$0 sm:$0xff] }
 0x2a7   :  { %v4078_v12 = vadd.f32 %v4077_v11, %v4065_v39 }
 0x2a9   :  { %v4094_v20 = vadd.f32 %v4086_v9, %v4078_v12 }
 0x2ab   :  { %v4098_v24 = vmax.f32 %v4094_v20, 0.0  ;;  %v4504_v16 = vpop.f32.mrf.mxu0 }
 0x2ac   :  { %v4517_v26 = vpop.f32.mrf.mxu1 }
 0x2ad   :  { %v4102_v25 = vpack.c.bf16 %v4098_v24, %v4098_v24 }
 0x2ae   :  { %v4079_v35 = vpop.f32.mrf.mxu3 }
 0x2af   :  { %4540 = vmatmul.bf16.vlgmr.msra.gmra.mxu3 %v4102_v25 }
 0x2b2   :  { %v4528_v30 = vpop.f32.mrf.mxu2 }
 0x2b3   :  { %v4529_v32 = vadd.f32 %v4528_v30, %v4516_v23 }
 0x2ba   :  { %v4530_v2 = vpop.f32.mrf.mxu2 }
 0x2bf   :  { %4592 = vmatmul.bf16.vlgmr.msrb.gmra.mxu3 %v4102_v25 }
 0x2c3   :  { %v4554_v37 = vpop.f32.mrf.mxu0 }
 0x2c4   :  { %v4555_v40 = vadd.f32 %v4554_v37, %v4170_v21  ;;  %v4567_v42 = vpop.f32.mrf.mxu1 }
 0x2c6   :  { %v4568_v57 = vadd.f32 %v4567_v42, %v4555_v40 }
 0x2cb   :  { %v4556_v54 = vpop.f32.mrf.mxu0 }
 0x2cc   :  { %v4569_v44 = vpop.f32.mrf.mxu1  ;;  %v4580_v45 = vpop.f32.mrf.mxu2 }
 0x2cd   :  { %v4581_v15 = vadd.f32 %v4580_v45, %v4568_v57 }
 0x2d4   :  { %v4582_v10 = vpop.f32.mrf.mxu2 }
 0x332   :  { %v4541_v55 = vpop.f32.mrf.mxu3 }
 0x333   :  { %v4542_v17 = vadd.f32 %v4541_v55, %v4529_v32 }
 0x335   :  { %v4597_v56 = vmax.f32 %v4542_v17, 0.0 }
 0x337   :  { %v4599_v59 = vpack.c.bf16 %v4597_v56, %v4597_v56 }
 0x339   :  { %4741 = vmatmul.bf16.vlgmr.msra.gmra.mxu0 %v4599_v59 }
 0x33a   :  { %v4543_v60 = vpop.f32.mrf.mxu3 }
 0x342   :  { %v4593_v61 = vpop.f32.mrf.mxu3 }
 0x343   :  { %v4594_v62 = vadd.f32 %v4593_v61, %v4581_v15 }
 0x345   :  { %v4598_v58 = vmax.f32 %v4594_v62, 0.0 }
 0x347   :  { %v4600_v34 = vpack.c.bf16 %v4598_v58, %v4598_v58 }
 0x349   :  { %4754 = vmatmul.bf16.vlgmr.msra.gmra.mxu1 %v4600_v34 }
 0x34a   :  { %v4595_v38 = vpop.f32.mrf.mxu3 }
 0x3b6   :  { %v4742_v7 = vpop.f32.mrf.mxu0 }
 0x3b7   :  { %v4743_v39 = vadd.f32 %v7856_v33, %v4742_v7 }
 0x3be   :  { %v4744_v8 = vpop.f32.mrf.mxu0 }
 0x3c6   :  { %v4755_v9 = vpop.f32.mrf.mxu1 }
 0x3c7   :  { %v4756_v11 = vadd.f32 %v4755_v9, %v4743_v39 }
 0x3c9   :  { %v4759_v12 = vmax.f32 %v4756_v11, 0.0 }
 0x3cb   :  { %v4760_v50 = vpack.c.bf16 %v4759_v12, %v4759_v12 }
 0x3cd   :  { %4837 = vmatmul.bf16.vlgmr.msra.gmra.mxu2 %v4760_v50 }
 0x3ce   :  { %v4757_v13 = vpop.f32.mrf.mxu1 }
 0x450   :  { %v4838_v20 = vpop.f32.mrf.mxu2 }
 0x451   :  { %v4839_v23 = vadd.f32 %v7857_v18, %v4838_v20 }
 0x453   :  { %4843 = vst.msk [vmem:[%s11653_s11] sm:$0x3] %vm4842_vm2, %v4839_v23 }
 0x458   :  { %v4840_v24 = vpop.f32.mrf.mxu2 }

</bundles_post_ra>
